<compile_context>
chip_gen: v5e
topology: v5e:2x2
jax: 0.10.0
libtpu: 0.0.40
codegen_flags: <defaults>
</compile_context>

<pallas_src>
import numpy as np
import jax
import jax.numpy as jnp
from jax import lax
from jax.experimental import pallas as pl
from jax.experimental.pallas import tpu as pltpu


def _make_kernel(radius, nsample, use_xyz, normalize_xyz, has_features, n_feat):
    r2 = float(radius) * float(radius)
    inv_r = 1.0 / float(radius)

    def kernel(*refs):
        xyz_ref, qt_ref, qpn_ref = refs[0], refs[1], refs[2]
        pos = 3
        feat_ref = None
        if has_features:
            feat_ref = refs[pos]
            pos += 1
        tri_ref = refs[pos]
        perm_ref = refs[pos + 1]
        out_ref = refs[pos + 2]
        pos += 3
        sel_ref = refs[pos]
        pos += 1
        src_ref = None
        qpad_ref = None
        if has_features and use_xyz:
            src_ref = refs[pos]
            pos += 1
        if use_xyz:
            qpad_ref = refs[pos]
            pos += 1

        xyz = xyz_ref[0].astype(jnp.float32)          # (3, N)   points on lanes
        qpn = qpn_ref[0].astype(jnp.float32)          # (Pt, 3)  queries on sublanes
        N = xyz.shape[1]
        Pt = qpn.shape[0]
        L = Pt * nsample

        # ---------------- ball query: difference-form distances (VPU, exact) -----------
        d2 = None
        for d in range(3):
            diff = qpn[:, d:d + 1] - xyz[d:d + 1, :]                  # (Pt, N)
            d2 = diff * diff if d2 is None else d2 + diff * diff
        mask = d2 < r2                                                # (Pt, N) in-radius hits

        # -------- inclusive prefix hit count along N (bf16 0/1 ops, f32 acc: exact) ----
        csum = lax.dot_general(mask.astype(jnp.bfloat16), tri_ref[...],
                               (((1,), (0,)), ((), ())),
                               preferred_element_type=jnp.float32)    # (Pt, N)
        count = csum[:, N - 1:N]                                      # (Pt, 1) total hits
        lane0 = lax.broadcasted_iota(jnp.int32, (1, N), 1) == 0
        fallback = jnp.logical_and(count == 0.0, lane0)               # no hit -> point 0

        # -------- per-slot one-hot selectors at (Pt, N); k-major row blocks to scratch --
        # CUDA ball_query semantics: slot k gets hit #(k+1) if count > k, else the first
        # hit; if there is no hit at all the slot stays at index 0.
        for k in range(nsample):
            tgt = jnp.where(count > float(k), float(k + 1), 1.0)      # (Pt, 1)
            sel_k = jnp.logical_or(jnp.logical_and(mask, csum == tgt), fallback)
            sel_ref[k * Pt:(k + 1) * Pt, :] = sel_k.astype(jnp.float32)
        sel = sel_ref[...]                                            # (L, N), row = k*Pt + p

        # ---------------- source rows: [xyz (scaled) ; features] -----------------------
        q_s = None
        if use_xyz:
            xyz_s = xyz * inv_r if normalize_xyz else xyz
            q_s = qt_ref[0].astype(jnp.float32)                       # (3, Pt)
            if normalize_xyz:
                q_s = q_s * inv_r
        if has_features:
            feats = feat_ref[0].astype(jnp.float32)                   # (C, N)
            if use_xyz:
                src_ref[0:3, :] = xyz_s
                src_ref[3:3 + n_feat, :] = feats
                src = src_ref[...]                                    # (3+C, N)
            else:
                src = feats
        else:
            src = xyz_s
        c_out = src.shape[0]

        # ---------------- fused gather on the MXU (one sel push), k-major columns ------
        g = lax.dot_general(src, sel, (((1,), (1,)), ((), ())),
                            preferred_element_type=jnp.float32)       # (c_out, L)

        # -------- subtract repeated query centers from the xyz rows (no rep matmul) ----
        if use_xyz:
            if c_out > 3:
                qpad_ref[3:c_out, :] = jnp.zeros((c_out - 3, L), jnp.float32)
            for k in range(nsample):
                qpad_ref[0:3, k * Pt:(k + 1) * Pt] = q_s
            g = g - qpad_ref[...]

        # -------- reorder columns k*Pt+p -> p*nsample+k via hoisted one-hot perm -------
        out = lax.dot_general(g, perm_ref[...], (((1,), (0,)), ((), ())),
                              preferred_element_type=jnp.float32)     # (c_out, L)
        out_ref[0, :, :] = out.astype(out_ref.dtype)

    return kernel


def query_and_group(xyz, new_xyz, features=None, *, radius, nsample,
                    use_xyz=True, normalize_xyz=False, p_tile=None,
                    out_dtype=jnp.float32):
    """Pallas equivalent of QueryAndGroup.forward (sample_uniformly=False)."""
    B, N, _ = xyz.shape
    P = new_xyz.shape[1]
    has_features = features is not None
    if not has_features:
        assert use_xyz, "Cannot have not features and not use xyz as a feature!"
        C = 0
        c_out = 3
    else:
        C = features.shape[1]
        c_out = (3 + C) if use_xyz else C

    # p_tile: 128 fills v5e's MXU M-dim and keeps several grid steps for megacore sharding
    # on v7x; bump to 256 on v6e (128 MiB VMEM) if the workload is MXU-bound there.
    if p_tile is None:
        p_tile = 128 if P > 128 else P
    P_pad = -(-P // p_tile) * p_tile
    if P_pad != P:
        pad = jnp.zeros((B, P_pad - P, 3), new_xyz.dtype)
        new_xyz_p = jnp.concatenate([new_xyz, pad], axis=1)
    else:
        new_xyz_p = new_xyz
    n_ptiles = P_pad // p_tile
    L = p_tile * nsample

    # point-major copies so the long point/query axes sit on the 128-lane axis
    xyz_t = jnp.transpose(xyz, (0, 2, 1))              # (B, 3, N)
    new_xyz_t = jnp.transpose(new_xyz_p, (0, 2, 1))    # (B, 3, P_pad)

    # ---- grid-invariant constants (hoisted host-side, DMA'd once, resident in VMEM) ----
    # tri[i, j] = 1 iff i <= j  -> inclusive prefix count via one bf16 matmul.
    tri = jnp.asarray(np.triu(np.ones((N, N), np.float32)), dtype=jnp.bfloat16)
    # perm[k*Pt+p, p*nsample+k] = 1  -> k-major gather columns to the lane-dense torch order.
    cols = np.arange(L)
    rows = (cols % nsample) * p_tile + cols // nsample
    perm_np = np.zeros((L, L), np.float32)
    perm_np[rows, cols] = 1.0
    perm = jnp.asarray(perm_np)

    kernel = _make_kernel(radius, nsample, use_xyz, normalize_xyz, has_features, C)

    in_specs = [
        pl.BlockSpec((1, 3, N), lambda b, t: (b, 0, 0)),         # xyz (3, N)
        pl.BlockSpec((1, 3, p_tile), lambda b, t: (b, 0, t)),    # new_xyz (3, Pt)
        pl.BlockSpec((1, p_tile, 3), lambda b, t: (b, t, 0)),    # new_xyz (Pt, 3)
    ]
    args = [xyz_t, new_xyz_t, new_xyz_p]
    if has_features:
        in_specs.append(pl.BlockSpec((1, C, N), lambda b, t: (b, 0, 0)))
        args.append(features)
    in_specs += [
        pl.BlockSpec((N, N), lambda b, t: (0, 0)),               # tri (constant)
        pl.BlockSpec((L, L), lambda b, t: (0, 0)),               # perm (constant)
    ]
    args += [tri, perm]

    scratch_shapes = [pltpu.VMEM((L, N), jnp.float32)]           # selector (k-major rows)
    if has_features and use_xyz:
        scratch_shapes.append(pltpu.VMEM((c_out, N), jnp.float32))   # stacked [xyz;feat]
    if use_xyz:
        scratch_shapes.append(pltpu.VMEM((c_out, L), jnp.float32))   # repeated centers

    # ---- VMEM budget derived from actual tile sizes (clamped for v7x's 64 MiB) ----
    blk = ((3 * N + 3 * p_tile + p_tile * 3 + (C * N if has_features else 0)
            + c_out * L + L * L) * 4 + N * N * 2)
    scratch_b = (L * N * 4
                 + (c_out * N * 4 if (has_features and use_xyz) else 0)
                 + (c_out * L * 4 if use_xyz else 0))
    interm_b = 8 * p_tile * N * 4 + L * N * 4 + 4 * c_out * L * 4
    vmem_bytes = 2 * blk + scratch_b + interm_b + 16 * 1024 * 1024
    vmem_bytes = max(32 * 1024 * 1024, min(int(vmem_bytes), 64 * 1024 * 1024))

    out = pl.pallas_call(
        kernel,
        out_shape=jax.ShapeDtypeStruct((B, c_out, P_pad * nsample), out_dtype),
        grid_spec=pltpu.PrefetchScalarGridSpec(
            num_scalar_prefetch=0,
            grid=(B, n_ptiles),
            in_specs=in_specs,
            out_specs=pl.BlockSpec((1, c_out, L), lambda b, t: (b, 0, t)),
            scratch_shapes=scratch_shapes,
        ),
        compiler_params=pltpu.CompilerParams(
            dimension_semantics=("parallel", "parallel"),
            vmem_limit_bytes=vmem_bytes,
        ),
    )(*args)

    # lane-dense (B, c_out, P_pad*nsample) -> torch layout (B, c_out, P, nsample): free reshape
    out = out.reshape(B, c_out, P_pad, nsample)
    if P_pad != P:
        out = out[:, :, :P, :]
    return out


def _reference_numpy(xyz, new_xyz, features, radius, nsample, use_xyz=True,
                     normalize_xyz=False):
    """Reference reproducing the CUDA ball_query / group_points semantics."""
    B, N, _ = xyz.shape
    P = new_xyz.shape[1]
    r2 = radius * radius
    idx = np.zeros((B, P, nsample), dtype=np.int64)
    for b in range(B):
        d2 = ((new_xyz[b][:, None, :] - xyz[b][None, :, :]) ** 2).sum(-1)  # (P, N)
        for j in range(P):
            hits = np.nonzero(d2[j] < r2)[0]
            if hits.size > 0:
                idx[b, j, :] = hits[0]                 # fill all slots with first hit
                m = min(nsample, hits.size)
                idx[b, j, :m] = hits[:m]               # then the first m hits in order
    b_idx = np.arange(B)[:, None, None]
    grouped_xyz = np.transpose(xyz[b_idx, idx], (0, 3, 1, 2))          # (B, 3, P, ns)
    grouped_xyz = grouped_xyz - np.transpose(new_xyz, (0, 2, 1))[:, :, :, None]
    if normalize_xyz:
        grouped_xyz = grouped_xyz / radius
    if features is None:
        return grouped_xyz.astype(np.float32)
    gf = np.transpose(features[b_idx, :, idx], (0, 3, 1, 2))           # (B, C, P, ns)
    if use_xyz:
        return np.concatenate([grouped_xyz, gf], axis=1).astype(np.float32)
    return gf.astype(np.float32)


if __name__ == "__main__":
    B, N, P, C, nsample = 2, 128, 256, 4, 8
    radius = 0.35

    key = jax.random.PRNGKey(0)
    k1, k2, k3 = jax.random.split(key, 3)
    # coords quantized to a 1/8 grid so `d2 < radius^2` has a wide margin versus any
    # 1-ulp difference between the kernel's and the reference's f32 rounding order.
    xyz = (jnp.round(jax.random.uniform(k1, (B, N, 3)) * 8.0) / 8.0).astype(jnp.float32)
    new_xyz = (jnp.round(jax.random.uniform(k3, (B, P, 3)) * 8.0) / 8.0).astype(jnp.float32)
    features = jax.random.normal(k2, (B, C, N), dtype=jnp.float32)

    out = query_and_group(xyz, new_xyz, features, radius=radius, nsample=nsample)
    out = jax.block_until_ready(out)

    out_xyz_only = query_and_group(xyz, new_xyz, None, radius=radius, nsample=nsample,
                                   normalize_xyz=True)
    out_xyz_only = jax.block_until_ready(out_xyz_only)

    out_feat_only = query_and_group(xyz, new_xyz, features, radius=radius, nsample=nsample,
                                    use_xyz=False)
    out_feat_only = jax.block_until_ready(out_feat_only)

    xyz_np, new_np, feat_np = np.asarray(xyz), np.asarray(new_xyz), np.asarray(features)
    ref = _reference_numpy(xyz_np, new_np, feat_np, radius, nsample, use_xyz=True)
    ref_xyz = _reference_numpy(xyz_np, new_np, None, radius, nsample, use_xyz=True,
                               normalize_xyz=True)
    ref_feat = _reference_numpy(xyz_np, new_np, feat_np, radius, nsample, use_xyz=False)

    assert out.shape == (B, 3 + C, P, nsample), out.shape
    assert out_xyz_only.shape == (B, 3, P, nsample), out_xyz_only.shape
    assert out_feat_only.shape == (B, C, P, nsample), out_feat_only.shape
    np.testing.assert_allclose(np.asarray(out), ref, rtol=1e-5, atol=1e-5)
    np.testing.assert_allclose(np.asarray(out_xyz_only), ref_xyz, rtol=1e-5, atol=1e-5)
    np.testing.assert_allclose(np.asarray(out_feat_only), ref_feat, rtol=1e-5, atol=1e-5)

    print("KERNEL_OK")
</pallas_src>

<mosaic_0001>
module attributes {stable_mosaic.version = 11 : i64} {
  func.func @kernel(%arg0: i32, %arg1: i32, %arg2: memref<1x3x128xf32, #tpu.memory_space<vmem>>, %arg3: memref<1x3x128xf32, #tpu.memory_space<vmem>>, %arg4: memref<1x128x3xf32, #tpu.memory_space<vmem>>, %arg5: memref<1x4x128xf32, #tpu.memory_space<vmem>>, %arg6: memref<128x128xbf16, #tpu.memory_space<vmem>>, %arg7: memref<1024x1024xf32, #tpu.memory_space<vmem>>, %arg8: memref<1x7x1024xf32, #tpu.memory_space<vmem>>, %arg9: memref<1024x128xf32, #tpu.memory_space<vmem>>, %arg10: memref<7x128xf32, #tpu.memory_space<vmem>>, %arg11: memref<7x1024xf32, #tpu.memory_space<vmem>>) attributes {dimension_semantics = [#tpu.dimension_semantics<parallel>, #tpu.dimension_semantics<parallel>], iteration_bounds = array<i64: 2, 2>, scalar_prefetch = 0 : i64, scratch_operands = 3 : i64, tpu.core_type = #tpu.core_type<tc>, window_params = [{transform_indices = @transform_0, window_bounds = array<i64: 1, 3, 128>}, {transform_indices = @transform_1, window_bounds = array<i64: 1, 3, 128>}, {transform_indices = @transform_2, window_bounds = array<i64: 1, 128, 3>}, {transform_indices = @transform_3, window_bounds = array<i64: 1, 4, 128>}, {pipeline_mode = #tpu.pipeline_mode<synchronous>, transform_indices = @transform_4, window_bounds = array<i64: 128, 128>}, {pipeline_mode = #tpu.pipeline_mode<synchronous>, transform_indices = @transform_5, window_bounds = array<i64: 1024, 1024>}, {transform_indices = @transform_6, window_bounds = array<i64: 1, 7, 1024>}]} {
    %c0 = arith.constant 0 : index
    %c0_0 = arith.constant 0 : index
    %c0_1 = arith.constant 0 : index
    %0 = vector.load %arg2[%c0, %c0_0, %c0_1] : memref<1x3x128xf32, #tpu.memory_space<vmem>>, vector<1x3x128xf32>
    %1 = vector.shape_cast %0 : vector<1x3x128xf32> to vector<3x128xf32>
    %c0_2 = arith.constant 0 : index
    %c0_3 = arith.constant 0 : index
    %c0_4 = arith.constant 0 : index
    %2 = vector.load %arg4[%c0_2, %c0_3, %c0_4] : memref<1x128x3xf32, #tpu.memory_space<vmem>>, vector<1x128x3xf32>
    %3 = vector.shape_cast %2 : vector<1x128x3xf32> to vector<128x3xf32>
    %4 = vector.extract_strided_slice %3 {offsets = [0, 0], sizes = [128, 1], strides = [1, 1]} : vector<128x3xf32> to vector<128x1xf32>
    %5 = vector.extract_strided_slice %1 {offsets = [0, 0], sizes = [1, 128], strides = [1, 1]} : vector<3x128xf32> to vector<1x128xf32>
    %6 = vector.broadcast %4 : vector<128x1xf32> to vector<128x128xf32>
    %7 = vector.broadcast %5 : vector<1x128xf32> to vector<128x128xf32>
    %8 = arith.subf %6, %7 : vector<128x128xf32>
    %9 = arith.mulf %8, %8 : vector<128x128xf32>
    %10 = vector.extract_strided_slice %3 {offsets = [0, 1], sizes = [128, 1], strides = [1, 1]} : vector<128x3xf32> to vector<128x1xf32>
    %11 = vector.extract_strided_slice %1 {offsets = [1, 0], sizes = [1, 128], strides = [1, 1]} : vector<3x128xf32> to vector<1x128xf32>
    %12 = vector.broadcast %10 : vector<128x1xf32> to vector<128x128xf32>
    %13 = vector.broadcast %11 : vector<1x128xf32> to vector<128x128xf32>
    %14 = arith.subf %12, %13 : vector<128x128xf32>
    %15 = arith.mulf %14, %14 : vector<128x128xf32>
    %16 = arith.addf %9, %15 : vector<128x128xf32>
    %17 = vector.extract_strided_slice %3 {offsets = [0, 2], sizes = [128, 1], strides = [1, 1]} : vector<128x3xf32> to vector<128x1xf32>
    %18 = vector.extract_strided_slice %1 {offsets = [2, 0], sizes = [1, 128], strides = [1, 1]} : vector<3x128xf32> to vector<1x128xf32>
    %19 = vector.broadcast %17 : vector<128x1xf32> to vector<128x128xf32>
    %20 = vector.broadcast %18 : vector<1x128xf32> to vector<128x128xf32>
    %21 = arith.subf %19, %20 : vector<128x128xf32>
    %22 = arith.mulf %21, %21 : vector<128x128xf32>
    %23 = arith.addf %16, %22 : vector<128x128xf32>
    %cst = arith.constant 1.225000e-01 : f32
    %24 = vector.broadcast %cst : f32 to vector<128x128xf32>
    %25 = arith.cmpf olt, %23, %24 : vector<128x128xf32>
    %26 = arith.extui %25 : vector<128x128xi1> to vector<128x128xi32>
    %27 = arith.sitofp %26 : vector<128x128xi32> to vector<128x128xf32>
    %28 = arith.truncf %27 : vector<128x128xf32> to vector<128x128xbf16>
    %c0_5 = arith.constant 0 : index
    %c0_6 = arith.constant 0 : index
    %29 = vector.load %arg6[%c0_5, %c0_6] : memref<128x128xbf16, #tpu.memory_space<vmem>>, vector<128x128xbf16>
    %cst_7 = arith.constant dense<0.000000e+00> : vector<128x128xf32>
    %30 = tpu.matmul %28, %29, %cst_7 {dimension_numbers = #tpu.dot_dimension_numbers<[1], [0], [0], [1], [0, 0, 1, 1], [], []>} : vector<128x128xbf16>, vector<128x128xbf16>, vector<128x128xf32> -> vector<128x128xf32>
    %31 = vector.extract_strided_slice %30 {offsets = [0, 127], sizes = [128, 1], strides = [1, 1]} : vector<128x128xf32> to vector<128x1xf32>
    %32 = tpu.iota {dimensions = array<i32: 1>} : vector<1x128xi32>
    %c0_i32 = arith.constant 0 : i32
    %33 = vector.broadcast %c0_i32 : i32 to vector<1x128xi32>
    %34 = arith.cmpi eq, %32, %33 : vector<1x128xi32>
    %cst_8 = arith.constant 0.000000e+00 : f32
    %35 = vector.broadcast %cst_8 : f32 to vector<128x1xf32>
    %36 = arith.cmpf oeq, %31, %35 : vector<128x1xf32>
    %37 = vector.broadcast %36 : vector<128x1xi1> to vector<128x128xi1>
    %38 = vector.broadcast %34 : vector<1x128xi1> to vector<128x128xi1>
    %39 = arith.andi %37, %38 : vector<128x128xi1>
    %cst_9 = arith.constant 0.000000e+00 : f32
    %40 = vector.broadcast %cst_9 : f32 to vector<128x1xf32>
    %41 = arith.cmpf ogt, %31, %40 : vector<128x1xf32>
    %cst_10 = arith.constant 1.000000e+00 : f32
    %cst_11 = arith.constant 1.000000e+00 : f32
    %42 = vector.broadcast %cst_10 : f32 to vector<128x1xf32>
    %43 = vector.broadcast %cst_11 : f32 to vector<128x1xf32>
    %44 = arith.select %41, %42, %43 : vector<128x1xi1>, vector<128x1xf32>
    %45 = vector.broadcast %44 : vector<128x1xf32> to vector<128x128xf32>
    %46 = arith.cmpf oeq, %30, %45 : vector<128x128xf32>
    %47 = arith.andi %25, %46 : vector<128x128xi1>
    %48 = arith.ori %47, %39 : vector<128x128xi1>
    %49 = arith.extui %48 : vector<128x128xi1> to vector<128x128xi32>
    %50 = arith.sitofp %49 : vector<128x128xi32> to vector<128x128xf32>
    %c0_12 = arith.constant 0 : index
    %c0_13 = arith.constant 0 : index
    %51 = vector.load %arg9[%c0_12, %c0_13] : memref<1024x128xf32, #tpu.memory_space<vmem>>, vector<128x128xf32>
    tpu.vector_store %arg9[%c0_12, %c0_13], %50 {strides = array<i32>} : memref<1024x128xf32, #tpu.memory_space<vmem>>, vector<128x128xf32>,
    %cst_14 = arith.constant 1.000000e+00 : f32
    %52 = vector.broadcast %cst_14 : f32 to vector<128x1xf32>
    %53 = arith.cmpf ogt, %31, %52 : vector<128x1xf32>
    %cst_15 = arith.constant 2.000000e+00 : f32
    %cst_16 = arith.constant 1.000000e+00 : f32
    %54 = vector.broadcast %cst_15 : f32 to vector<128x1xf32>
    %55 = vector.broadcast %cst_16 : f32 to vector<128x1xf32>
    %56 = arith.select %53, %54, %55 : vector<128x1xi1>, vector<128x1xf32>
    %57 = vector.broadcast %56 : vector<128x1xf32> to vector<128x128xf32>
    %58 = arith.cmpf oeq, %30, %57 : vector<128x128xf32>
    %59 = arith.andi %25, %58 : vector<128x128xi1>
    %60 = arith.ori %59, %39 : vector<128x128xi1>
    %61 = arith.extui %60 : vector<128x128xi1> to vector<128x128xi32>
    %62 = arith.sitofp %61 : vector<128x128xi32> to vector<128x128xf32>
    %c128 = arith.constant 128 : index
    %c0_17 = arith.constant 0 : index
    %63 = vector.load %arg9[%c128, %c0_17] : memref<1024x128xf32, #tpu.memory_space<vmem>>, vector<128x128xf32>
    tpu.vector_store %arg9[%c128, %c0_17], %62 {strides = array<i32>} : memref<1024x128xf32, #tpu.memory_space<vmem>>, vector<128x128xf32>,
    %cst_18 = arith.constant 2.000000e+00 : f32
    %64 = vector.broadcast %cst_18 : f32 to vector<128x1xf32>
    %65 = arith.cmpf ogt, %31, %64 : vector<128x1xf32>
    %cst_19 = arith.constant 3.000000e+00 : f32
    %cst_20 = arith.constant 1.000000e+00 : f32
    %66 = vector.broadcast %cst_19 : f32 to vector<128x1xf32>
    %67 = vector.broadcast %cst_20 : f32 to vector<128x1xf32>
    %68 = arith.select %65, %66, %67 : vector<128x1xi1>, vector<128x1xf32>
    %69 = vector.broadcast %68 : vector<128x1xf32> to vector<128x128xf32>
    %70 = arith.cmpf oeq, %30, %69 : vector<128x128xf32>
    %71 = arith.andi %25, %70 : vector<128x128xi1>
    %72 = arith.ori %71, %39 : vector<128x128xi1>
    %73 = arith.extui %72 : vector<128x128xi1> to vector<128x128xi32>
    %74 = arith.sitofp %73 : vector<128x128xi32> to vector<128x128xf32>
    %c256 = arith.constant 256 : index
    %c0_21 = arith.constant 0 : index
    %75 = vector.load %arg9[%c256, %c0_21] : memref<1024x128xf32, #tpu.memory_space<vmem>>, vector<128x128xf32>
    tpu.vector_store %arg9[%c256, %c0_21], %74 {strides = array<i32>} : memref<1024x128xf32, #tpu.memory_space<vmem>>, vector<128x128xf32>,
    %cst_22 = arith.constant 3.000000e+00 : f32
    %76 = vector.broadcast %cst_22 : f32 to vector<128x1xf32>
    %77 = arith.cmpf ogt, %31, %76 : vector<128x1xf32>
    %cst_23 = arith.constant 4.000000e+00 : f32
    %cst_24 = arith.constant 1.000000e+00 : f32
    %78 = vector.broadcast %cst_23 : f32 to vector<128x1xf32>
    %79 = vector.broadcast %cst_24 : f32 to vector<128x1xf32>
    %80 = arith.select %77, %78, %79 : vector<128x1xi1>, vector<128x1xf32>
    %81 = vector.broadcast %80 : vector<128x1xf32> to vector<128x128xf32>
    %82 = arith.cmpf oeq, %30, %81 : vector<128x128xf32>
    %83 = arith.andi %25, %82 : vector<128x128xi1>
    %84 = arith.ori %83, %39 : vector<128x128xi1>
    %85 = arith.extui %84 : vector<128x128xi1> to vector<128x128xi32>
    %86 = arith.sitofp %85 : vector<128x128xi32> to vector<128x128xf32>
    %c384 = arith.constant 384 : index
    %c0_25 = arith.constant 0 : index
    %87 = vector.load %arg9[%c384, %c0_25] : memref<1024x128xf32, #tpu.memory_space<vmem>>, vector<128x128xf32>
    tpu.vector_store %arg9[%c384, %c0_25], %86 {strides = array<i32>} : memref<1024x128xf32, #tpu.memory_space<vmem>>, vector<128x128xf32>,
    %cst_26 = arith.constant 4.000000e+00 : f32
    %88 = vector.broadcast %cst_26 : f32 to vector<128x1xf32>
    %89 = arith.cmpf ogt, %31, %88 : vector<128x1xf32>
    %cst_27 = arith.constant 5.000000e+00 : f32
    %cst_28 = arith.constant 1.000000e+00 : f32
    %90 = vector.broadcast %cst_27 : f32 to vector<128x1xf32>
    %91 = vector.broadcast %cst_28 : f32 to vector<128x1xf32>
    %92 = arith.select %89, %90, %91 : vector<128x1xi1>, vector<128x1xf32>
    %93 = vector.broadcast %92 : vector<128x1xf32> to vector<128x128xf32>
    %94 = arith.cmpf oeq, %30, %93 : vector<128x128xf32>
    %95 = arith.andi %25, %94 : vector<128x128xi1>
    %96 = arith.ori %95, %39 : vector<128x128xi1>
    %97 = arith.extui %96 : vector<128x128xi1> to vector<128x128xi32>
    %98 = arith.sitofp %97 : vector<128x128xi32> to vector<128x128xf32>
    %c512 = arith.constant 512 : index
    %c0_29 = arith.constant 0 : index
    %99 = vector.load %arg9[%c512, %c0_29] : memref<1024x128xf32, #tpu.memory_space<vmem>>, vector<128x128xf32>
    tpu.vector_store %arg9[%c512, %c0_29], %98 {strides = array<i32>} : memref<1024x128xf32, #tpu.memory_space<vmem>>, vector<128x128xf32>,
    %cst_30 = arith.constant 5.000000e+00 : f32
    %100 = vector.broadcast %cst_30 : f32 to vector<128x1xf32>
    %101 = arith.cmpf ogt, %31, %100 : vector<128x1xf32>
    %cst_31 = arith.constant 6.000000e+00 : f32
    %cst_32 = arith.constant 1.000000e+00 : f32
    %102 = vector.broadcast %cst_31 : f32 to vector<128x1xf32>
    %103 = vector.broadcast %cst_32 : f32 to vector<128x1xf32>
    %104 = arith.select %101, %102, %103 : vector<128x1xi1>, vector<128x1xf32>
    %105 = vector.broadcast %104 : vector<128x1xf32> to vector<128x128xf32>
    %106 = arith.cmpf oeq, %30, %105 : vector<128x128xf32>
    %107 = arith.andi %25, %106 : vector<128x128xi1>
    %108 = arith.ori %107, %39 : vector<128x128xi1>
    %109 = arith.extui %108 : vector<128x128xi1> to vector<128x128xi32>
    %110 = arith.sitofp %109 : vector<128x128xi32> to vector<128x128xf32>
    %c640 = arith.constant 640 : index
    %c0_33 = arith.constant 0 : index
    %111 = vector.load %arg9[%c640, %c0_33] : memref<1024x128xf32, #tpu.memory_space<vmem>>, vector<128x128xf32>
    tpu.vector_store %arg9[%c640, %c0_33], %110 {strides = array<i32>} : memref<1024x128xf32, #tpu.memory_space<vmem>>, vector<128x128xf32>,
    %cst_34 = arith.constant 6.000000e+00 : f32
    %112 = vector.broadcast %cst_34 : f32 to vector<128x1xf32>
    %113 = arith.cmpf ogt, %31, %112 : vector<128x1xf32>
    %cst_35 = arith.constant 7.000000e+00 : f32
    %cst_36 = arith.constant 1.000000e+00 : f32
    %114 = vector.broadcast %cst_35 : f32 to vector<128x1xf32>
    %115 = vector.broadcast %cst_36 : f32 to vector<128x1xf32>
    %116 = arith.select %113, %114, %115 : vector<128x1xi1>, vector<128x1xf32>
    %117 = vector.broadcast %116 : vector<128x1xf32> to vector<128x128xf32>
    %118 = arith.cmpf oeq, %30, %117 : vector<128x128xf32>
    %119 = arith.andi %25, %118 : vector<128x128xi1>
    %120 = arith.ori %119, %39 : vector<128x128xi1>
    %121 = arith.extui %120 : vector<128x128xi1> to vector<128x128xi32>
    %122 = arith.sitofp %121 : vector<128x128xi32> to vector<128x128xf32>
    %c768 = arith.constant 768 : index
    %c0_37 = arith.constant 0 : index
    %123 = vector.load %arg9[%c768, %c0_37] : memref<1024x128xf32, #tpu.memory_space<vmem>>, vector<128x128xf32>
    tpu.vector_store %arg9[%c768, %c0_37], %122 {strides = array<i32>} : memref<1024x128xf32, #tpu.memory_space<vmem>>, vector<128x128xf32>,
    %cst_38 = arith.constant 7.000000e+00 : f32
    %124 = vector.broadcast %cst_38 : f32 to vector<128x1xf32>
    %125 = arith.cmpf ogt, %31, %124 : vector<128x1xf32>
    %cst_39 = arith.constant 8.000000e+00 : f32
    %cst_40 = arith.constant 1.000000e+00 : f32
    %126 = vector.broadcast %cst_39 : f32 to vector<128x1xf32>
    %127 = vector.broadcast %cst_40 : f32 to vector<128x1xf32>
    %128 = arith.select %125, %126, %127 : vector<128x1xi1>, vector<128x1xf32>
    %129 = vector.broadcast %128 : vector<128x1xf32> to vector<128x128xf32>
    %130 = arith.cmpf oeq, %30, %129 : vector<128x128xf32>
    %131 = arith.andi %25, %130 : vector<128x128xi1>
    %132 = arith.ori %131, %39 : vector<128x128xi1>
    %133 = arith.extui %132 : vector<128x128xi1> to vector<128x128xi32>
    %134 = arith.sitofp %133 : vector<128x128xi32> to vector<128x128xf32>
    %c896 = arith.constant 896 : index
    %c0_41 = arith.constant 0 : index
    %135 = vector.load %arg9[%c896, %c0_41] : memref<1024x128xf32, #tpu.memory_space<vmem>>, vector<128x128xf32>
    tpu.vector_store %arg9[%c896, %c0_41], %134 {strides = array<i32>} : memref<1024x128xf32, #tpu.memory_space<vmem>>, vector<128x128xf32>,
    %c0_42 = arith.constant 0 : index
    %c0_43 = arith.constant 0 : index
    %136 = vector.load %arg9[%c0_42, %c0_43] : memref<1024x128xf32, #tpu.memory_space<vmem>>, vector<1024x128xf32>
    %c0_44 = arith.constant 0 : index
    %c0_45 = arith.constant 0 : index
    %c0_46 = arith.constant 0 : index
    %137 = vector.load %arg3[%c0_44, %c0_45, %c0_46] : memref<1x3x128xf32, #tpu.memory_space<vmem>>, vector<1x3x128xf32>
    %138 = vector.shape_cast %137 : vector<1x3x128xf32> to vector<3x128xf32>
    %c0_47 = arith.constant 0 : index
    %c0_48 = arith.constant 0 : index
    %c0_49 = arith.constant 0 : index
    %139 = vector.load %arg5[%c0_47, %c0_48, %c0_49] : memref<1x4x128xf32, #tpu.memory_space<vmem>>, vector<1x4x128xf32>
    %140 = vector.shape_cast %139 : vector<1x4x128xf32> to vector<4x128xf32>
    %c0_50 = arith.constant 0 : index
    %c0_51 = arith.constant 0 : index
    %141 = vector.load %arg10[%c0_50, %c0_51] : memref<7x128xf32, #tpu.memory_space<vmem>>, vector<3x128xf32>
    tpu.vector_store %arg10[%c0_50, %c0_51], %1 {strides = array<i32>} : memref<7x128xf32, #tpu.memory_space<vmem>>, vector<3x128xf32>,
    %c3 = arith.constant 3 : index
    %c0_52 = arith.constant 0 : index
    %142 = vector.load %arg10[%c3, %c0_52] : memref<7x128xf32, #tpu.memory_space<vmem>>, vector<4x128xf32>
    tpu.vector_store %arg10[%c3, %c0_52], %140 {strides = array<i32>} : memref<7x128xf32, #tpu.memory_space<vmem>>, vector<4x128xf32>,
    %c0_53 = arith.constant 0 : index
    %c0_54 = arith.constant 0 : index
    %143 = vector.load %arg10[%c0_53, %c0_54] : memref<7x128xf32, #tpu.memory_space<vmem>>, vector<7x128xf32>
    %cst_55 = arith.constant dense<0.000000e+00> : vector<7x1024xf32>
    %144 = tpu.matmul %143, %136, %cst_55 {dimension_numbers = #tpu.dot_dimension_numbers<[1], [1], [0], [0], [0, 0, 1, 0], [], []>} : vector<7x128xf32>, vector<1024x128xf32>, vector<7x1024xf32> -> vector<7x1024xf32>
    %cst_56 = arith.constant 0.000000e+00 : f32
    %145 = vector.broadcast %cst_56 : f32 to vector<4x1024xf32>
    %c3_57 = arith.constant 3 : index
    %c0_58 = arith.constant 0 : index
    %146 = vector.load %arg11[%c3_57, %c0_58] : memref<7x1024xf32, #tpu.memory_space<vmem>>, vector<4x1024xf32>
    tpu.vector_store %arg11[%c3_57, %c0_58], %145 {strides = array<i32>} : memref<7x1024xf32, #tpu.memory_space<vmem>>, vector<4x1024xf32>,
    %c0_59 = arith.constant 0 : index
    %c0_60 = arith.constant 0 : index
    %147 = vector.load %arg11[%c0_59, %c0_60] : memref<7x1024xf32, #tpu.memory_space<vmem>>, vector<3x128xf32>
    tpu.vector_store %arg11[%c0_59, %c0_60], %138 {strides = array<i32>} : memref<7x1024xf32, #tpu.memory_space<vmem>>, vector<3x128xf32>,
    %c0_61 = arith.constant 0 : index
    %c128_62 = arith.constant 128 : index
    %148 = vector.load %arg11[%c0_61, %c128_62] : memref<7x1024xf32, #tpu.memory_space<vmem>>, vector<3x128xf32>
    tpu.vector_store %arg11[%c0_61, %c128_62], %138 {strides = array<i32>} : memref<7x1024xf32, #tpu.memory_space<vmem>>, vector<3x128xf32>,
    %c0_63 = arith.constant 0 : index
    %c256_64 = arith.constant 256 : index
    %149 = vector.load %arg11[%c0_63, %c256_64] : memref<7x1024xf32, #tpu.memory_space<vmem>>, vector<3x128xf32>
    tpu.vector_store %arg11[%c0_63, %c256_64], %138 {strides = array<i32>} : memref<7x1024xf32, #tpu.memory_space<vmem>>, vector<3x128xf32>,
    %c0_65 = arith.constant 0 : index
    %c384_66 = arith.constant 384 : index
    %150 = vector.load %arg11[%c0_65, %c384_66] : memref<7x1024xf32, #tpu.memory_space<vmem>>, vector<3x128xf32>
    tpu.vector_store %arg11[%c0_65, %c384_66], %138 {strides = array<i32>} : memref<7x1024xf32, #tpu.memory_space<vmem>>, vector<3x128xf32>,
    %c0_67 = arith.constant 0 : index
    %c512_68 = arith.constant 512 : index
    %151 = vector.load %arg11[%c0_67, %c512_68] : memref<7x1024xf32, #tpu.memory_space<vmem>>, vector<3x128xf32>
    tpu.vector_store %arg11[%c0_67, %c512_68], %138 {strides = array<i32>} : memref<7x1024xf32, #tpu.memory_space<vmem>>, vector<3x128xf32>,
    %c0_69 = arith.constant 0 : index
    %c640_70 = arith.constant 640 : index
    %152 = vector.load %arg11[%c0_69, %c640_70] : memref<7x1024xf32, #tpu.memory_space<vmem>>, vector<3x128xf32>
    tpu.vector_store %arg11[%c0_69, %c640_70], %138 {strides = array<i32>} : memref<7x1024xf32, #tpu.memory_space<vmem>>, vector<3x128xf32>,
    %c0_71 = arith.constant 0 : index
    %c768_72 = arith.constant 768 : index
    %153 = vector.load %arg11[%c0_71, %c768_72] : memref<7x1024xf32, #tpu.memory_space<vmem>>, vector<3x128xf32>
    tpu.vector_store %arg11[%c0_71, %c768_72], %138 {strides = array<i32>} : memref<7x1024xf32, #tpu.memory_space<vmem>>, vector<3x128xf32>,
    %c0_73 = arith.constant 0 : index
    %c896_74 = arith.constant 896 : index
    %154 = vector.load %arg11[%c0_73, %c896_74] : memref<7x1024xf32, #tpu.memory_space<vmem>>, vector<3x128xf32>
    tpu.vector_store %arg11[%c0_73, %c896_74], %138 {strides = array<i32>} : memref<7x1024xf32, #tpu.memory_space<vmem>>, vector<3x128xf32>,
    %c0_75 = arith.constant 0 : index
    %c0_76 = arith.constant 0 : index
    %155 = vector.load %arg11[%c0_75, %c0_76] : memref<7x1024xf32, #tpu.memory_space<vmem>>, vector<7x1024xf32>
    %156 = arith.subf %144, %155 : vector<7x1024xf32>
    %c0_77 = arith.constant 0 : index
    %c0_78 = arith.constant 0 : index
    %157 = vector.load %arg7[%c0_77, %c0_78] : memref<1024x1024xf32, #tpu.memory_space<vmem>>, vector<1024x1024xf32>
    %cst_79 = arith.constant dense<0.000000e+00> : vector<7x1024xf32>
    %158 = tpu.matmul %156, %157, %cst_79 {dimension_numbers = #tpu.dot_dimension_numbers<[1], [0], [0], [1], [0, 0, 1, 1], [], []>} : vector<7x1024xf32>, vector<1024x1024xf32>, vector<7x1024xf32> -> vector<7x1024xf32>
    %c0_80 = arith.constant 0 : index
    %c0_81 = arith.constant 0 : index
    %c0_82 = arith.constant 0 : index
    %159 = vector.load %arg8[%c0_80, %c0_81, %c0_82] : memref<1x7x1024xf32, #tpu.memory_space<vmem>>, vector<1x7x1024xf32>
    %160 = vector.shape_cast %159 : vector<1x7x1024xf32> to vector<7x1024xf32>
    %161 = vector.shape_cast %158 : vector<7x1024xf32> to vector<1x7x1024xf32>
    tpu.vector_store %arg8[%c0_80, %c0_81, %c0_82], %161 {strides = array<i32>} : memref<1x7x1024xf32, #tpu.memory_space<vmem>>, vector<1x7x1024xf32>,
    return
  }
  func.func @transform_0(%arg0: i32, %arg1: i32) -> (i32, i32, i32) {
    %c0_i32 = arith.constant 0 : i32
    %c0_i32_0 = arith.constant 0 : i32
    %c0_i32_1 = arith.constant 0 : i32
    return %arg0, %c0_i32, %c0_i32_0 : i32, i32, i32
  }
  func.func @transform_1(%arg0: i32, %arg1: i32) -> (i32, i32, i32) {
    %c0_i32 = arith.constant 0 : i32
    %c0_i32_0 = arith.constant 0 : i32
    return %arg0, %c0_i32, %arg1 : i32, i32, i32
  }
  func.func @transform_2(%arg0: i32, %arg1: i32) -> (i32, i32, i32) {
    %c0_i32 = arith.constant 0 : i32
    %c0_i32_0 = arith.constant 0 : i32
    return %arg0, %arg1, %c0_i32 : i32, i32, i32
  }
  func.func @transform_3(%arg0: i32, %arg1: i32) -> (i32, i32, i32) {
    %c0_i32 = arith.constant 0 : i32
    %c0_i32_0 = arith.constant 0 : i32
    %c0_i32_1 = arith.constant 0 : i32
    return %arg0, %c0_i32, %c0_i32_0 : i32, i32, i32
  }
  func.func @transform_4(%arg0: i32, %arg1: i32) -> (i32, i32) {
    %c0_i32 = arith.constant 0 : i32
    %c0_i32_0 = arith.constant 0 : i32
    %c0_i32_1 = arith.constant 0 : i32
    return %c0_i32, %c0_i32_0 : i32, i32
  }
  func.func @transform_5(%arg0: i32, %arg1: i32) -> (i32, i32) {
    %c0_i32 = arith.constant 0 : i32
    %c0_i32_0 = arith.constant 0 : i32
    %c0_i32_1 = arith.constant 0 : i32
    return %c0_i32, %c0_i32_0 : i32, i32
  }
  func.func @transform_6(%arg0: i32, %arg1: i32) -> (i32, i32, i32) {
    %c0_i32 = arith.constant 0 : i32
    %c0_i32_0 = arith.constant 0 : i32
    return %arg0, %c0_i32, %arg1 : i32, i32, i32
  }
}

</mosaic_0001>

<bundles_post_ra>
// kernel: tpu_custom_call.1
= control target key start
LH: loop header
LB: loop body
LE: loop exit
PB: predicated region body
PF: predicated region fallthrough
CT: control target
= control target key end

     0   :  { %s9336_s0 = inlined_call_operand.vmem [shape: f32[2,3,128], index: 0, kind: input, shape index: {}]   ;;  %s9337_s1 = inlined_call_operand.vmem [shape: f32[2,3,256], index: 1, kind: input, shape index: {}]   ;;  %s9338_s2 = inlined_call_operand.vmem [shape: f32[2,256,3], index: 2, kind: input, shape index: {}]   ;;  %s9339_s3 = inlined_call_operand.hbm [shape: f32[2,4,128], index: 3, kind: input, shape index: {}]   ;;  %s9340_s4 = inlined_call_operand.hbm [shape: bf16[128,128], index: 4, kind: input, shape index: {}]   ;;  %s9341_s5 = inlined_call_operand.hbm [shape: f32[1024,1024], index: 5, kind: input, shape index: {}]   ;;  %s9342_s6 = inlined_call_operand.vmem [shape: f32[2,7,2048], index: 6, kind: output, shape index: {}]  }
   0x1   :  { %9557 = sst [smem:[#allocation58_spill]] %s9340_s4 }
   0x2   :  { %9558 = sst [smem:[#allocation59_spill]] %s9341_s5 }
   0x3   :  { %11 = vsyncpa [#allocation6], 0 }
   0x4   :  { %13 = vsyncpa [#allocation6 + $0x1], 0 }
   0x5   :  { %14 = vsyncpa [#allocation8], 0  ;;  %s6367_s21 = smov 0   ;;  %s6369_s22 = smov 0  }
   0x6   :  { %s6371_s23 = smov 0   ;;  %s6373_s24 = smov 0  }
   0x7   :  { %s6375_s25 = smov 0   ;;  %s6377_s26 = smov 0  }
   0x8   :  { %s6379_s27 = smov 0   ;;  %s6381_s28 = smov 0  }
   0x9 LB: > { %s5404_s29 = sadd.s32 4294967295, %s6318_s28   ;;  %p5406_p0 = scmp.ge.s32.totalorder %s6318_s28, 1  ;;  %s6318_s28 = sphi %s6381_s28, %s20_s28   ;;  %s6314_s27 = sphi %s6379_s27, %s10397_s27   ;;  %s6310_s26 = sphi %s6377_s26, %s10396_s26   ;;  %s6306_s25 = sphi %s6375_s25, %s10395_s25   ;;  %s6302_s24 = sphi %s6373_s24, %s10394_s24   ;;  %s6298_s23 = sphi %s6371_s23, %s10393_s23   ;;  %s6294_s22 = sphi %s6369_s22, %s10392_s22   ;;  %s6290_s21 = sphi %s6367_s21, %s10391_s21  }
   0xa   : > { %p6409_p1 = scmp.eq.s32.totalorder %s5404_s29, 0  ;;  %p215_p2 = scmp.lt.s32.totalorder %s6318_s28, 5 }
   0xb   : > { %s9560_s4 = sld [smem:[#allocation58_spill]]  ;;  %s6320_s11 = smov [#allocation7]  }
   0xc   : > { %p6417_p3 = pnand %p5406_p0, %p215_p2  ;;  %s228_s12 = sshll.u32 %s6320_s11, 4  ;;  %s229_s12 = int_to_ptr.vmem [resolvable:$true] %s228_s12 }
   0xd   : > { %s9562_s5 = sld [smem:[#allocation59_spill]]  ;;  %s6321_s16 = smov 64  }
   0xe   : > { %p5765_p4 = pneg %p6417_p3  ;;  %s6322_s17 = smov 4  }
   0xf   : > { %s6323_s18 = smov [#allocation9]   ;;  %s6324_s20 = smov 1024  }
  0x10   : > { %p5766_p5 = pnand %p5765_p4, %p6409_p1  ;;  %s242_s19 = sshll.u32 %s6323_s18, 4  ;;  %s243_s19 = int_to_ptr.vmem [resolvable:$true] %s242_s19 }
  0x11   : > { %s226_s9 = sshll.u32 %s9560_s4, 4  ;;  %s29_s29 = sadd.s32 1, %s6310_s26  ;;  %s227_s9 = int_to_ptr.hbm [resolvable:$true] %s226_s9 }
  0x12   : > { %5768 = dma.hbm_to_vmem [thread:$0]  (!%p5766_p5), %s227_s9, 1024, %s229_s12, [#allocation8], %s6321_s16, %s6321_s16, %s6322_s17  }
  0x13   : > { %s240_s15 = sshll.u32 %s9562_s5, 4  ;;  %p30_p6 = scmp.ge.s32.totalorder %s29_s29, 2  ;;  %s241_s15 = int_to_ptr.hbm [resolvable:$true] %s240_s15 }
  0x14   : > { %5771 = dma.hbm_to_vmem [thread:$0]  (!%p5766_p5), %s241_s15, 131072, %s243_s19, [#allocation8], %s6324_s20, %s6324_s20, %s6321_s16  }
  0x15   : > { %s32_s7 = sadd.s32 1, %s6314_s27  ;;  %s121_s8 = sadd.s32 1, %s6298_s23 }
  0x16   : > { %s10399_s29 = smov (%p30_p6, %s29_s29), 0  ;;  %s10401_s7 = smov (!%p30_p6, %s32_s7), %s6314_s27 }
  0x17   : > { %p128_p7 = scmp.ne.s32.totalorder %s6298_s23, %s6294_s22  ;;  %p134_p8 = scmp.ne.s32.totalorder %s6294_s22, %s6290_s21 }
  0x18   : > { %p34_p9 = scmp.ge.s32.totalorder %s10401_s7, 2  ;;  %p129_p10 = scmp.eq.s32.totalorder %s6318_s28, 0 }
  0x19   : > { %p6441_p11 = por %p6409_p1, %p134_p8  ;;  %p5778_p12 = scmp.lt.s32.totalorder %s6318_s28, 4 }
  0x1a   : > { %s10403_s7 = smov (%p34_p9, %s10401_s7), 0  ;;  %s287_s11 = sand.u32 1, %s6298_s23  }
  0x1b   : > { %s5411_s12 = sshll.u32 %s6314_s27, 2  ;;  %s118_s13 = ssub.s32 %s6314_s27, %s10403_s7 }
  0x1c   : > { %p130_p13 = por %p129_p10, %p128_p7  ;;  %p119_p0 = scmp.eq.s32.totalorder %s118_s13, 0 }
  0x1d   : > { %s5410_s14 = sshll.u32 %s287_s11, 2  ;;  %s295_s16 = scalar_lea.hbm %s9339_s3, %s5411_s12 }
  0x1e   : > { %s6456_s17 = scalar_select %p119_p0, %s6298_s23, %s121_s8  }
  0x1f   : > { %s297_s18 = sshll.u32 %s295_s16, 4  ;;  %s291_s19 = scalar_lea.vmem [#allocation5], %s5410_s14  ;;  %s298_s18 = int_to_ptr.hbm [resolvable:$true] %s297_s18 }
  0x20   : > { %s299_s20 = sshll.u32 %s291_s19, 4  ;;  %p5773_p2 = pnand %p5778_p12, %p130_p13  ;;  %s300_s20 = int_to_ptr.vmem [resolvable:$true] %s299_s20 }
  0x21   : > { %s288_s4 = scalar_lea.sflag [#allocation6], %s287_s11  ;;  %308 = sbr.rel (%p6417_p3) target bundleno = 1572 (0x624), region = 44 }
  0x22   : > { %5775 = dma.hbm_to_vmem [thread:$0]  (!%p5773_p2), %s298_s18, 64, %s300_s20, %s288_s4  }
  0x26   : > { %s310_s13 = sand.u32 1, %s6294_s22  }
  0x27   : > { %s6463_s5 = sshll.u32 %s310_s13, 2  ;;  %s311_s8 = scalar_lea.sflag [#allocation6], %s310_s13 }
  0x28   : > { %s314_s12 = scalar_lea.vmem [#allocation5], %s6463_s5 }
  0x29   : > { %6281 = dma.done.wait (%p6441_p11), %s311_s8, 64  }
  0x2a   : > { %6283 = vsyncadd (%p6441_p11), %s311_s8, 4294967232 }
  0x2b   : > { %6285 = dma.done.wait (%p6409_p1), [#allocation8], 132096  }
  0x2c   : > { %6287 = vsyncadd (%p6409_p1), [#allocation8], 4294835200  ;;  %p379_p3 = scmp.lt.s32.totalorder %s6306_s25, 1  ;;  %s5419_s4 = sshll.u32 %s6302_s24, 4  ;;  %v6325_v0 = vmov 0   ;;  %v6326_v18 = vmov 1  }
  0x2d   : > { %5859 = vset.pattern.permute.xlu2 %v6325_v0  ;;  %5858 = vset.pattern.permute.xlu1 %v6325_v0  ;;  %p394_p4 = scmp.lt.s32.totalorder %s5419_s4, 31  ;;  %v6327_v19 = vmov 2   ;;  %v5626_v21 = vld [vmem:[#allocation7 + $0x38] sm:$0xff]  ;;  %v5625_v23 = vld [vmem:[#allocation7 + $0x30] sm:$0xff]  ;;  %v5624_v26 = vld [vmem:[#allocation7 + $0x28] sm:$0xff]  ;;  %p385_p1 = scmp.lt.s32.totalorder %s6302_s24, 1 }
  0x2e   : > { %5857 = vset.pattern.permute.xlu0 %v6325_v0  ;;  %s10405_s25 = smov (!%p379_p3, %s6306_s25), 1  ;;  %887 = vmatpush.bf16.msra.mxu0 %v5626_v21  ;;  %v5623_v28 = vld [vmem:[#allocation7 + $0x20] sm:$0xff]  ;;  %v5622_v31 = vld [vmem:[#allocation7 + $0x18] sm:$0xff]  ;;  %v5621_v32 = vld [vmem:[#allocation7 + $0x10] sm:$0xff] }
  0x2f   : > { %s10407_s4 = smov (!%p394_p4, %s5419_s4), 31  ;;  %s5416_s30 = sshll.u32 %s10405_s25, 2  ;;  %v5620_v36 = vld [vmem:[#allocation7 + $0x8] sm:$0xff]  ;;  %v5619_v37 = vld [vmem:[#allocation7] sm:$0xff] }
  0x30   : > { %s5420_s10 = sshll.u32 %s10405_s25, 5  ;;  %s382_s14 = scalar_lea.vmem %s9336_s0, %s5416_s30 }
  0x31   : > { %s397_s15 = sadd.s32 %s5420_s10, %s10407_s4  ;;  %v6492_v1 = vld [vmem:[%s382_s14] sm:$0x7]  ;;  %s5417_s20 = sshll.u32 %s10405_s25, 1 }
  0x32   : > { %s5421_s21 = sshll.u32 %s397_s15, 3  ;;  %2735 = vst [vmem:[#allocation3] sm:$0x7] %v6492_v1  ;;  %888 = vmatpush.bf16.msra.mxu0 %v5625_v23  ;;  %v6563_v45 = vperm.slane %v6492_v1, 1  ;;  %v6566_v47 = vperm.slane %v6492_v1, 0  ;;  %v6573_v53 = vperm.slane %v6492_v1, 2 }
  0x33   : > { %s6490_s19 = scalar_lea.vmem %s9338_s2, %s5421_s21  ;;  %s5422_s10 = sshll.u32 %s6302_s24, 3 }
  0x34   : > { %v416_v2 = vld [vmem:[%s6490_s19 + $0x20] sm:$0xff]  ;;  %v414_v3 = vld [vmem:[%s6490_s19 + $0x10] sm:$0xff]  ;;  %v417_v5 = vld [vmem:[%s6490_s19 + $0x28] sm:$0xff]  ;;  %s386_s5 = scalar_select %p385_p1, %s6302_s24, 1 }
  0x35   : > { %450 = vperm.xlu2 %5859, %v416_v2   ;;  %v412_v4 = vld [vmem:[%s6490_s19] sm:$0xff]  ;;  %440 = vperm.xlu1 %5858, %v414_v3   ;;  %v415_v6 = vld [vmem:[%s6490_s19 + $0x18] sm:$0xff]  ;;  %v413_v7 = vld [vmem:[%s6490_s19 + $0x8] sm:$0xff]  ;;  %p9250_p5 = scmp.lt.s32.totalorder %s5422_s10, 15  ;;  %s5423_s11 = sshll.u32 %s10405_s25, 4 }
  0x36   : > { %430 = vperm.xlu0 %5857, %v412_v4   ;;  %v420_v8 = vld [vmem:[%s6490_s19 + $0x40] sm:$0xff]  ;;  %v419_v9 = vld [vmem:[%s6490_s19 + $0x38] sm:$0xff]  ;;  %v418_v10 = vld [vmem:[%s6490_s19 + $0x30] sm:$0xff]  ;;  %889 = vmatpush.bf16.msra.mxu0 %v5624_v26  ;;  %s388_s13 = sadd.s32 %s5417_s20, %s386_s5 }
  0x37   : > { %v423_v11 = vld [vmem:[%s6490_s19 + $0x58] sm:$0xff]  ;;  %v422_v12 = vld [vmem:[%s6490_s19 + $0x50] sm:$0xff]  ;;  %v421_v13 = vld [vmem:[%s6490_s19 + $0x48] sm:$0xff]  ;;  %s5418_s8 = sshll.u32 %s388_s13, 2  ;;  %s10409_s10 = smov (!%p9250_p5, %s5422_s10), 15 }
  0x38   : > { %v6508_v14 = vld [vmem:[%s6490_s19 + $0x70] sm:$0xff]  ;;  %v6511_v15 = vld [vmem:[%s6490_s19 + $0x68] sm:$0xff]  ;;  %v424_v16 = vld [vmem:[%s6490_s19 + $0x60] sm:$0xff]  ;;  %s390_s30 = scalar_lea.vmem %s9337_s1, %s5418_s8  ;;  %s9259_s24 = sadd.s32 %s5423_s11, %s10409_s10 }
  0x39   : > { %v6517_v17 = vld [vmem:[%s6490_s19 + $0x78] sm:$0xff]  ;;  %s5424_s25 = sshll.u32 %s9259_s24, 3 }
  0x3a   : > { %890 = vmatpush.bf16.msra.mxu0 %v5623_v28  ;;  %s9265_s21 = scalar_lea.vmem %s9342_s6, %s5424_s25 }
  0x3d   : > { %455 = vperm.xlu2 %5859, %v417_v5   ;;  %445 = vperm.xlu1 %5858, %v415_v6  }
  0x3e   : > { %435 = vperm.xlu0 %5857, %v413_v7   ;;  %891 = vmatpush.bf16.msra.mxu0 %v5622_v31 }
  0x42   : > { %892 = vmatpush.bf16.msra.mxu0 %v5621_v32 }
  0x45   : > { %470 = vperm.xlu2 %5859, %v420_v8   ;;  %465 = vperm.xlu1 %5858, %v419_v9  }
  0x46   : > { %460 = vperm.xlu0 %5857, %v418_v10   ;;  %893 = vmatpush.bf16.msra.mxu0 %v5620_v36 }
  0x4a   : > { %894 = vmatpush.bf16.msra.mxu0 %v5619_v37 }
  0x4d   : > { %485 = vperm.xlu2 %5859, %v423_v11   ;;  %480 = vperm.xlu1 %5858, %v422_v12  }
  0x4e   : > { %475 = vperm.xlu0 %5857, %v421_v13  }
  0x55   : > { %500 = vperm.xlu2 %5859, %v6508_v14   ;;  %495 = vperm.xlu1 %5858, %v6511_v15  }
  0x56   : > { %490 = vperm.xlu0 %5857, %v424_v16  }
  0x5d   : > { %5861 = vset.pattern.permute.xlu2 %v6326_v18  ;;  %5860 = vset.pattern.permute.xlu1 %v6326_v18 }
  0x5e   : > { %505 = vperm.xlu0 %5857, %v6517_v17   ;;  %546 = vperm.xlu2 %5861, %v413_v7  }
  0x5f   : > { %542 = vperm.xlu1 %5860, %v412_v4  }
  0x66   : > { %5862 = vset.pattern.permute.xlu0 %v6327_v19  ;;  %550 = vperm.xlu2 %5861, %v414_v3  }
  0x67   : > { %5863 = vset.pattern.permute.xlu1 %v6327_v19  ;;  %655 = vperm.xlu0 %5862, %v412_v4  }
  0x68   : > { %659 = vperm.xlu1 %5863, %v413_v7  }
  0x6e   : > { %5865 = vset.pattern.permute.xlu2 %v6327_v19 }
  0x6f   : > { %667 = vperm.xlu0 %5862, %v415_v6   ;;  %663 = vperm.xlu2 %5865, %v414_v3  }
  0x70   : > { %5864 = vset.pattern.permute.xlu1 %v6326_v18 }
  0x71   : > { %554 = vperm.xlu1 %5864, %v415_v6  }
  0x77   : > { %671 = vperm.xlu0 %5862, %v416_v2   ;;  %5866 = vset.pattern.permute.xlu2 %v6326_v18 }
  0x78   : > { %562 = vperm.xlu2 %5866, %v417_v5  }
  0x79   : > { %558 = vperm.xlu1 %5864, %v416_v2  }
  0x7f   : > { %5868 = vset.pattern.permute.xlu0 %v6326_v18 }
  0x80   : > { %570 = vperm.xlu0 %5868, %v419_v9   ;;  %566 = vperm.xlu2 %5866, %v418_v10  }
  0x81   : > { %5867 = vset.pattern.permute.xlu1 %v6327_v19 }
  0x82   : > { %675 = vperm.xlu1 %5867, %v417_v5  }
  0x88   : > { %5872 = vset.pattern.permute.xlu0 %v6327_v19  ;;  %5869 = vset.pattern.permute.xlu2 %v6327_v19 }
  0x89   : > { %687 = vperm.xlu0 %5872, %v420_v8   ;;  %683 = vperm.xlu2 %5869, %v419_v9   ;;  %v6328_v9 = vmov 1.0|1.0  }
  0x8a   : > { %679 = vperm.xlu1 %5867, %v418_v10  }
  0x8f   : > { %v6526_v20 = vpop.permute.xlu2 %450 }
  0x90   : > { %v513_v32 = vsub.f32 %v6526_v20, %v6566_v47 }
  0x91   : > { %699 = vperm.xlu0 %5872, %v423_v11   ;;  %5871 = vset.pattern.permute.xlu2 %v6326_v18 }
  0x92   : > { %5870 = vset.pattern.permute.xlu1 %v6326_v18  ;;  %578 = vperm.xlu2 %5871, %v421_v13  }
  0x93   : > { %574 = vperm.xlu1 %5870, %v420_v8  }
  0x97   : > { %v6531_v22 = vpop.permute.xlu2 %455 }
  0x98   : > { %v514_v36 = vsub.f32 %v6531_v22, %v6566_v47 }
  0x99   : > { %703 = vperm.xlu0 %5872, %v424_v16  }
  0x9a   : > { %582 = vperm.xlu2 %5871, %v422_v12  }
  0x9b   : > { %5873 = vset.pattern.permute.xlu1 %v6327_v19 }
  0x9c   : > { %691 = vperm.xlu1 %5873, %v421_v13  }
  0x9f   : > { %v6536_v27 = vpop.permute.xlu2 %470 }
  0xa1   : > { %5878 = vset.pattern.permute.xlu0 %v6326_v18 }
  0xa2   : > { %602 = vperm.xlu0 %5878, %v6517_v17   ;;  %5875 = vset.pattern.permute.xlu2 %v6327_v19 }
  0xa3   : > { %695 = vperm.xlu2 %5875, %v422_v12  }
  0xa4   : > { %5874 = vset.pattern.permute.xlu1 %v6326_v18 }
  0xa5   : > { %586 = vperm.xlu1 %5874, %v423_v11  }
  0xa7   : > { %v6533_v24 = vpop.permute.xlu1 %440  ;;  %v6545_v35 = vpop.permute.xlu2 %485 }
  0xa8   : > { %v431_v25 = vpop.permute.xlu0 %430  ;;  %v511_v11 = vsub.f32 %v6533_v24, %v6566_v47 }
  0xa9   : > { %v509_v50 = vsub.f32 %v431_v25, %v6566_v47 }
  0xab   : > { %5876 = vset.pattern.permute.xlu2 %v6326_v18  ;;  %v525_v58 = vmul.f32 %v509_v50, %v509_v50  ;;  %v527_v18 = vmul.f32 %v511_v11, %v511_v11  ;;  %v529_v50 = vmul.f32 %v513_v32, %v513_v32 }
  0xac   : > { %594 = vperm.xlu2 %5876, %v6511_v15  }
  0xad   : > { %590 = vperm.xlu1 %5874, %v424_v16  }
  0xaf   : > { %v446_v29 = vpop.permute.xlu1 %445  ;;  %v6554_v40 = vpop.permute.xlu2 %500 }
  0xb0   : > { %v436_v30 = vpop.permute.xlu0 %435  ;;  %v512_v7 = vsub.f32 %v446_v29, %v6566_v47 }
  0xb1   : > { %v510_v51 = vsub.f32 %v436_v30, %v6566_v47 }
  0xb3   : > { %v526_v59 = vmul.f32 %v510_v51, %v510_v51  ;;  %v530_v51 = vmul.f32 %v514_v36, %v514_v36 }
  0xb4   : > { %598 = vperm.xlu2 %5876, %v6508_v14  }
  0xb5   : > { %5877 = vset.pattern.permute.xlu1 %v6327_v19 }
  0xb6   : > { %707 = vperm.xlu1 %5877, %v6511_v15   ;;  %v528_v15 = vmul.f32 %v512_v7, %v512_v7 }
  0xb7   : > { %v6541_v33 = vpop.permute.xlu1 %465 }
  0xb8   : > { %v6543_v34 = vpop.permute.xlu0 %460  ;;  %v547_v43 = vpop.permute.xlu2 %546 }
  0xb9   : > { %v607_v48 = vsub.f32 %v547_v43, %v6563_v45 }
  0xbb   : > { %v623_v54 = vmul.f32 %v607_v48, %v607_v48 }
  0xbc   : > { %5879 = vset.pattern.permute.xlu2 %v6327_v19 }
  0xbd   : > { %715 = vperm.xlu2 %5879, %v6517_v17   ;;  %v639_v62 = vadd.f32 %v623_v54, %v526_v59 }
  0xbe   : > { %711 = vperm.xlu1 %5877, %v6508_v14  }
  0xbf   : > { %v6550_v38 = vpop.permute.xlu1 %480 }
  0xc0   : > { %v6552_v39 = vpop.permute.xlu0 %475  ;;  %v551_v52 = vpop.permute.xlu2 %550 }
  0xc1   : > { %v608_v8 = vsub.f32 %v551_v52, %v6563_v45 }
  0xc3   : > { %v624_v16 = vmul.f32 %v608_v8, %v608_v8 }
  0xc5   : > { %v640_v25 = vadd.f32 %v624_v16, %v527_v18 }
  0xc7   : > { %v6556_v41 = vpop.permute.xlu1 %495 }
  0xc8   : > { %v6558_v42 = vpop.permute.xlu0 %490 }
  0xc9   : > { %v664_v1 = vpop.permute.xlu2 %663 }
  0xca   : > { %v721_v12 = vsub.f32 %v664_v1, %v6573_v53 }
  0xcc   : > { %v737_v19 = vmul.f32 %v721_v12, %v721_v12 }
  0xce   : > { %v6597_v29 = vadd.f32 %v737_v19, %v640_v25  ;;  %v518_v25 = vsub.f32 %v6552_v39, %v6566_v47 }
  0xd0   : > { %v6560_v44 = vpop.permute.xlu0 %505  ;;  %9567 = vst [vmem:[#allocation15_spill] sm:$0xff] %v6597_v29  ;;  %vm9345_vm4 = vcmp.lt.f32.partialorder %v6597_v29, 0.1225 }
  0xd1   : > { %v543_v46 = vpop.permute.xlu1 %542 }
  0xd2   : > { %v606_v49 = vsub.f32 %v543_v46, %v6563_v45  ;;  %v563_v24 = vpop.permute.xlu2 %562 }
  0xd3   : > { %v611_v30 = vsub.f32 %v563_v24, %v6563_v45 }
  0xd4   : > { %v622_v55 = vmul.f32 %v606_v49, %v606_v49 }
  0xd5   : > { %v627_v43 = vmul.f32 %v611_v30, %v611_v30 }
  0xd6   : > { %v638_v63 = vadd.f32 %v622_v55, %v525_v58 }
  0xd7   : > { %v643_v55 = vadd.f32 %v627_v43, %v530_v51 }
  0xd9   : > { %v656_v56 = vpop.permute.xlu0 %655 }
  0xda   : > { %v660_v57 = vpop.permute.xlu1 %659  ;;  %v719_v60 = vsub.f32 %v656_v56, %v6573_v53  ;;  %v567_v58 = vpop.permute.xlu2 %566 }
  0xdb   : > { %v720_v61 = vsub.f32 %v660_v57, %v6573_v53 }
  0xdc   : > { %v735_v2 = vmul.f32 %v719_v60, %v719_v60 }
  0xdd   : > { %v736_v3 = vmul.f32 %v720_v61, %v720_v61  ;;  %v612_v61 = vsub.f32 %v567_v58, %v6563_v45 }
  0xde   : > { %v6577_v4 = vadd.f32 %v735_v2, %v638_v63  ;;  %v516_v63 = vsub.f32 %v6541_v33, %v6566_v47  ;;  %v515_v2 = vsub.f32 %v6543_v34, %v6566_v47 }
  0xdf   : > { %v6579_v5 = vadd.f32 %v736_v3, %v639_v62 }
  0xe0   : > { %9564 = vst [vmem:[#allocation12_spill] sm:$0xff] %v6577_v4  ;;  %vm9343_vm0 = vcmp.lt.f32.partialorder %v6577_v4, 0.1225  ;;  %v532_v11 = vmul.f32 %v516_v63, %v516_v63  ;;  %v531_v12 = vmul.f32 %v515_v2, %v515_v2 }
  0xe1   : > { %9565 = vst [vmem:[#allocation13_spill] sm:$0xff] %v6579_v5  ;;  %vm9344_vm1 = vcmp.lt.f32.partialorder %v6579_v5, 0.1225  ;;  %v668_v6 = vpop.permute.xlu0 %667 }
  0xe2   : > { %vm5473_vm2 = vmpackc.low %vm9344_vm1, %vm9343_vm0  ;;  %v722_v13 = vsub.f32 %v668_v6, %v6573_v53  ;;  %v628_v6 = vmul.f32 %v612_v61, %v612_v61 }
  0xe3   : > { %5474 = vmatmul.msk.bf16.vlgmr.msra.gmra.mxu0 %vm5473_vm2, %v6328_v9  ;;  %v555_v10 = vpop.permute.xlu1 %554  ;;  %v684_v1 = vpop.permute.xlu2 %683 }
  0xe4   : > { %v609_v14 = vsub.f32 %v555_v10, %v6563_v45  ;;  %v738_v21 = vmul.f32 %v722_v13, %v722_v13  ;;  %v726_v7 = vsub.f32 %v684_v1, %v6573_v53 }
  0xe6   : > { %v625_v17 = vmul.f32 %v609_v14, %v609_v14  ;;  %v644_v14 = vadd.f32 %v628_v6, %v531_v12 }
  0xe8   : > { %v641_v23 = vadd.f32 %v625_v17, %v528_v15  ;;  %v742_v15 = vmul.f32 %v726_v7, %v726_v7 }
  0xe9   : > { %v672_v37 = vpop.permute.xlu0 %671 }
  0xea   : > { %v6595_v26 = vadd.f32 %v738_v21, %v641_v23  ;;  %v723_v52 = vsub.f32 %v672_v37, %v6573_v53  ;;  %v517_v23 = vsub.f32 %v6536_v27, %v6566_v47  ;;  %v534_v37 = vmul.f32 %v518_v25, %v518_v25 }
  0xeb   : > { %v559_v28 = vpop.permute.xlu1 %558 }
  0xec   : > { %9566 = vst [vmem:[#allocation14_spill] sm:$0xff] %v6595_v26  ;;  %vm9346_vm3 = vcmp.lt.f32.partialorder %v6595_v26, 0.1225  ;;  %v610_v31 = vsub.f32 %v559_v28, %v6563_v45  ;;  %v739_v57 = vmul.f32 %v723_v52, %v723_v52  ;;  %v579_v34 = vpop.permute.xlu2 %578  ;;  %v533_v36 = vmul.f32 %v517_v23, %v517_v23 }
  0xed   : > { %vm5475_vm5 = vmpackc.low %vm9346_vm3, %vm9345_vm4  ;;  %v615_v19 = vsub.f32 %v579_v34, %v6563_v45 }
  0xee   : > { %v626_v46 = vmul.f32 %v610_v31, %v610_v31 }
  0xef   : > { %v631_v30 = vmul.f32 %v615_v19, %v615_v19 }
  0xf0   : > { %v642_v56 = vadd.f32 %v626_v46, %v529_v50 }
  0xf2   : > { %v6616_v22 = vadd.f32 %v739_v57, %v642_v56  ;;  %v571_v60 = vpop.permute.xlu0 %570 }
  0xf3   : > { %5476 = vmatmul.msk.bf16.gmra.mxu0 %vm5475_vm5, %v6328_v9  ;;  %v613_v62 = vsub.f32 %v571_v60, %v6563_v45 }
  0xf4   : > { %v676_v48 = vpop.permute.xlu1 %675  ;;  %9568 = vst [vmem:[#allocation16_spill] sm:$0xff] %v6616_v22  ;;  %vm9348_vm7 = vcmp.lt.f32.partialorder %v6616_v22, 0.1225  ;;  %v583_v46 = vpop.permute.xlu2 %582 }
  0xf5   : > { %v724_v49 = vsub.f32 %v676_v48, %v6573_v53  ;;  %v629_v8 = vmul.f32 %v613_v62, %v613_v62  ;;  %v647_v48 = vadd.f32 %v631_v30, %v534_v37  ;;  %v616_v57 = vsub.f32 %v583_v46, %v6563_v45 }
  0xf6   : > { %v6329_v46 = vmov 127  }
  0xf7   : > { %v740_v54 = vmul.f32 %v724_v49, %v724_v49  ;;  %v645_v16 = vadd.f32 %v629_v8, %v532_v11  ;;  %v632_v63 = vmul.f32 %v616_v57, %v616_v57  ;;  %5880 = vset.pattern.permute.xlu1 %v6329_v46  ;;  %5881 = vset.pattern.permute.xlu2 %v6329_v46 }
  0xf8   : > { %5882 = vset.pattern.permute.xlu0 %v6329_v46 }
  0xf9   : > { %v6614_v20 = vadd.f32 %v740_v54, %v643_v55  ;;  %v6635_v17 = vadd.f32 %v742_v15, %v645_v16  ;;  %v520_v54 = vsub.f32 %v6545_v35, %v6566_v47  ;;  %v519_v35 = vsub.f32 %v6550_v38, %v6566_v47 }
  0xfa   : > { %v521_v15 = vsub.f32 %v6558_v42, %v6566_v47 }
  0xfb   : > { %vm9347_vm6 = vcmp.lt.f32.partialorder %v6614_v20, 0.1225  ;;  %9570 = vst [vmem:[#allocation18_spill] sm:$0xff] %v6635_v17  ;;  %vm9354_vm10 = vcmp.lt.f32.partialorder %v6635_v17, 0.1225  ;;  %v688_v24 = vpop.permute.xlu0 %687  ;;  %v536_v60 = vmul.f32 %v520_v54, %v520_v54  ;;  %v535_v1 = vmul.f32 %v519_v35, %v519_v35 }
  0xfc   : > { %v680_v59 = vpop.permute.xlu1 %679  ;;  %vm5477_vm8 = vmpackc.low %vm9347_vm6, %vm9348_vm7  ;;  %v727_v31 = vsub.f32 %v688_v24, %v6573_v53  ;;  %v537_v23 = vmul.f32 %v521_v15, %v521_v15 }
  0xfd   : > { %v725_v3 = vsub.f32 %v680_v59, %v6573_v53  ;;  %v696_v55 = vpop.permute.xlu2 %695  ;;  %v648_v7 = vadd.f32 %v632_v63, %v535_v1  ;;  %v9387_v63 = vmov 1.0  }
  0xfe   : > { %v743_v49 = vmul.f32 %v727_v31, %v727_v31  ;;  %v729_v61 = vsub.f32 %v696_v55, %v6573_v53 }
  0xff   : > { %v741_v13 = vmul.f32 %v725_v3, %v725_v3 }
 0x100   : > { %v745_v6 = vmul.f32 %v729_v61, %v729_v61 }
 0x101   : > { %v6633_v33 = vadd.f32 %v741_v13, %v644_v14  ;;  %v522_v14 = vsub.f32 %v6556_v41, %v6566_v47 }
 0x103   : > { %5478 = vmatmul.msk.bf16.gmra.mxu0 %vm5477_vm8, %v6328_v9  ;;  %9569 = vst [vmem:[#allocation17_spill] sm:$0xff] %v6633_v33  ;;  %vm9349_vm9 = vcmp.lt.f32.partialorder %v6633_v33, 0.1225  ;;  %v700_v56 = vpop.permute.xlu0 %699 }
 0x104   : > { %vm5479_vm11 = vmpackc.low %vm9354_vm10, %vm9349_vm9  ;;  %v730_v58 = vsub.f32 %v700_v56, %v6573_v53 }
 0x105   : > { %v575_v10 = vpop.permute.xlu1 %574 }
 0x106   : > { %v614_v21 = vsub.f32 %v575_v10, %v6563_v45  ;;  %v746_v2 = vmul.f32 %v730_v58, %v730_v58  ;;  %v6673_v10 = vadd.f32 %v745_v6, %v648_v7  ;;  %v595_v11 = vpop.permute.xlu2 %594 }
 0x107   : > { %v619_v38 = vsub.f32 %v595_v11, %v6563_v45 }
 0x108   : > { %v630_v32 = vmul.f32 %v614_v21, %v614_v21  ;;  %vm9355_vm2 = vcmp.lt.f32.partialorder %v6673_v10, 0.1225  ;;  %v538_v21 = vmul.f32 %v522_v14, %v522_v14 }
 0x109   : > { %v635_v34 = vmul.f32 %v619_v38, %v619_v38 }
 0x10a   : > { %v646_v50 = vadd.f32 %v630_v32, %v533_v36 }
 0x10b   : > { %v704_v19 = vpop.permute.xlu0 %703  ;;  %v651_v30 = vadd.f32 %v635_v34, %v538_v21 }
 0x10c   : > { %v6654_v39 = vadd.f32 %v743_v49, %v646_v50  ;;  %v731_v25 = vsub.f32 %v704_v19, %v6573_v53  ;;  %v523_v49 = vsub.f32 %v6554_v40, %v6566_v47 }
 0x10e   : > { %v692_v18 = vpop.permute.xlu1 %691  ;;  %9571 = vst [vmem:[#allocation19_spill] sm:$0xff] %v6654_v39  ;;  %vm9353_vm13 = vcmp.lt.f32.partialorder %v6654_v39, 0.1225  ;;  %v599_v24 = vpop.permute.xlu2 %598  ;;  %v747_v32 = vmul.f32 %v731_v25, %v731_v25  ;;  %v539_v56 = vmul.f32 %v523_v49, %v523_v49 }
 0x10f   : > { %v728_v28 = vsub.f32 %v692_v18, %v6573_v53 }
 0x111   : > { %v744_v43 = vmul.f32 %v728_v28, %v728_v28 }
 0x113   : > { %5480 = vmatmul.msk.bf16.gmra.mxu0 %vm5479_vm11, %v6328_v9  ;;  %v6652_v27 = vadd.f32 %v744_v43, %v647_v48  ;;  %v620_v43 = vsub.f32 %v599_v24, %v6563_v45 }
 0x114   : > { %v603_v42 = vpop.permute.xlu0 %602 }
 0x115   : > { %vm9350_vm12 = vcmp.lt.f32.partialorder %v6652_v27, 0.1225  ;;  %v621_v50 = vsub.f32 %v603_v42, %v6563_v45  ;;  %v636_v54 = vmul.f32 %v620_v43, %v620_v43 }
 0x116   : > { %vm5481_vm14 = vmpackc.low %vm9350_vm12, %vm9353_vm13 }
 0x117   : > { %v587_v51 = vpop.permute.xlu1 %586  ;;  %v716_v48 = vpop.permute.xlu2 %715  ;;  %v637_v57 = vmul.f32 %v621_v50, %v621_v50 }
 0x118   : > { %v617_v52 = vsub.f32 %v587_v51, %v6563_v45  ;;  %v734_v55 = vsub.f32 %v716_v48, %v6573_v53 }
 0x11a   : > { %v633_v59 = vmul.f32 %v617_v52, %v617_v52  ;;  %v524_v52 = vsub.f32 %v6560_v44, %v6566_v47  ;;  %v750_v35 = vmul.f32 %v734_v55, %v734_v55 }
 0x11c   : > { %v649_v3 = vadd.f32 %v633_v59, %v536_v60  ;;  %v540_v59 = vmul.f32 %v524_v52, %v524_v52  ;;  %v652_v60 = vadd.f32 %v636_v54, %v539_v56 }
 0x11e   : > { %v6671_v8 = vadd.f32 %v746_v2, %v649_v3  ;;  %v653_v61 = vadd.f32 %v637_v57, %v540_v59 }
 0x11f   : > { %v591_v62 = vpop.permute.xlu1 %590 }
 0x120   : > { %9572 = vst [vmem:[#allocation20_spill] sm:$0xff] %v6671_v8  ;;  %vm9367_vm15 = vcmp.lt.f32.partialorder %v6671_v8, 0.1225  ;;  %v618_v13 = vsub.f32 %v591_v62, %v6563_v45  ;;  %v6711_v45 = vadd.f32 %v750_v35, %v653_v61 }
 0x121   : > { %vm5483_vm5 = vmpackc.low %vm9367_vm15, %vm9355_vm2 }
 0x122   : > { %v634_v18 = vmul.f32 %v618_v13, %v618_v13 }
 0x123   : > { %5482 = vmatmul.msk.bf16.gmra.mxu0 %vm5481_vm14, %v6328_v9 }
 0x124   : > { %v650_v31 = vadd.f32 %v634_v18, %v537_v23 }
 0x126   : > { %v6692_v36 = vadd.f32 %v747_v32, %v650_v31 }
 0x128   : > { %v708_v12 = vpop.permute.xlu1 %707  ;;  %9574 = vst [vmem:[#allocation22_spill] sm:$0xff] %v6692_v36  ;;  %vm9368_vm11 = vcmp.lt.f32.partialorder %v6692_v36, 0.1225 }
 0x129   : > { %v732_v16 = vsub.f32 %v708_v12, %v6573_v53 }
 0x12b   : > { %v748_v28 = vmul.f32 %v732_v16, %v732_v16 }
 0x12d   : > { %v6690_v41 = vadd.f32 %v748_v28, %v651_v30 }
 0x12f   : > { %9573 = vst [vmem:[#allocation21_spill] sm:$0xff] %v6690_v41  ;;  %vm9366_vm8 = vcmp.lt.f32.partialorder %v6690_v41, 0.1225 }
 0x130   : > { %v712_v37 = vpop.permute.xlu1 %711  ;;  %vm5485_vm14 = vmpackc.low %vm9366_vm8, %vm9368_vm11 }
 0x131   : > { %v733_v51 = vsub.f32 %v712_v37, %v6573_v53 }
 0x133   : > { %5484 = vmatmul.msk.bf16.gmra.mxu0 %vm5483_vm5, %v6328_v9  ;;  %v749_v58 = vmul.f32 %v733_v51, %v733_v51 }
 0x135   : > { %v6709_v40 = vadd.f32 %v749_v58, %v652_v60 }
 0x137   : > { %9575 = vst [vmem:[#allocation23_spill] sm:$0xff] %v6709_v40  ;;  %vm9365_vm5 = vcmp.lt.f32.partialorder %v6709_v40, 0.1225 }
 0x143   : > { %5486 = vmatmul.msk.bf16.gmra.mxu0 %vm5485_vm14, %v6328_v9  ;;  %vm9364_vm14 = vcmp.lt.f32.partialorder %v6711_v45, 0.1225 }
 0x144   : > { %vm5487_vm0 = vmpackc.low %vm9364_vm14, %vm9365_vm5 }
 0x153   : > { %5488 = vmatmul.msk.bf16.gmra.mxu0 %vm5487_vm0, %v6328_v9 }
 0x160   : > { %v6720_v44 = vpop.f32.mrf.mxu0 }
 0x161   : > { %9576 = vst [vmem:[#allocation24_spill] sm:$0xff] %v6720_v44  ;;  %vm939_vm1 = vcmp.eq.f32.partialorder %v6720_v44, 0.0  ;;  %vm1149_vm4 = vcmp.gt.f32.partialorder %v6720_v44, 1.0 }
 0x162   : > { %v955_v47 = vsel %vm939_vm1, 1, %v6325_v0  ;;  %v1165_v9 = vsel %vm1149_vm4, 2.0, %v9387_v63 }
 0x163   : > { %972 = vperm.xlu1 %5880, %v955_v47  }
 0x168   : > { %v6725_v53 = vpop.f32.mrf.mxu0 }
 0x169   : > { %9577 = vst [vmem:[#allocation25_spill] sm:$0xff] %v6725_v53  ;;  %vm940_vm3 = vcmp.eq.f32.partialorder %v6725_v53, 0.0  ;;  %vm1150_vm6 = vcmp.gt.f32.partialorder %v6725_v53, 1.0 }
 0x16a   : > { %v956_v62 = vsel %vm940_vm3, 1, %v6325_v0  ;;  %v1166_v2 = vsel %vm1150_vm6, 2.0, %v9387_v63 }
 0x16b   : > { %975 = vperm.xlu2 %5881, %v956_v62   ;;  %v5883_v3 = vpack.i.bf16 %v1166_v2, %v1165_v9 }
 0x16d   : > { %5884 = vperm.xlu0 %5882, %v5883_v3  }
 0x170   : > { %v6732_v1 = vpop.f32.mrf.mxu0 }
 0x171   : > { %9578 = vst [vmem:[#allocation26_spill] sm:$0xff] %v6732_v1  ;;  %vm941_vm0 = vcmp.eq.f32.partialorder %v6732_v1, 0.0  ;;  %vm1151_vm4 = vcmp.gt.f32.partialorder %v6732_v1, 1.0 }
 0x172   : > { %v957_v6 = vsel %vm941_vm0, 1, %v6325_v0  ;;  %v1167_v13 = vsel %vm1151_vm4, 2.0, %v9387_v63 }
 0x175   : > { %978 = vperm.xlu0 %5882, %v957_v6  }
 0x178   : > { %v6736_v7 = vpop.f32.mrf.mxu0 }
 0x179   : > { %9579 = vst [vmem:[#allocation27_spill] sm:$0xff] %v6736_v7  ;;  %vm942_vm1 = vcmp.eq.f32.partialorder %v6736_v7, 0.0  ;;  %vm1152_vm3 = vcmp.gt.f32.partialorder %v6736_v7, 1.0 }
 0x17a   : > { %v958_v11 = vsel %vm942_vm1, 1, %v6325_v0  ;;  %v1168_v12 = vsel %vm1152_vm3, 2.0, %v9387_v63 }
 0x17b   : > { %981 = vperm.xlu1 %5880, %v958_v11   ;;  %v5888_v14 = vpack.i.bf16 %v1168_v12, %v1167_v13 }
 0x180   : > { %v6743_v38 = vpop.f32.mrf.mxu0 }
 0x181   : > { %vm943_vm6 = vcmp.eq.f32.partialorder %v6743_v38, 0.0  ;;  %vm1153_vm0 = vcmp.gt.f32.partialorder %v6743_v38, 1.0 }
 0x182   : > { %v959_v15 = vsel %vm943_vm6, 1, %v6325_v0  ;;  %v1169_v18 = vsel %vm1153_vm0, 2.0, %v9387_v63 }
 0x183   : > { %5889 = vperm.xlu1 %5880, %v5888_v14   ;;  %984 = vperm.xlu2 %5881, %v959_v15  }
 0x188   : > { %v6749_v16 = vpop.f32.mrf.mxu0 }
 0x189   : > { %vm944_vm1 = vcmp.eq.f32.partialorder %v6749_v16, 0.0  ;;  %vm1154_vm7 = vcmp.gt.f32.partialorder %v6749_v16, 1.0 }
 0x18a   : > { %v960_v34 = vsel %vm944_vm1, 1, %v6325_v0  ;;  %v1170_v19 = vsel %vm1154_vm7, 2.0, %v9387_v63 }
 0x18b   : > { %987 = vperm.xlu1 %5880, %v960_v34   ;;  %v5893_v21 = vpack.i.bf16 %v1170_v19, %v1169_v18 }
 0x18d   : > { %5894 = vperm.xlu2 %5881, %v5893_v21  }
 0x190   : > { %v6756_v23 = vpop.f32.mrf.mxu0 }
 0x191   : > { %9580 = vst [vmem:[#allocation28_spill] sm:$0xff] %v6756_v23  ;;  %vm945_vm3 = vcmp.eq.f32.partialorder %v6756_v23, 0.0  ;;  %vm1155_vm7 = vcmp.gt.f32.partialorder %v6756_v23, 1.0 }
 0x192   : > { %v961_v25 = vsel %vm945_vm3, 1, %v6325_v0  ;;  %v1171_v32 = vsel %vm1155_vm7, 2.0, %v9387_v63 }
 0x195   : > { %990 = vperm.xlu2 %5881, %v961_v25  }
 0x198   : > { %v6760_v28 = vpop.f32.mrf.mxu0 }
 0x199   : > { %9581 = vst [vmem:[#allocation29_spill] sm:$0xff] %v6760_v28  ;;  %vm946_vm4 = vcmp.eq.f32.partialorder %v6760_v28, 0.0  ;;  %vm1156_vm6 = vcmp.gt.f32.partialorder %v6760_v28, 1.0 }
 0x19a   : > { %v962_v24 = vsel %vm946_vm4, 1, %v6325_v0  ;;  %v1172_v30 = vsel %vm1156_vm6, 2.0, %v9387_v63 }
 0x19b   : > { %993 = vperm.xlu0 %5882, %v962_v24   ;;  %v5898_v42 = vpack.i.bf16 %v1172_v30, %v1171_v32 }
 0x1a0   : > { %v6767_v31 = vpop.f32.mrf.mxu0 }
 0x1a1   : > { %9582 = vst [vmem:[#allocation30_spill] sm:$0xff] %v6767_v31  ;;  %vm947_vm0 = vcmp.eq.f32.partialorder %v6767_v31, 0.0  ;;  %vm1157_vm1 = vcmp.gt.f32.partialorder %v6767_v31, 1.0 }
 0x1a2   : > { %v963_v37 = vsel %vm947_vm0, 1, %v6325_v0  ;;  %v1173_v48 = vsel %vm1157_vm1, 2.0, %v9387_v63 }
 0x1a3   : > { %5899 = vperm.xlu0 %5882, %v5898_v42   ;;  %996 = vperm.xlu1 %5880, %v963_v37  }
 0x1a8   : > { %v6773_v43 = vpop.f32.mrf.mxu0 }
 0x1a9   : > { %vm948_vm3 = vcmp.eq.f32.partialorder %v6773_v43, 0.0  ;;  %vm1158_vm4 = vcmp.gt.f32.partialorder %v6773_v43, 1.0 }
 0x1aa   : > { %v964_v46 = vsel %vm948_vm3, 1, %v6325_v0  ;;  %v1174_v49 = vsel %vm1158_vm4, 2.0, %v9387_v63 }
 0x1ab   : > { %999 = vperm.xlu2 %5881, %v964_v46   ;;  %v5903_v50 = vpack.i.bf16 %v1174_v49, %v1173_v48 }
 0x1ad   : > { %5904 = vperm.xlu1 %5880, %v5903_v50  }
 0x1b0   : > { %v6780_v51 = vpop.f32.mrf.mxu0 }
 0x1b1   : > { %vm949_vm6 = vcmp.eq.f32.partialorder %v6780_v51, 0.0  ;;  %vm1367_vm9 = vcmp.gt.f32.partialorder %v6780_v51, 2.0 }
 0x1b2   : > { %v965_v52 = vsel %vm949_vm6, 1, %v6325_v0  ;;  %v1383_v12 = vsel %vm1367_vm9, 3.0, %v9387_v63 }
 0x1b3   : > { %1002 = vperm.xlu0 %5882, %v965_v52  }
 0x1b8   : > { %v6784_v54 = vpop.f32.mrf.mxu0 }
 0x1b9   : > { %9583 = vst [vmem:[#allocation31_spill] sm:$0xff] %v6784_v54  ;;  %vm950_vm7 = vcmp.eq.f32.partialorder %v6784_v54, 0.0  ;;  %vm1368_vm0 = vcmp.gt.f32.partialorder %v6784_v54, 2.0  ;;  %vm1160_vm4 = vcmp.gt.f32.partialorder %v6784_v54, 1.0 }
 0x1ba   : > { %v966_v55 = vsel %vm950_vm7, 1, %v6325_v0  ;;  %v1384_v58 = vsel %vm1368_vm0, 3.0, %v9387_v63  ;;  %v1176_v61 = vsel %vm1160_vm4, 2.0, %v9387_v63 }
 0x1bb   : > { %1005 = vperm.xlu1 %5880, %v966_v55  }
 0x1c0   : > { %v6789_v56 = vpop.f32.mrf.mxu0 }
 0x1c1   : > { %9584 = vst [vmem:[#allocation32_spill] sm:$0xff] %v6789_v56  ;;  %vm951_vm1 = vcmp.eq.f32.partialorder %v6789_v56, 0.0  ;;  %vm1577_vm3 = vcmp.gt.f32.partialorder %v6789_v56, 3.0  ;;  %vm1161_vm12 = vcmp.gt.f32.partialorder %v6789_v56, 1.0 }
 0x1c2   : > { %v967_v57 = vsel %vm951_vm1, 1, %v6325_v0  ;;  %v1593_v59 = vsel %vm1577_vm3, 4.0, %v9387_v63  ;;  %vm1576_vm1 = vcmp.gt.f32.partialorder %v6784_v54, 3.0  ;;  %vm1785_vm3 = vcmp.gt.f32.partialorder %v6789_v56, 4.0 }
 0x1c3   : > { %1008 = vperm.xlu2 %5881, %v967_v57   ;;  %v5908_v60 = vpack.i.bf16 %v1593_v59, %v1384_v58  ;;  %v1592_v6 = vsel %vm1576_vm1, 4.0, %v9387_v63  ;;  %v1801_v11 = vsel %vm1785_vm3, 5.0, %v9387_v63  ;;  %v1177_v13 = vsel %vm1161_vm12, 2.0, %v9387_v63 }
 0x1c4   : > { %v5928_v34 = vpack.i.bf16 %v1592_v6, %v1383_v12  ;;  %vm1575_vm12 = vcmp.gt.f32.partialorder %v6780_v51, 3.0 }
 0x1c5   : > { %5909 = vperm.xlu0 %5882, %v5908_v60   ;;  %v1591_v46 = vsel %vm1575_vm12, 4.0, %v9387_v63  ;;  %vm1365_vm12 = vcmp.gt.f32.partialorder %v6767_v31, 2.0 }
 0x1c8   : > { %v6797_v35 = vpop.f32.mrf.mxu0 }
 0x1c9   : > { %9585 = vst [vmem:[#allocation33_spill] sm:$0xff] %v6797_v35  ;;  %vm1370_vm6 = vcmp.gt.f32.partialorder %v6797_v35, 2.0  ;;  %vm952_vm7 = vcmp.eq.f32.partialorder %v6797_v35, 0.0  ;;  %vm1578_vm0 = vcmp.gt.f32.partialorder %v6797_v35, 3.0  ;;  %vm1786_vm1 = vcmp.gt.f32.partialorder %v6797_v35, 4.0 }
 0x1ca   : > { %v1386_v47 = vsel %vm1370_vm6, 3.0, %v9387_v63  ;;  %v968_v9 = vsel %vm952_vm7, 1, %v6325_v0  ;;  %v1594_v3 = vsel %vm1578_vm0, 4.0, %v9387_v63  ;;  %vm1162_vm0 = vcmp.gt.f32.partialorder %v6797_v35, 1.0 }
 0x1cb   : > { %v5913_v62 = vpack.i.bf16 %v1386_v47, %v1176_v61  ;;  %v5918_v15 = vpack.i.bf16 %v1801_v11, %v1594_v3  ;;  %v1178_v25 = vsel %vm1162_vm0, 2.0, %v9387_v63  ;;  %v1802_v24 = vsel %vm1786_vm1, 5.0, %v9387_v63 }
 0x1cc   : > { %vm1994_vm3 = vcmp.gt.f32.partialorder %v6797_v35, 5.0  ;;  %vm1574_vm0 = vcmp.gt.f32.partialorder %v6773_v43, 3.0  ;;  %vm1993_vm1 = vcmp.gt.f32.partialorder %v6789_v56, 5.0 }
 0x1cd   : > { %5914 = vperm.xlu1 %5880, %v5913_v62   ;;  %1011 = vperm.xlu0 %5882, %v968_v9   ;;  %v2010_v48 = vsel %vm1994_vm3, 6.0, %v9387_v63  ;;  %vm1783_vm3 = vcmp.gt.f32.partialorder %v6780_v51, 4.0  ;;  %v1590_v58 = vsel %vm1574_vm0, 4.0, %v9387_v63  ;;  %v2009_v59 = vsel %vm1993_vm1, 6.0, %v9387_v63 }
 0x1ce   : > { %v1799_v61 = vsel %vm1783_vm3, 5.0, %v9387_v63  ;;  %vm2202_vm0 = vcmp.gt.f32.partialorder %v6797_v35, 6.0  ;;  %vm1364_vm1 = vcmp.gt.f32.partialorder %v6760_v28, 2.0  ;;  %vm1572_vm3 = vcmp.gt.f32.partialorder %v6760_v28, 3.0 }
 0x1cf   : > { %v5933_v62 = vpack.i.bf16 %v2009_v59, %v1799_v61  ;;  %v2218_v12 = vsel %vm2202_vm0, 7.0, %v9387_v63  ;;  %vm1781_vm0 = vcmp.gt.f32.partialorder %v6767_v31, 4.0 }
 0x1d0   : > { %v6809_v2 = vpop.f32.mrf.mxu0 }
 0x1d1   : > { %9586 = vst [vmem:[#allocation34_spill] sm:$0xff] %v6809_v2  ;;  %vm1371_vm4 = vcmp.gt.f32.partialorder %v6809_v2, 2.0  ;;  %vm1163_vm6 = vcmp.gt.f32.partialorder %v6809_v2, 1.0  ;;  %vm1579_vm7 = vcmp.gt.f32.partialorder %v6809_v2, 3.0  ;;  %vm953_vm9 = vcmp.eq.f32.partialorder %v6809_v2, 0.0 }
 0x1d2   : > { %v1387_v14 = vsel %vm1371_vm4, 3.0, %v9387_v63  ;;  %v1179_v19 = vsel %vm1163_vm6, 2.0, %v9387_v63  ;;  %v1595_v21 = vsel %vm1579_vm7, 4.0, %v9387_v63  ;;  %v969_v42 = vsel %vm953_vm9, 1, %v6325_v0 }
 0x1d3   : > { %v5943_v18 = vpack.i.bf16 %v1387_v14, %v1177_v13  ;;  %v5938_v30 = vpack.i.bf16 %v1178_v25, %v1179_v19  ;;  %v5948_v32 = vpack.i.bf16 %v1802_v24, %v1595_v21  ;;  %vm1366_vm4 = vcmp.gt.f32.partialorder %v6773_v43, 2.0 }
 0x1d4   : > { %vm1784_vm6 = vcmp.gt.f32.partialorder %v6784_v54, 4.0  ;;  %v1382_v49 = vsel %vm1366_vm4, 3.0, %v9387_v63  ;;  %vm2203_vm9 = vcmp.gt.f32.partialorder %v6809_v2, 6.0  ;;  %vm2410_vm4 = vcmp.gt.f32.partialorder %v6797_v35, 7.0 }
 0x1d5   : > { %5919 = vperm.xlu1 %5880, %v5918_v15   ;;  %5929 = vperm.xlu0 %5882, %v5928_v34   ;;  %v1800_v50 = vsel %vm1784_vm6, 5.0, %v9387_v63  ;;  %v5958_v52 = vpack.i.bf16 %v1591_v46, %v1382_v49  ;;  %v2219_v60 = vsel %vm2203_vm9, 7.0, %v9387_v63  ;;  %v2426_v9 = vsel %vm2410_vm4, 8.0, %v9387_v63 }
 0x1d6   : > { %5944 = vperm.xlu2 %5881, %v5943_v18   ;;  %v5923_v55 = vpack.i.bf16 %v2010_v48, %v1800_v50  ;;  %v5953_v3 = vpack.i.bf16 %v2426_v9, %v2219_v60  ;;  %vm1573_vm6 = vcmp.gt.f32.partialorder %v6767_v31, 3.0  ;;  %vm1782_vm9 = vcmp.gt.f32.partialorder %v6773_v43, 4.0  ;;  %v6878_v50 = vpop.permute.xlu2 %975  ;;  %v6889_v60 = vpop.permute.xlu1 %972 }
 0x1d7   : > { %v1589_v6 = vsel %vm1573_vm6, 4.0, %v9387_v63  ;;  %v1380_v13 = vsel %vm1364_vm1, 3.0, %v9387_v63  ;;  %v1798_v14 = vsel %vm1782_vm9, 5.0, %v9387_v63  ;;  %vm1991_vm4 = vcmp.gt.f32.partialorder %v6780_v51, 5.0 }
 0x1d8   : > { %v6830_v37 = vpop.f32.mrf.mxu0  ;;  %v5988_v15 = vpack.i.bf16 %v1589_v6, %v1380_v13  ;;  %vm2201_vm6 = vcmp.gt.f32.partialorder %v6789_v56, 6.0  ;;  %v1588_v21 = vsel %vm1572_vm3, 4.0, %v9387_v63  ;;  %v2007_v25 = vsel %vm1991_vm4, 6.0, %v9387_v63 }
 0x1d9   : > { %vm954_vm7 = vcmp.eq.f32.partialorder %v6830_v37, 0.0  ;;  %vm2408_vm1 = vcmp.gt.f32.partialorder %v6784_v54, 7.0  ;;  %v2217_v24 = vsel %vm2201_vm6, 7.0, %v9387_v63  ;;  %vm1990_vm9 = vcmp.gt.f32.partialorder %v6773_v43, 5.0 }
 0x1da   : > { %v970_v57 = vsel %vm954_vm7, 1, %v6325_v0  ;;  %v1381_v0 = vsel %vm1365_vm12, 3.0, %v9387_v63  ;;  %vm1992_vm7 = vcmp.gt.f32.partialorder %v6784_v54, 5.0  ;;  %vm2409_vm12 = vcmp.gt.f32.partialorder %v6789_v56, 7.0 }
 0x1db   : > { %v5973_v47 = vpack.i.bf16 %v1590_v58, %v1381_v0  ;;  %v2008_v11 = vsel %vm1992_vm7, 6.0, %v9387_v63  ;;  %v2425_v18 = vsel %vm2409_vm12, 8.0, %v9387_v63  ;;  %vm1363_vm7 = vcmp.gt.f32.partialorder %v6756_v23, 2.0 }
 0x1dc   : > { %v5963_v34 = vpack.i.bf16 %v2008_v11, %v1798_v14  ;;  %v5968_v19 = vpack.i.bf16 %v2425_v18, %v2218_v12  ;;  %v2424_v48 = vsel %vm2408_vm1, 8.0, %v9387_v63  ;;  %vm1580_vm12 = vcmp.gt.f32.partialorder %v6830_v37, 3.0 }
 0x1dd   : > { %5939 = vperm.xlu0 %5882, %v5938_v30   ;;  %1014 = vperm.xlu1 %5880, %v969_v42   ;;  %v1379_v30 = vsel %vm1363_vm7, 3.0, %v9387_v63  ;;  %v5983_v49 = vpack.i.bf16 %v2424_v48, %v2217_v24  ;;  %vm2200_vm3 = vcmp.gt.f32.partialorder %v6784_v54, 6.0  ;;  %vm1780_vm4 = vcmp.gt.f32.partialorder %v6760_v28, 4.0 }
 0x1de   : > { %5949 = vperm.xlu2 %5881, %v5948_v32   ;;  %v1797_v32 = vsel %vm1781_vm0, 5.0, %v9387_v63  ;;  %v6003_v42 = vpack.i.bf16 %v1588_v21, %v1379_v30  ;;  %vm1787_vm6 = vcmp.gt.f32.partialorder %v6809_v2, 4.0  ;;  %vm2407_vm7 = vcmp.gt.f32.partialorder %v6780_v51, 7.0  ;;  %v6895_v9 = vpop.permute.xlu2 %984 }
 0x1df   : > { %v5978_v46 = vpack.i.bf16 %v2007_v25, %v1797_v32  ;;  %v1796_v58 = vsel %vm1780_vm4, 5.0, %v9387_v63  ;;  %v1803_v59 = vsel %vm1787_vm6, 5.0, %v9387_v63  ;;  %vm1996_vm0 = vcmp.gt.f32.partialorder %v6830_v37, 5.0  ;;  %v6905_v14 = vpop.permute.xlu0 %5884 }
 0x1e0   : > { %vm1372_vm1 = vcmp.gt.f32.partialorder %v6830_v37, 2.0  ;;  %vm1159_vm4 = vcmp.gt.f32.partialorder %v6780_v51, 1.0  ;;  %9587 = vst [vmem:[#allocation35_spill] sm:$0xff] %v6905_v14  ;;  %vm1571_vm6 = vcmp.gt.f32.partialorder %v6756_v23, 3.0 }
 0x1e1   : > { %v1388_v6 = vsel %vm1372_vm1, 3.0, %v9387_v63  ;;  %vm1362_vm1 = vcmp.gt.f32.partialorder %v6749_v16, 2.0  ;;  %v1587_v24 = vsel %vm1571_vm6, 4.0, %v9387_v63  ;;  %vm2412_vm6 = vcmp.gt.f32.partialorder %v6830_v37, 7.0 }
 0x1e5   : > { %5959 = vperm.xlu0 %5882, %v5958_v52   ;;  %5924 = vperm.xlu1 %5880, %v5923_v55   ;;  %v2006_v52 = vsel %vm1990_vm9, 6.0, %v9387_v63  ;;  %v1596_v55 = vsel %vm1580_vm12, 4.0, %v9387_v63  ;;  %vm1788_vm9 = vcmp.gt.f32.partialorder %v6830_v37, 4.0  ;;  %vm1164_vm12 = vcmp.gt.f32.partialorder %v6830_v37, 1.0 }
 0x1e6   : > { %1017 = vperm.xlu2 %5881, %v970_v57   ;;  %v2216_v57 = vsel %vm2200_vm3, 7.0, %v9387_v63  ;;  %v5993_v0 = vpack.i.bf16 %v2006_v52, %v1796_v58  ;;  %v6028_v61 = vpack.i.bf16 %v1803_v59, %v1596_v55  ;;  %vm1369_vm3 = vcmp.gt.f32.partialorder %v6789_v56, 2.0 }
 0x1e7   : > { %v1804_v11 = vsel %vm1788_vm9, 5.0, %v9387_v63  ;;  %v1180_v12 = vsel %vm1164_vm12, 2.0, %v9387_v63  ;;  %v1385_v13 = vsel %vm1369_vm3, 3.0, %v9387_v63  ;;  %v6912_v25 = vpop.permute.xlu2 %5894  ;;  %vm1779_vm9 = vcmp.gt.f32.partialorder %v6756_v23, 4.0 }
 0x1e8   : > { %v6013_v18 = vpack.i.bf16 %v1804_v11, %v1388_v6  ;;  %9588 = vst [vmem:[#allocation36_spill] sm:$0xff] %v6912_v25  ;;  %vm2406_vm12 = vcmp.gt.f32.partialorder %v6773_v43, 7.0  ;;  %vm1570_vm3 = vcmp.gt.f32.partialorder %v6749_v16, 3.0 }
 0x1e9   : > { %v2422_v52 = vsel %vm2406_vm12, 8.0, %v9387_v63  ;;  %vm1987_vm12 = vcmp.gt.f32.partialorder %v6756_v23, 5.0 }
 0x1ed   : > { %5974 = vperm.xlu0 %5882, %v5973_v47   ;;  %5934 = vperm.xlu1 %5880, %v5933_v62   ;;  %v2423_v47 = vsel %vm2407_vm7, 8.0, %v9387_v63  ;;  %vm1989_vm7 = vcmp.gt.f32.partialorder %v6767_v31, 5.0 }
 0x1ee   : > { %5954 = vperm.xlu2 %5881, %v5953_v3   ;;  %v5998_v62 = vpack.i.bf16 %v2423_v47, %v2216_v57  ;;  %v2012_v3 = vsel %vm1996_vm0, 6.0, %v9387_v63  ;;  %vm2199_vm0 = vcmp.gt.f32.partialorder %v6780_v51, 6.0  ;;  %v2005_v30 = vsel %vm1989_vm7, 6.0, %v9387_v63  ;;  %v6924_v57 = vpop.permute.xlu0 %978 }
 0x1ef   : > { %v2215_v32 = vsel %vm2199_vm0, 7.0, %v9387_v63  ;;  %vm1361_vm7 = vcmp.gt.f32.partialorder %v6743_v38, 2.0  ;;  %vm1778_vm0 = vcmp.gt.f32.partialorder %v6749_v16, 4.0  ;;  %v6933_v59 = vpop.permute.xlu2 %990  ;;  %v2428_v47 = vsel %vm2412_vm6, 8.0, %v9387_v63 }
 0x1f0   : > { %v6023_v55 = vpack.i.bf16 %v2422_v52, %v2215_v32  ;;  %vm1777_vm6 = vcmp.gt.f32.partialorder %v6743_v38, 4.0 }
 0x1f5   : > { %5989 = vperm.xlu0 %5882, %v5988_v15   ;;  %5964 = vperm.xlu1 %5880, %v5963_v34   ;;  %v6907_v15 = vpop.permute.xlu1 %981  ;;  %v6033_v34 = vpack.i.bf16 %v1385_v13, %v2012_v3  ;;  %v1794_v3 = vsel %vm1778_vm0, 5.0, %v9387_v63  ;;  %vm1568_vm0 = vcmp.gt.f32.partialorder %v6736_v7, 3.0 }
 0x1f6   : > { %5969 = vperm.xlu2 %5881, %v5968_v19   ;;  %v1175_v19 = vsel %vm1159_vm4, 2.0, %v9387_v63  ;;  %vm1988_vm4 = vcmp.gt.f32.partialorder %v6760_v28, 5.0 }
 0x1f7   : > { %v6008_v21 = vpack.i.bf16 %v1180_v12, %v1175_v19 }
 0x1fd   : > { %6004 = vperm.xlu0 %5882, %v6003_v42   ;;  %5979 = vperm.xlu1 %5880, %v5978_v46   ;;  %v1378_v42 = vsel %vm1362_vm1, 3.0, %v9387_v63  ;;  %v1795_v46 = vsel %vm1779_vm9, 5.0, %v9387_v63  ;;  %v6926_v58 = vpop.permute.xlu1 %5889  ;;  %vm1995_vm1 = vcmp.gt.f32.partialorder %v6809_v2, 5.0  ;;  %vm1569_vm9 = vcmp.gt.f32.partialorder %v6743_v38, 3.0 }
 0x1fe   : > { %5984 = vperm.xlu2 %5881, %v5983_v49   ;;  %v6038_v48 = vpack.i.bf16 %v1587_v24, %v1378_v42  ;;  %v6018_v49 = vpack.i.bf16 %v2005_v30, %v1795_v46  ;;  %9589 = vst [vmem:[#allocation37_spill] sm:$0xff] %v6926_v58  ;;  %v2011_v12 = vsel %vm1995_vm1, 6.0, %v9387_v63  ;;  %v2003_v24 = vsel %vm1987_vm12, 6.0, %v9387_v63 }
 0x1ff   : > { %v6048_v13 = vpack.i.bf16 %v2428_v47, %v2011_v12  ;;  %v1793_v42 = vsel %vm1777_vm6, 5.0, %v9387_v63  ;;  %vm1986_vm1 = vcmp.gt.f32.partialorder %v6749_v16, 5.0  ;;  %vm1359_vm12 = vcmp.gt.f32.partialorder %v6732_v1, 2.0 }
 0x200   : > { %v1584_v47 = vsel %vm1568_vm0, 4.0, %v9387_v63  ;;  %vm1567_vm6 = vcmp.gt.f32.partialorder %v6732_v1, 3.0  ;;  %vm2197_vm0 = vcmp.gt.f32.partialorder %v6767_v31, 6.0 }
 0x205   : > { %5994 = vperm.xlu1 %5880, %v5993_v0   ;;  %6029 = vperm.xlu0 %5882, %v6028_v61   ;;  %v1586_v0 = vsel %vm1570_vm3, 4.0, %v9387_v63  ;;  %v2004_v61 = vsel %vm1988_vm4, 6.0, %v9387_v63  ;;  %vm2204_vm3 = vcmp.gt.f32.partialorder %v6830_v37, 6.0  ;;  %vm1360_vm4 = vcmp.gt.f32.partialorder %v6736_v7, 2.0  ;;  %v6951_v19 = vpop.permute.xlu2 %999 }
 0x206   : > { %5999 = vperm.xlu2 %5881, %v5998_v62   ;;  %v1377_v62 = vsel %vm1361_vm7, 3.0, %v9387_v63  ;;  %v6043_v11 = vpack.i.bf16 %v2004_v61, %v1794_v3  ;;  %vm2411_vm7 = vcmp.gt.f32.partialorder %v6809_v2, 7.0  ;;  %v2220_v30 = vsel %vm2204_vm3, 7.0, %v9387_v63 }
 0x207   : > { %v6063_v6 = vpack.i.bf16 %v1586_v0, %v1377_v62  ;;  %v1376_v32 = vsel %vm1360_vm4, 3.0, %v9387_v63  ;;  %vm1776_vm3 = vcmp.gt.f32.partialorder %v6736_v7, 4.0  ;;  %v2002_v62 = vsel %vm1986_vm1, 6.0, %v9387_v63 }
 0x208   : > { %vm2405_vm4 = vcmp.gt.f32.partialorder %v6767_v31, 7.0  ;;  %vm1358_vm1 = vcmp.gt.f32.partialorder %v6725_v53, 2.0 }
 0x20d   : > { %6034 = vperm.xlu0 %5882, %v6033_v34   ;;  %6014 = vperm.xlu1 %5880, %v6013_v18   ;;  %v6942_v34 = vpop.permute.xlu0 %993  ;;  %v6947_v18 = vpop.permute.xlu1 %987 }
 0x20e   : > { %6009 = vperm.xlu2 %5881, %v6008_v21   ;;  %v1585_v21 = vsel %vm1569_vm9, 4.0, %v9387_v63  ;;  %vm2198_vm9 = vcmp.gt.f32.partialorder %v6773_v43, 6.0 }
 0x20f   : > { %v6078_v46 = vpack.i.bf16 %v1585_v21, %v1376_v32  ;;  %v2214_v3 = vsel %vm2198_vm9, 7.0, %v9387_v63  ;;  %v2421_v21 = vsel %vm2405_vm4, 8.0, %v9387_v63  ;;  %vm1775_vm9 = vcmp.gt.f32.partialorder %v6732_v1, 4.0 }
 0x210   : > { %vm1984_vm4 = vcmp.gt.f32.partialorder %v6736_v7, 5.0 }
 0x215   : > { %6039 = vperm.xlu0 %5882, %v6038_v48   ;;  %6019 = vperm.xlu1 %5880, %v6018_v49   ;;  %v6068_v48 = vpack.i.bf16 %v2003_v24, %v1793_v42  ;;  %v2427_v49 = vsel %vm2411_vm7, 8.0, %v9387_v63  ;;  %v6965_v0 = vpop.permute.xlu1 %996  ;;  %v6058_v24 = vpack.i.bf16 %v2421_v21, %v2214_v3  ;;  %vm1985_vm7 = vcmp.gt.f32.partialorder %v6743_v38, 5.0 }
 0x216   : > { %6024 = vperm.xlu2 %5881, %v6023_v55   ;;  %v6053_v52 = vpack.i.bf16 %v2427_v49, %v2220_v30  ;;  %v6963_v55 = vpop.permute.xlu0 %5899  ;;  %v2213_v49 = vsel %vm2197_vm0, 7.0, %v9387_v63  ;;  %vm1774_vm0 = vcmp.gt.f32.partialorder %v6725_v53, 4.0 }
 0x21d   : > { %6064 = vperm.xlu0 %5882, %v6063_v6   ;;  %6044 = vperm.xlu1 %5880, %v6043_v11   ;;  %v6969_v61 = vpop.permute.xlu2 %1008  ;;  %v1375_v6 = vsel %vm1359_vm12, 3.0, %v9387_v63  ;;  %v1792_v11 = vsel %vm1776_vm3, 5.0, %v9387_v63  ;;  %vm2404_vm12 = vcmp.gt.f32.partialorder %v6760_v28, 7.0  ;;  %vm1566_vm3 = vcmp.gt.f32.partialorder %v6725_v53, 3.0 }
 0x21e   : > { %6049 = vperm.xlu2 %5881, %v6048_v13   ;;  %v6093_v12 = vpack.i.bf16 %v1584_v47, %v1375_v6  ;;  %v6083_v13 = vpack.i.bf16 %v2002_v62, %v1792_v11  ;;  %v1791_v47 = vsel %vm1775_vm9, 5.0, %v9387_v63  ;;  %v2420_v6 = vsel %vm2404_vm12, 8.0, %v9387_v63 }
 0x21f   : > { %v6981_v30 = vpop.permute.xlu1 %5904  ;;  %v6073_v11 = vpack.i.bf16 %v2420_v6, %v2213_v49  ;;  %vm1982_vm9 = vcmp.gt.f32.partialorder %v6725_v53, 5.0  ;;  %vm1983_vm12 = vcmp.gt.f32.partialorder %v6732_v1, 5.0 }
 0x225   : > { %6079 = vperm.xlu0 %5882, %v6078_v46   ;;  %6069 = vperm.xlu1 %5880, %v6068_v48   ;;  %v6983_v32 = vpop.permute.xlu0 %1002  ;;  %v1583_v46 = vsel %vm1567_vm6, 4.0, %v9387_v63  ;;  %v2001_v48 = vsel %vm1985_vm7, 6.0, %v9387_v63  ;;  %vm2196_vm6 = vcmp.gt.f32.partialorder %v6760_v28, 6.0  ;;  %vm1357_vm7 = vcmp.gt.f32.partialorder %v6720_v44, 2.0 }
 0x226   : > { %6054 = vperm.xlu2 %5881, %v6053_v52   ;;  %v1374_v52 = vsel %vm1358_vm1, 3.0, %v9387_v63  ;;  %v6098_v3 = vpack.i.bf16 %v2001_v48, %v1791_v47  ;;  %vm2403_vm1 = vcmp.gt.f32.partialorder %v6756_v23, 7.0  ;;  %v936_v48 = vlaneseq }
 0x227   : > { %v6108_v62 = vpack.i.bf16 %v1583_v46, %v1374_v52  ;;  %v2000_v46 = vsel %vm1984_vm4, 6.0, %v9387_v63  ;;  %v2212_v49 = vsel %vm2196_vm6, 7.0, %v9387_v63  ;;  %v1373_v52 = vsel %vm1357_vm7, 3.0, %v9387_v63 }
 0x228   : > { %v1790_v47 = vsel %vm1774_vm0, 5.0, %v9387_v63  ;;  %v2419_v6 = vsel %vm2403_vm1, 8.0, %v9387_v63  ;;  %v7014_v14 = vand.u32 127, %v936_v48  ;;  %vm2195_vm4 = vcmp.gt.f32.partialorder %v6756_v23, 6.0 }
 0x229   : > { %vm1565_vm6 = vcmp.gt.f32.partialorder %v6720_v44, 3.0  ;;  %vm1773_vm7 = vcmp.gt.f32.partialorder %v6720_v44, 4.0  ;;  %v1998_v48 = vsel %vm1982_vm9, 6.0, %v9387_v63  ;;  %vm2402_vm0 = vcmp.gt.f32.partialorder %v6749_v16, 7.0 }
 0x22a   : > { %vm9369_vm1 = vcmp.eq.s32.totalorder %v7014_v14, 0 }
 0x22d   : > { %6094 = vperm.xlu0 %5882, %v6093_v12   ;;  %6084 = vperm.xlu1 %5880, %v6083_v13   ;;  %v6999_v12 = vpop.permute.xlu1 %1005 }
 0x22e   : > { %6059 = vperm.xlu2 %5881, %v6058_v24   ;;  %v1582_v24 = vsel %vm1566_vm3, 4.0, %v9387_v63  ;;  %vm1068_vm3 = vcmp.eq.f32.partialorder %v6830_v37, 1.0 }
 0x22f   : > { %vm1084_vm10 = vmand %vm9364_vm14, %vm1068_vm3  ;;  %vm2192_vm3 = vcmp.gt.f32.partialorder %v6736_v7, 6.0  ;;  %vm1066_vm14 = vcmp.eq.f32.partialorder %v6797_v35, 1.0 }
 0x230   : > { %v6987_v42 = vpop.permute.xlu2 %5944 }
 0x235   : > { %6109 = vperm.xlu0 %5882, %v6108_v62   ;;  %6099 = vperm.xlu1 %5880, %v6098_v3   ;;  %v6123_v62 = vpack.i.bf16 %v1582_v24, %v1373_v52  ;;  %v6113_v3 = vpack.i.bf16 %v2000_v46, %v1790_v47  ;;  %v2211_v52 = vsel %vm2195_vm4, 7.0, %v9387_v63  ;;  %v9592_v47 = vmov 0 }
 0x236   : > { %6074 = vperm.xlu2 %5881, %v6073_v11   ;;  %v6088_v11 = vpack.i.bf16 %v2419_v6, %v2212_v49  ;;  %v1999_v49 = vsel %vm1983_vm12, 6.0, %v9387_v63  ;;  %vm2398_vm12 = vcmp.gt.f32.partialorder %v6725_v53, 7.0  ;;  %vm2194_vm4 = vcmp.gt.f32.partialorder %v6749_v16, 6.0 }
 0x237   : > { %v7001_v13 = vpop.permute.xlu0 %5909 }
 0x238   : > { %9590 = vst [vmem:[#allocation38_spill] sm:$0xff] %v7001_v13  ;;  %v7005_v21 = vpop.permute.xlu2 %5949 }
 0x239   : > { %9591 = vst [vmem:[#allocation39_spill] sm:$0xff] %v7005_v21 }
 0x23d   : > { %6124 = vperm.xlu0 %5882, %v6123_v62   ;;  %6114 = vperm.xlu1 %5880, %v6113_v3   ;;  %v1581_v62 = vsel %vm1565_vm6, 4.0, %v9387_v63  ;;  %v1789_v3 = vsel %vm1773_vm7, 5.0, %v9387_v63  ;;  %vm2401_vm6 = vcmp.gt.f32.partialorder %v6743_v38, 7.0  ;;  %vm1067_vm7 = vcmp.eq.f32.partialorder %v6809_v2, 1.0 }
 0x23e   : > { %6089 = vperm.xlu2 %5881, %v6088_v11   ;;  %v6138_v6 = vpack.i.bf16 %v1998_v48, %v1581_v62  ;;  %v6128_v11 = vpack.i.bf16 %v1999_v49, %v1789_v3  ;;  %v2414_v62 = vsel %vm2398_vm12, 8.0, %v9387_v63  ;;  %v2208_v3 = vsel %vm2192_vm3, 7.0, %v9387_v63  ;;  %vm1083_vm12 = vmand %vm9365_vm5, %vm1067_vm7 }
 0x23f   : > { %v7020_v58 = vpop.permute.xlu1 %5914  ;;  %v1012_v24 = vpop.permute.xlu0 %1011  ;;  %vm2400_vm3 = vcmp.gt.f32.partialorder %v6736_v7, 7.0  ;;  %vm2191_vm5 = vcmp.gt.f32.partialorder %v6732_v1, 6.0 }
 0x240   : > { %v1018_v46 = vpop.permute.xlu2 %1017 }
 0x241   : > { %vm1034_vm13 = vcmp.eq.s32.totalorder %v1018_v46, 1  ;;  %v2418_v46 = vsel %vm2402_vm0, 8.0, %v9387_v63  ;;  %vm2193_vm0 = vcmp.gt.f32.partialorder %v6743_v38, 6.0 }
 0x242   : > { %vm7033_vm2 = vmand %vm1034_vm13, %vm9369_vm1  ;;  %v6103_v25 = vpack.i.bf16 %v2418_v46, %v2211_v52  ;;  %vm2190_vm13 = vcmp.gt.f32.partialorder %v6725_v53, 6.0 }
 0x243   : > { %v9593_v47 = vsel %vm7033_vm2, 4294967295, %v9592_v47  ;;  %vm1100_vm9 = vmor %vm1084_vm10, %vm7033_vm2  ;;  %vm2399_vm10 = vcmp.gt.f32.partialorder %v6732_v1, 7.0  ;;  %v2206_v52 = vsel %vm2190_vm13, 7.0, %v9387_v63 }
 0x244   : > { %5627 = vmatpush.xpose.msk.msra.mxu1 %vm1100_vm9, %v9387_v63  ;;  %vm1032_vm9 = vcmp.eq.s32.totalorder %v1012_v24, 1  ;;  %v2416_v24 = vsel %vm2400_vm3, 8.0, %v9387_v63 }
 0x245   : > { %6139 = vperm.xlu0 %5882, %v6138_v6   ;;  %6129 = vperm.xlu1 %5880, %v6128_v11   ;;  %v2415_v6 = vsel %vm2399_vm10, 8.0, %v9387_v63  ;;  %v6153_v11 = vpack.i.bf16 %v2206_v52, %v2414_v62  ;;  %vm2397_vm10 = vcmp.gt.f32.partialorder %v6720_v44, 7.0  ;;  %vm7083_vm7 = vmand %vm1032_vm9, %vm9369_vm1 }
 0x246   : > { %6104 = vperm.xlu2 %5881, %v6103_v25   ;;  %v2210_v25 = vsel %vm2194_vm4, 7.0, %v9387_v63  ;;  %v6143_v46 = vpack.i.bf16 %v2415_v6, %v2208_v3  ;;  %v2413_v52 = vsel %vm2397_vm10, 8.0, %v9387_v63  ;;  %v9602_v3 = vmov 0 }
 0x247   : > { %v7047_v21 = vpop.permute.xlu1 %5919  ;;  %v7049_v48 = vpop.permute.xlu0 %5929  ;;  %vm1981_vm10 = vcmp.gt.f32.partialorder %v6720_v44, 5.0 }
 0x248   : > { %9594 = vst [vmem:[#allocation40_spill] sm:$0xff] %v7047_v21  ;;  %v7052_v49 = vpop.permute.xlu2 %5954 }
 0x249   : > { %9595 = vst [vmem:[#allocation41_spill] sm:$0xff] %v7049_v48  ;;  %v2417_v48 = vsel %vm2401_vm6, 8.0, %v9387_v63 }
 0x24a   : > { %9596 = vst [vmem:[#allocation42_spill] sm:$0xff] %v7052_v49  ;;  %v6118_v13 = vpack.i.bf16 %v2417_v48, %v2210_v25  ;;  %v9598_v48 = vmov 0 }
 0x24d   : > { %6154 = vperm.xlu0 %5882, %v6153_v11   ;;  %6144 = vperm.xlu1 %5880, %v6143_v46   ;;  %v2207_v11 = vsel %vm2191_vm5, 7.0, %v9387_v63  ;;  %v9607_v46 = vmov 0 }
 0x24e   : > { %6119 = vperm.xlu2 %5881, %v6118_v13   ;;  %v2209_v13 = vsel %vm2193_vm0, 7.0, %v9387_v63  ;;  %vm1082_vm0 = vmand %vm9366_vm8, %vm1066_vm14  ;;  %vm1030_vm14 = vcmp.eq.s32.totalorder %v6999_v12, 1  ;;  %v1997_v12 = vsel %vm1981_vm10, 6.0, %v9387_v63  ;;  %vm1060_vm10 = vcmp.eq.f32.partialorder %v6760_v28, 1.0 }
 0x24f   : > { %v7063_v4 = vpop.permute.xlu0 %5939  ;;  %v1015_v21 = vpop.permute.xlu1 %1014  ;;  %v6133_v62 = vpack.i.bf16 %v2416_v24, %v2209_v13  ;;  %vm1098_vm9 = vmor %vm1082_vm0, %vm7083_vm7  ;;  %vm1064_vm0 = vcmp.eq.f32.partialorder %v6784_v54, 1.0  ;;  %v6148_v13 = vpack.i.bf16 %v2207_v11, %v1997_v12  ;;  %v9609_v24 = vmov 0 }
 0x250   : > { %vm1033_vm13 = vcmp.eq.s32.totalorder %v1015_v21, 1  ;;  %v7065_v49 = vpop.permute.xlu2 %5969  ;;  %v9600_v21 = vmov 0  ;;  %vm7120_vm8 = vmand %vm1030_vm14, %vm9369_vm1  ;;  %v9616_v11 = vmov 0  ;;  %v9660_v12 = vmov 0 }
 0x251   : > { %9597 = vst [vmem:[#allocation43_spill] sm:$0xff] %v7065_v49  ;;  %vm7072_vm4 = vmand %vm1033_vm13, %vm9369_vm1  ;;  %v9601_v21 = vsel %vm7083_vm7, 4294967295, %v9600_v21  ;;  %vm1031_vm13 = vcmp.eq.s32.totalorder %v6969_v61, 1  ;;  %v9608_v46 = vsel %vm7120_vm8, 4294967295, %v9607_v46 }
 0x252   : > { %v9599_v48 = vsel %vm7072_vm4, 4294967295, %v9598_v48  ;;  %vm1099_vm6 = vmor %vm1083_vm12, %vm7072_vm4  ;;  %vm1065_vm12 = vcmp.eq.f32.partialorder %v6789_v56, 1.0 }
 0x253   : > { %5628 = vmatpush.xpose.msk.msra.mxu1 %vm1099_vm6, %v9387_v63  ;;  %vm7099_vm3 = vmand %vm1031_vm13, %vm9369_vm1 }
 0x254   : > { %v9603_v3 = vsel %vm7099_vm3, 4294967295, %v9602_v3  ;;  %vm1081_vm6 = vmand %vm9368_vm11, %vm1065_vm12  ;;  %vm2189_vm11 = vcmp.gt.f32.partialorder %v6720_v44, 6.0 }
 0x255   : > { %2431 = vperm.xlu1 %5880, %v2413_v52   ;;  %vm1097_vm13 = vmor %vm1081_vm6, %vm7099_vm3  ;;  %vm1063_vm6 = vcmp.eq.f32.partialorder %v6780_v51, 1.0  ;;  %vm9618_vm3 = vcmp.eq.s32.totalorder %v7014_v14, 0 }
 0x256   : > { %6134 = vperm.xlu2 %5881, %v6133_v62   ;;  %vm1080_vm5 = vmand %vm9367_vm15, %vm1064_vm0  ;;  %vm9614_vm0 = vcmp.lt.f32.partialorder %v6673_v10, 0.1225 }
 0x257   : > { %v7103_v61 = vpop.permute.xlu0 %5959  ;;  %v7105_v25 = vpop.permute.xlu1 %5924  ;;  %5629 = vmatpush.xpose.msk.msra.mxu1 %vm1098_vm9, %v9387_v63  ;;  %vm1029_vm9 = vcmp.eq.s32.totalorder %v6983_v32, 1  ;;  %vm1096_vm12 = vmor %vm1080_vm5, %vm7120_vm8 }
 0x258   : > { %9604 = vst [vmem:[#allocation44_spill] sm:$0xff] %v7103_v61  ;;  %v7109_v6 = vpop.permute.xlu2 %5984  ;;  %vm7134_vm14 = vmand %vm1029_vm9, %vm9369_vm1  ;;  %vm1061_vm9 = vcmp.eq.f32.partialorder %v6767_v31, 1.0  ;;  %vm1062_vm1 = vcmp.eq.f32.partialorder %v6773_v43, 1.0  ;;  %v9646_v61 = vmov 1.0  }
 0x259   : > { %9605 = vst [vmem:[#allocation45_spill] sm:$0xff] %v7105_v25  ;;  %v9610_v24 = vsel %vm7134_vm14, 4294967295, %v9609_v24  ;;  %vm1079_vm5 = vmand %vm9614_vm0, %vm1063_vm6  ;;  %vm1023_vm6 = vcmp.eq.s32.totalorder %v6895_v9, 1  ;;  %vm1027_vm0 = vcmp.eq.s32.totalorder %v6965_v0, 1  ;;  %v9626_v9 = vmov 0 }
 0x25a   : > { %9606 = vst [vmem:[#allocation46_spill] sm:$0xff] %v7109_v6  ;;  %vm1095_vm15 = vmor %vm1079_vm5, %vm7134_vm14  ;;  %vm9621_vm5 = vcmp.lt.f32.partialorder %v6654_v39, 0.1225  ;;  %v9638_v25 = vmov 0 }
 0x25b   : > { %5630 = vmatpush.xpose.msk.msra.mxu1 %vm1097_vm13, %v9387_v63  ;;  %vm1028_vm13 = vcmp.eq.s32.totalorder %v6951_v19, 1  ;;  %v9619_v19 = vmov 0  ;;  %vm7171_vm14 = vmand %vm9621_vm5, %vm1061_vm9  ;;  %vm1057_vm9 = vcmp.eq.f32.partialorder %v6743_v38, 1.0  ;;  %vm9625_vm5 = vcmp.eq.s32.totalorder %v7014_v14, 0 }
 0x25c   : > { %vm7162_vm7 = vmand %vm1028_vm13, %vm9618_vm3  ;;  %vm9624_vm3 = vcmp.lt.f32.partialorder %v6652_v27, 0.1225 }
 0x25d   : > { %v9620_v19 = vsel %vm7162_vm7, 4294967295, %v9619_v19  ;;  %vm1078_vm13 = vmand %vm9624_vm3, %vm1062_vm1  ;;  %vm9634_vm1 = vcmp.lt.f32.partialorder %v6633_v33, 0.1225 }
 0x25e   : > { %6149 = vperm.xlu2 %5881, %v6148_v13   ;;  %v2205_v13 = vsel %vm2189_vm11, 7.0, %v9387_v63  ;;  %vm1094_vm4 = vmor %vm1078_vm13, %vm7162_vm7 }
 0x25f   : > { %v7138_v52 = vpop.permute.xlu0 %5974  ;;  %v7140_v62 = vpop.permute.xlu1 %5934  ;;  %5631 = vmatpush.xpose.msk.msra.mxu1 %vm1096_vm12, %v9387_v63  ;;  %vm9615_vm12 = vcmp.lt.f32.partialorder %v6635_v17, 0.1225  ;;  %vm7186_vm2 = vmand %vm1023_vm6, %vm9625_vm5 }
 0x260   : > { %9611 = vst [vmem:[#allocation47_spill] sm:$0xff] %v7138_v52  ;;  %v7145_v32 = vpop.permute.xlu2 %5999  ;;  %vm7156_vm8 = vmand %vm9615_vm12, %vm1060_vm10  ;;  %vm1059_vm10 = vcmp.eq.f32.partialorder %v6756_v23, 1.0  ;;  %vm1026_vm12 = vcmp.eq.s32.totalorder %v6942_v34, 1  ;;  %v9627_v9 = vsel %vm7186_vm2, 4294967295, %v9626_v9  ;;  %v9630_v34 = vmov 0 }
 0x261   : > { %9612 = vst [vmem:[#allocation48_spill] sm:$0xff] %v7140_v62  ;;  %v9617_v11 = vsel %vm7156_vm8, 4294967295, %v9616_v11  ;;  %vm9629_vm8 = vmmov %vm9625_vm5  ;;  %v9635_v62 = vmov 0  ;;  %vm9650_vm2 = vcmp.lt.f32.partialorder %v6614_v20, 0.1225 }
 0x262   : > { %9613 = vst [vmem:[#allocation49_spill] sm:$0xff] %v7145_v32  ;;  %vm7192_vm11 = vmand %vm1027_vm0, %vm9629_vm8  ;;  %v5942_v32 = vunpack.i.h.bf16 %v7063_v4 }
 0x263   : > { %5632 = vmatpush.xpose.msk.msra.mxu1 %vm1095_vm15, %v9387_v63  ;;  %vm1025_vm15 = vcmp.eq.s32.totalorder %v6933_v59, 1  ;;  %9628 = vst [vmem:[#allocation50_spill] sm:$0xff] %v9627_v9  ;;  %v9631_v34 = vsel %vm7192_vm11, 4294967295, %v9630_v34  ;;  %v5941_v59 = vunpack.i.l.bf16 %v7063_v4  ;;  %vm7204_vm6 = vmand %vm9634_vm1, %vm1059_vm10  ;;  %v5946_v4 = vunpack.i.l.bf16 %v6987_v42 }
 0x264   : > { %v9636_v62 = vsel %vm7204_vm6, 4294967295, %v9635_v62  ;;  %vm9637_vm3 = vmmov %vm9625_vm5  ;;  %vm1058_vm5 = vcmp.eq.f32.partialorder %v6749_v16, 1.0 }
 0x265   : > { %vm7210_vm8 = vmand %vm1026_vm12, %vm9637_vm3 }
 0x266   : > { %2223 = vperm.xlu2 %5881, %v2205_v13   ;;  %v9639_v25 = vsel %vm7210_vm8, 4294967295, %v9638_v25  ;;  %vm9640_vm0 = vmmov %vm9637_vm3  ;;  %vm9653_vm3 = vcmp.lt.f32.partialorder %v6595_v26, 0.1225 }
 0x267   : > { %v7197_v0 = vpop.permute.xlu0 %5989  ;;  %v7199_v13 = vpop.permute.xlu1 %5964  ;;  %5633 = vmatpush.xpose.msk.msra.mxu1 %vm1094_vm4, %v9387_v63  ;;  %vm7218_vm13 = vmand %vm1025_vm15, %vm9640_vm0  ;;  %vm9643_vm4 = vcmp.lt.f32.partialorder %v6616_v22, 0.1225  ;;  %vm1056_vm15 = vcmp.eq.f32.partialorder %v6736_v7, 1.0  ;;  %vm1275_vm0 = vcmp.eq.f32.partialorder %v6809_v2, %v5941_v59  ;;  %v9663_v59 = vmov 0 }
 0x268   : > { %9632 = vst [vmem:[#allocation51_spill] sm:$0xff] %v7197_v0  ;;  %v7214_v52 = vpop.permute.xlu2 %6009  ;;  %vm7225_vm10 = vmand %vm9643_vm4, %vm1057_vm9  ;;  %v9644_v0 = vmov 0  ;;  %vm9647_vm9 = vnez %v9617_v11  ;;  %vm1021_vm4 = vcmp.eq.s32.totalorder %v6924_v57, 1  ;;  %v9654_v57 = vmov 0 }
 0x269   : > { %9633 = vst [vmem:[#allocation52_spill] sm:$0xff] %v7199_v13  ;;  %v9641_v13 = vmov 0  ;;  %v6012_v63 = vunpack.i.h.bf16 %v7214_v52  ;;  %v9645_v0 = vsel %vm7225_vm10, 4294967295, %v9644_v0  ;;  %vm1093_vm12 = vmor %vm7171_vm14, %vm7192_vm11  ;;  %vm1022_vm14 = vcmp.eq.s32.totalorder %v6907_v15, 1 }
 0x26a   : > { %v9642_v13 = vsel %vm7218_vm13, 4294967295, %v9641_v13  ;;  %vm9648_vm11 = vcmp.lt.f32.partialorder %v6711_v45, 0.1225  ;;  %vm7252_vm6 = vmand %vm9650_vm2, %vm1058_vm5  ;;  %vm9659_vm2 = vcmp.eq.s32.totalorder %v7014_v14, 0  ;;  %v9684_v11 = vmov 0 }
 0x26b   : > { %5634 = vmatpush.xpose.msk.msra.mxu1 %vm1093_vm12, %v9646_v61  ;;  %vm1276_vm1 = vcmp.eq.f32.partialorder %v6830_v37, %v6012_v63  ;;  %vm9649_vm12 = vnez %v9593_v47  ;;  %vm7258_vm13 = vmand %vm9653_vm3, %vm1056_vm15  ;;  %v5906_v15 = vunpack.i.l.bf16 %v6981_v30  ;;  %v6011_v63 = vunpack.i.l.bf16 %v7214_v52 }
 0x26c   : > { %vm1292_vm7 = vmand %vm9648_vm11, %vm1276_vm1  ;;  %v9655_v57 = vsel %vm7258_vm13, 4294967295, %v9654_v57  ;;  %vm9656_vm11 = vcmp.lt.f32.partialorder %v6709_v40, 0.1225  ;;  %vm9675_vm13 = vcmp.lt.f32.partialorder %v6690_v41, 0.1225 }
 0x26d   : > { %vm1308_vm10 = vmor %vm1292_vm7, %vm9649_vm12  ;;  %vm1055_vm7 = vcmp.eq.f32.partialorder %v6732_v1, 1.0  ;;  %v5907_v1 = vunpack.i.h.bf16 %v6981_v30  ;;  %vm9671_vm12 = vnez %v9599_v48  ;;  %v5917_v30 = vunpack.i.h.bf16 %v7020_v58 }
 0x26e   : > { %5643 = vmatpush.xpose.msk.msra.mxu2 %vm1308_vm10, %v9646_v61  ;;  %vm7265_vm1 = vmand %vm9656_vm11, %vm1275_vm0  ;;  %vm1274_vm0 = vcmp.eq.f32.partialorder %v6797_v35, %v5942_v32  ;;  %vm9669_vm11 = vnez %v9642_v13  ;;  %v9681_v32 = vmov 0 }
 0x26f   : > { %vm7272_vm5 = vmand %vm1021_vm4, %vm9659_vm2  ;;  %v7282_v26 = vpop.permute.xlu0 %6004  ;;  %v7284_v7 = vpop.permute.xlu1 %5979  ;;  %vm1020_vm4 = vcmp.eq.s32.totalorder %v6878_v50, 1  ;;  %v9673_v50 = vmov 0 }
 0x270   : > { %v9661_v12 = vsel %vm7272_vm5, 4294967295, %v9660_v12  ;;  %vm9662_vm15 = vmmov %vm9659_vm2  ;;  %9665 = vst [vmem:[#allocation53_spill] sm:$0xff] %v7282_v26  ;;  %v7296_v22 = vpop.permute.xlu2 %6024  ;;  %vm9670_vm2 = vnez %v9636_v62  ;;  %v9718_v26 = vld [vmem:[#allocation38_spill] sm:$0xff] }
 0x271   : > { %vm7278_vm3 = vmand %vm1022_vm14, %vm9662_vm15  ;;  %9666 = vst [vmem:[#allocation54_spill] sm:$0xff] %v7284_v7  ;;  %vm1024_vm14 = vcmp.eq.s32.totalorder %v6947_v18, 1  ;;  %v5916_v18 = vunpack.i.l.bf16 %v7020_v58  ;;  %v5947_v7 = vunpack.i.h.bf16 %v6987_v42  ;;  %v9700_v58 = vmov 0 }
 0x272   : > { %v9664_v59 = vsel %vm7278_vm3, 4294967295, %v9663_v59  ;;  %vm9667_vm10 = vmor %vm9647_vm9, %vm7210_vm8  ;;  %9668 = vst [vmem:[#allocation55_spill] sm:$0xff] %v7296_v22  ;;  %vm9672_vm8 = vcmp.lt.f32.partialorder %v6597_v29, 0.1225  ;;  %v5901_v42 = vunpack.i.l.bf16 %v6963_v55 }
 0x273   : > { %5635 = vmatpush.xpose.msk.msra.mxu1 %vm9667_vm10, %v9646_v61  ;;  %vm1091_vm15 = vmor %vm9670_vm2, %vm9669_vm11  ;;  %vm1273_vm10 = vcmp.eq.f32.partialorder %v6789_v56, %v5946_v4  ;;  %vm9679_vm11 = vnez %v9645_v0  ;;  %v5902_v4 = vunpack.i.h.bf16 %v6963_v55  ;;  %v9706_v55 = vld [vmem:[#allocation42_spill] sm:$0xff]  ;;  %v9767_v0 = vmov 0 }
 0x274   : > { %vm1307_vm9 = vmor %vm7265_vm1, %vm9671_vm12  ;;  %vm9678_vm1 = vnez %v9627_v9  ;;  %v5956_v52 = vunpack.i.l.bf16 %v9706_v55  ;;  %v9716_v55 = vmov 0 }
 0x275   : > { %vm7309_vm5 = vmand %vm9672_vm8, %vm1055_vm7  ;;  %5644 = vmatpush.xpose.msk.msra.mxu2 %vm1307_vm9, %v9646_v61  ;;  %vm1054_vm8 = vcmp.eq.f32.partialorder %v6725_v53, 1.0  ;;  %vm9680_vm7 = vcmp.eq.s32.totalorder %v7014_v14, 0  ;;  %v9709_v53 = vld [vmem:[#allocation40_spill] sm:$0xff] }
 0x276   : > { %v9674_v50 = vsel %vm7309_vm5, 4294967295, %v9673_v50  ;;  %vm7317_vm2 = vmand %vm9675_vm13, %vm1274_vm0  ;;  %vm1019_vm13 = vcmp.eq.s32.totalorder %v6889_v60, 1  ;;  %vm9686_vm0 = vcmp.lt.f32.partialorder %v6692_v36, 0.1225  ;;  %v9693_v60 = vmov 0 }
 0x277   : > { %vm7328_vm5 = vmand %vm1020_vm4, %vm9680_vm7  ;;  %5636 = vmatpush.xpose.msk.msra.mxu1 %vm1091_vm15, %v9646_v61  ;;  %v7390_v62 = vpop.permute.xlu0 %6029 }
 0x278   : > { %v9682_v32 = vsel %vm7328_vm5, 4294967295, %v9681_v32  ;;  %vm9683_vm9 = vmmov %vm9680_vm7  ;;  %vm9691_vm7 = vnez %v9601_v21 }
 0x279   : > { %vm7334_vm3 = vmand %vm1024_vm14, %vm9683_vm9  ;;  %vm7350_vm14 = vcmp.eq.f32.partialorder %v6773_v43, %v5907_v1  ;;  %vm9692_vm9 = vcmp.lt.f32.partialorder %v6579_v5, 0.1225  ;;  %v7404_v5 = vpop.permute.xlu2 %6049  ;;  %v9723_v1 = vmov 0 }
 0x27a   : > { %v9685_v11 = vsel %vm7334_vm3, 4294967295, %v9684_v11  ;;  %vm7345_vm4 = vmand %vm9686_vm0, %vm1273_vm10  ;;  %vm7371_vm0 = vcmp.eq.f32.partialorder %v6784_v54, %v5916_v18  ;;  %v7388_v18 = vpop.permute.xlu1 %5994  ;;  %9707 = vst [vmem:[#allocation57_spill] sm:$0xff] %v7404_v5  ;;  %v9719_v5 = vld [vmem:[#allocation39_spill] sm:$0xff] }
 0x27b   : > { %vm1306_vm15 = vmor %vm7317_vm2, %vm9691_vm7  ;;  %9702 = vst [vmem:[#allocation56_spill] sm:$0xff] %v7388_v18  ;;  %vm9708_vm7 = vnez %v9603_v3  ;;  %v5921_v18 = vunpack.i.l.bf16 %v9709_v53  ;;  %v5951_v53 = vunpack.i.l.bf16 %v9719_v5  ;;  %v5971_v5 = vunpack.i.l.bf16 %v7065_v49 }
 0x27c   : > { %vm7360_vm12 = vmand %vm9692_vm9, %vm1054_vm8  ;;  %5645 = vmatpush.xpose.msk.msra.mxu2 %vm1306_vm15, %v9646_v61 }
 0x27d   : > { %v9694_v60 = vsel %vm7360_vm12, 4294967295, %v9693_v60  ;;  %vm1090_vm10 = vmor %vm7252_vm6, %vm7334_vm3  ;;  %vm9699_vm12 = vcmp.eq.s32.totalorder %v7014_v14, 0  ;;  %vm9703_vm6 = vcmp.lt.f32.partialorder %v6652_v27, 0.1225  ;;  %v9704_v14 = vmov 0 }
 0x27e   : > { %vm7382_vm15 = vmand %vm1019_vm13, %vm9699_vm12  ;;  %5637 = vmatpush.xpose.msk.msra.mxu1 %vm1090_vm10, %v9646_v61  ;;  %vm1269_vm12 = vcmp.eq.f32.partialorder %v6767_v31, %v5906_v15  ;;  %vm1268_vm13 = vcmp.eq.f32.partialorder %v6760_v28, %v5902_v4  ;;  %vm1483_vm3 = vcmp.eq.f32.partialorder %v6809_v2, %v5947_v7  ;;  %v9714_v4 = vld [vmem:[#allocation12_spill] sm:$0xff]  ;;  %v5911_v7 = vunpack.i.l.bf16 %v9718_v26 }
 0x27f   : > { %v9701_v58 = vsel %vm7382_vm15, 4294967295, %v9700_v58  ;;  %vm7397_vm9 = vmand %vm9703_vm6, %vm7350_vm14  ;;  %vm9710_vm14 = vcmp.lt.f32.partialorder %v6671_v8, 0.1225  ;;  %vm9713_vm15 = vcmp.eq.f32.partialorder %v6720_v44, 1.0  ;;  %vm9715_vm2 = vcmp.lt.f32.partialorder %v9714_v4, 0.1225  ;;  %v7518_v9 = vpop.permute.xlu0 %6034 }
 0x280   : > { %v9705_v14 = vsel %vm7397_vm9, 4294967295, %v9704_v14  ;;  %vm1305_vm10 = vmor %vm7345_vm4, %vm9708_vm7  ;;  %vm9722_vm7 = vcmp.lt.f32.partialorder %v6654_v39, 0.1225  ;;  %v9726_v4 = vmov 0  ;;  %vm9750_vm9 = vcmp.lt.f32.partialorder %v6633_v33, 0.1225 }
 0x281   : > { %vm7416_vm6 = vmand %vm9710_vm14, %vm7371_vm0  ;;  %5646 = vmatpush.xpose.msk.msra.mxu2 %vm1305_vm10, %v9646_v61  ;;  %vm9721_vm0 = vnez %v9674_v50  ;;  %9755 = vst [vmem:[#allocation38_spill] sm:$0xff] %v7518_v9  ;;  %v9777_v15 = vmov 0  ;;  %v9784_v28 = vmov 0  ;;  %v9808_v50 = vmov 0 }
 0x282   : > { %vm7424_vm8 = vmand %vm9715_vm2, %vm9713_vm15  ;;  %vm9725_vm2 = vcmp.lt.f32.partialorder %v6635_v17, 0.1225  ;;  %v9730_v17 = vmov 0  ;;  %v7520_v31 = vpop.permute.xlu1 %6014 }
 0x283   : > { %v9717_v55 = vsel %vm7424_vm8, 4294967295, %v9716_v55  ;;  %vm7437_vm5 = vmand %vm9722_vm7, %vm1269_vm12  ;;  %vm1482_vm8 = vcmp.eq.f32.partialorder %v6797_v35, %v5917_v30  ;;  %vm1271_vm7 = vcmp.eq.f32.partialorder %v6780_v51, %v6011_v63  ;;  %vm9729_vm12 = vcmp.lt.f32.partialorder %v6709_v40, 0.1225  ;;  %v9732_v30 = vld [vmem:[#allocation36_spill] sm:$0xff] }
 0x284   : > { %v9724_v1 = vsel %vm7437_vm5, 4294967295, %v9723_v1  ;;  %vm7443_vm15 = vmand %vm9725_vm2, %vm1268_vm13  ;;  %vm1267_vm13 = vcmp.eq.f32.partialorder %v6756_v23, %v5901_v42  ;;  %v5897_v44 = vunpack.i.h.bf16 %v9732_v30  ;;  %vm9733_vm2 = vnez %v9608_v46 }
 0x285   : > { %v9727_v4 = vsel %vm7443_vm15, 4294967295, %v9726_v4  ;;  %vm9728_vm10 = vmor %vm9679_vm11, %vm9678_vm1  ;;  %vm7469_vm11 = vcmp.eq.f32.partialorder %v6809_v2, %v5956_v52  ;;  %v5912_v63 = vunpack.i.h.bf16 %v9718_v26  ;;  %v9738_v42 = vmov 0  ;;  %v9742_v52 = vld [vmem:[#allocation41_spill] sm:$0xff] }
 0x286   : > { %5638 = vmatpush.xpose.msk.msra.mxu1 %vm9728_vm10, %v9646_v61  ;;  %vm7458_vm14 = vmand %vm9729_vm12, %vm1483_vm3  ;;  %vm9737_vm12 = vcmp.lt.f32.partialorder %v6690_v41, 0.1225  ;;  %v5931_v49 = vunpack.i.l.bf16 %v9742_v52  ;;  %vm7502_vm3 = vcmp.eq.f32.partialorder %v6809_v2, %v5951_v53  ;;  %v9751_v23 = vmov 0 }
 0x287   : > { %v9731_v17 = vsel %vm7458_vm14, 4294967295, %v9730_v17  ;;  %vm1304_vm15 = vmor %vm7416_vm6, %vm9733_vm2  ;;  %vm7485_vm6 = vcmp.eq.f32.partialorder %v6797_v35, %v5921_v18  ;;  %vm9743_vm2 = vcmp.lt.f32.partialorder %v6673_v10, 0.1225  ;;  %v5896_v39 = vunpack.i.l.bf16 %v9732_v30 }
 0x288   : > { %vm7480_vm1 = vmand %vm9737_vm12, %vm1482_vm8  ;;  %5647 = vmatpush.xpose.msk.msra.mxu2 %vm1304_vm15, %v9646_v61  ;;  %vm7513_vm15 = vcmp.eq.f32.partialorder %v6784_v54, %v5911_v7  ;;  %v9760_v53 = vmov 0  ;;  %v6016_v30 = vunpack.i.l.bf16 %v7520_v31  ;;  %v6031_v2 = vunpack.i.l.bf16 %v7390_v62  ;;  %v9827_v7 = vld [vmem:[#allocation49_spill] sm:$0xff] }
 0x289   : > { %v9739_v42 = vsel %vm7480_vm1, 4294967295, %v9738_v42  ;;  %vm7493_vm4 = vmand %vm9743_vm2, %vm1271_vm7  ;;  %vm9756_vm7 = vnez %v9655_v57  ;;  %vm9757_vm2 = vnez %v9664_v59  ;;  %v7542_v57 = vpop.permute.xlu2 %6054  ;;  %vm9776_vm12 = vcmp.lt.f32.partialorder %v6671_v8, 0.1225 }
 0x28a   : > { %vm7508_vm1 = vmand %vm9750_vm9, %vm1267_vm13  ;;  %vm9759_vm13 = vcmp.lt.f32.partialorder %v6709_v40, 0.1225  ;;  %9764 = vst [vmem:[#allocation36_spill] sm:$0xff] %v7542_v57  ;;  %v6056_v33 = vunpack.i.l.bf16 %v7542_v57  ;;  %v5986_v26 = vunpack.i.l.bf16 %v7109_v6  ;;  %vm7654_vm5 = vcmp.eq.f32.partialorder %v6830_v37, %v6031_v2  ;;  %v9821_v6 = vld [vmem:[#allocation44_spill] sm:$0xff] }
 0x28b   : > { %v9752_v23 = vsel %vm7508_vm1, 4294967295, %v9751_v23  ;;  %vm9758_vm9 = vmor %vm9756_vm7, %vm9757_vm2  ;;  %vm7537_vm1 = vcmp.eq.f32.partialorder %v6797_v35, %v5971_v5  ;;  %vm7557_vm2 = vcmp.eq.f32.partialorder %v6749_v16, %v5897_v44  ;;  %v9769_v5 = vmov 0 }
 0x28c   : > { %5639 = vmatpush.xpose.msk.msra.mxu1 %vm9758_vm9, %v9646_v61  ;;  %vm7532_vm10 = vmand %vm9759_vm13, %vm7469_vm11  ;;  %vm9766_vm11 = vcmp.lt.f32.partialorder %v6690_v41, 0.1225  ;;  %v9770_v5 = vsel %vm7557_vm2, 4294967295, %v9769_v5  ;;  %v5932_v35 = vunpack.i.h.bf16 %v9742_v52  ;;  %vm9771_vm9 = vnez %v9610_v24 }
 0x28d   : > { %v9761_v53 = vsel %vm7532_vm10, 4294967295, %v9760_v53  ;;  %vm7552_vm13 = vmand %vm9766_vm11, %vm7485_vm6  ;;  %v9774_v44 = vmov 0  ;;  %vm9793_vm6 = vnez %v9601_v21  ;;  %v6037_v2 = vunpack.i.h.bf16 %v7518_v9  ;;  %v7698_v9 = vpop.permute.xlu0 %6039 }
 0x28e   : > { %v9768_v0 = vsel %vm7552_vm13, 4294967295, %v9767_v0  ;;  %vm1303_vm14 = vmor %vm7493_vm4, %vm9771_vm9  ;;  %vm9773_vm13 = vcmp.lt.f32.partialorder %v6709_v40, 0.1225  ;;  %vm7589_vm4 = vcmp.eq.f32.partialorder %v6789_v56, %v5912_v63  ;;  %v9786_v63 = vld [vmem:[#allocation37_spill] sm:$0xff]  ;;  %v9819_v52 = vmov 0 }
 0x28f   : > { %vm7576_vm8 = vmand %vm9773_vm13, %vm7502_vm3  ;;  %5648 = vmatpush.xpose.msk.msra.mxu2 %vm1303_vm14, %v9646_v61  ;;  %vm1484_vm3 = vcmp.eq.f32.partialorder %v6830_v37, %v6016_v30  ;;  %vm1479_vm14 = vcmp.eq.f32.partialorder %v6780_v51, %v5931_v49  ;;  %v5892_v18 = vunpack.i.h.bf16 %v9786_v63  ;;  %vm9787_vm13 = vnez %v9661_v12  ;;  %v9849_v30 = vld [vmem:[#allocation14_spill] sm:$0xff] }
 0x290   : > { %v9775_v44 = vsel %vm7576_vm8, 4294967295, %v9774_v44  ;;  %vm7584_vm2 = vmand %vm9776_vm12, %vm7513_vm15  ;;  %vm2316_vm15 = vcmp.eq.f32.partialorder %v6830_v37, %v6056_v33  ;;  %v9797_v49 = vmov 0  ;;  %v9800_v33 = vmov 0 }
 0x291   : > { %v9778_v15 = vsel %vm7584_vm2, 4294967295, %v9777_v15  ;;  %vm9783_vm9 = vmmov %vm9766_vm11  ;;  %vm9789_vm11 = vcmp.lt.f32.partialorder %v6711_v45, 0.1225  ;;  %v5961_v57 = vunpack.i.l.bf16 %v9821_v6  ;;  %v7714_v41 = vpop.permute.xlu2 %6059 }
 0x292   : > { %vm7608_vm2 = vmand %vm9783_vm9, %vm7537_vm1  ;;  %vm7624_vm1 = vcmp.eq.f32.partialorder %v6743_v38, %v5896_v39  ;;  %vm9792_vm9 = vnez %v9593_v47  ;;  %9828 = vst [vmem:[#allocation37_spill] sm:$0xff] %v7714_v41  ;;  %v5962_v39 = vunpack.i.h.bf16 %v9821_v6  ;;  %v9851_v6 = vmov 0 }
 0x293   : > { %v9785_v28 = vsel %vm7608_vm2, 4294967295, %v9784_v28  ;;  %vm9788_vm10 = vmor %vm9721_vm0, %vm9787_vm13  ;;  %vm9795_vm0 = vnez %v9770_v5  ;;  %vm9846_vm2 = vnez %v9775_v44  ;;  %v9904_v44 = vmov 0 }
 0x294   : > { %5640 = vmatpush.xpose.msk.msra.mxu1 %vm9788_vm10, %v9646_v61  ;;  %vm1500_vm12 = vmand %vm9789_vm11, %vm1484_vm3  ;;  %vm9796_vm10 = vcmp.lt.f32.partialorder %v6614_v20, 0.1225  ;;  %vm9799_vm3 = vcmp.lt.f32.partialorder %v6692_v36, 0.1225 }
 0x295   : > { %vm1516_vm8 = vmor %vm1500_vm12, %vm9792_vm9  ;;  %vm9802_vm12 = vcmp.lt.f32.partialorder %v6711_v45, 0.1225 }
 0x296   : > { %vm7638_vm11 = vmand %vm9796_vm10, %vm9795_vm0  ;;  %5659 = vmatpush.xpose.msk.msra.mxu3 %vm1516_vm8, %v9646_v61  ;;  %vm9806_vm10 = vnez %v9727_v4  ;;  %vm7669_vm8 = vcmp.eq.f32.partialorder %v6784_v54, %v5932_v35  ;;  %v9817_v35 = vld [vmem:[#allocation16_spill] sm:$0xff]  ;;  %vm9840_vm0 = vcmp.lt.f32.partialorder %v6692_v36, 0.1225 }
 0x297   : > { %v9798_v49 = vsel %vm7638_vm11, 4294967295, %v9797_v49  ;;  %vm7646_vm13 = vmand %vm9799_vm3, %vm7589_vm4  ;;  %vm9807_vm4 = vcmp.lt.f32.partialorder %v6673_v10, 0.1225  ;;  %vm9818_vm11 = vcmp.lt.f32.partialorder %v9817_v35, 0.1225  ;;  %v6001_v35 = vunpack.i.l.bf16 %v9827_v7  ;;  %v9854_v7 = vld [vmem:[#allocation47_spill] sm:$0xff] }
 0x298   : > { %v9801_v33 = vsel %vm7646_vm13, 4294967295, %v9800_v33  ;;  %vm2332_vm7 = vmand %vm9802_vm12, %vm2316_vm15  ;;  %vm9812_vm15 = vnez %v9705_v14  ;;  %vm9813_vm12 = vnez %v9620_v19  ;;  %v5891_v14 = vunpack.i.l.bf16 %v9786_v63  ;;  %v9826_v63 = vld [vmem:[#allocation27_spill] sm:$0xff] }
 0x299   : > { %vm7664_vm3 = vmand %vm9807_vm4, %vm1479_vm14  ;;  %vm7683_vm4 = vcmp.eq.f32.partialorder %v6789_v56, %v5986_v26  ;;  %v7700_v26 = vpop.permute.xlu1 %6019 }
 0x29a   : > { %v9809_v50 = vsel %vm7664_vm3, 4294967295, %v9808_v50  ;;  %vm9814_vm13 = vmor %vm9812_vm15, %vm9813_vm12  ;;  %9822 = vst [vmem:[#allocation41_spill] sm:$0xff] %v7700_v26  ;;  %v9833_v26 = vmov 0 }
 0x29b   : > { %5649 = vmatpush.xpose.msk.msra.mxu2 %vm9814_vm13, %v9646_v61  ;;  %vm2348_vm14 = vmor %vm2332_vm7, %vm9792_vm9  ;;  %vm9823_vm7 = vnez %v9694_v60  ;;  %vm9824_vm13 = vnez %v9682_v32  ;;  %v9883_v60 = vmov 0 }
 0x29c   : > { %vm7691_vm3 = vmand %vm9818_vm11, %vm7624_vm1  ;;  %5723 = vmatpush.xpose.msk.msrb.mxu0 %vm2348_vm14, %v9646_v61  ;;  %vm1264_vm11 = vcmp.eq.f32.partialorder %v9826_v63, %v5892_v18  ;;  %vm9829_vm14 = vcmp.lt.f32.partialorder %v6711_v45, 0.1225  ;;  %vm9835_vm1 = vnez %v9731_v17  ;;  %v9841_v18 = vmov 0 }
 0x29d   : > { %v9820_v52 = vsel %vm7691_vm3, 4294967295, %v9819_v52  ;;  %vm9825_vm15 = vmor %vm9823_vm7, %vm9824_vm13  ;;  %vm9832_vm7 = vcmp.lt.f32.partialorder %v6671_v8, 0.1225  ;;  %vm9836_vm13 = vnez %v9599_v48  ;;  %v5976_v63 = vunpack.i.l.bf16 %v9854_v7 }
 0x29e   : > { %5641 = vmatpush.xpose.msk.msra.mxu1 %vm9825_vm15, %v9646_v61  ;;  %vm7720_vm12 = vmand %vm9829_vm14, %vm7654_vm5  ;;  %vm7762_vm5 = vcmp.eq.f32.partialorder %v6789_v56, %v6037_v2  ;;  %v6026_v17 = vunpack.i.l.bf16 %v7296_v22  ;;  %v9909_v2 = vld [vmem:[#allocation19_spill] sm:$0xff] }
 0x29f   : > { %vm7728_vm15 = vmand %vm9832_vm7, %vm7669_vm8  ;;  %vm9843_vm7 = vnez %v9724_v1  ;;  %v9853_v1 = vld [vmem:[#allocation35_spill] sm:$0xff] }
 0x2a0   : > { %v9834_v26 = vsel %vm7728_vm15, 4294967295, %v9833_v26  ;;  %vm9837_vm3 = vmor %vm9835_vm1, %vm9836_vm13  ;;  %v5887_v5 = vunpack.i.h.bf16 %v9853_v1  ;;  %vm9857_vm15 = vnez %v9717_v55  ;;  %v5886_v4 = vunpack.i.l.bf16 %v9853_v1  ;;  %v9893_v1 = vld [vmem:[#allocation25_spill] sm:$0xff]  ;;  %v9900_v55 = vld [vmem:[#allocation50_spill] sm:$0xff] }
 0x2a1   : > { %5660 = vmatpush.xpose.msk.msra.mxu3 %vm9837_vm3, %v9646_v61  ;;  %vm7746_vm8 = vmand %vm9840_vm0, %vm7683_vm4  ;;  %vm9844_vm3 = vnez %v9631_v34  ;;  %vm9850_vm0 = vcmp.lt.f32.partialorder %v9849_v30, 0.1225  ;;  %v9984_v30 = vmov 0 }
 0x2a2   : > { %v9842_v18 = vsel %vm7746_vm8, 4294967295, %v9841_v18  ;;  %vm9845_vm1 = vmor %vm9843_vm7, %vm9844_vm3  ;;  %vm9855_vm7 = vnez %v9761_v53  ;;  %vm9858_vm3 = vnez %v9701_v58  ;;  %v9861_v53 = vld [vmem:[#allocation26_spill] sm:$0xff]  ;;  %vm9877_vm8 = vcmp.lt.f32.partialorder %v6652_v27, 0.1225 }
 0x2a3   : > { %5650 = vmatpush.xpose.msk.msra.mxu2 %vm9845_vm1, %v9646_v61  ;;  %vm7768_vm4 = vmand %vm9850_vm0, %vm1264_vm11 }
 0x2a4   : > { %v9852_v6 = vsel %vm7768_vm4, 4294967295, %v9851_v6  ;;  %vm9856_vm1 = vmor %vm9855_vm7, %vm9836_vm13  ;;  %vm1478_vm7 = vcmp.eq.f32.partialorder %v6773_v43, %v5961_v57  ;;  %vm9862_vm13 = vnez %v9603_v3  ;;  %v5977_v57 = vunpack.i.h.bf16 %v9854_v7  ;;  %v9913_v7 = vld [vmem:[#allocation13_spill] sm:$0xff] }
 0x2a5   : > { %5724 = vmatpush.xpose.msk.msrb.mxu0 %vm9856_vm1, %v9646_v61  ;;  %vm9859_vm11 = vmor %vm9857_vm15, %vm9858_vm3  ;;  %vm1263_vm1 = vcmp.eq.f32.partialorder %v9861_v53, %v5891_v14  ;;  %vm7806_vm3 = vcmp.eq.f32.partialorder %v6784_v54, %v6001_v35  ;;  %vm9869_vm15 = vcmp.lt.f32.partialorder %v6692_v36, 0.1225  ;;  %v9874_v35 = vld [vmem:[#allocation51_spill] sm:$0xff]  ;;  %v7863_v53 = vpop.permute.xlu1 %6044 }
 0x2a6   : > { %5642 = vmatpush.xpose.msk.msra.mxu1 %vm9859_vm11, %v9646_v61  ;;  %vm1724_vm0 = vmor %vm7720_vm12, %vm9792_vm9  ;;  %v5991_v14 = vunpack.i.l.bf16 %v9874_v35  ;;  %vm9882_vm11 = vcmp.lt.f32.partialorder %v6597_v29, 0.1225  ;;  %9887 = vst [vmem:[#allocation44_spill] sm:$0xff] %v7863_v53  ;;  %v5992_v22 = vunpack.i.h.bf16 %v9874_v35  ;;  %v7880_v53 = vpop.permute.xlu2 %6074  ;;  %v9911_v35 = vmov 0 }
 0x2a7   : > { %vm7821_vm4 = vmand %vm9869_vm15, %vm7762_vm5  ;;  %vm7843_vm15 = vcmp.eq.f32.partialorder %v6780_v51, %v5962_v39  ;;  %v7861_v39 = vpop.permute.xlu0 %6064  ;;  %9894 = vst [vmem:[#allocation35_spill] sm:$0xff] %v7880_v53 }
 0x2a8   : > { %vm7838_vm5 = vmand %vm9877_vm8, %vm1478_vm7  ;;  %vm9888_vm7 = vcmp.lt.f32.partialorder %v6671_v8, 0.1225 }
 0x2a9   : > { %vm7849_vm9 = vmand %vm9882_vm11, %vm1263_vm1  ;;  %vm9906_vm11 = vnez %v9752_v23 }
 0x2aa   : > { %5675 = vmatpush.xpose.msk.msrb.mxu1 %vm1724_vm0, %v9646_v61  ;;  %vm9867_vm0 = vnez %v9739_v42  ;;  %v9878_v42 = vmov 0  ;;  %v9884_v60 = vsel %vm7849_vm9, 4294967295, %v9883_v60  ;;  %vm7869_vm1 = vmand %vm9888_vm7, %vm7806_vm3  ;;  %vm9895_vm3 = vnez %v9599_v48 }
 0x2ab   : > { %vm9868_vm14 = vmor %vm9867_vm0, %vm9793_vm6  ;;  %v9879_v42 = vsel %vm7838_vm5, 4294967295, %v9878_v42 }
 0x2ac   : > { %5661 = vmatpush.xpose.msk.msra.mxu3 %vm9868_vm14, %v9646_v61  ;;  %vm9875_vm14 = vnez %v9639_v25  ;;  %vm9896_vm7 = vmor %vm9846_vm2, %vm9895_vm3 }
 0x2ad   : > { %vm9876_vm0 = vmor %vm9806_vm10, %vm9875_vm14  ;;  %vm9885_vm10 = vnez %v9785_v28  ;;  %v9892_v28 = vld [vmem:[#allocation30_spill] sm:$0xff]  ;;  %vm9910_vm14 = vcmp.lt.f32.partialorder %v9909_v2, 0.1225 }
 0x2ae   : > { %5651 = vmatpush.xpose.msk.msra.mxu2 %vm9876_vm0, %v9646_v61  ;;  %vm9886_vm8 = vmor %vm9885_vm10, %vm9793_vm6  ;;  %vm1477_vm10 = vcmp.eq.f32.partialorder %v9892_v28, %v5976_v63  ;;  %5676 = vmatpush.xpose.msk.msrb.mxu1 %vm9896_vm7, %v9646_v61  ;;  %v9899_v63 = vld [vmem:[#allocation53_spill] sm:$0xff]  ;;  %vm9903_vm7 = vcmp.lt.f32.partialorder %v6673_v10, 0.1225 }
 0x2af   : > { %5725 = vmatpush.xpose.msk.msrb.mxu0 %vm9886_vm8, %v9646_v61  ;;  %vm1262_vm8 = vcmp.eq.f32.partialorder %v9893_v1, %v5887_v5  ;;  %vm1513_vm0 = vmor %vm7821_vm4, %vm9862_vm13  ;;  %v6006_v5 = vunpack.i.l.bf16 %v9899_v63  ;;  %vm1686_vm4 = vcmp.eq.f32.partialorder %v6773_v43, %v5977_v57  ;;  %v9915_v1 = vmov 0  ;;  %v9917_v57 = vld [vmem:[#allocation29_spill] sm:$0xff] }
 0x2b0   : > { %5662 = vmatpush.xpose.msk.msra.mxu3 %vm1513_vm0, %v9646_v61  ;;  %vm7906_vm3 = vmand %vm9903_vm7, %vm7843_vm15  ;;  %vm9907_vm0 = vnez %v9642_v13  ;;  %vm9914_vm15 = vcmp.lt.f32.partialorder %v9913_v7, 0.1225  ;;  %vm7930_vm12 = vcmp.eq.f32.partialorder %v9917_v57, %v5991_v14  ;;  %v6007_v23 = vunpack.i.h.bf16 %v9899_v63  ;;  %v8044_v7 = vpop.permute.xlu2 %6089 }
 0x2b1   : > { %v9905_v44 = vsel %vm7906_vm3, 4294967295, %v9904_v44  ;;  %vm9908_vm9 = vmor %vm9906_vm11, %vm9907_vm0  ;;  %vm9922_vm11 = vnez %v9608_v46  ;;  %v6061_v63 = vunpack.i.l.bf16 %v7714_v41  ;;  %vm1685_vm0 = vcmp.eq.f32.partialorder %v9892_v28, %v5992_v22  ;;  %9964 = vst [vmem:[#allocation51_spill] sm:$0xff] %v8044_v7 }
 0x2b2   : > { %5652 = vmatpush.xpose.msk.msra.mxu2 %vm9908_vm9, %v9646_v61  ;;  %vm7919_vm2 = vmand %vm9910_vm14, %vm1477_vm10  ;;  %vm9920_vm9 = vnez %v9842_v18  ;;  %v9926_v18 = vld [vmem:[#allocation24_spill] sm:$0xff]  ;;  %vm9929_vm10 = vnez %v9620_v19  ;;  %v9940_v22 = vmov 0  ;;  %v6017_v41 = vunpack.i.h.bf16 %v7520_v31  ;;  %v8024_v31 = vpop.permute.xlu0 %6079 }
 0x2b3   : > { %v9912_v35 = vsel %vm7919_vm2, 4294967295, %v9911_v35  ;;  %vm7925_vm7 = vmand %vm9914_vm15, %vm1262_vm8  ;;  %vm7946_vm8 = vcmp.eq.f32.partialorder %v6780_v51, %v6026_v17  ;;  %v9932_v17 = vmov 0  ;;  %vm9934_vm15 = vnez %v9778_v15  ;;  %v9979_v15 = vld [vmem:[#allocation39_spill] sm:$0xff] }
 0x2b4   : > { %v9916_v1 = vsel %vm7925_vm7, 4294967295, %v9915_v1  ;;  %vm9921_vm14 = vmor %vm9920_vm9, %vm9862_vm13  ;;  %vm1261_vm7 = vcmp.eq.f32.partialorder %v9926_v18, %v5886_v4  ;;  %vm9927_vm9 = vnez %v9768_v0  ;;  %vm9931_vm13 = vcmp.lt.f32.partialorder %v6652_v27, 0.1225  ;;  %v9938_v0 = vld [vmem:[#allocation18_spill] sm:$0xff] }
 0x2b5   : > { %5726 = vmatpush.xpose.msk.msrb.mxu0 %vm9921_vm14, %v9646_v61  ;;  %vm9928_vm14 = vmor %vm9927_vm9, %vm9793_vm6  ;;  %v6032_v4 = vunpack.i.h.bf16 %v7390_v62  ;;  %v9942_v62 = vld [vmem:[#allocation28_spill] sm:$0xff]  ;;  %v9953_v18 = vmov 0  ;;  %v9960_v14 = vmov 0 }
 0x2b6   : > { %5677 = vmatpush.xpose.msk.msrb.mxu1 %vm9928_vm14, %v9646_v61  ;;  %vm7968_vm3 = vmand %vm9931_vm13, %vm1686_vm4  ;;  %vm9939_vm13 = vcmp.lt.f32.partialorder %v9938_v0, 0.1225  ;;  %vm7993_vm5 = vcmp.eq.f32.partialorder %v9942_v62, %v6006_v5  ;;  %v9951_v5 = vld [vmem:[#allocation12_spill] sm:$0xff] }
 0x2b7   : > { %v9933_v17 = vsel %vm7968_vm3, 4294967295, %v9932_v17  ;;  %vm9935_vm9 = vmor %vm9934_vm15, %vm9922_vm11  ;;  %vm9945_vm15 = vnez %v9798_v49  ;;  %vm9952_vm14 = vcmp.lt.f32.partialorder %v9951_v5, 0.1225  ;;  %v8026_v49 = vpop.permute.xlu1 %6069  ;;  %v6076_v5 = vunpack.i.l.bf16 %v7880_v53 }
 0x2b8   : > { %5663 = vmatpush.xpose.msk.msra.mxu3 %vm9935_vm9, %v9646_v61  ;;  %vm7988_vm4 = vmand %vm9939_vm13, %vm7930_vm12  ;;  %vm9946_vm9 = vnez %v9685_v11  ;;  %vm9948_vm12 = vcmp.lt.f32.partialorder %v6673_v10, 0.1225  ;;  %9956 = vst [vmem:[#allocation47_spill] sm:$0xff] %v8026_v49  ;;  %v9972_v53 = vmov 0  ;;  %v5952_v49 = vunpack.i.h.bf16 %v9979_v15 }
 0x2b9   : > { %v9941_v22 = vsel %vm7988_vm4, 4294967295, %v9940_v22  ;;  %vm9947_vm6 = vmor %vm9945_vm15, %vm9946_vm9  ;;  %vm8039_vm9 = vcmp.eq.f32.partialorder %v9917_v57, %v6007_v23  ;;  %v9970_v23 = vld [vmem:[#allocation17_spill] sm:$0xff]  ;;  %v9997_v15 = vmov 0 }
 0x2ba   : > { %5653 = vmatpush.xpose.msk.msra.mxu2 %vm9947_vm6, %v9646_v61  ;;  %vm8008_vm13 = vmand %vm9948_vm12, %vm7946_vm8  ;;  %vm9957_vm8 = vnez %v9610_v24 }
 0x2bb   : > { %vm8014_vm2 = vmand %vm9952_vm14, %vm1261_vm7  ;;  %vm9959_vm7 = vcmp.lt.f32.partialorder %v9909_v2, 0.1225 }
 0x2bc   : > { %v9954_v18 = vsel %vm8014_vm2, 4294967295, %v9953_v18  ;;  %vm9955_vm6 = vmor %vm7869_vm1, %vm9922_vm11  ;;  %vm9965_vm1 = vnez %v9801_v33  ;;  %v6041_v33 = vunpack.i.l.bf16 %v7698_v9 }
 0x2bd   : > { %5727 = vmatpush.xpose.msk.msrb.mxu0 %vm9955_vm6, %v9646_v61  ;;  %vm8034_vm14 = vmand %vm9959_vm7, %vm1685_vm0  ;;  %vm9966_vm6 = vnez %v9603_v3  ;;  %vm2310_vm0 = vcmp.eq.f32.partialorder %v6773_v43, %v6061_v63  ;;  %vm9968_vm7 = vnez %v9631_v34  ;;  %v9978_v63 = vld [vmem:[#allocation34_spill] sm:$0xff] }
 0x2be   : > { %v9961_v14 = vsel %vm8034_vm14, 4294967295, %v9960_v14  ;;  %vm9967_vm12 = vmor %vm9965_vm1, %vm9966_vm6  ;;  %vm9971_vm14 = vcmp.lt.f32.partialorder %v9970_v23, 0.1225  ;;  %vm1899_vm2 = vcmp.eq.f32.partialorder %v9978_v63, %v6032_v4  ;;  %vm9986_vm6 = vcmp.lt.f32.partialorder %v6652_v27, 0.1225 }
 0x2bf   : > { %5678 = vmatpush.xpose.msk.msrb.mxu1 %vm9967_vm12, %v9646_v61  ;;  %vm8061_vm4 = vmand %vm9971_vm14, %vm7993_vm5  ;;  %vm9974_vm12 = vnez %v9809_v50  ;;  %v6042_v50 = vunpack.i.h.bf16 %v7698_v9  ;;  %v6091_v4 = vunpack.i.l.bf16 %v8044_v7  ;;  %v10013_v7 = vld [vmem:[#allocation33_spill] sm:$0xff] }
 0x2c0   : > { %v9973_v53 = vsel %vm8061_vm4, 4294967295, %v9972_v53  ;;  %vm9975_vm1 = vmor %vm9974_vm12, %vm9957_vm8  ;;  %vm9980_vm12 = vnez %v9820_v52 }
 0x2c1   : > { %5664 = vmatpush.xpose.msk.msra.mxu3 %vm9975_vm1, %v9646_v61  ;;  %vm2343_vm15 = vmor %vm8008_vm13, %vm9957_vm8  ;;  %vm9981_vm1 = vnez %v9900_v55  ;;  %vm1900_vm13 = vcmp.eq.f32.partialorder %v6830_v37, %v6017_v41  ;;  %vm9983_vm8 = vcmp.lt.f32.partialorder %v9938_v0, 0.1225  ;;  %v9989_v41 = vld [vmem:[#allocation40_spill] sm:$0xff] }
 0x2c2   : > { %vm9982_vm4 = vmor %vm9980_vm12, %vm9981_vm1  ;;  %5728 = vmatpush.xpose.msk.msrb.mxu0 %vm2343_vm15, %v9646_v61  ;;  %v5922_v52 = vunpack.i.h.bf16 %v9989_v41  ;;  %vm8118_vm15 = vcmp.eq.f32.partialorder %v9892_v28, %v6076_v5  ;;  %v10004_v5 = vmov 0  ;;  %vm8171_vm12 = vcmp.eq.f32.partialorder %v10013_v7, %v5952_v49  ;;  %v10021_v49 = vld [vmem:[#allocation45_spill] sm:$0xff]  ;;  %v8193_v7 = vpop.permute.xlu2 %6104 }
 0x2c3   : > { %5654 = vmatpush.xpose.msk.msra.mxu2 %vm9982_vm4, %v9646_v61  ;;  %vm8094_vm14 = vmand %vm9983_vm8, %vm8039_vm9  ;;  %vm9990_vm9 = vnez %v9834_v26  ;;  %vm9996_vm4 = vcmp.lt.f32.partialorder %v6709_v40, 0.1225  ;;  %v6066_v26 = vunpack.i.l.bf16 %v7861_v39  ;;  %v8178_v40 = vpop.permute.xlu1 %6084  ;;  %v5926_v9 = vunpack.i.l.bf16 %v10021_v49  ;;  %10022 = vst [vmem:[#allocation53_spill] sm:$0xff] %v8193_v7  ;;  %v10044_v41 = vld [vmem:[#allocation21_spill] sm:$0xff] }
 0x2c4   : > { %v9985_v30 = vsel %vm8094_vm14, 4294967295, %v9984_v30  ;;  %vm8101_vm5 = vmand %vm9986_vm6, %vm2310_vm0  ;;  %vm9994_vm6 = vnez %v9639_v25  ;;  %vm10003_vm0 = vcmp.lt.f32.partialorder %v6711_v45, 0.1225  ;;  %10016 = vst [vmem:[#allocation30_spill] sm:$0xff] %v8178_v40  ;;  %v10099_v40 = vld [vmem:[#allocation52_spill] sm:$0xff] }
 0x2c5   : > { %vm9991_vm8 = vmor %vm9990_vm9, %vm9922_vm11  ;;  %vm9999_vm9 = vnez %v9879_v42  ;;  %v6067_v42 = vunpack.i.h.bf16 %v7861_v39  ;;  %vm10024_vm11 = vnez %v9610_v24  ;;  %v10061_v39 = vld [vmem:[#allocation48_spill] sm:$0xff] }
 0x2c6   : > { %5679 = vmatpush.xpose.msk.msrb.mxu1 %vm9991_vm8, %v9646_v61  ;;  %vm8128_vm1 = vmand %vm9996_vm4, %vm1899_vm2  ;;  %vm8150_vm4 = vcmp.eq.f32.partialorder %v6749_v16, %v6041_v33  ;;  %v6082_v33 = vunpack.i.h.bf16 %v8024_v31 }
 0x2c7   : > { %v9998_v15 = vsel %vm8128_vm1, 4294967295, %v9997_v15  ;;  %vm10000_vm8 = vmor %vm9999_vm9, %vm9929_vm10  ;;  %vm10008_vm9 = vnez %v9852_v6  ;;  %v8176_v6 = vpop.permute.xlu0 %6094 }
 0x2c8   : > { %5665 = vmatpush.xpose.msk.msra.mxu3 %vm10000_vm8, %v9646_v61  ;;  %vm8145_vm2 = vmand %vm10003_vm0, %vm1900_vm13  ;;  %vm10009_vm8 = vnez %v9664_v59  ;;  %vm8166_vm0 = vcmp.eq.f32.partialorder %v9942_v62, %v6042_v50  ;;  %v5936_v50 = vunpack.i.l.bf16 %v10061_v39  ;;  %v6096_v29 = vunpack.i.l.bf16 %v8176_v6 }
 0x2c9   : > { %v10005_v5 = vsel %vm8145_vm2, 4294967295, %v10004_v5  ;;  %vm10010_vm1 = vmor %vm10008_vm9, %vm10009_vm8  ;;  %vm10039_vm8 = vcmp.lt.f32.partialorder %v9970_v23, 0.1225 }
 0x2ca   : > { %5655 = vmatpush.xpose.msk.msra.mxu2 %vm10010_vm1, %v9646_v61  ;;  %vm2342_vm13 = vmor %vm8101_vm5, %vm9929_vm10  ;;  %vm10017_vm5 = vcmp.lt.f32.partialorder %v9909_v2, 0.1225  ;;  %vm10030_vm10 = vcmp.lt.f32.partialorder %v6614_v20, 0.1225 }
 0x2cb   : > { %5729 = vmatpush.xpose.msk.msrb.mxu0 %vm2342_vm13, %v9646_v61  ;;  %vm8184_vm1 = vmand %vm10017_vm5, %vm8118_vm15  ;;  %vm10023_vm13 = vnez %v9905_v44  ;;  %vm8202_vm15 = vcmp.eq.f32.partialorder %v9917_v57, %v6091_v4  ;;  %v10031_v44 = vmov 0  ;;  %v6081_v4 = vunpack.i.l.bf16 %v8024_v31 }
 0x2cc   : > { %vm10025_vm3 = vmor %vm10023_vm13, %vm10024_vm11  ;;  %v6106_v57 = vunpack.i.l.bf16 %v8193_v7  ;;  %vm10035_vm13 = vnez %v9912_v35  ;;  %v10046_v7 = vmov 0 }
 0x2cd   : > { %5680 = vmatpush.xpose.msk.msrb.mxu1 %vm10025_vm3, %v9646_v61  ;;  %vm8214_vm14 = vmand %vm10030_vm10, %vm8150_vm4  ;;  %vm8219_vm3 = vcmp.eq.f32.partialorder %v6789_v56, %v5922_v52  ;;  %v10040_v52 = vmov 0  ;;  %v10104_v56 = vld [vmem:[#allocation14_spill] sm:$0xff] }
 0x2ce   : > { %v10032_v44 = vsel %vm8214_vm14, 4294967295, %v10031_v44  ;;  %vm10036_vm9 = vmor %vm10035_vm13, %vm9968_vm7  ;;  %vm8244_vm14 = vcmp.eq.f32.partialorder %v6743_v38, %v6066_v26  ;;  %v10059_v26 = vmov 0 }
 0x2cf   : > { %5666 = vmatpush.xpose.msk.msra.mxu3 %vm10036_vm9, %v9646_v61  ;;  %vm8239_vm5 = vmand %vm10039_vm8, %vm8166_vm0  ;;  %vm10045_vm9 = vcmp.lt.f32.partialorder %v10044_v41, 0.1225  ;;  %vm10048_vm8 = vnez %v9884_v60  ;;  %vm10049_vm0 = vnez %v9661_v12  ;;  %v6110_v31 = vpop.permute.xlu0 %6109  ;;  %v10136_v60 = vld [vmem:[#allocation54_spill] sm:$0xff] }
 0x2d0   : > { %v10041_v52 = vsel %vm8239_vm5, 4294967295, %v10040_v52  ;;  %vm8252_vm13 = vmand %vm10045_vm9, %vm8171_vm12  ;;  %vm8272_vm9 = vcmp.eq.f32.partialorder %v6749_v16, %v6067_v42  ;;  %v2734_v42 = vld [vmem:[%s314_s12] sm:$0xf]  ;;  %vm8308_vm12 = vcmp.eq.f32.partialorder %v9942_v62, %v6106_v57  ;;  %v10078_v57 = vmov 0 }
 0x2d1   : > { %v10047_v7 = vsel %vm8252_vm13, 4294967295, %v10046_v7  ;;  %vm10050_vm11 = vmor %vm10048_vm8, %vm10049_vm0  ;;  %vm10058_vm0 = vcmp.lt.f32.partialorder %v6692_v36, 0.1225  ;;  %v10069_v36 = vld [vmem:[#allocation16_spill] sm:$0xff]  ;;  %2736 = vst [vmem:[#allocation3 + $0x3] sm:$0xf] %v2734_v42  ;;  %vm8363_vm13 = vcmp.eq.f32.partialorder %v6743_v38, %v6082_v33  ;;  %v8369_v42 = vpop.permute.xlu1 %6099 }
 0x2d2   : > { %5656 = vmatpush.xpose.msk.msra.mxu2 %vm10050_vm11, %v9646_v61  ;;  %vm2341_vm10 = vmor %vm8184_vm1, %vm9968_vm7  ;;  %vm10054_vm11 = vcmp.lt.f32.partialorder %v9938_v0, 0.1225  ;;  %vm10070_vm1 = vcmp.lt.f32.partialorder %v10069_v36, 0.1225  ;;  %10091 = vst [vmem:[#allocation50_spill] sm:$0xff] %v8369_v42  ;;  %v10097_v33 = vmov 0  ;;  %v8392_v42 = vpop.permute.xlu2 %6119 }
 0x2d3   : > { %5730 = vmatpush.xpose.msk.msrb.mxu0 %vm2341_vm10, %v9646_v61  ;;  %vm8281_vm8 = vmand %vm10054_vm11, %vm8202_vm15  ;;  %vm10062_vm15 = vnez %v9933_v17  ;;  %vm10063_vm10 = vnez %v9620_v19  ;;  %v10071_v17 = vmov 0  ;;  %10100 = vst [vmem:[#allocation19_spill] sm:$0xff] %v8392_v42 }
 0x2d4   : > { %vm8293_vm4 = vmand %vm10058_vm0, %vm8219_vm3  ;;  %vm10083_vm0 = vnez %v9916_v1  ;;  %vm10084_vm3 = vnez %v9682_v32  ;;  %v10090_v1 = vld [vmem:[#allocation38_spill] sm:$0xff] }
 0x2d5   : > { %v10060_v26 = vsel %vm8293_vm4, 4294967295, %v10059_v26  ;;  %vm10064_vm11 = vmor %vm10062_vm15, %vm10063_vm10  ;;  %vm8325_vm15 = vcmp.eq.f32.partialorder %v6784_v54, %v5926_v9  ;;  %v10080_v9 = vld [vmem:[#allocation27_spill] sm:$0xff]  ;;  %v10108_v54 = vld [vmem:[#allocation26_spill] sm:$0xff] }
 0x2d6   : > { %5681 = vmatpush.xpose.msk.msrb.mxu1 %vm10064_vm11, %v9646_v61  ;;  %vm8320_vm2 = vmand %vm10070_vm1, %vm8244_vm14  ;;  %vm10075_vm11 = vnez %v9941_v22  ;;  %vm10077_vm14 = vcmp.lt.f32.partialorder %v6614_v20, 0.1225  ;;  %vm8344_vm10 = vcmp.eq.f32.partialorder %v10080_v9, %v6081_v4  ;;  %v6036_v4 = vunpack.i.l.bf16 %v10090_v1 }
 0x2d7   : > { %v10072_v17 = vsel %vm8320_vm2, 4294967295, %v10071_v17  ;;  %vm10076_vm4 = vmor %vm10075_vm11, %vm9994_vm6  ;;  %v5966_v1 = vunpack.i.l.bf16 %v10099_v40  ;;  %vm10119_vm2 = vnez %v9701_v58  ;;  %v10131_v22 = vmov 0 }
 0x2d8   : > { %5667 = vmatpush.xpose.msk.msra.mxu3 %vm10076_vm4, %v9646_v61  ;;  %vm8339_vm1 = vmand %vm10077_vm14, %vm8272_vm9  ;;  %vm10087_vm14 = vnez %v9998_v15  ;;  %vm10139_vm9 = vcmp.lt.f32.partialorder %v6614_v20, 0.1225  ;;  %v10158_v15 = vmov 0  ;;  %v10178_v40 = vmov 0 }
 0x2d9   : > { %v10079_v57 = vsel %vm8339_vm1, 4294967295, %v10078_v57  ;;  %vm10085_vm11 = vmor %vm10083_vm0, %vm10084_vm3 }
 0x2da   : > { %5657 = vmatpush.xpose.msk.msra.mxu2 %vm10085_vm11, %v9646_v61  ;;  %vm2340_vm4 = vmor %vm8281_vm8, %vm9994_vm6  ;;  %vm10092_vm8 = vcmp.lt.f32.partialorder %v9970_v23, 0.1225  ;;  %vm10095_vm11 = vnez %v9642_v13  ;;  %v6121_v23 = vunpack.i.l.bf16 %v8392_v42  ;;  %v6112_v42 = vunpack.i.h.bf16 %v6110_v31 }
 0x2db   : > { %5731 = vmatpush.xpose.msk.msrb.mxu0 %vm2340_vm4, %v9646_v61  ;;  %vm8375_vm0 = vmand %vm10092_vm8, %vm8308_vm12  ;;  %vm10096_vm4 = vcmp.lt.f32.partialorder %v6671_v8, 0.1225  ;;  %vm10101_vm12 = vnez %v9961_v14  ;;  %v10106_v8 = vmov 0  ;;  %v5981_v14 = vunpack.i.l.bf16 %v10136_v60 }
 0x2dc   : > { %vm8387_vm3 = vmand %vm10096_vm4, %vm8325_vm15  ;;  %vm10105_vm15 = vcmp.lt.f32.partialorder %v10104_v56, 0.1225 }
 0x2dd   : > { %v10098_v33 = vsel %vm8387_vm3, 4294967295, %v10097_v33  ;;  %vm10102_vm8 = vmor %vm10101_vm12, %vm9968_vm7  ;;  %vm8413_vm3 = vcmp.eq.f32.partialorder %v10108_v54, %v6096_v29  ;;  %vm8418_vm12 = vcmp.eq.f32.partialorder %v6780_v51, %v5936_v50  ;;  %v10116_v29 = vmov 0 }
 0x2de   : > { %5682 = vmatpush.xpose.msk.msrb.mxu1 %vm10102_vm8, %v9646_v61  ;;  %vm8408_vm4 = vmand %vm10105_vm15, %vm8344_vm10  ;;  %vm10113_vm8 = vnez %v9973_v53  ;;  %vm10115_vm15 = vcmp.lt.f32.partialorder %v10069_v36, 0.1225  ;;  %v6097_v50 = vunpack.i.h.bf16 %v8176_v6  ;;  %vm10118_vm7 = vnez %v9954_v18  ;;  %v10123_v53 = vld [vmem:[#allocation57_spill] sm:$0xff]  ;;  %v10129_v18 = vld [vmem:[#allocation15_spill] sm:$0xff] }
 0x2df   : > { %v10107_v8 = vsel %vm8408_vm4, 4294967295, %v10106_v8  ;;  %vm10114_vm10 = vmor %vm10113_vm8, %vm10095_vm11  ;;  %v6051_v35 = vunpack.i.l.bf16 %v10123_v53  ;;  %v6111_v6 = vunpack.i.l.bf16 %v6110_v31  ;;  %v6125_v31 = vpop.permute.xlu0 %6124 }
 0x2e0   : > { %5668 = vmatpush.xpose.msk.msra.mxu3 %vm10114_vm10, %v9646_v61  ;;  %vm8433_vm5 = vmand %vm10115_vm15, %vm8363_vm13  ;;  %vm10122_vm13 = vnez %v10047_v7  ;;  %vm10130_vm15 = vcmp.lt.f32.partialorder %v10129_v18, 0.1225 }
 0x2e1   : > { %v10117_v29 = vsel %vm8433_vm5, 4294967295, %v10116_v29  ;;  %vm10120_vm1 = vmor %vm10118_vm7, %vm10119_vm2  ;;  %vm10124_vm5 = vnez %v10005_v5  ;;  %vm10125_vm7 = vnez %v9593_v47  ;;  %vm2306_vm2 = vcmp.eq.f32.partialorder %v6749_v16, %v6121_v23  ;;  %v8482_v23 = vld [vmem:[#allocation3] sm:$0x7f] }
 0x2e2   : > { %5658 = vmatpush.xpose.msk.msra.mxu2 %vm10120_vm1, %v9646_v61  ;;  %vm2339_vm8 = vmor %vm8375_vm0, %vm10095_vm11  ;;  %vm10127_vm0 = vnez %v9685_v11  ;;  %v10134_v5 = vmov 0  ;;  %2754 = vmatmul.f32.vlgmr.msra.gmra.mxu1 %v8482_v23 }
 0x2e3   : > { %5732 = vmatpush.xpose.msk.msrb.mxu0 %vm2339_vm8, %v9646_v61  ;;  %vm10126_vm1 = vmor %vm10124_vm5, %vm10125_vm7  ;;  %vm10133_vm5 = vcmp.lt.f32.partialorder %v6673_v10, 0.1225  ;;  %vm10142_vm7 = vnez %v10032_v44  ;;  %v6127_v44 = vunpack.i.h.bf16 %v6125_v31 }
 0x2e4   : > { %vm8469_vm10 = vmand %vm10130_vm15, %vm8413_vm3  ;;  %vm10137_vm3 = vnez %v9985_v30  ;;  %v6052_v30 = vunpack.i.h.bf16 %v10123_v53  ;;  %v8551_v53 = vpop.permute.xlu2 %6134 }
 0x2e5   : > { %v10132_v22 = vsel %vm8469_vm10, 4294967295, %v10131_v22  ;;  %vm8477_vm8 = vmand %vm10133_vm5, %vm8418_vm12  ;;  %vm8494_vm5 = vcmp.eq.f32.partialorder %v6773_v43, %v5966_v1  ;;  %2774 = vmatmul.f32.vlgmr.msra.gmra.mxu2 %v8482_v23  ;;  %v8535_v1 = vpop.permute.xlu1 %6114  ;;  %10160 = vst [vmem:[#allocation28_spill] sm:$0xff] %v8551_v53  ;;  %vm10171_vm10 = vnez %v10098_v33  ;;  %v10299_v33 = vld [vmem:[#allocation44_spill] sm:$0xff] }
 0x2e6   : > { %5691 = vmatpush.xpose.msk.msrb.mxu2 %vm10126_vm1, %v9646_v61  ;;  %v10135_v5 = vsel %vm8477_vm8, 4294967295, %v10134_v5  ;;  %vm2108_vm1 = vcmp.eq.f32.partialorder %v6830_v37, %v6036_v4  ;;  %vm10138_vm15 = vmor %vm10137_vm3, %vm9994_vm6  ;;  %v10150_v4 = vmov 0  ;;  %vm10152_vm6 = vnez %v9599_v48 }
 0x2e7   : > { %5683 = vmatpush.xpose.msk.msrb.mxu1 %vm10138_vm15, %v9646_v61  ;;  %vm2322_vm12 = vmand %vm10139_vm9, %vm2306_vm2  ;;  %vm10154_vm3 = vnez %v9900_v55  ;;  %vm2524_vm2 = vcmp.eq.f32.partialorder %v6830_v37, %v6052_v30  ;;  %v10183_v37 = vmov 0  ;;  %v10186_v30 = vmov 0 }
 0x2e8   : > { %vm10143_vm8 = vmor %vm10142_vm7, %vm10127_vm0  ;;  %vm8517_vm7 = vcmp.eq.f32.partialorder %v10080_v9, %v6097_v50  ;;  %v10156_v50 = vld [vmem:[#allocation25_spill] sm:$0xff] }
 0x2e9   : > { %5669 = vmatpush.xpose.msk.msra.mxu3 %vm10143_vm8, %v9646_v61  ;;  %vm2338_vm11 = vmor %vm2322_vm12, %vm10127_vm0  ;;  %vm10149_vm8 = vcmp.lt.f32.partialorder %v6711_v45, 0.1225 }
 0x2ea   : > { %vm8523_vm12 = vmand %vm10149_vm8, %vm2108_vm1  ;;  %5733 = vmatpush.xpose.msk.msrb.mxu0 %vm2338_vm11, %v9646_v61  ;;  %vm10157_vm11 = vcmp.lt.f32.partialorder %v6652_v27, 0.1225 }
 0x2eb   : > { %v10151_v4 = vsel %vm8523_vm12, 4294967295, %v10150_v4  ;;  %vm10153_vm9 = vmor %vm10087_vm14, %vm10152_vm6  ;;  %vm1470_vm12 = vcmp.eq.f32.partialorder %v10156_v50, %v6111_v6  ;;  %vm2107_vm14 = vcmp.eq.f32.partialorder %v9978_v63, %v6051_v35  ;;  %vm10162_vm6 = vnez %v9642_v13 }
 0x2ec   : > { %5692 = vmatpush.xpose.msk.msrb.mxu2 %vm10153_vm9, %v9646_v61  ;;  %vm8546_vm15 = vmand %vm10157_vm11, %vm8494_vm5  ;;  %vm10161_vm9 = vnez %v10041_v52  ;;  %vm1679_vm5 = vcmp.eq.f32.partialorder %v10108_v54, %v6112_v42  ;;  %vm1893_vm11 = vcmp.eq.f32.partialorder %v9892_v28, %v5981_v14  ;;  %v6136_v35 = vunpack.i.l.bf16 %v8551_v53  ;;  %v10176_v14 = vld [vmem:[#allocation23_spill] sm:$0xff] }
 0x2ed   : > { %v10159_v15 = vsel %vm8546_vm15, 4294967295, %v10158_v15  ;;  %vm10163_vm8 = vmor %vm10161_vm9, %vm10162_vm6  ;;  %vm10165_vm15 = vnez %v10072_v17  ;;  %v10168_v52 = vmov 0  ;;  %v6126_v42 = vunpack.i.l.bf16 %v6125_v31  ;;  %v10172_v17 = vld [vmem:[#allocation13_spill] sm:$0xff]  ;;  %v10188_v31 = vld [vmem:[#allocation56_spill] sm:$0xff]  ;;  %v8658_v53 = vpop.permute.xlu1 %6129 }
 0x2ee   : > { %5684 = vmatpush.xpose.msk.msrb.mxu1 %vm10163_vm8, %v9646_v61  ;;  %vm10166_vm4 = vmor %vm10165_vm15, %vm10154_vm3  ;;  %vm10167_vm8 = vcmp.lt.f32.partialorder %v10104_v56, 0.1225  ;;  %vm10173_vm0 = vcmp.lt.f32.partialorder %v10172_v17, 0.1225  ;;  %v10174_v6 = vmov 0  ;;  %vm2305_vm1 = vcmp.eq.f32.partialorder %v6743_v38, %v6136_v35 }
 0x2ef   : > { %5670 = vmatpush.xpose.msk.msra.mxu3 %vm10166_vm4, %v9646_v61  ;;  %vm8576_vm9 = vmand %vm10167_vm8, %vm8517_vm7  ;;  %vm10177_vm4 = vcmp.lt.f32.partialorder %v10176_v14, 0.1225  ;;  %vm10180_vm8 = vnez %v9601_v21  ;;  %v5996_v7 = vunpack.i.l.bf16 %v10188_v31  ;;  %v10194_v35 = vmov 0 }
 0x2f0   : > { %v10169_v52 = vsel %vm8576_vm9, 4294967295, %v10168_v52  ;;  %vm8587_vm15 = vmand %vm10173_vm0, %vm1470_vm12  ;;  %vm10182_vm0 = vcmp.lt.f32.partialorder %v10129_v18, 0.1225 }
 0x2f1   : > { %v10175_v6 = vsel %vm8587_vm15, 4294967295, %v10174_v6  ;;  %vm8593_vm7 = vmand %vm10177_vm4, %vm2107_vm14  ;;  %vm10185_vm14 = vcmp.lt.f32.partialorder %v9909_v2, 0.1225  ;;  %vm10248_vm15 = vnez %v10135_v5 }
 0x2f2   : > { %v10179_v40 = vsel %vm8593_vm7, 4294967295, %v10178_v40  ;;  %vm10181_vm9 = vmor %vm10122_vm13, %vm10180_vm8  ;;  %vm10189_vm13 = vnez %v10079_v57  ;;  %vm10193_vm7 = vcmp.lt.f32.partialorder %v6711_v45, 0.1225  ;;  %v5927_v45 = vunpack.i.h.bf16 %v10021_v49  ;;  %v8656_v57 = vpop.permute.xlu0 %6139 }
 0x2f3   : > { %5693 = vmatpush.xpose.msk.msrb.mxu2 %vm10181_vm9, %v9646_v61  ;;  %vm8606_vm12 = vmand %vm10182_vm0, %vm1679_vm5  ;;  %vm10190_vm9 = vnez %v9685_v11  ;;  %vm10192_vm5 = vcmp.lt.f32.partialorder %v10069_v36, 0.1225  ;;  %10206 = vst [vmem:[#allocation34_spill] sm:$0xff] %v8656_v57  ;;  %v6141_v49 = vunpack.i.l.bf16 %v8656_v57  ;;  %v10217_v57 = vmov 0 }
 0x2f4   : > { %v10184_v37 = vsel %vm8606_vm12, 4294967295, %v10183_v37  ;;  %vm8612_vm4 = vmand %vm10185_vm14, %vm1893_vm11  ;;  %vm10196_vm11 = vnez %v10107_v8  ;;  %vm10197_vm14 = vnez %v9664_v59  ;;  %v10202_v8 = vld [vmem:[#allocation24_spill] sm:$0xff] }
 0x2f5   : > { %v10187_v30 = vsel %vm8612_vm4, 4294967295, %v10186_v30  ;;  %vm10191_vm8 = vmor %vm10189_vm13, %vm10190_vm9  ;;  %vm1469_vm9 = vcmp.eq.f32.partialorder %v10202_v8, %v6126_v42  ;;  %v8666_v42 = vpop.permute.xlu2 %6149 }
 0x2f6   : > { %5685 = vmatpush.xpose.msk.msrb.mxu1 %vm10191_vm8, %v9646_v61  ;;  %vm2321_vm0 = vmand %vm10192_vm5, %vm2305_vm1  ;;  %vm10199_vm1 = vnez %v10169_v52  ;;  %10208 = vst [vmem:[#allocation39_spill] sm:$0xff] %v8666_v42  ;;  %v10246_v52 = vmov 0 }
 0x2f7   : > { %vm8627_vm6 = vmand %vm10193_vm7, %vm2524_vm2  ;;  %vm1678_vm2 = vcmp.eq.f32.partialorder %v10156_v50, %v6127_v44  ;;  %v6152_v44 = vunpack.i.h.bf16 %v8666_v42  ;;  %vm10213_vm7 = vnez %v10132_v22  ;;  %v10295_v22 = vmov 0 }
 0x2f8   : > { %v10195_v35 = vsel %vm8627_vm6, 4294967295, %v10194_v35  ;;  %vm10198_vm4 = vmor %vm10196_vm11, %vm10197_vm14  ;;  %vm10209_vm6 = vnez %v10117_v29  ;;  %v10215_v29 = vld [vmem:[#allocation12_spill] sm:$0xff] }
 0x2f9   : > { %5671 = vmatpush.xpose.msk.msra.mxu3 %vm10198_vm4, %v9646_v61  ;;  %vm2337_vm13 = vmor %vm2321_vm0, %vm10154_vm3  ;;  %vm10203_vm4 = vnez %v10060_v26  ;;  %vm10204_vm0 = vnez %v9603_v3  ;;  %v10212_v26 = vld [vmem:[#allocation29_spill] sm:$0xff] }
 0x2fa   : > { %5734 = vmatpush.xpose.msk.msrb.mxu0 %vm2337_vm13, %v9646_v61  ;;  %vm10205_vm11 = vmor %vm10203_vm4, %vm10204_vm0  ;;  %vm1892_vm5 = vcmp.eq.f32.partialorder %v10212_v26, %v5996_v7  ;;  %vm10216_vm13 = vcmp.lt.f32.partialorder %v10215_v29, 0.1225  ;;  %v10221_v7 = vld [vmem:[#allocation36_spill] sm:$0xff]  ;;  %v10232_v26 = vld [vmem:[#allocation33_spill] sm:$0xff] }
 0x2fb   : > { %5694 = vmatpush.xpose.msk.msrb.mxu2 %vm10205_vm11, %v9646_v61  ;;  %vm10210_vm4 = vmor %vm10209_vm6, %vm10154_vm3  ;;  %vm10211_vm11 = vnez %v9661_v12  ;;  %v6057_v42 = vunpack.i.h.bf16 %v10221_v7  ;;  %vm10229_vm3 = vcmp.lt.f32.partialorder %v9938_v0, 0.1225  ;;  %v10230_v7 = vmov 0 }
 0x2fc   : > { %5686 = vmatpush.xpose.msk.msrb.mxu1 %vm10210_vm4, %v9646_v61  ;;  %vm10214_vm8 = vmor %vm10213_vm7, %vm10211_vm11  ;;  %vm10219_vm4 = vnez %v9593_v47  ;;  %vm10224_vm7 = vcmp.lt.f32.partialorder %v10172_v17, 0.1225  ;;  %vm2106_vm14 = vcmp.eq.f32.partialorder %v10232_v26, %v5927_v45  ;;  %v10259_v0 = vmov 0 }
 0x2fd   : > { %5672 = vmatpush.xpose.msk.msra.mxu3 %vm10214_vm8, %v9646_v61  ;;  %vm8688_vm6 = vmand %vm10216_vm13, %vm1469_vm9  ;;  %vm10227_vm9 = vnez %v9608_v46 }
 0x2fe   : > { %v10218_v57 = vsel %vm8688_vm6, 4294967295, %v10217_v57  ;;  %vm8703_vm8 = vmand %vm10224_vm7, %vm1678_vm2  ;;  %vm10233_vm2 = vnez %v9664_v59  ;;  %vm10245_vm6 = vcmp.lt.f32.partialorder %v10044_v41, 0.1225 }
 0x2ff   : > { %vm10228_vm13 = vmor %vm10171_vm10, %vm10227_vm9  ;;  %vm2303_vm10 = vcmp.eq.f32.partialorder %v10108_v54, %v6152_v44 }
 0x300   : > { %5695 = vmatpush.xpose.msk.msrb.mxu2 %vm10228_vm13, %v9646_v61  ;;  %vm8715_vm0 = vmand %vm10229_vm3, %vm1892_vm5  ;;  %vm1677_vm13 = vcmp.eq.f32.partialorder %v10202_v8, %v6141_v49  ;;  %vm10236_vm3 = vnez %v10175_v6  ;;  %vm10237_vm5 = vnez %v9682_v32  ;;  %v8769_v6 = vpop.permute.xlu1 %6144  ;;  %v10255_v49 = vld [vmem:[#allocation41_spill] sm:$0xff] }
 0x301   : > { %v10231_v7 = vsel %vm8715_vm0, 4294967295, %v10230_v7  ;;  %vm10234_vm7 = vmor %vm10199_vm1, %vm10233_vm2  ;;  %vm8747_vm0 = vcmp.eq.f32.partialorder %v9978_v63, %v6057_v42  ;;  %vm10249_vm2 = vnez %v9610_v24  ;;  %v8767_v63 = vpop.permute.xlu0 %6154  ;;  %10251 = vst [vmem:[#allocation40_spill] sm:$0xff] %v8769_v6  ;;  %v6021_v42 = vunpack.i.l.bf16 %v10255_v49 }
 0x302   : > { %5687 = vmatpush.xpose.msk.msrb.mxu1 %vm10234_vm7, %v9646_v61  ;;  %vm10238_vm9 = vmor %vm10236_vm3, %vm10237_vm5  ;;  %vm10252_vm5 = vcmp.lt.f32.partialorder %v10215_v29, 0.1225  ;;  %v6157_v44 = vunpack.i.h.bf16 %v8767_v63  ;;  %v6146_v5 = vunpack.i.l.bf16 %v8769_v6  ;;  %vm10263_vm3 = vnez %v9701_v58  ;;  %v2224_v6 = vpop.permute.xlu2 %2223  ;;  %v3258_v58 = vld [vmem:[#allocation9 + $0xa40] sm:$0xff] }
 0x303   : > { %5673 = vmatpush.xpose.msk.msra.mxu3 %vm10238_vm9, %v9646_v61  ;;  %vm8757_vm1 = vmand %vm10245_vm6, %vm2106_vm14  ;;  %vm10258_vm6 = vcmp.lt.f32.partialorder %v10129_v18, 0.1225 }
 0x304   : > { %v10247_v52 = vsel %vm8757_vm1, 4294967295, %v10246_v52  ;;  %vm10250_vm7 = vmor %vm10248_vm15, %vm10249_vm2  ;;  %vm10256_vm15 = vnez %v10184_v37  ;;  %vm10262_vm2 = vnez %v10218_v57  ;;  %v10267_v37 = vmov 0  ;;  %v10351_v57 = vld [vmem:[#allocation29_spill] sm:$0xff] }
 0x305   : > { %5696 = vmatpush.xpose.msk.msrb.mxu2 %vm10250_vm7, %v9646_v61  ;;  %vm8773_vm12 = vmand %vm10252_vm5, %vm1677_vm13  ;;  %vm10269_vm5 = vnez %v10151_v4  ;;  %vm2302_vm1 = vcmp.eq.f32.partialorder %v10156_v50, %v6157_v44  ;;  %vm10273_vm13 = vnez %v10159_v15  ;;  %v5937_v4 = vunpack.i.h.bf16 %v10061_v39  ;;  %v10286_v15 = vld [vmem:[#allocation42_spill] sm:$0xff] }
 0x306   : > { %vm10257_vm14 = vmor %vm10256_vm15, %vm10211_vm11  ;;  %vm10276_vm15 = vnez %v9682_v32  ;;  %vm10280_vm11 = vnez %v9664_v59 }
 0x307   : > { %5688 = vmatpush.xpose.msk.msrb.mxu1 %vm10257_vm14, %v9646_v61  ;;  %vm8788_vm7 = vmand %vm10258_vm6, %vm2303_vm10  ;;  %vm10266_vm14 = vcmp.lt.f32.partialorder %v10176_v14, 0.1225  ;;  %v5957_v14 = vunpack.i.h.bf16 %v10286_v15  ;;  %v6022_v15 = vunpack.i.h.bf16 %v10255_v49  ;;  %v6047_v49 = vunpack.i.h.bf16 %v10299_v33 }
 0x308   : > { %v10260_v0 = vsel %vm8788_vm7, 4294967295, %v10259_v0  ;;  %vm10264_vm9 = vmor %vm10262_vm2, %vm10263_vm3 }
 0x309   : > { %5674 = vmatpush.xpose.msk.msra.mxu3 %vm10264_vm9, %v9646_v61  ;;  %vm8810_vm6 = vmand %vm10266_vm14, %vm8747_vm0  ;;  %vm2304_vm9 = vcmp.eq.f32.partialorder %v10080_v9, %v6146_v5  ;;  %vm10278_vm0 = vcmp.lt.f32.partialorder %v10104_v56, 0.1225 }
 0x30a   : > { %v10268_v37 = vsel %vm8810_vm6, 4294967295, %v10267_v37  ;;  %vm10270_vm2 = vmor %vm10269_vm5, %vm10219_vm4  ;;  %vm10274_vm5 = vnez %v9620_v19  ;;  %vm1891_vm4 = vcmp.eq.f32.partialorder %v9942_v62, %v6021_v42  ;;  %v5982_v42 = vunpack.i.h.bf16 %v10136_v60  ;;  %v10331_v60 = vld [vmem:[#allocation30_spill] sm:$0xff] }
 0x30b   : > { %vm10277_vm10 = vmor %vm8703_vm8, %vm10276_vm15  ;;  %vm10281_vm8 = vnez %v10179_v40  ;;  %v10290_v40 = vld [vmem:[#allocation17_spill] sm:$0xff]  ;;  %v6086_v5 = vunpack.i.l.bf16 %v10331_v60 }
 0x30c   : > { %5689 = vmatpush.xpose.msk.msrb.mxu1 %vm10277_vm10, %v9646_v61  ;;  %vm2320_vm14 = vmand %vm10278_vm0, %vm2304_vm9  ;;  %2794 = vmatmul.f32.vlgmr.msra.gmra.mxu3 %v8482_v23  ;;  %vm10283_vm9 = vcmp.lt.f32.partialorder %v10172_v17, 0.1225 }
 0x30d   : > { %5707 = vmatpush.xpose.msk.msrb.mxu3 %vm10270_vm2, %v9646_v61  ;;  %vm10275_vm2 = vmor %vm10273_vm13, %vm10274_vm5  ;;  %vm10279_vm13 = vnez %v9599_v48  ;;  %vm2301_vm5 = vcmp.eq.f32.partialorder %v10202_v8, %v2224_v6  ;;  %v6046_v6 = vunpack.i.l.bf16 %v10299_v33  ;;  %v10323_v48 = vld [vmem:[#allocation31_spill] sm:$0xff] }
 0x30e   : > { %5697 = vmatpush.xpose.msk.msrb.mxu2 %vm10275_vm2, %v9646_v61  ;;  %vm2336_vm7 = vmor %vm2320_vm14, %vm10280_vm11  ;;  %vm10287_vm14 = vnez %v10187_v30  ;;  %vm10291_vm11 = vcmp.lt.f32.partialorder %v10290_v40, 0.1225  ;;  %v10298_v30 = vld [vmem:[#allocation32_spill] sm:$0xff]  ;;  %v10360_v33 = vld [vmem:[#allocation51_spill] sm:$0xff] }
 0x30f   : > { %5735 = vmatpush.xpose.msk.msrb.mxu0 %vm2336_vm7, %v9646_v61  ;;  %vm10282_vm10 = vmor %vm10281_vm8, %vm10279_vm13  ;;  %vm10288_vm7 = vnez %v9631_v34 }
 0x310   : > { %vm8867_vm0 = vmand %vm10283_vm9, %vm2302_vm1  ;;  %vm10294_vm1 = vcmp.lt.f32.partialorder %v10215_v29, 0.1225 }
 0x311   : > { %5708 = vmatpush.xpose.msk.msrb.mxu3 %vm10282_vm10, %v9646_v61  ;;  %vm10289_vm2 = vmor %vm10287_vm14, %vm10288_vm7  ;;  %vm10304_vm14 = vnez %v9661_v12  ;;  %vm10307_vm7 = vnez %v9601_v21  ;;  %v10328_v21 = vld [vmem:[#allocation46_spill] sm:$0xff] }
 0x312   : > { %5698 = vmatpush.xpose.msk.msrb.mxu2 %vm10289_vm2, %v9646_v61  ;;  %vm8880_vm6 = vmand %vm10291_vm11, %vm1891_vm4  ;;  %vm2105_vm2 = vcmp.eq.f32.partialorder %v10298_v30, %v5937_v4  ;;  %vm10300_vm11 = vnez %v10195_v35  ;;  %vm10301_vm4 = vnez %v9593_v47  ;;  %v10310_v47 = vld [vmem:[#allocation52_spill] sm:$0xff]  ;;  %v10314_v35 = vld [vmem:[#allocation22_spill] sm:$0xff]  ;;  %v5987_v44 = vunpack.i.h.bf16 %v10328_v21 }
 0x313   : > { %vm8886_vm8 = vmand %vm10294_vm1, %vm2301_vm5  ;;  %v2978_v21 = vld [vmem:[#allocation9 + $0x180] sm:$0xff] }
 0x314   : > { %v10296_v22 = vsel %vm8886_vm8, 4294967295, %v10295_v22  ;;  %vm10297_vm10 = vmor %vm8773_vm12, %vm10263_vm3  ;;  %vm10303_vm12 = vnez %v10260_v0  ;;  %v5967_v0 = vunpack.i.h.bf16 %v10310_v47 }
 0x315   : > { %5690 = vmatpush.xpose.msk.msrb.mxu1 %vm10297_vm10, %v9646_v61  ;;  %vm10302_vm5 = vmor %vm10300_vm11, %vm10301_vm4  ;;  %vm10306_vm10 = vnez %v10247_v52  ;;  %vm10309_vm11 = vnez %v9642_v13  ;;  %v10317_v52 = vld [vmem:[#allocation43_spill] sm:$0xff] }
 0x316   : > { %vm2334_vm9 = vmor %vm8867_vm0, %vm10276_vm15  ;;  %vm2522_vm0 = vcmp.eq.f32.partialorder %v10232_v26, %v5957_v14  ;;  %vm10316_vm15 = vnez %v9603_v3  ;;  %v5972_v45 = vunpack.i.h.bf16 %v10317_v52  ;;  %v10322_v26 = vld [vmem:[#allocation47_spill] sm:$0xff]  ;;  %v10335_v3 = vld [vmem:[#allocation49_spill] sm:$0xff]  ;;  %v6117_v52 = vunpack.i.h.bf16 %v8535_v1 }
 0x317   : > { %vm10305_vm1 = vmor %vm10303_vm12, %vm10304_vm14  ;;  %vm10312_vm12 = vnez %v9639_v25  ;;  %v6002_v4 = vunpack.i.h.bf16 %v10335_v3  ;;  %v3274_v3 = vld [vmem:[#allocation9 + $0xac0] sm:$0xff] }
 0x318   : > { %5736 = vmatpush.xpose.msk.msrb.mxu0 %vm10305_vm1, %v9646_v61  ;;  %vm10308_vm8 = vmor %vm10306_vm10, %vm10307_vm7  ;;  %2814 = vmatmul.f32.vlgmr.msrb.gmra.mxu1 %v8482_v23 }
 0x319   : > { %5739 = vmatpush.xpose.msk.msra.mxu1 %vm10302_vm5, %v9646_v61  ;;  %5709 = vmatpush.xpose.msk.msrb.mxu3 %vm10308_vm8, %v9646_v61  ;;  %vm1923_vm4 = vmor %vm8880_vm6, %vm10309_vm11  ;;  %vm10311_vm5 = vnez %v10231_v7  ;;  %vm10315_vm8 = vcmp.lt.f32.partialorder %v10314_v35, 0.1225  ;;  %vm10318_vm6 = vnez %v10268_v37  ;;  %v6071_v7 = vunpack.i.l.bf16 %v10322_v26 }
 0x31a   : > { %vm10313_vm1 = vmor %vm10311_vm5, %vm10312_vm12  ;;  %vm10320_vm5 = vnez %v10296_v22  ;;  %vm1890_vm12 = vcmp.eq.f32.partialorder %v6749_v16, %v6046_v6  ;;  %v5997_v37 = vunpack.i.h.bf16 %v10188_v31  ;;  %v10338_v31 = vld [vmem:[#allocation50_spill] sm:$0xff]  ;;  %v6072_v22 = vunpack.i.h.bf16 %v10322_v26 }
 0x31b   : > { %5699 = vmatpush.xpose.msk.msrb.mxu2 %vm10313_vm1, %v9646_v61  ;;  %vm2121_vm10 = vmand %vm10315_vm8, %vm2105_vm2  ;;  %vm10321_vm2 = vcmp.lt.f32.partialorder %v10044_v41, 0.1225  ;;  %v10326_v41 = vld [vmem:[#allocation20_spill] sm:$0xff]  ;;  %v6101_v39 = vunpack.i.l.bf16 %v10338_v31  ;;  %v6092_v6 = vunpack.i.h.bf16 %v10360_v33  ;;  %v6132_v26 = vunpack.i.h.bf16 %v8658_v53 }
 0x31c   : > { %vm2137_vm14 = vmor %vm2121_vm10, %vm10316_vm15  ;;  %5737 = vmatpush.xpose.msk.msrb.mxu0 %vm2334_vm9, %v9646_v61  ;;  %vm10324_vm10 = vcmp.lt.f32.partialorder %v6614_v20, 0.1225  ;;  %vm10325_vm9 = vnez %v9685_v11  ;;  %v3778_v33 = vld [vmem:[#allocation9 + $0x1a80] sm:$0xff] }
 0x31d   : > { %vm10319_vm11 = vmor %vm10318_vm6, %vm10279_vm13  ;;  %5710 = vmatpush.xpose.msk.msrb.mxu3 %vm2137_vm14, %v9646_v61 }
 0x31e   : > { %5740 = vmatpush.xpose.msk.msra.mxu1 %vm10319_vm11, %v9646_v61  ;;  %vm2333_vm1 = vmor %vm10320_vm5, %vm10263_vm3  ;;  %vm2104_vm11 = vcmp.eq.f32.partialorder %v10323_v48, %v5967_v0  ;;  %vm2521_vm5 = vcmp.eq.f32.partialorder %v10298_v30, %v5972_v45  ;;  %v3050_v0 = vld [vmem:[#allocation9 + $0x3c0] sm:$0xff] }
 0x31f   : > { %vm2538_vm8 = vmand %vm10321_vm2, %vm2522_vm0  ;;  %5700 = vmatpush.xpose.msk.msrb.mxu2 %vm1923_vm4, %v9646_v61  ;;  %vm10327_vm4 = vcmp.lt.f32.partialorder %v10326_v41, 0.1225  ;;  %vm1889_vm2 = vcmp.eq.f32.partialorder %v6743_v38, %v6071_v7 }
 0x320   : > { %vm2554_vm13 = vmor %vm2538_vm8, %vm10307_vm7  ;;  %5738 = vmatpush.xpose.msk.msrb.mxu0 %vm2333_vm1, %v9646_v61  ;;  %vm10329_vm7 = vnez %v9608_v46  ;;  %vm10330_vm8 = vcmp.lt.f32.partialorder %v10314_v35, 0.1225  ;;  %v10342_v46 = vld [vmem:[#allocation55_spill] sm:$0xff]  ;;  %v3042_v35 = vld [vmem:[#allocation9 + $0x380] sm:$0xff] }
 0x321   : > { %vm1906_vm6 = vmand %vm10324_vm10, %vm1890_vm12  ;;  %vm10332_vm10 = vcmp.lt.f32.partialorder %v10069_v36, 0.1225  ;;  %v6027_v14 = vunpack.i.h.bf16 %v10342_v46  ;;  %v3810_v46 = vld [vmem:[#allocation9 + $0x1b80] sm:$0xff] }
 0x322   : > { %5741 = vmatpush.xpose.msk.msra.mxu1 %vm2554_vm13, %v9646_v61  ;;  %vm1922_vm14 = vmor %vm1906_vm6, %vm10325_vm9 }
 0x323   : > { %vm2120_vm0 = vmand %vm10327_vm4, %vm2104_vm11  ;;  %5701 = vmatpush.xpose.msk.msrb.mxu2 %vm1922_vm14, %v9646_v61  ;;  %2874 = vmatmul.f32.vlgmr.msrb.gmra.mxu0 %v8482_v23  ;;  %vm2103_vm11 = vcmp.eq.f32.partialorder %v6780_v51, %v5982_v42  ;;  %vm2520_vm14 = vcmp.eq.f32.partialorder %v10323_v48, %v5987_v44  ;;  %v2994_v42 = vld [vmem:[#allocation9 + $0x200] sm:$0xff] }
 0x324   : > { %vm2136_vm12 = vmor %vm2120_vm0, %vm10329_vm7  ;;  %vm10334_vm0 = vcmp.lt.f32.partialorder %v6673_v10, 0.1225  ;;  %v3298_v44 = vld [vmem:[#allocation9 + $0xb80] sm:$0xff] }
 0x325   : > { %5711 = vmatpush.xpose.msk.msrb.mxu3 %vm2136_vm12, %v9646_v61  ;;  %vm2537_vm13 = vmand %vm10330_vm8, %vm2521_vm5  ;;  %vm10333_vm5 = vnez %v9900_v55  ;;  %v2986_v55 = vld [vmem:[#allocation9 + $0x1c0] sm:$0xff] }
 0x326   : > { %vm2553_vm1 = vmor %vm2537_vm13, %vm10316_vm15  ;;  %vm10336_vm15 = vnez %v9610_v24  ;;  %vm1888_vm13 = vcmp.eq.f32.partialorder %v10080_v9, %v6086_v5  ;;  %v2946_v5 = vld [vmem:[#allocation9 + $0x80] sm:$0xff] }
 0x327   : > { %5742 = vmatpush.xpose.msk.msra.mxu1 %vm2553_vm1, %v9646_v61  ;;  %vm1905_vm6 = vmand %vm10332_vm10, %vm1889_vm2  ;;  %vm10337_vm2 = vcmp.lt.f32.partialorder %v10326_v41, 0.1225  ;;  %v3362_v41 = vld [vmem:[#allocation9 + $0xd80] sm:$0xff] }
 0x328   : > { %vm1921_vm4 = vmor %vm1905_vm6, %vm10333_vm5  ;;  %vm2102_vm6 = vcmp.eq.f32.partialorder %v6773_v43, %v5997_v37  ;;  %v3282_v37 = vld [vmem:[#allocation9 + $0xb00] sm:$0xff] }
 0x329   : > { %5702 = vmatpush.xpose.msk.msrb.mxu2 %vm1921_vm4, %v9646_v61  ;;  %vm2119_vm12 = vmand %vm10334_vm0, %vm2103_vm11  ;;  %vm10339_vm11 = vcmp.lt.f32.partialorder %v10104_v56, 0.1225  ;;  %vm2519_vm0 = vcmp.eq.f32.partialorder %v6780_v51, %v6002_v4  ;;  %v6116_v51 = vunpack.i.l.bf16 %v8535_v1  ;;  %v3026_v1 = vld [vmem:[#allocation9 + $0x300] sm:$0xff] }
 0x32a   : > { %vm2135_vm8 = vmor %vm2119_vm12, %vm10336_vm15  ;;  %vm10340_vm12 = vnez %v9664_v59  ;;  %v3818_v4 = vld [vmem:[#allocation9 + $0x1bc0] sm:$0xff] }
 0x32b   : > { %5712 = vmatpush.xpose.msk.msrb.mxu3 %vm2135_vm8, %v9646_v61  ;;  %vm2536_vm1 = vmand %vm10337_vm2, %vm2520_vm14  ;;  %vm10341_vm14 = vcmp.lt.f32.partialorder %v6652_v27, 0.1225 }
 0x32c   : > { %vm2552_vm10 = vmor %vm2536_vm1, %vm10329_vm7  ;;  %vm10343_vm7 = vnez %v9620_v19  ;;  %v10356_v19 = vld [vmem:[#allocation35_spill] sm:$0xff] }
 0x32d   : > { %5743 = vmatpush.xpose.msk.msra.mxu1 %vm2552_vm10, %v9646_v61  ;;  %vm1904_vm4 = vmand %vm10339_vm11, %vm1888_vm13  ;;  %vm1887_vm10 = vcmp.eq.f32.partialorder %v10108_v54, %v6101_v39  ;;  %vm10344_vm13 = vcmp.lt.f32.partialorder %v6673_v10, 0.1225  ;;  %v10348_v10 = vld [vmem:[#allocation37_spill] sm:$0xff]  ;;  %v6077_v30 = vunpack.i.h.bf16 %v10356_v19  ;;  %v3266_v39 = vld [vmem:[#allocation9 + $0xa80] sm:$0xff] }
 0x32e   : > { %vm1920_vm8 = vmor %vm1904_vm4, %vm10340_vm12  ;;  %v6062_v24 = vunpack.i.h.bf16 %v10348_v10  ;;  %v3138_v10 = vld [vmem:[#allocation9 + $0x680] sm:$0xff] }
 0x32f   : > { %5703 = vmatpush.xpose.msk.msrb.mxu2 %vm1920_vm8, %v9646_v61  ;;  %vm2118_vm2 = vmand %vm10341_vm14, %vm2102_vm6  ;;  %vm2101_vm8 = vcmp.eq.f32.partialorder %v9892_v28, %v6022_v15  ;;  %vm10345_vm6 = vcmp.lt.f32.partialorder %v10129_v18, 0.1225  ;;  %v2930_v15 = vld [vmem:[#allocation9] sm:$0xff] }
 0x330   : > { %vm2134_vm1 = vmor %vm2118_vm2, %vm10343_vm7  ;;  %vm2518_vm2 = vcmp.eq.f32.partialorder %v6773_v43, %v6027_v14  ;;  %v6131_v43 = vunpack.i.l.bf16 %v8658_v53  ;;  %v3010_v53 = vld [vmem:[#allocation9 + $0x280] sm:$0xff] }
 0x331   : > { %5713 = vmatpush.xpose.msk.msrb.mxu3 %vm2134_vm1, %v9646_v61  ;;  %vm2535_vm11 = vmand %vm10344_vm13, %vm2519_vm0  ;;  %vm10346_vm1 = vnez %v9661_v12  ;;  %vm10347_vm0 = vcmp.lt.f32.partialorder %v9909_v2, 0.1225  ;;  %v3146_v14 = vld [vmem:[#allocation9 + $0x6c0] sm:$0xff] }
 0x332   : > { %vm2551_vm4 = vmor %vm2535_vm11, %vm10336_vm15  ;;  %vm10349_vm15 = vnez %v9631_v34  ;;  %v6102_v34 = vunpack.i.h.bf16 %v10338_v31  ;;  %v3154_v31 = vld [vmem:[#allocation9 + $0x700] sm:$0xff] }
 0x333   : > { %5744 = vmatpush.xpose.msk.msra.mxu1 %vm2551_vm4, %v9646_v61  ;;  %vm1903_vm14 = vmand %vm10345_vm6, %vm1887_vm10  ;;  %vm1886_vm4 = vcmp.eq.f32.partialorder %v10156_v50, %v6116_v51  ;;  %vm10350_vm10 = vcmp.lt.f32.partialorder %v6652_v27, 0.1225  ;;  %v10354_v27 = vld [vmem:[#allocation18_spill] sm:$0xff]  ;;  %v3434_v51 = vld [vmem:[#allocation9 + $0xfc0] sm:$0xff] }
 0x334   : > { %vm1919_vm12 = vmor %vm1903_vm14, %vm10346_vm1  ;;  %vm2100_vm14 = vcmp.eq.f32.partialorder %v10351_v57, %v6047_v49  ;;  %v3802_v49 = vld [vmem:[#allocation9 + $0x1b40] sm:$0xff] }
 0x335   : > { %5704 = vmatpush.xpose.msk.msrb.mxu2 %vm1919_vm12, %v9646_v61  ;;  %vm2117_vm13 = vmand %vm10347_vm0, %vm2101_vm8  ;;  %vm10352_vm8 = vcmp.lt.f32.partialorder %v10172_v17, 0.1225  ;;  %v3786_v19 = vld [vmem:[#allocation9 + $0x1ac0] sm:$0xff] }
 0x336   : > { %vm2133_vm11 = vmor %vm2117_vm13, %vm10349_vm15  ;;  %vm2517_vm13 = vcmp.eq.f32.partialorder %v9892_v28, %v6062_v24  ;;  %v6087_v28 = vunpack.i.h.bf16 %v10331_v60  ;;  %v3170_v60 = vld [vmem:[#allocation9 + $0x780] sm:$0xff] }
 0x337   : > { %5714 = vmatpush.xpose.msk.msrb.mxu3 %vm2133_vm11, %v9646_v61  ;;  %vm2534_vm6 = vmand %vm10350_vm10, %vm2518_vm2  ;;  %vm10353_vm11 = vnez %v9682_v32  ;;  %vm10355_vm2 = vcmp.lt.f32.partialorder %v10354_v27, 0.1225  ;;  %v3250_v24 = vld [vmem:[#allocation9 + $0xa00] sm:$0xff] }
 0x338   : > { %vm2550_vm12 = vmor %vm2534_vm6, %vm10343_vm7  ;;  %vm10357_vm7 = vnez %v9639_v25  ;;  %v10367_v25 = vld [vmem:[#allocation19_spill] sm:$0xff] }
 0x339   : > { %5745 = vmatpush.xpose.msk.msra.mxu1 %vm2550_vm12, %v9646_v61  ;;  %vm1902_vm0 = vmand %vm10352_vm8, %vm1886_vm4  ;;  %vm1885_vm12 = vcmp.eq.f32.partialorder %v10202_v8, %v6131_v43  ;;  %vm10358_vm4 = vcmp.lt.f32.partialorder %v9909_v2, 0.1225  ;;  %v10364_v2 = vld [vmem:[#allocation53_spill] sm:$0xff]  ;;  %v6122_v45 = vunpack.i.h.bf16 %v10367_v25  ;;  %v3794_v43 = vld [vmem:[#allocation9 + $0x1b00] sm:$0xff] }
 0x33a   : > { %vm1918_vm1 = vmor %vm1902_vm0, %vm10353_vm11  ;;  %vm2099_vm0 = vcmp.eq.f32.partialorder %v9942_v62, %v6072_v22  ;;  %vm2515_vm11 = vcmp.eq.f32.partialorder %v9942_v62, %v6092_v6  ;;  %v6107_v47 = vunpack.i.h.bf16 %v10364_v2  ;;  %v3034_v62 = vld [vmem:[#allocation9 + $0x340] sm:$0xff] }
 0x33b   : > { %5705 = vmatpush.xpose.msk.msrb.mxu2 %vm1918_vm1, %v9646_v61  ;;  %vm2116_vm10 = vmand %vm10355_vm2, %vm2100_vm14  ;;  %vm10359_vm14 = vcmp.lt.f32.partialorder %v10215_v29, 0.1225  ;;  %v3418_v22 = vld [vmem:[#allocation9 + $0xf40] sm:$0xff] }
 0x33c   : > { %vm2132_vm6 = vmor %vm2116_vm10, %vm10357_vm7  ;;  %vm2516_vm10 = vcmp.eq.f32.partialorder %v10351_v57, %v6077_v30  ;;  %v3130_v57 = vld [vmem:[#allocation9 + $0x640] sm:$0xff] }
 0x33d   : > { %5715 = vmatpush.xpose.msk.msrb.mxu3 %vm2132_vm6, %v9646_v61  ;;  %vm2533_vm8 = vmand %vm10358_vm4, %vm2517_vm13  ;;  %vm10361_vm13 = vcmp.lt.f32.partialorder %v10290_v40, 0.1225  ;;  %v3122_v30 = vld [vmem:[#allocation9 + $0x600] sm:$0xff] }
 0x33e   : > { %vm2549_vm1 = vmor %vm2533_vm8, %vm10349_vm15  ;;  %vm10362_vm15 = vnez %v9642_v13  ;;  %v10370_v13 = vld [vmem:[#allocation28_spill] sm:$0xff] }
 0x33f   : > { %5746 = vmatpush.xpose.msk.msra.mxu1 %vm2549_vm1, %v9646_v61  ;;  %vm1901_vm2 = vmand %vm10359_vm14, %vm1885_vm12  ;;  %vm2098_vm1 = vcmp.eq.f32.partialorder %v6749_v16, %v6087_v28  ;;  %vm10363_vm12 = vcmp.lt.f32.partialorder %v10354_v27, 0.1225  ;;  %v6137_v7 = vunpack.i.h.bf16 %v10370_v13  ;;  %v3242_v27 = vld [vmem:[#allocation9 + $0x9c0] sm:$0xff] }
 0x340   : > { %vm1917_vm6 = vmor %vm1901_vm2, %vm10263_vm3  ;;  %vm10365_vm2 = vcmp.lt.f32.partialorder %v6614_v20, 0.1225  ;;  %v3002_v20 = vld [vmem:[#allocation9 + $0x240] sm:$0xff] }
 0x341   : > { %5706 = vmatpush.xpose.msk.msrb.mxu2 %vm1917_vm6, %v9646_v61  ;;  %vm2115_vm4 = vmand %vm10361_vm13, %vm2099_vm0  ;;  %vm2097_vm13 = vcmp.eq.f32.partialorder %v6743_v38, %v6102_v34  ;;  %v3234_v28 = vld [vmem:[#allocation9 + $0x980] sm:$0xff] }
 0x342   : > { %vm2131_vm8 = vmor %vm2115_vm4, %vm10362_vm15  ;;  %v3114_v6 = vld [vmem:[#allocation9 + $0x5c0] sm:$0xff] }
 0x343   : > { %5716 = vmatpush.xpose.msk.msrb.mxu3 %vm2131_vm8, %v9646_v61  ;;  %vm2532_vm14 = vmand %vm10363_vm12, %vm2516_vm10  ;;  %vm2514_vm8 = vcmp.eq.f32.partialorder %v6749_v16, %v6107_v47  ;;  %vm10368_vm12 = vcmp.lt.f32.partialorder %v10069_v36, 0.1225  ;;  %v3018_v16 = vld [vmem:[#allocation9 + $0x2c0] sm:$0xff] }
 0x344   : > { %2834 = vmatmul.f32.vlgmr.msrb.gmra.mxu2 %v8482_v23  ;;  %vm2548_vm0 = vmor %vm2532_vm14, %vm10357_vm7  ;;  %vm10366_vm7 = vcmp.lt.f32.partialorder %v10290_v40, 0.1225  ;;  %v6156_v40 = vunpack.i.l.bf16 %v8767_v63  ;;  %v10372_v63 = vld [vmem:[#allocation34_spill] sm:$0xff]  ;;  %v3402_v34 = vld [vmem:[#allocation9 + $0xec0] sm:$0xff] }
 0x345   : > { %5747 = vmatpush.xpose.msk.msra.mxu1 %vm2548_vm0, %v9646_v61  ;;  %vm2114_vm6 = vmand %vm10365_vm2, %vm2098_vm1  ;;  %3954 = vmatpush.msra.mxu2 %v3050_v0  ;;  %vm2096_vm0 = vcmp.eq.f32.partialorder %v10080_v9, %v6117_v52  ;;  %v6142_v48 = vunpack.i.h.bf16 %v10372_v63  ;;  %v3226_v2 = vld [vmem:[#allocation9 + $0x940] sm:$0xff] }
 0x346   : > { %vm2130_vm10 = vmor %vm2114_vm6, %vm10325_vm9  ;;  %vm2513_vm6 = vcmp.eq.f32.partialorder %v6743_v38, %v6122_v45  ;;  %v10375_v38 = vld [vmem:[#allocation40_spill] sm:$0xff]  ;;  %v9194_v45 = vld [vmem:[%s390_s30] sm:$0x7] }
 0x347   : > { %5717 = vmatpush.xpose.msk.msrb.mxu3 %vm2130_vm10, %v9646_v61  ;;  %vm2531_vm4 = vmand %vm10366_vm7, %vm2515_vm11  ;;  %3955 = vmatpush.msra.mxu2 %v3042_v35  ;;  %v6147_v11 = vunpack.i.h.bf16 %v10375_v38  ;;  %v3770_v47 = vld [vmem:[#allocation9 + $0x1a40] sm:$0xff]  ;;  %2906 = vst [vmem:[#allocation4 + $0x30] sm:$0x7] %v9194_v45 }
 0x348   : > { %vm2547_vm1 = vmor %vm2531_vm4, %vm10362_vm15  ;;  %vm2510_vm4 = vcmp.eq.f32.partialorder %v10156_v50, %v6156_v40  ;;  %v3106_v0 = vld [vmem:[#allocation9 + $0x580] sm:$0xff]  ;;  %2907 = vst [vmem:[#allocation4] sm:$0x7] %v9194_v45 }
 0x349   : > { %5748 = vmatpush.xpose.msk.msra.mxu1 %vm2547_vm1, %v9646_v61  ;;  %vm2113_vm14 = vmand %vm10368_vm12, %vm2097_vm13  ;;  %3956 = vmatpush.msra.mxu2 %v3034_v62  ;;  %vm10371_vm13 = vcmp.lt.f32.partialorder %v10104_v56, 0.1225  ;;  %vm2095_vm12 = vcmp.eq.f32.partialorder %v10108_v54, %v6132_v26  ;;  %v3394_v35 = vld [vmem:[#allocation9 + $0xe80] sm:$0xff]  ;;  %v6331_v26 = vmov 0.0   ;;  %2908 = vst [vmem:[#allocation4 + $0x18] sm:$0x7] %v9194_v45 }
 0x34a   : > { %vm2129_vm11 = vmor %vm2113_vm14, %vm10333_vm5  ;;  %v3218_v52 = vld [vmem:[#allocation9 + $0x900] sm:$0xff]  ;;  %2898 = vst [vmem:[#allocation4 + $0x30] sm:$0x78] %v6331_v26 }
 0x34b   : > { %5718 = vmatpush.xpose.msk.msrb.mxu3 %vm2129_vm11, %v9646_v61  ;;  %vm10369_vm15 = vmmov %vm10365_vm2  ;;  %3957 = vmatpush.msra.mxu2 %v3026_v1  ;;  %vm2512_vm11 = vcmp.eq.f32.partialorder %v10080_v9, %v6137_v7  ;;  %v3762_v62 = vld [vmem:[#allocation9 + $0x1a00] sm:$0xff]  ;;  %2899 = vst [vmem:[#allocation4] sm:$0x78] %v6331_v26 }
 0x34c   : > { %vm2530_vm2 = vmand %vm10369_vm15, %vm2514_vm8  ;;  %vm10373_vm8 = vnez %v9664_v59  ;;  %vm10376_vm15 = vcmp.lt.f32.partialorder %v10172_v17, 0.1225  ;;  %v2962_v59 = vld [vmem:[#allocation9 + $0x100] sm:$0xff]  ;;  %2900 = vst [vmem:[#allocation4 + $0x18] sm:$0x78] %v6331_v26 }
 0x34d   : > { %vm2546_vm10 = vmor %vm2530_vm2, %vm10325_vm9  ;;  %3958 = vmatpush.msra.mxu2 %v3018_v16  ;;  %vm10374_vm9 = vcmp.lt.f32.partialorder %v10069_v36, 0.1225  ;;  %v10380_v36 = vld [vmem:[#allocation39_spill] sm:$0xff]  ;;  %v3178_v17 = vld [vmem:[#allocation9 + $0x7c0] sm:$0xff]  ;;  %2901 = vst [vmem:[#allocation4 + $0x10] sm:$0x78] %v6331_v26 }
 0x34e   : > { %5749 = vmatpush.xpose.msk.msra.mxu1 %vm2546_vm10, %v9646_v61  ;;  %vm2112_vm7 = vmand %vm10371_vm13, %vm2096_vm0  ;;  %vm10379_vm10 = vcmp.lt.f32.partialorder %v10129_v18, 0.1225  ;;  %v6151_v9 = vunpack.i.l.bf16 %v10380_v36  ;;  %vm10381_vm13 = vnez %v9661_v12  ;;  %v3290_v12 = vld [vmem:[#allocation9 + $0xb40] sm:$0xff]  ;;  %2902 = vst [vmem:[#allocation4 + $0x8] sm:$0x78] %v6331_v26 }
 0x34f   : > { %vm2128_vm1 = vmor %vm2112_vm7, %vm10373_vm8  ;;  %3959 = vmatpush.msra.mxu2 %v3010_v53  ;;  %v3098_v25 = vld [vmem:[#allocation9 + $0x540] sm:$0xff]  ;;  %2903 = vst [vmem:[#allocation4 + $0x20] sm:$0x78] %v6331_v26 }
 0x350   : > { %5719 = vmatpush.xpose.msk.msrb.mxu3 %vm2128_vm1, %v9646_v61  ;;  %vm2529_vm14 = vmand %vm10374_vm9, %vm2513_vm6  ;;  %vm2511_vm9 = vcmp.eq.f32.partialorder %v10108_v54, %v6147_v11  ;;  %v3306_v54 = vld [vmem:[#allocation9 + $0xbc0] sm:$0xff]  ;;  %2904 = vst [vmem:[#allocation4 + $0x28] sm:$0x78] %v6331_v26 }
 0x351   : > { %vm2545_vm0 = vmor %vm2529_vm14, %vm10333_vm5  ;;  %3960 = vmatpush.msra.mxu2 %v3002_v20  ;;  %vm2094_vm5 = vcmp.eq.f32.partialorder %v10156_v50, %v6142_v48  ;;  %v2432_v50 = vpop.permute.xlu1 %2431  ;;  %3994 = vmatpush.msra.mxu0 %v3306_v54  ;;  %v3386_v1 = vld [vmem:[#allocation9 + $0xe40] sm:$0xff]  ;;  %2905 = vst [vmem:[#allocation4 + $0x38] sm:$0x78] %v6331_v26  ;;  %v3251_v26 = vld [vmem:[#allocation9 + $0xa08] sm:$0xff] }
 0x352   : > { %vm9133_vm2 = vmand %vm10376_vm15, %vm2510_vm4  ;;  %5750 = vmatpush.xpose.msk.msra.mxu1 %vm2545_vm0, %v9646_v61  ;;  %vm10382_vm4 = vcmp.lt.f32.partialorder %v10104_v56, 0.1225  ;;  %v2970_v56 = vld [vmem:[#allocation9 + $0x140] sm:$0xff]  ;;  %2909 = vst [vmem:[#allocation4 + $0x10] sm:$0x7] %v9194_v45 }
 0x353   : > { %vm2111_vm6 = vmand %vm10379_vm10, %vm2095_vm12  ;;  %3961 = vmatpush.msra.mxu2 %v2994_v42  ;;  %3995 = vmatpush.msra.mxu0 %v3298_v44  ;;  %v3210_v40 = vld [vmem:[#allocation9 + $0x8c0] sm:$0xff]  ;;  %2910 = vst [vmem:[#allocation4 + $0x8] sm:$0x7] %v9194_v45 }
 0x354   : > { %vm2127_vm7 = vmor %vm2111_vm6, %vm10381_vm13  ;;  %vm2093_vm6 = vcmp.eq.f32.partialorder %v10202_v8, %v6151_v9  ;;  %v3754_v16 = vld [vmem:[#allocation9 + $0x19c0] sm:$0xff]  ;;  %2911 = vst [vmem:[#allocation4 + $0x20] sm:$0x7] %v9194_v45 }
 0x355   : > { %5720 = vmatpush.xpose.msk.msrb.mxu3 %vm2127_vm7, %v9646_v61  ;;  %vm2528_vm1 = vmand %vm10382_vm4, %vm2512_vm11  ;;  %3962 = vmatpush.msra.mxu2 %v2986_v55  ;;  %vm10385_vm11 = vcmp.lt.f32.partialorder %v10129_v18, 0.1225  ;;  %v2954_v18 = vld [vmem:[#allocation9 + $0xc0] sm:$0xff]  ;;  %2912 = vst [vmem:[#allocation4 + $0x28] sm:$0x7] %v9194_v45 }
 0x356   : > { %vm2544_vm12 = vmor %vm2528_vm1, %vm10373_vm8  ;;  %vm2509_vm1 = vcmp.eq.f32.partialorder %v10202_v8, %v2432_v50  ;;  %3996 = vmatpush.msra.mxu0 %v3290_v12  ;;  %v3090_v13 = vld [vmem:[#allocation9 + $0x500] sm:$0xff]  ;;  %2913 = vst [vmem:[#allocation4 + $0x38] sm:$0x7] %v9194_v45 }
 0x357   : > { %5751 = vmatpush.xpose.msk.msra.mxu1 %vm2544_vm12, %v9646_v61  ;;  %vm10383_vm14 = vmmov %vm10376_vm15  ;;  %vm10384_vm15 = vnez %v9682_v32  ;;  %3963 = vmatpush.msra.mxu2 %v2978_v21  ;;  %v3162_v32 = vld [vmem:[#allocation9 + $0x740] sm:$0xff] }
 0x358   : > { %vm2110_vm0 = vmand %vm10383_vm14, %vm2094_vm5  ;;  %vm10386_vm5 = vcmp.lt.f32.partialorder %v10215_v29, 0.1225  ;;  %3997 = vmatpush.msra.mxu0 %v3282_v37  ;;  %v2938_v29 = vld [vmem:[#allocation9 + $0x40] sm:$0xff] }
 0x359   : > { %vm2126_vm10 = vmor %vm2110_vm0, %vm10384_vm15  ;;  %3964 = vmatpush.msra.mxu2 %v2970_v56  ;;  %v3378_v7 = vld [vmem:[#allocation9 + $0xe00] sm:$0xff] }
 0x35a   : > { %5721 = vmatpush.xpose.msk.msrb.mxu3 %vm2126_vm10, %v9646_v61  ;;  %vm2527_vm7 = vmand %vm10385_vm11, %vm2511_vm9  ;;  %3998 = vmatpush.msra.mxu0 %v3274_v3  ;;  %v3202_v53 = vld [vmem:[#allocation9 + $0x880] sm:$0xff] }
 0x35b   : > { %vm2543_vm8 = vmor %vm2527_vm7, %vm10381_vm13  ;;  %3965 = vmatpush.msra.mxu2 %v2962_v59  ;;  %v3746_v63 = vld [vmem:[#allocation9 + $0x1980] sm:$0xff] }
 0x35c   : > { %5752 = vmatpush.xpose.msk.msra.mxu1 %vm2543_vm8, %v9646_v61  ;;  %vm2109_vm4 = vmand %vm10386_vm5, %vm2093_vm6  ;;  %3999 = vmatpush.msra.mxu0 %v3266_v39  ;;  %v3082_v48 = vld [vmem:[#allocation9 + $0x4c0] sm:$0xff]  ;;  %v3307_v39 = vld [vmem:[#allocation9 + $0xbc8] sm:$0xff] }
 0x35d   : > { %vm2125_vm9 = vmor %vm2109_vm4, %vm10263_vm3  ;;  %3966 = vmatpush.msra.mxu2 %v2954_v18  ;;  %v3370_v20 = vld [vmem:[#allocation9 + $0xdc0] sm:$0xff]  ;;  %v2914_v18 = vld [vmem:[#allocation4 + $0x30] sm:$0x7f] }
 0x35e   : > { %5722 = vmatpush.xpose.msk.msrb.mxu3 %vm2125_vm9, %v9646_v61  ;;  %vm2542_vm13 = vmor %vm9133_vm2, %vm10384_vm15  ;;  %4000 = vmatpush.msra.mxu0 %v3258_v58  ;;  %v3194_v38 = vld [vmem:[#allocation9 + $0x840] sm:$0xff]  ;;  %v3299_v58 = vld [vmem:[#allocation9 + $0xb88] sm:$0xff] }
 0x35f   : > { %vm10387_vm12 = vmmov %vm10386_vm5  ;;  %3967 = vmatpush.msra.mxu2 %v2946_v5  ;;  %v3738_v11 = vld [vmem:[#allocation9 + $0x1940] sm:$0xff]  ;;  %v2755_v37 = vpop.f32.mrf.mxu1 }
 0x360   : > { %vm9174_vm14 = vmand %vm10387_vm12, %vm2509_vm1  ;;  %5753 = vmatpush.xpose.msk.msra.mxu1 %vm2542_vm13, %v9646_v61  ;;  %4001 = vmatpush.msra.mxu0 %v3250_v24  ;;  %v3074_v42 = vld [vmem:[#allocation9 + $0x480] sm:$0xff]  ;;  %v9202_v3 = vsub.f32 %v2755_v37, %v2914_v18  ;;  %v3203_v37 = vld [vmem:[#allocation9 + $0x888] sm:$0xff] }
 0x361   : > { %2854 = vmatmul.f32.vlgmr.msrb.gmra.mxu3 %v8482_v23  ;;  %vm2541_vm2 = vmor %vm9174_vm14, %vm10263_vm3  ;;  %3968 = vmatpush.msra.mxu2 %v2938_v29  ;;  %v3186_v36 = vld [vmem:[#allocation9 + $0x800] sm:$0xff] }
 0x362   : > { %3974 = vmatpush.msra.mxu3 %v3178_v17  ;;  %4002 = vmatpush.msra.mxu0 %v3242_v27  ;;  %v3730_v9 = vld [vmem:[#allocation9 + $0x1900] sm:$0xff] }
 0x363   : > { %3969 = vmatpush.msra.mxu2 %v2930_v15  ;;  %v3066_v55 = vld [vmem:[#allocation9 + $0x440] sm:$0xff] }
 0x364   : > { %3975 = vmatpush.msra.mxu3 %v3170_v60  ;;  %5754 = vmatpush.xpose.msk.msra.mxu1 %vm2541_vm2, %v9646_v61  ;;  %v3426_v61 = vld [vmem:[#allocation9 + $0xf80] sm:$0xff] }
 0x365   : > { %4014 = vmatpush.msrb.mxu2 %v3434_v51  ;;  %4003 = vmatpush.msra.mxu0 %v3234_v28  ;;  %v3354_v21 = vld [vmem:[#allocation9 + $0xd40] sm:$0xff] }
 0x366   : > { %3976 = vmatpush.msra.mxu3 %v3162_v32  ;;  %v3690_v56 = vld [vmem:[#allocation9 + $0x17c0] sm:$0xff]  ;;  %3970 = vmatmul.f32.vlgmr.msra.gmra.mxu2 %v9202_v3 }
 0x367   : > { %2894 = vmatmul.f32.vlgmr.msra.gmra.mxu1 %v8482_v23  ;;  %4015 = vmatpush.msrb.mxu2 %v3426_v61  ;;  %v3410_v23 = vld [vmem:[#allocation9 + $0xf00] sm:$0xff] }
 0x368   : > { %4074 = vmatpush.msrb.mxu1 %v3818_v4  ;;  %3977 = vmatpush.msra.mxu3 %v3154_v31  ;;  %v3722_v50 = vld [vmem:[#allocation9 + $0x18c0] sm:$0xff] }
 0x369   : > { %4016 = vmatpush.msrb.mxu2 %v3418_v22  ;;  %4004 = vmatpush.msra.mxu0 %v3226_v2  ;;  %v3058_v54 = vld [vmem:[#allocation9 + $0x400] sm:$0xff] }
 0x36a   : > { %4075 = vmatpush.msrb.mxu1 %v3810_v46  ;;  %3978 = vmatpush.msra.mxu3 %v3146_v14  ;;  %v3562_v59 = vld [vmem:[#allocation9 + $0x13c0] sm:$0xff]  ;;  %v2915_v46 = vld [vmem:[#allocation4] sm:$0x7f] }
 0x36b   : > { %4017 = vmatpush.msrb.mxu2 %v3410_v23  ;;  %4005 = vmatpush.msra.mxu0 %v3218_v52  ;;  %v3346_v17 = vld [vmem:[#allocation9 + $0xd00] sm:$0xff] }
 0x36c   : > { %4076 = vmatpush.msrb.mxu1 %v3802_v49  ;;  %3979 = vmatpush.msra.mxu3 %v3138_v10  ;;  %v3714_v44 = vld [vmem:[#allocation9 + $0x1880] sm:$0xff]  ;;  %v2775_v10 = vpop.f32.mrf.mxu2 }
 0x36d   : > { %4018 = vmatpush.msrb.mxu2 %v3402_v34  ;;  %4006 = vmatpush.msra.mxu0 %v3210_v40  ;;  %v3682_v12 = vld [vmem:[#allocation9 + $0x1780] sm:$0xff]  ;;  %v9207_v61 = vsub.f32 %v2775_v10, %v2915_v46  ;;  %v3179_v10 = vld [vmem:[#allocation9 + $0x7c8] sm:$0xff] }
 0x36e   : > { %4077 = vmatpush.msrb.mxu1 %v3794_v43  ;;  %3980 = vmatpush.msra.mxu3 %v3130_v57  ;;  %v3554_v60 = vld [vmem:[#allocation9 + $0x1380] sm:$0xff]  ;;  %v3291_v43 = vld [vmem:[#allocation9 + $0xb48] sm:$0xff] }
 0x36f   : > { %4019 = vmatpush.msrb.mxu2 %v3394_v35  ;;  %4007 = vmatpush.msra.mxu0 %v3202_v53  ;;  %v3338_v5 = vld [vmem:[#allocation9 + $0xcc0] sm:$0xff] }
 0x370   : > { %4078 = vmatpush.msrb.mxu1 %v3786_v19  ;;  %3981 = vmatpush.msra.mxu3 %v3122_v30  ;;  %v3706_v8 = vld [vmem:[#allocation9 + $0x1840] sm:$0xff]  ;;  %v3283_v19 = vld [vmem:[#allocation9 + $0xb08] sm:$0xff] }
 0x371   : > { %4020 = vmatpush.msrb.mxu2 %v3386_v1  ;;  %4008 = vmatpush.msra.mxu0 %v3194_v38  ;;  %v3546_v32 = vld [vmem:[#allocation9 + $0x1340] sm:$0xff] }
 0x372   : > { %4079 = vmatpush.msrb.mxu1 %v3778_v33  ;;  %3982 = vmatpush.msra.mxu3 %v3114_v6  ;;  %v3330_v4 = vld [vmem:[#allocation9 + $0xc80] sm:$0xff]  ;;  %v3275_v33 = vld [vmem:[#allocation9 + $0xac8] sm:$0xff] }
 0x373   : > { %4021 = vmatpush.msrb.mxu2 %v3378_v7  ;;  %4009 = vmatpush.msra.mxu0 %v3186_v36  ;;  %v3698_v29 = vld [vmem:[#allocation9 + $0x1800] sm:$0xff]  ;;  %v3243_v7 = vld [vmem:[#allocation9 + $0x9c8] sm:$0xff] }
 0x374   : > { %4080 = vmatpush.msrb.mxu1 %v3770_v47  ;;  %3983 = vmatpush.msra.mxu3 %v3106_v0  ;;  %v3674_v31 = vld [vmem:[#allocation9 + $0x1740] sm:$0xff]  ;;  %v3267_v47 = vld [vmem:[#allocation9 + $0xa88] sm:$0xff] }
 0x375   : > { %4022 = vmatpush.msrb.mxu2 %v3370_v20  ;;  %4054 = vmatpush.msrb.mxu0 %v3690_v56  ;;  %v3538_v15 = vld [vmem:[#allocation9 + $0x1300] sm:$0xff]  ;;  %v3235_v20 = vld [vmem:[#allocation9 + $0x988] sm:$0xff] }
 0x376   : > { %4081 = vmatpush.msrb.mxu1 %v3762_v62  ;;  %3984 = vmatpush.msra.mxu3 %v3098_v25  ;;  %v3322_v14 = vld [vmem:[#allocation9 + $0xc40] sm:$0xff]  ;;  %v3259_v62 = vld [vmem:[#allocation9 + $0xa48] sm:$0xff] }
 0x377   : > { %4023 = vmatpush.msrb.mxu2 %v3362_v41  ;;  %4055 = vmatpush.msrb.mxu0 %v3682_v12  ;;  %v3666_v51 = vld [vmem:[#allocation9 + $0x1700] sm:$0xff]  ;;  %v3227_v41 = vld [vmem:[#allocation9 + $0x948] sm:$0xff] }
 0x378   : > { %4082 = vmatpush.msrb.mxu1 %v3754_v16  ;;  %3985 = vmatpush.msra.mxu3 %v3090_v13  ;;  %v3530_v49 = vld [vmem:[#allocation9 + $0x12c0] sm:$0xff] }
 0x379   : > { %4024 = vmatpush.msrb.mxu2 %v3354_v21  ;;  %4056 = vmatpush.msrb.mxu0 %v3674_v31  ;;  %v3314_v24 = vld [vmem:[#allocation9 + $0xc00] sm:$0xff]  ;;  %v3219_v21 = vld [vmem:[#allocation9 + $0x908] sm:$0xff] }
 0x37a   : > { %4083 = vmatpush.msrb.mxu1 %v3746_v63  ;;  %3986 = vmatpush.msra.mxu3 %v3082_v48  ;;  %v3522_v57 = vld [vmem:[#allocation9 + $0x1280] sm:$0xff]  ;;  %v3195_v31 = vld [vmem:[#allocation9 + $0x848] sm:$0xff] }
 0x37b   : > { %4025 = vmatpush.msrb.mxu2 %v3346_v17  ;;  %4057 = vmatpush.msrb.mxu0 %v3666_v51  ;;  %v3946_v22 = vld [vmem:[#allocation9 + $0x1fc0] sm:$0xff]  ;;  %v2917_v17 = vld [vmem:[#allocation4 + $0x10] sm:$0x7f] }
 0x37c   : > { %4084 = vmatpush.msrb.mxu1 %v3738_v11  ;;  %3987 = vmatpush.msra.mxu3 %v3074_v42  ;;  %v3658_v27 = vld [vmem:[#allocation9 + $0x16c0] sm:$0xff] }
 0x37d   : > { %4026 = vmatpush.msrb.mxu2 %v3338_v5  ;;  %v3514_v30 = vld [vmem:[#allocation9 + $0x1240] sm:$0xff]  ;;  %4058 = vmatpush.msrb.mxu0 %v3658_v27  ;;  %v3011_v27 = vld [vmem:[#allocation9 + $0x288] sm:$0xff] }
 0x37e   : > { %4085 = vmatpush.msrb.mxu1 %v3730_v9  ;;  %3988 = vmatpush.msra.mxu3 %v3066_v55  ;;  %v3938_v23 = vld [vmem:[#allocation9 + $0x1f80] sm:$0xff] }
 0x37f   : > { %4027 = vmatpush.msrb.mxu2 %v3330_v4  ;;  %v3650_v28 = vld [vmem:[#allocation9 + $0x1680] sm:$0xff]  ;;  %v3043_v4 = vld [vmem:[#allocation9 + $0x388] sm:$0xff] }
 0x380   : > { %4086 = vmatpush.msrb.mxu1 %v3722_v50  ;;  %3989 = vmatpush.msra.mxu3 %v3058_v54  ;;  %v3506_v6 = vld [vmem:[#allocation9 + $0x1200] sm:$0xff]  ;;  %v2916_v50 = vld [vmem:[#allocation4 + $0x18] sm:$0x7f] }
 0x381   : > { %4028 = vmatpush.msrb.mxu2 %v3322_v14  ;;  %3990 = vmatmul.f32.vlgmr.msra.gmra.mxu3 %v9207_v61  ;;  %v3930_v34 = vld [vmem:[#allocation9 + $0x1f40] sm:$0xff]  ;;  %v3187_v14 = vld [vmem:[#allocation9 + $0x808] sm:$0xff] }
 0x382   : > { %4034 = vmatpush.msrb.mxu3 %v3562_v59  ;;  %4087 = vmatpush.msrb.mxu1 %v3714_v44  ;;  %v3642_v2 = vld [vmem:[#allocation9 + $0x1640] sm:$0xff]  ;;  %v3211_v44 = vld [vmem:[#allocation9 + $0x8c8] sm:$0xff] }
 0x383   : > { %4029 = vmatpush.msrb.mxu2 %v3314_v24  ;;  %v3498_v0 = vld [vmem:[#allocation9 + $0x11c0] sm:$0xff]  ;;  %4059 = vmatpush.msrb.mxu0 %v3650_v28  ;;  %v3019_v24 = vld [vmem:[#allocation9 + $0x2c8] sm:$0xff] }
 0x384   : > { %4035 = vmatpush.msrb.mxu3 %v3554_v60  ;;  %4088 = vmatpush.msrb.mxu1 %v3706_v8  ;;  %v3922_v35 = vld [vmem:[#allocation9 + $0x1f00] sm:$0xff]  ;;  %v3051_v60 = vld [vmem:[#allocation9 + $0x3c8] sm:$0xff] }
 0x385   : > { %4094 = vmatpush.msra.mxu2 %v3946_v22  ;;  %v3634_v52 = vld [vmem:[#allocation9 + $0x1600] sm:$0xff]  ;;  %4060 = vmatpush.msrb.mxu0 %v3642_v2  ;;  %v3171_v22 = vld [vmem:[#allocation9 + $0x788] sm:$0xff] }
 0x386   : > { %4036 = vmatpush.msrb.mxu3 %v3546_v32  ;;  %4089 = vmatpush.msrb.mxu1 %v3698_v29  ;;  %v3490_v25 = vld [vmem:[#allocation9 + $0x1180] sm:$0xff]  ;;  %v3819_v28 = vld [vmem:[#allocation9 + $0x1bc8] sm:$0xff] }
 0x387   : > { %4095 = vmatpush.msra.mxu2 %v3938_v23  ;;  %v3914_v45 = vld [vmem:[#allocation9 + $0x1ec0] sm:$0xff]  ;;  %4061 = vmatpush.msrb.mxu0 %v3634_v52  ;;  %v2995_v2 = vld [vmem:[#allocation9 + $0x208] sm:$0xff] }
 0x388   : > { %4154 = vmatpush.msra.mxu1 %v3307_v39  ;;  %4037 = vmatpush.msrb.mxu3 %v3538_v15  ;;  %v3626_v1 = vld [vmem:[#allocation9 + $0x15c0] sm:$0xff]  ;;  %v3035_v15 = vld [vmem:[#allocation9 + $0x348] sm:$0xff] }
 0x389   : > { %4096 = vmatpush.msra.mxu2 %v3930_v34  ;;  %v3482_v40 = vld [vmem:[#allocation9 + $0x1140] sm:$0xff]  ;;  %4062 = vmatpush.msrb.mxu0 %v3626_v1  ;;  %v3811_v34 = vld [vmem:[#allocation9 + $0x1b88] sm:$0xff] }
 0x38a   : > { %4155 = vmatpush.msra.mxu1 %v3299_v58  ;;  %4038 = vmatpush.msrb.mxu3 %v3530_v49  ;;  %v3906_v16 = vld [vmem:[#allocation9 + $0x1e80] sm:$0xff]  ;;  %v3027_v58 = vld [vmem:[#allocation9 + $0x308] sm:$0xff] }
 0x38b   : > { %4097 = vmatpush.msra.mxu2 %v3922_v35  ;;  %v3618_v13 = vld [vmem:[#allocation9 + $0x1580] sm:$0xff]  ;;  %v2987_v35 = vld [vmem:[#allocation9 + $0x1c8] sm:$0xff] }
 0x38c   : > { %4156 = vmatpush.msra.mxu1 %v3291_v43  ;;  %4039 = vmatpush.msrb.mxu3 %v3522_v57  ;;  %v3474_v53 = vld [vmem:[#allocation9 + $0x1100] sm:$0xff]  ;;  %v3163_v52 = vld [vmem:[#allocation9 + $0x748] sm:$0xff] }
 0x38d   : > { %4098 = vmatpush.msra.mxu2 %v3914_v45  ;;  %v3898_v63 = vld [vmem:[#allocation9 + $0x1e40] sm:$0xff]  ;;  %4063 = vmatpush.msrb.mxu0 %v3618_v13  ;;  %v3795_v45 = vld [vmem:[#allocation9 + $0x1b08] sm:$0xff] }
 0x38e   : > { %4157 = vmatpush.msra.mxu1 %v3283_v19  ;;  %4040 = vmatpush.msrb.mxu3 %v3514_v30  ;;  %v3610_v48 = vld [vmem:[#allocation9 + $0x1540] sm:$0xff]  ;;  %v2979_v1 = vld [vmem:[#allocation9 + $0x188] sm:$0xff] }
 0x38f   : > { %v3466_v38 = vld [vmem:[#allocation9 + $0x10c0] sm:$0xff]  ;;  %4099 = vmatpush.msra.mxu2 %v3906_v16  ;;  %4064 = vmatpush.msrb.mxu0 %v3610_v48  ;;  %v2795_v12 = vpop.f32.mrf.mxu3  ;;  %v2971_v16 = vld [vmem:[#allocation9 + $0x148] sm:$0xff] }
 0x390   : > { %4158 = vmatpush.msra.mxu1 %v3275_v33  ;;  %4041 = vmatpush.msrb.mxu3 %v3506_v6  ;;  %v3890_v11 = vld [vmem:[#allocation9 + $0x1e00] sm:$0xff]  ;;  %v9210_v8 = vsub.f32 %v2795_v12, %v2916_v50  ;;  %v3003_v33 = vld [vmem:[#allocation9 + $0x248] sm:$0xff] }
 0x391   : > { %v3602_v42 = vld [vmem:[#allocation9 + $0x1500] sm:$0xff]  ;;  %4100 = vmatpush.msra.mxu2 %v3898_v63  ;;  %v3411_v13 = vld [vmem:[#allocation9 + $0xf08] sm:$0xff] }
 0x392   : > { %4159 = vmatpush.msra.mxu1 %v3267_v47  ;;  %4042 = vmatpush.msrb.mxu3 %v3498_v0  ;;  %v3458_v36 = vld [vmem:[#allocation9 + $0x1080] sm:$0xff]  ;;  %v3435_v47 = vld [vmem:[#allocation9 + $0xfc8] sm:$0xff] }
 0x393   : > { %v3882_v9 = vld [vmem:[#allocation9 + $0x1dc0] sm:$0xff]  ;;  %4101 = vmatpush.msra.mxu2 %v3890_v11  ;;  %4065 = vmatpush.msrb.mxu0 %v3602_v42  ;;  %v3803_v0 = vld [vmem:[#allocation9 + $0x1b48] sm:$0xff] }
 0x394   : > { %4160 = vmatpush.msra.mxu1 %v3259_v62  ;;  %4043 = vmatpush.msrb.mxu3 %v3490_v25  ;;  %v3594_v55 = vld [vmem:[#allocation9 + $0x14c0] sm:$0xff]  ;;  %v3427_v62 = vld [vmem:[#allocation9 + $0xf88] sm:$0xff] }
 0x395   : > { %v3450_v56 = vld [vmem:[#allocation9 + $0x1040] sm:$0xff]  ;;  %4102 = vmatpush.msra.mxu2 %v3882_v9  ;;  %4066 = vmatpush.msrb.mxu0 %v3594_v55  ;;  %v2815_v5 = vpop.f32.mrf.mxu1  ;;  %v3155_v25 = vld [vmem:[#allocation9 + $0x708] sm:$0xff] }
 0x396   : > { %4161 = vmatpush.msra.mxu1 %v3251_v26  ;;  %4044 = vmatpush.msrb.mxu3 %v3482_v40  ;;  %v3874_v54 = vld [vmem:[#allocation9 + $0x1d80] sm:$0xff]  ;;  %v9212_v32 = vsub.f32 %v2815_v5, %v2917_v17  ;;  %v3419_v26 = vld [vmem:[#allocation9 + $0xf48] sm:$0xff] }
 0x397   : > { %v3586_v59 = vld [vmem:[#allocation9 + $0x1480] sm:$0xff]  ;;  %4103 = vmatpush.msra.mxu2 %v3874_v54  ;;  %4010 = vmatmul.f32.vlgmr.msra.gmra.mxu0 %v9210_v8  ;;  %v3787_v40 = vld [vmem:[#allocation9 + $0x1ac8] sm:$0xff] }
 0x398   : > { %4162 = vmatpush.msra.mxu1 %v3243_v7  ;;  %4045 = vmatpush.msrb.mxu3 %v3474_v53  ;;  %v3442_v18 = vld [vmem:[#allocation9 + $0x1000] sm:$0xff]  ;;  %v3147_v7 = vld [vmem:[#allocation9 + $0x6c8] sm:$0xff] }
 0x399   : > { %4067 = vmatpush.msrb.mxu0 %v3586_v59  ;;  %v3866_v29 = vld [vmem:[#allocation9 + $0x1d40] sm:$0xff]  ;;  %4030 = vmatmul.f32.vlgmr.msrb.gmra.mxu2 %v9212_v32  ;;  %v3779_v53 = vld [vmem:[#allocation9 + $0x1a88] sm:$0xff] }
 0x39a   : > { %4163 = vmatpush.msra.mxu1 %v3235_v20  ;;  %4046 = vmatpush.msrb.mxu3 %v3466_v38  ;;  %v3578_v39 = vld [vmem:[#allocation9 + $0x1440] sm:$0xff]  ;;  %v2963_v63 = vld [vmem:[#allocation9 + $0x108] sm:$0xff] }
 0x39b   : > { %v3858_v46 = vld [vmem:[#allocation9 + $0x1d00] sm:$0xff]  ;;  %4104 = vmatpush.msra.mxu2 %v3866_v29  ;;  %4068 = vmatpush.msrb.mxu0 %v3578_v39  ;;  %v3403_v48 = vld [vmem:[#allocation9 + $0xec8] sm:$0xff] }
 0x39c   : > { %4164 = vmatpush.msra.mxu1 %v3227_v41  ;;  %4047 = vmatpush.msrb.mxu3 %v3458_v36  ;;  %v3570_v51 = vld [vmem:[#allocation9 + $0x1400] sm:$0xff]  ;;  %v3139_v20 = vld [vmem:[#allocation9 + $0x688] sm:$0xff] }
 0x39d   : > { %v3850_v49 = vld [vmem:[#allocation9 + $0x1cc0] sm:$0xff]  ;;  %4105 = vmatpush.msra.mxu2 %v3858_v46  ;;  %4069 = vmatpush.msrb.mxu0 %v3570_v51  ;;  %v3771_v38 = vld [vmem:[#allocation9 + $0x1a48] sm:$0xff] }
 0x39e   : > { %4165 = vmatpush.msra.mxu1 %v3219_v21  ;;  %4048 = vmatpush.msrb.mxu3 %v3450_v56  ;;  %v3842_v43 = vld [vmem:[#allocation9 + $0x1c80] sm:$0xff]  ;;  %v2955_v11 = vld [vmem:[#allocation9 + $0xc8] sm:$0xff] }
 0x39f   : > { %v2920_v57 = vld [vmem:[#allocation4 + $0x28] sm:$0x7f]  ;;  %4106 = vmatpush.msra.mxu2 %v3850_v49  ;;  %4134 = vmatpush.msra.mxu0 %v3179_v10  ;;  %v3395_v42 = vld [vmem:[#allocation9 + $0xe88] sm:$0xff] }
 0x3a0   : > { %4166 = vmatpush.msra.mxu1 %v3211_v44  ;;  %4049 = vmatpush.msrb.mxu3 %v3442_v18  ;;  %v3834_v19 = vld [vmem:[#allocation9 + $0x1c40] sm:$0xff]  ;;  %v2875_v30 = vpop.f32.mrf.mxu0  ;;  %v3131_v41 = vld [vmem:[#allocation9 + $0x648] sm:$0xff] }
 0x3a1   : > { %4107 = vmatpush.msra.mxu2 %v3842_v43  ;;  %v9216_v23 = vsub.f32 %v2875_v30, %v2920_v57  ;;  %4135 = vmatpush.msra.mxu0 %v3171_v22  ;;  %v3826_v6 = vld [vmem:[#allocation9 + $0x1c00] sm:$0xff]  ;;  %v3763_v36 = vld [vmem:[#allocation9 + $0x1a08] sm:$0xff]  ;;  %v3308_v57 = vld [vmem:[#allocation9 + $0xbd0] sm:$0xff] }
 0x3a2   : > { %4114 = vmatpush.msra.mxu3 %v3051_v60  ;;  %4167 = vmatpush.msra.mxu1 %v3203_v37  ;;  %v2947_v9 = vld [vmem:[#allocation9 + $0x88] sm:$0xff]  ;;  %v3300_v30 = vld [vmem:[#allocation9 + $0xb90] sm:$0xff] }
 0x3a3   : > { %4108 = vmatpush.msra.mxu2 %v3834_v19  ;;  %4090 = vmatmul.f32.vlgmr.msrb.gmra.mxu1 %v9216_v23  ;;  %v3387_v55 = vld [vmem:[#allocation9 + $0xe48] sm:$0xff]  ;;  %v2918_v19 = vld [vmem:[#allocation4 + $0x8] sm:$0x7f] }
 0x3a4   : > { %4115 = vmatpush.msra.mxu3 %v3043_v4  ;;  %4168 = vmatpush.msra.mxu1 %v3195_v31  ;;  %v3123_v21 = vld [vmem:[#allocation9 + $0x608] sm:$0xff] }
 0x3a5   : > { %4109 = vmatpush.msra.mxu2 %v3826_v6  ;;  %4136 = vmatpush.msra.mxu0 %v3163_v52  ;;  %v3755_v56 = vld [vmem:[#allocation9 + $0x19c8] sm:$0xff]  ;;  %v3292_v6 = vld [vmem:[#allocation9 + $0xb50] sm:$0xff] }
 0x3a6   : > { %4116 = vmatpush.msra.mxu3 %v3035_v15  ;;  %4169 = vmatpush.msra.mxu1 %v3187_v14  ;;  %v2939_v50 = vld [vmem:[#allocation9 + $0x48] sm:$0xff] }
 0x3a7   : > { %4174 = vmatpush.msrb.mxu2 %v3435_v47  ;;  %4137 = vmatpush.msra.mxu0 %v3155_v25  ;;  %v3379_v54 = vld [vmem:[#allocation9 + $0xe08] sm:$0xff]  ;;  %v3284_v47 = vld [vmem:[#allocation9 + $0xb10] sm:$0xff] }
 0x3a8   : > { %4117 = vmatpush.msra.mxu3 %v3027_v58  ;;  %4234 = vmatpush.msrb.mxu1 %v3819_v28  ;;  %v3115_v59 = vld [vmem:[#allocation9 + $0x5c8] sm:$0xff] }
 0x3a9   : > { %4175 = vmatpush.msrb.mxu2 %v3427_v62  ;;  %4138 = vmatpush.msra.mxu0 %v3147_v7  ;;  %v3747_v17 = vld [vmem:[#allocation9 + $0x1988] sm:$0xff]  ;;  %v3268_v62 = vld [vmem:[#allocation9 + $0xa90] sm:$0xff] }
 0x3aa   : > { %4118 = vmatpush.msra.mxu3 %v3019_v24  ;;  %4235 = vmatpush.msrb.mxu1 %v3811_v34  ;;  %v2931_v44 = vld [vmem:[#allocation9 + $0x8] sm:$0xff]  ;;  %v3236_v7 = vld [vmem:[#allocation9 + $0x990] sm:$0xff] }
 0x3ab   : > { %4170 = vmatmul.f32.vlgmr.msra.gmra.mxu1 %v9210_v8  ;;  %4176 = vmatpush.msrb.mxu2 %v3419_v26  ;;  %v3371_v18 = vld [vmem:[#allocation9 + $0xdc8] sm:$0xff]  ;;  %v3252_v26 = vld [vmem:[#allocation9 + $0xa10] sm:$0xff] }
 0x3ac   : > { %4119 = vmatpush.msra.mxu3 %v3011_v27  ;;  %4236 = vmatpush.msrb.mxu1 %v3803_v0  ;;  %v3107_v12 = vld [vmem:[#allocation9 + $0x588] sm:$0xff] }
 0x3ad   : > { %4177 = vmatpush.msrb.mxu2 %v3411_v13  ;;  %4139 = vmatpush.msra.mxu0 %v3139_v20  ;;  %v3739_v60 = vld [vmem:[#allocation9 + $0x1948] sm:$0xff]  ;;  %v3220_v20 = vld [vmem:[#allocation9 + $0x910] sm:$0xff] }
 0x3ae   : > { %4120 = vmatpush.msra.mxu3 %v3003_v33  ;;  %4237 = vmatpush.msrb.mxu1 %v3795_v45  ;;  %v3363_v5 = vld [vmem:[#allocation9 + $0xd88] sm:$0xff]  ;;  %v3260_v45 = vld [vmem:[#allocation9 + $0xa50] sm:$0xff] }
 0x3af   : > { %4178 = vmatpush.msrb.mxu2 %v3403_v48  ;;  %4140 = vmatpush.msra.mxu0 %v3131_v41  ;;  %v3099_v37 = vld [vmem:[#allocation9 + $0x548] sm:$0xff]  ;;  %v3204_v41 = vld [vmem:[#allocation9 + $0x890] sm:$0xff] }
 0x3b0   : > { %4121 = vmatpush.msra.mxu3 %v2995_v2  ;;  %4238 = vmatpush.msrb.mxu1 %v3787_v40  ;;  %v3731_v4 = vld [vmem:[#allocation9 + $0x1908] sm:$0xff] }
 0x3b1   : > { %4179 = vmatpush.msrb.mxu2 %v3395_v42  ;;  %4141 = vmatpush.msra.mxu0 %v3123_v21  ;;  %v3355_v29 = vld [vmem:[#allocation9 + $0xd48] sm:$0xff]  ;;  %v3196_v21 = vld [vmem:[#allocation9 + $0x850] sm:$0xff] }
 0x3b2   : > { %4122 = vmatpush.msra.mxu3 %v2987_v35  ;;  %4239 = vmatpush.msrb.mxu1 %v3779_v53  ;;  %v3091_v31 = vld [vmem:[#allocation9 + $0x508] sm:$0xff]  ;;  %v3276_v35 = vld [vmem:[#allocation9 + $0xad0] sm:$0xff] }
 0x3b3   : > { %4180 = vmatpush.msrb.mxu2 %v3387_v55  ;;  %4142 = vmatpush.msra.mxu0 %v3115_v59  ;;  %v3723_v39 = vld [vmem:[#allocation9 + $0x18c8] sm:$0xff]  ;;  %v2921_v55 = vld [vmem:[#allocation4 + $0x38] sm:$0x7f] }
 0x3b4   : > { %4123 = vmatpush.msra.mxu3 %v2979_v1  ;;  %4240 = vmatpush.msrb.mxu1 %v3771_v38  ;;  %v3347_v15 = vld [vmem:[#allocation9 + $0xd08] sm:$0xff] }
 0x3b5   : > { %4181 = vmatpush.msrb.mxu2 %v3379_v54  ;;  %4143 = vmatpush.msra.mxu0 %v3107_v12  ;;  %v3083_v46 = vld [vmem:[#allocation9 + $0x4c8] sm:$0xff] }
 0x3b6   : > { %4124 = vmatpush.msra.mxu3 %v2971_v16  ;;  %4241 = vmatpush.msrb.mxu1 %v3763_v36  ;;  %v3715_v14 = vld [vmem:[#allocation9 + $0x1888] sm:$0xff]  ;;  %v3244_v16 = vld [vmem:[#allocation9 + $0x9d0] sm:$0xff] }
 0x3b7   : > { %4182 = vmatpush.msrb.mxu2 %v3371_v18  ;;  %4144 = vmatpush.msra.mxu0 %v3099_v37  ;;  %v3339_v51 = vld [vmem:[#allocation9 + $0xcc8] sm:$0xff] }
 0x3b8   : > { %4125 = vmatpush.msra.mxu3 %v2963_v63  ;;  %4242 = vmatpush.msrb.mxu1 %v3755_v56  ;;  %v3075_v58 = vld [vmem:[#allocation9 + $0x488] sm:$0xff]  ;;  %v3228_v63 = vld [vmem:[#allocation9 + $0x950] sm:$0xff] }
 0x3b9   : > { %4183 = vmatpush.msrb.mxu2 %v3363_v5  ;;  %4145 = vmatpush.msra.mxu0 %v3091_v31  ;;  %v3707_v49 = vld [vmem:[#allocation9 + $0x1848] sm:$0xff] }
 0x3ba   : > { %4126 = vmatpush.msra.mxu3 %v2955_v11  ;;  %4243 = vmatpush.msrb.mxu1 %v3747_v17  ;;  %v3331_v10 = vld [vmem:[#allocation9 + $0xc88] sm:$0xff]  ;;  %v3212_v11 = vld [vmem:[#allocation9 + $0x8d0] sm:$0xff] }
 0x3bb   : > { %4184 = vmatpush.msrb.mxu2 %v3355_v29  ;;  %4146 = vmatpush.msra.mxu0 %v3083_v46  ;;  %v3699_v24 = vld [vmem:[#allocation9 + $0x1808] sm:$0xff] }
 0x3bc   : > { %4127 = vmatpush.msra.mxu3 %v2947_v9  ;;  %4244 = vmatpush.msrb.mxu1 %v3739_v60  ;;  %v3067_v43 = vld [vmem:[#allocation9 + $0x448] sm:$0xff]  ;;  %v2919_v9 = vld [vmem:[#allocation4 + $0x20] sm:$0x7f]  ;;  %v3188_v60 = vld [vmem:[#allocation9 + $0x810] sm:$0xff] }
 0x3bd   : > { %4185 = vmatpush.msrb.mxu2 %v3347_v15  ;;  %4147 = vmatpush.msra.mxu0 %v3075_v58  ;;  %v3323_v22 = vld [vmem:[#allocation9 + $0xc48] sm:$0xff]  ;;  %v3820_v15 = vld [vmem:[#allocation9 + $0x1bd0] sm:$0xff] }
 0x3be   : > { %4128 = vmatpush.msra.mxu3 %v2939_v50  ;;  %4245 = vmatpush.msrb.mxu1 %v3731_v4  ;;  %v3059_v27 = vld [vmem:[#allocation9 + $0x408] sm:$0xff] }
 0x3bf   : > { %4186 = vmatpush.msrb.mxu2 %v3339_v51  ;;  %4148 = vmatpush.msra.mxu0 %v3067_v43  ;;  %v3315_v28 = vld [vmem:[#allocation9 + $0xc08] sm:$0xff]  ;;  %v3052_v51 = vld [vmem:[#allocation9 + $0x3d0] sm:$0xff] }
 0x3c0   : > { %4129 = vmatpush.msra.mxu3 %v2931_v44  ;;  %4246 = vmatpush.msrb.mxu1 %v3723_v39  ;;  %v3563_v2 = vld [vmem:[#allocation9 + $0x13c8] sm:$0xff] }
 0x3c1   : > { %4187 = vmatpush.msrb.mxu2 %v3331_v10  ;;  %4149 = vmatpush.msra.mxu0 %v3059_v27  ;;  %v3555_v0 = vld [vmem:[#allocation9 + $0x1388] sm:$0xff]  ;;  %v3044_v10 = vld [vmem:[#allocation9 + $0x390] sm:$0xff] }
 0x3c2   : > { %4247 = vmatpush.msrb.mxu1 %v3715_v14  ;;  %v3547_v52 = vld [vmem:[#allocation9 + $0x1348] sm:$0xff]  ;;  %v3804_v27 = vld [vmem:[#allocation9 + $0x1b50] sm:$0xff] }
 0x3c3   : > { %4188 = vmatpush.msrb.mxu2 %v3323_v22  ;;  %v3539_v25 = vld [vmem:[#allocation9 + $0x1308] sm:$0xff]  ;;  %v3036_v22 = vld [vmem:[#allocation9 + $0x350] sm:$0xff] }
 0x3c4   : > { %4248 = vmatpush.msrb.mxu1 %v3707_v49  ;;  %v3531_v1 = vld [vmem:[#allocation9 + $0x12c8] sm:$0xff] }
 0x3c5   : > { %4189 = vmatpush.msrb.mxu2 %v3315_v28  ;;  %v3523_v40 = vld [vmem:[#allocation9 + $0x1288] sm:$0xff]  ;;  %v3028_v28 = vld [vmem:[#allocation9 + $0x310] sm:$0xff] }
 0x3c6   : > { %4249 = vmatpush.msrb.mxu1 %v3699_v24  ;;  %v3515_v13 = vld [vmem:[#allocation9 + $0x1248] sm:$0xff]  ;;  %v3812_v24 = vld [vmem:[#allocation9 + $0x1b90] sm:$0xff] }
 0x3c7   : > { %v2835_v33 = vpop.f32.mrf.mxu2  ;;  %4250 = vmatmul.f32.vlgmr.msrb.gmra.mxu1 %v9216_v23  ;;  %v3507_v53 = vld [vmem:[#allocation9 + $0x1208] sm:$0xff] }
 0x3c8   : > { %4314 = vmatpush.msra.mxu1 %v3308_v57  ;;  %v9221_v34 = vsub.f32 %v2835_v33, %v2918_v19  ;;  %v3499_v48 = vld [vmem:[#allocation9 + $0x11c8] sm:$0xff]  ;;  %v3796_v33 = vld [vmem:[#allocation9 + $0x1b10] sm:$0xff] }
 0x3c9   : > { %v3491_v38 = vld [vmem:[#allocation9 + $0x1188] sm:$0xff] }
 0x3ca   : > { %4315 = vmatpush.msra.mxu1 %v3300_v30  ;;  %4050 = vmatmul.f32.vlgmr.msrb.gmra.mxu3 %v9221_v34  ;;  %v3483_v42 = vld [vmem:[#allocation9 + $0x1148] sm:$0xff] }
 0x3cb   : > { %4194 = vmatpush.msrb.mxu3 %v3563_v2  ;;  %v3475_v36 = vld [vmem:[#allocation9 + $0x1108] sm:$0xff] }
 0x3cc   : > { %4316 = vmatpush.msra.mxu1 %v3292_v6  ;;  %v3467_v56 = vld [vmem:[#allocation9 + $0x10c8] sm:$0xff] }
 0x3cd   : > { %4195 = vmatpush.msrb.mxu3 %v3555_v0  ;;  %v3691_v44 = vld [vmem:[#allocation9 + $0x17c8] sm:$0xff]  ;;  %v3788_v0 = vld [vmem:[#allocation9 + $0x1ad0] sm:$0xff] }
 0x3ce   : > { %4317 = vmatpush.msra.mxu1 %v3284_v47  ;;  %v3947_v18 = vld [vmem:[#allocation9 + $0x1fc8] sm:$0xff]  ;;  %v3020_v47 = vld [vmem:[#allocation9 + $0x2d0] sm:$0xff] }
 0x3cf   : > { %4196 = vmatpush.msrb.mxu3 %v3547_v52  ;;  %v3459_v12 = vld [vmem:[#allocation9 + $0x1088] sm:$0xff] }
 0x3d0   : > { %4318 = vmatpush.msra.mxu1 %v3276_v35  ;;  %v3683_v5 = vld [vmem:[#allocation9 + $0x1788] sm:$0xff] }
 0x3d1   : > { %4197 = vmatpush.msrb.mxu3 %v3539_v25  ;;  %v3939_v37 = vld [vmem:[#allocation9 + $0x1f88] sm:$0xff]  ;;  %v3780_v25 = vld [vmem:[#allocation9 + $0x1a90] sm:$0xff] }
 0x3d2   : > { %4319 = vmatpush.msra.mxu1 %v3268_v62  ;;  %4130 = vmatmul.f32.vlgmr.msra.gmra.mxu3 %v9202_v3  ;;  %v3451_v4 = vld [vmem:[#allocation9 + $0x1048] sm:$0xff]  ;;  %v3012_v62 = vld [vmem:[#allocation9 + $0x290] sm:$0xff] }
 0x3d3   : > { %4198 = vmatpush.msrb.mxu3 %v3531_v1  ;;  %v3675_v29 = vld [vmem:[#allocation9 + $0x1748] sm:$0xff] }
 0x3d4   : > { %4320 = vmatpush.msra.mxu1 %v3260_v45  ;;  %v3931_v31 = vld [vmem:[#allocation9 + $0x1f48] sm:$0xff] }
 0x3d5   : > { %4199 = vmatpush.msrb.mxu3 %v3523_v40  ;;  %v3443_v39 = vld [vmem:[#allocation9 + $0x1008] sm:$0xff]  ;;  %v3772_v40 = vld [vmem:[#allocation9 + $0x1a50] sm:$0xff] }
 0x3d6   : > { %4321 = vmatpush.msra.mxu1 %v3252_v26  ;;  %v3667_v46 = vld [vmem:[#allocation9 + $0x1708] sm:$0xff]  ;;  %v3004_v26 = vld [vmem:[#allocation9 + $0x250] sm:$0xff] }
 0x3d7   : > { %4200 = vmatpush.msrb.mxu3 %v3515_v13  ;;  %v3923_v14 = vld [vmem:[#allocation9 + $0x1f08] sm:$0xff] }
 0x3d8   : > { %4322 = vmatpush.msra.mxu1 %v3244_v16  ;;  %v3659_v58 = vld [vmem:[#allocation9 + $0x16c8] sm:$0xff] }
 0x3d9   : > { %4201 = vmatpush.msrb.mxu3 %v3507_v53  ;;  %v3915_v49 = vld [vmem:[#allocation9 + $0x1ec8] sm:$0xff]  ;;  %v3764_v53 = vld [vmem:[#allocation9 + $0x1a10] sm:$0xff] }
 0x3da   : > { %4323 = vmatpush.msra.mxu1 %v3236_v7  ;;  %v3651_v43 = vld [vmem:[#allocation9 + $0x1688] sm:$0xff]  ;;  %v2996_v7 = vld [vmem:[#allocation9 + $0x210] sm:$0xff] }
 0x3db   : > { %4202 = vmatpush.msrb.mxu3 %v3499_v48  ;;  %v3907_v57 = vld [vmem:[#allocation9 + $0x1e88] sm:$0xff] }
 0x3dc   : > { %4324 = vmatpush.msra.mxu1 %v3228_v63  ;;  %v3643_v19 = vld [vmem:[#allocation9 + $0x1648] sm:$0xff] }
 0x3dd   : > { %4203 = vmatpush.msrb.mxu3 %v3491_v38  ;;  %v3899_v30 = vld [vmem:[#allocation9 + $0x1e48] sm:$0xff]  ;;  %v3756_v38 = vld [vmem:[#allocation9 + $0x19d0] sm:$0xff] }
 0x3de   : > { %4325 = vmatpush.msra.mxu1 %v3220_v20  ;;  %v3635_v6 = vld [vmem:[#allocation9 + $0x1608] sm:$0xff]  ;;  %v2988_v20 = vld [vmem:[#allocation9 + $0x1d0] sm:$0xff] }
 0x3df   : > { %4204 = vmatpush.msrb.mxu3 %v3483_v42  ;;  %v3891_v2 = vld [vmem:[#allocation9 + $0x1e08] sm:$0xff] }
 0x3e0   : > { %4326 = vmatpush.msra.mxu1 %v3212_v11  ;;  %v3627_v35 = vld [vmem:[#allocation9 + $0x15c8] sm:$0xff] }
 0x3e1   : > { %4205 = vmatpush.msrb.mxu3 %v3475_v36  ;;  %v3883_v52 = vld [vmem:[#allocation9 + $0x1dc8] sm:$0xff]  ;;  %v3748_v36 = vld [vmem:[#allocation9 + $0x1990] sm:$0xff] }
 0x3e2   : > { %4327 = vmatpush.msra.mxu1 %v3204_v41  ;;  %v3619_v45 = vld [vmem:[#allocation9 + $0x1588] sm:$0xff]  ;;  %v2980_v41 = vld [vmem:[#allocation9 + $0x190] sm:$0xff] }
 0x3e3   : > { %4206 = vmatpush.msrb.mxu3 %v3467_v56  ;;  %v3875_v1 = vld [vmem:[#allocation9 + $0x1d88] sm:$0xff]  ;;  %v3740_v56 = vld [vmem:[#allocation9 + $0x1950] sm:$0xff] }
 0x3e4   : > { %v2855_v50 = vpop.f32.mrf.mxu3  ;;  %v2895_v54 = vpop.f32.mrf.mxu1  ;;  %4328 = vmatpush.msra.mxu1 %v3196_v21  ;;  %v3611_v16 = vld [vmem:[#allocation9 + $0x1548] sm:$0xff]  ;;  %v2972_v21 = vld [vmem:[#allocation9 + $0x150] sm:$0xff] }
 0x3e5   : > { %v9225_v59 = vsub.f32 %v2855_v50, %v2919_v9  ;;  %v9227_v17 = vsub.f32 %v2895_v54, %v2921_v55  ;;  %4207 = vmatpush.msrb.mxu3 %v3459_v12  ;;  %v3867_v13 = vld [vmem:[#allocation9 + $0x1d48] sm:$0xff] }
 0x3e6   : > { %4329 = vmatpush.msra.mxu1 %v3188_v60  ;;  %v3603_v63 = vld [vmem:[#allocation9 + $0x1508] sm:$0xff] }
 0x3e7   : > { %4070 = vmatmul.f32.vlgmr.msrb.gmra.mxu0 %v9225_v59  ;;  %4110 = vmatmul.f32.vlgmr.msra.gmra.mxu2 %v9227_v17  ;;  %v3859_v48 = vld [vmem:[#allocation9 + $0x1d08] sm:$0xff] }
 0x3e8   : > { %4214 = vmatpush.msrb.mxu0 %v3691_v44  ;;  %4254 = vmatpush.msra.mxu2 %v3947_v18  ;;  %v3595_v11 = vld [vmem:[#allocation9 + $0x14c8] sm:$0xff]  ;;  %v2964_v44 = vld [vmem:[#allocation9 + $0x110] sm:$0xff] }
 0x3e9   : > { %4208 = vmatpush.msrb.mxu3 %v3451_v4  ;;  %4330 = vmatmul.f32.vlgmr.msra.gmra.mxu1 %v9210_v8  ;;  %v3851_v42 = vld [vmem:[#allocation9 + $0x1cc8] sm:$0xff]  ;;  %v3732_v18 = vld [vmem:[#allocation9 + $0x1910] sm:$0xff] }
 0x3ea   : > { %4215 = vmatpush.msrb.mxu0 %v3683_v5  ;;  %4255 = vmatpush.msra.mxu2 %v3939_v37  ;;  %v3587_v9 = vld [vmem:[#allocation9 + $0x1488] sm:$0xff]  ;;  %v2956_v5 = vld [vmem:[#allocation9 + $0xd0] sm:$0xff] }
 0x3eb   : > { %4209 = vmatpush.msrb.mxu3 %v3443_v39  ;;  %4394 = vmatpush.msrb.mxu1 %v3820_v15  ;;  %v3843_v55 = vld [vmem:[#allocation9 + $0x1c88] sm:$0xff]  ;;  %v3180_v37 = vld [vmem:[#allocation9 + $0x7d0] sm:$0xff] }
 0x3ec   : > { %4216 = vmatpush.msrb.mxu0 %v3675_v29  ;;  %4256 = vmatpush.msra.mxu2 %v3931_v31  ;;  %v3579_v50 = vld [vmem:[#allocation9 + $0x1448] sm:$0xff]  ;;  %v3436_v4 = vld [vmem:[#allocation9 + $0xfd0] sm:$0xff] }
 0x3ed   : > { %4210 = vmatmul.f32.vlgmr.msrb.gmra.mxu3 %v9221_v34  ;;  %4395 = vmatpush.msrb.mxu1 %v3812_v24  ;;  %v3835_v54 = vld [vmem:[#allocation9 + $0x1c48] sm:$0xff]  ;;  %v2948_v29 = vld [vmem:[#allocation9 + $0x90] sm:$0xff] }
 0x3ee   : > { %4217 = vmatpush.msrb.mxu0 %v3667_v46  ;;  %4257 = vmatpush.msra.mxu2 %v3923_v14  ;;  %v3571_v12 = vld [vmem:[#allocation9 + $0x1408] sm:$0xff]  ;;  %v3172_v31 = vld [vmem:[#allocation9 + $0x790] sm:$0xff] }
 0x3ef   : > { %4274 = vmatpush.msra.mxu3 %v3052_v51  ;;  %4150 = vmatmul.f32.vlgmr.msra.gmra.mxu0 %v9207_v61  ;;  %v3827_v60 = vld [vmem:[#allocation9 + $0x1c08] sm:$0xff]  ;;  %v3724_v39 = vld [vmem:[#allocation9 + $0x18d0] sm:$0xff] }
 0x3f0   : > { %4190 = vmatmul.f32.vlgmr.msrb.gmra.mxu2 %v9212_v32  ;;  %4218 = vmatpush.msrb.mxu0 %v3659_v58  ;;  %v3428_v15 = vld [vmem:[#allocation9 + $0xf90] sm:$0xff] }
 0x3f1   : > { %4258 = vmatpush.msra.mxu2 %v3915_v49  ;;  %4275 = vmatpush.msra.mxu3 %v3044_v10  ;;  %v2940_v46 = vld [vmem:[#allocation9 + $0x50] sm:$0xff] }
 0x3f2   : > { %4219 = vmatpush.msrb.mxu0 %v3651_v43  ;;  %4396 = vmatpush.msrb.mxu1 %v3804_v27  ;;  %v3164_v14 = vld [vmem:[#allocation9 + $0x750] sm:$0xff] }
 0x3f3   : > { %4259 = vmatpush.msra.mxu2 %v3907_v57  ;;  %4276 = vmatpush.msra.mxu3 %v3036_v22  ;;  %v3716_v51 = vld [vmem:[#allocation9 + $0x1890] sm:$0xff] }
 0x3f4   : > { %4220 = vmatpush.msrb.mxu0 %v3643_v19  ;;  %4397 = vmatpush.msrb.mxu1 %v3796_v33  ;;  %v3420_v58 = vld [vmem:[#allocation9 + $0xf50] sm:$0xff] }
 0x3f5   : > { %4260 = vmatpush.msra.mxu2 %v3899_v30  ;;  %4277 = vmatpush.msra.mxu3 %v3028_v28  ;;  %v2932_v49 = vld [vmem:[#allocation9 + $0x10] sm:$0xff] }
 0x3f6   : > { %4221 = vmatpush.msrb.mxu0 %v3635_v6  ;;  %4398 = vmatpush.msrb.mxu1 %v3788_v0  ;;  %v3156_v10 = vld [vmem:[#allocation9 + $0x710] sm:$0xff] }
 0x3f7   : > { %4261 = vmatpush.msra.mxu2 %v3891_v2  ;;  %4278 = vmatpush.msra.mxu3 %v3020_v47  ;;  %v3412_v24 = vld [vmem:[#allocation9 + $0xf10] sm:$0xff]  ;;  %v3309_v47 = vld [vmem:[#allocation9 + $0xbd8] sm:$0xff] }
 0x3f8   : > { %4222 = vmatpush.msrb.mxu0 %v3627_v35  ;;  %4399 = vmatpush.msrb.mxu1 %v3780_v25  ;;  %v3564_v43 = vld [vmem:[#allocation9 + $0x13d0] sm:$0xff] }
 0x3f9   : > { %4262 = vmatpush.msra.mxu2 %v3883_v52  ;;  %4279 = vmatpush.msra.mxu3 %v3012_v62  ;;  %v3148_v57 = vld [vmem:[#allocation9 + $0x6d0] sm:$0xff]  ;;  %v3301_v62 = vld [vmem:[#allocation9 + $0xb98] sm:$0xff] }
 0x3fa   : > { %4223 = vmatpush.msrb.mxu0 %v3619_v45  ;;  %4400 = vmatpush.msrb.mxu1 %v3772_v40  ;;  %v3708_v22 = vld [vmem:[#allocation9 + $0x1850] sm:$0xff] }
 0x3fb   : > { %4263 = vmatpush.msra.mxu2 %v3875_v1  ;;  %4280 = vmatpush.msra.mxu3 %v3004_v26  ;;  %v3404_v27 = vld [vmem:[#allocation9 + $0xed0] sm:$0xff]  ;;  %v3293_v26 = vld [vmem:[#allocation9 + $0xb58] sm:$0xff] }
 0x3fc   : > { %4224 = vmatpush.msrb.mxu0 %v3611_v16  ;;  %4401 = vmatpush.msrb.mxu1 %v3764_v53  ;;  %v3556_v19 = vld [vmem:[#allocation9 + $0x1390] sm:$0xff] }
 0x3fd   : > { %4264 = vmatpush.msra.mxu2 %v3867_v13  ;;  %4281 = vmatpush.msra.mxu3 %v2996_v7  ;;  %v3140_v30 = vld [vmem:[#allocation9 + $0x690] sm:$0xff]  ;;  %v3285_v7 = vld [vmem:[#allocation9 + $0xb18] sm:$0xff] }
 0x3fe   : > { %4225 = vmatpush.msrb.mxu0 %v3603_v63  ;;  %4402 = vmatpush.msrb.mxu1 %v3756_v38  ;;  %v3700_v28 = vld [vmem:[#allocation9 + $0x1810] sm:$0xff] }
 0x3ff   : > { %4265 = vmatpush.msra.mxu2 %v3859_v48  ;;  %4282 = vmatpush.msra.mxu3 %v2988_v20  ;;  %v3396_v33 = vld [vmem:[#allocation9 + $0xe90] sm:$0xff]  ;;  %v3277_v20 = vld [vmem:[#allocation9 + $0xad8] sm:$0xff] }
 0x400   : > { %4226 = vmatpush.msrb.mxu0 %v3595_v11  ;;  %4403 = vmatpush.msrb.mxu1 %v3748_v36  ;;  %v3548_v6 = vld [vmem:[#allocation9 + $0x1350] sm:$0xff] }
 0x401   : > { %4266 = vmatpush.msra.mxu2 %v3851_v42  ;;  %4283 = vmatpush.msra.mxu3 %v2980_v41  ;;  %v3132_v2 = vld [vmem:[#allocation9 + $0x650] sm:$0xff]  ;;  %v3269_v41 = vld [vmem:[#allocation9 + $0xa98] sm:$0xff] }
 0x402   : > { %4227 = vmatpush.msrb.mxu0 %v3587_v9  ;;  %4404 = vmatpush.msrb.mxu1 %v3740_v56  ;;  %v3388_v0 = vld [vmem:[#allocation9 + $0xe50] sm:$0xff] }
 0x403   : > { %4267 = vmatpush.msra.mxu2 %v3843_v55  ;;  %4284 = vmatpush.msra.mxu3 %v2972_v21  ;;  %v3540_v35 = vld [vmem:[#allocation9 + $0x1310] sm:$0xff]  ;;  %v3261_v21 = vld [vmem:[#allocation9 + $0xa58] sm:$0xff] }
 0x404   : > { %4228 = vmatpush.msrb.mxu0 %v3579_v50  ;;  %4405 = vmatpush.msrb.mxu1 %v3732_v18  ;;  %v3124_v52 = vld [vmem:[#allocation9 + $0x610] sm:$0xff] }
 0x405   : > { %4268 = vmatpush.msra.mxu2 %v3835_v54  ;;  %4285 = vmatpush.msra.mxu3 %v2964_v44  ;;  %v3380_v25 = vld [vmem:[#allocation9 + $0xe10] sm:$0xff]  ;;  %v3253_v44 = vld [vmem:[#allocation9 + $0xa18] sm:$0xff] }
 0x406   : > { %4229 = vmatpush.msrb.mxu0 %v3571_v12  ;;  %4406 = vmatpush.msrb.mxu1 %v3724_v39  ;;  %v3532_v45 = vld [vmem:[#allocation9 + $0x12d0] sm:$0xff] }
 0x407   : > { %4269 = vmatpush.msra.mxu2 %v3827_v60  ;;  %4230 = vmatmul.f32.vlgmr.msrb.gmra.mxu0 %v9225_v59  ;;  %v3116_v1 = vld [vmem:[#allocation9 + $0x5d0] sm:$0xff] }
 0x408   : > { %4286 = vmatpush.msra.mxu3 %v2956_v5  ;;  %4294 = vmatpush.msra.mxu0 %v3180_v37  ;;  %v3372_v40 = vld [vmem:[#allocation9 + $0xdd0] sm:$0xff]  ;;  %v3245_v5 = vld [vmem:[#allocation9 + $0x9d8] sm:$0xff] }
 0x409   : > { %4270 = vmatmul.f32.vlgmr.msra.gmra.mxu2 %v9227_v17  ;;  %4407 = vmatpush.msrb.mxu1 %v3716_v51  ;;  %v3524_v16 = vld [vmem:[#allocation9 + $0x1290] sm:$0xff] }
 0x40a   : > { %4334 = vmatpush.msrb.mxu2 %v3436_v4  ;;  %4287 = vmatpush.msra.mxu3 %v2948_v29  ;;  %v3108_v13 = vld [vmem:[#allocation9 + $0x590] sm:$0xff] }
 0x40b   : > { %4295 = vmatpush.msra.mxu0 %v3172_v31  ;;  %4408 = vmatpush.msrb.mxu1 %v3708_v22  ;;  %v3364_v53 = vld [vmem:[#allocation9 + $0xd90] sm:$0xff]  ;;  %v3237_v31 = vld [vmem:[#allocation9 + $0x998] sm:$0xff] }
 0x40c   : > { %4335 = vmatpush.msrb.mxu2 %v3428_v15  ;;  %4288 = vmatpush.msra.mxu3 %v2940_v46  ;;  %v3516_v63 = vld [vmem:[#allocation9 + $0x1250] sm:$0xff]  ;;  %v3213_v22 = vld [vmem:[#allocation9 + $0x8d8] sm:$0xff] }
 0x40d   : > { %4296 = vmatpush.msra.mxu0 %v3164_v14  ;;  %4409 = vmatpush.msrb.mxu1 %v3700_v28  ;;  %v3100_v48 = vld [vmem:[#allocation9 + $0x550] sm:$0xff]  ;;  %v3229_v14 = vld [vmem:[#allocation9 + $0x958] sm:$0xff] }
 0x40e   : > { %4336 = vmatpush.msrb.mxu2 %v3420_v58  ;;  %4289 = vmatpush.msra.mxu3 %v2932_v49  ;;  %v3356_v38 = vld [vmem:[#allocation9 + $0xd50] sm:$0xff]  ;;  %v3205_v28 = vld [vmem:[#allocation9 + $0x898] sm:$0xff] }
 0x40f   : > { %4297 = vmatpush.msra.mxu0 %v3156_v10  ;;  %4290 = vmatmul.f32.vlgmr.msra.gmra.mxu3 %v9202_v3  ;;  %v3508_v11 = vld [vmem:[#allocation9 + $0x1210] sm:$0xff]  ;;  %v3221_v10 = vld [vmem:[#allocation9 + $0x918] sm:$0xff] }
 0x410   : > { %4337 = vmatpush.msrb.mxu2 %v3412_v24  ;;  %4354 = vmatpush.msrb.mxu3 %v3564_v43  ;;  %v3092_v42 = vld [vmem:[#allocation9 + $0x510] sm:$0xff] }
 0x411   : > { %4298 = vmatpush.msra.mxu0 %v3148_v57  ;;  %4410 = vmatmul.f32.vlgmr.msrb.gmra.mxu1 %v9216_v23  ;;  %v3348_v36 = vld [vmem:[#allocation9 + $0xd10] sm:$0xff] }
 0x412   : > { %4338 = vmatpush.msrb.mxu2 %v3404_v27  ;;  %4355 = vmatpush.msrb.mxu3 %v3556_v19  ;;  %v3500_v9 = vld [vmem:[#allocation9 + $0x11d0] sm:$0xff] }
 0x413   : > { %4299 = vmatpush.msra.mxu0 %v3140_v30  ;;  %4474 = vmatpush.msra.mxu1 %v3309_v47  ;;  %v3084_v55 = vld [vmem:[#allocation9 + $0x4d0] sm:$0xff]  ;;  %v3197_v47 = vld [vmem:[#allocation9 + $0x858] sm:$0xff] }
 0x414   : > { %4339 = vmatpush.msrb.mxu2 %v3396_v33  ;;  %4356 = vmatpush.msrb.mxu3 %v3548_v6  ;;  %v3340_v56 = vld [vmem:[#allocation9 + $0xcd0] sm:$0xff]  ;;  %v3053_v6 = vld [vmem:[#allocation9 + $0x3d8] sm:$0xff] }
 0x415   : > { %4300 = vmatpush.msra.mxu0 %v3132_v2  ;;  %4475 = vmatpush.msra.mxu1 %v3301_v62  ;;  %v3492_v50 = vld [vmem:[#allocation9 + $0x1190] sm:$0xff]  ;;  %v3189_v62 = vld [vmem:[#allocation9 + $0x818] sm:$0xff] }
 0x416   : > { %4340 = vmatpush.msrb.mxu2 %v3388_v0  ;;  %4357 = vmatpush.msrb.mxu3 %v3540_v35  ;;  %v3076_v54 = vld [vmem:[#allocation9 + $0x490] sm:$0xff]  ;;  %v3045_v35 = vld [vmem:[#allocation9 + $0x398] sm:$0xff] }
 0x417   : > { %4301 = vmatpush.msra.mxu0 %v3124_v52  ;;  %4476 = vmatpush.msra.mxu1 %v3293_v26  ;;  %v3332_v18 = vld [vmem:[#allocation9 + $0xc90] sm:$0xff]  ;;  %v3821_v26 = vld [vmem:[#allocation9 + $0x1bd8] sm:$0xff] }
 0x418   : > { %4341 = vmatpush.msrb.mxu2 %v3380_v25  ;;  %4358 = vmatpush.msrb.mxu3 %v3532_v45  ;;  %v3484_v12 = vld [vmem:[#allocation9 + $0x1150] sm:$0xff]  ;;  %v3037_v45 = vld [vmem:[#allocation9 + $0x358] sm:$0xff] }
 0x419   : > { %4302 = vmatpush.msra.mxu0 %v3116_v1  ;;  %4477 = vmatpush.msra.mxu1 %v3285_v7  ;;  %v3068_v60 = vld [vmem:[#allocation9 + $0x450] sm:$0xff]  ;;  %v3813_v7 = vld [vmem:[#allocation9 + $0x1b98] sm:$0xff] }
 0x41a   : > { %4342 = vmatpush.msrb.mxu2 %v3372_v40  ;;  %4359 = vmatpush.msrb.mxu3 %v3524_v16  ;;  %v3324_v37 = vld [vmem:[#allocation9 + $0xc50] sm:$0xff]  ;;  %v3029_v16 = vld [vmem:[#allocation9 + $0x318] sm:$0xff] }
 0x41b   : > { %4303 = vmatpush.msra.mxu0 %v3108_v13  ;;  %4478 = vmatpush.msra.mxu1 %v3277_v20  ;;  %v3476_v4 = vld [vmem:[#allocation9 + $0x1110] sm:$0xff]  ;;  %v3805_v20 = vld [vmem:[#allocation9 + $0x1b58] sm:$0xff] }
 0x41c   : > { %4343 = vmatpush.msrb.mxu2 %v3364_v53  ;;  %4360 = vmatpush.msrb.mxu3 %v3516_v63  ;;  %v3060_v29 = vld [vmem:[#allocation9 + $0x410] sm:$0xff]  ;;  %v3021_v63 = vld [vmem:[#allocation9 + $0x2d8] sm:$0xff] }
 0x41d   : > { %4304 = vmatpush.msra.mxu0 %v3100_v48  ;;  %4479 = vmatpush.msra.mxu1 %v3269_v41  ;;  %v3316_v39 = vld [vmem:[#allocation9 + $0xc10] sm:$0xff]  ;;  %v3797_v41 = vld [vmem:[#allocation9 + $0x1b18] sm:$0xff] }
 0x41e   : > { %4344 = vmatpush.msrb.mxu2 %v3356_v38  ;;  %4361 = vmatpush.msrb.mxu3 %v3508_v11  ;;  %v3468_v15 = vld [vmem:[#allocation9 + $0x10d0] sm:$0xff]  ;;  %v3013_v11 = vld [vmem:[#allocation9 + $0x298] sm:$0xff] }
 0x41f   : > { %4305 = vmatpush.msra.mxu0 %v3092_v42  ;;  %4480 = vmatpush.msra.mxu1 %v3261_v21  ;;  %v3692_v46 = vld [vmem:[#allocation9 + $0x17d0] sm:$0xff]  ;;  %v3789_v21 = vld [vmem:[#allocation9 + $0x1ad8] sm:$0xff] }
 0x420   : > { %4345 = vmatpush.msrb.mxu2 %v3348_v36  ;;  %4362 = vmatpush.msrb.mxu3 %v3500_v9  ;;  %v3460_v51 = vld [vmem:[#allocation9 + $0x1090] sm:$0xff]  ;;  %v3005_v9 = vld [vmem:[#allocation9 + $0x258] sm:$0xff] }
 0x421   : > { %4306 = vmatpush.msra.mxu0 %v3084_v55  ;;  %4481 = vmatpush.msra.mxu1 %v3253_v44  ;;  %v3948_v58 = vld [vmem:[#allocation9 + $0x1fd0] sm:$0xff]  ;;  %v3781_v44 = vld [vmem:[#allocation9 + $0x1a98] sm:$0xff] }
 0x422   : > { %4346 = vmatpush.msrb.mxu2 %v3340_v56  ;;  %4363 = vmatpush.msrb.mxu3 %v3492_v50  ;;  %v3684_v49 = vld [vmem:[#allocation9 + $0x1790] sm:$0xff]  ;;  %v2997_v50 = vld [vmem:[#allocation9 + $0x218] sm:$0xff] }
 0x423   : > { %4307 = vmatpush.msra.mxu0 %v3076_v54  ;;  %4482 = vmatpush.msra.mxu1 %v3245_v5  ;;  %v3452_v24 = vld [vmem:[#allocation9 + $0x1050] sm:$0xff]  ;;  %v3773_v5 = vld [vmem:[#allocation9 + $0x1a58] sm:$0xff] }
 0x424   : > { %4347 = vmatpush.msrb.mxu2 %v3332_v18  ;;  %4364 = vmatpush.msrb.mxu3 %v3484_v12  ;;  %v3940_v43 = vld [vmem:[#allocation9 + $0x1f90] sm:$0xff]  ;;  %v2989_v12 = vld [vmem:[#allocation9 + $0x1d8] sm:$0xff] }
 0x425   : > { %4308 = vmatpush.msra.mxu0 %v3068_v60  ;;  %4483 = vmatpush.msra.mxu1 %v3237_v31  ;;  %v3676_v57 = vld [vmem:[#allocation9 + $0x1750] sm:$0xff]  ;;  %v3765_v31 = vld [vmem:[#allocation9 + $0x1a18] sm:$0xff] }
 0x426   : > { %4348 = vmatpush.msrb.mxu2 %v3324_v37  ;;  %4365 = vmatpush.msrb.mxu3 %v3476_v4  ;;  %v3444_v27 = vld [vmem:[#allocation9 + $0x1010] sm:$0xff]  ;;  %v2981_v4 = vld [vmem:[#allocation9 + $0x198] sm:$0xff] }
 0x427   : > { %4309 = vmatpush.msra.mxu0 %v3060_v29  ;;  %4484 = vmatpush.msra.mxu1 %v3229_v14  ;;  %v3932_v19 = vld [vmem:[#allocation9 + $0x1f50] sm:$0xff]  ;;  %v3757_v14 = vld [vmem:[#allocation9 + $0x19d8] sm:$0xff] }
 0x428   : > { %4310 = vmatmul.f32.vlgmr.msra.gmra.mxu0 %v9207_v61  ;;  %4349 = vmatpush.msrb.mxu2 %v3316_v39  ;;  %v3668_v30 = vld [vmem:[#allocation9 + $0x1710] sm:$0xff] }
 0x429   : > { %4366 = vmatpush.msrb.mxu3 %v3468_v15  ;;  %4374 = vmatpush.msrb.mxu0 %v3692_v46  ;;  %v3924_v33 = vld [vmem:[#allocation9 + $0x1f10] sm:$0xff]  ;;  %v2973_v15 = vld [vmem:[#allocation9 + $0x158] sm:$0xff] }
 0x42a   : > { %4350 = vmatmul.f32.vlgmr.msrb.gmra.mxu2 %v9212_v32  ;;  %4485 = vmatpush.msra.mxu1 %v3221_v10  ;;  %v3660_v2 = vld [vmem:[#allocation9 + $0x16d0] sm:$0xff]  ;;  %v3749_v10 = vld [vmem:[#allocation9 + $0x1998] sm:$0xff] }
 0x42b   : > { %4367 = vmatpush.msrb.mxu3 %v3460_v51  ;;  %4414 = vmatpush.msra.mxu2 %v3948_v58  ;;  %v3916_v0 = vld [vmem:[#allocation9 + $0x1ed0] sm:$0xff]  ;;  %v2965_v58 = vld [vmem:[#allocation9 + $0x118] sm:$0xff] }
 0x42c   : > { %4375 = vmatpush.msrb.mxu0 %v3684_v49  ;;  %4486 = vmatpush.msra.mxu1 %v3213_v22  ;;  %v3652_v52 = vld [vmem:[#allocation9 + $0x1690] sm:$0xff]  ;;  %v3741_v22 = vld [vmem:[#allocation9 + $0x1958] sm:$0xff] }
 0x42d   : > { %4368 = vmatpush.msrb.mxu3 %v3452_v24  ;;  %4415 = vmatpush.msra.mxu2 %v3940_v43  ;;  %v3908_v25 = vld [vmem:[#allocation9 + $0x1e90] sm:$0xff]  ;;  %v2957_v43 = vld [vmem:[#allocation9 + $0xd8] sm:$0xff] }
 0x42e   : > { %4376 = vmatpush.msrb.mxu0 %v3676_v57  ;;  %4487 = vmatpush.msra.mxu1 %v3205_v28  ;;  %v3644_v1 = vld [vmem:[#allocation9 + $0x1650] sm:$0xff]  ;;  %v3181_v57 = vld [vmem:[#allocation9 + $0x7d8] sm:$0xff] }
 0x42f   : > { %4369 = vmatpush.msrb.mxu3 %v3444_v27  ;;  %4416 = vmatpush.msra.mxu2 %v3932_v19  ;;  %v3900_v40 = vld [vmem:[#allocation9 + $0x1e50] sm:$0xff]  ;;  %v2949_v27 = vld [vmem:[#allocation9 + $0x98] sm:$0xff] }
 0x430   : > { %4377 = vmatpush.msrb.mxu0 %v3668_v30  ;;  %4370 = vmatmul.f32.vlgmr.msrb.gmra.mxu3 %v9221_v34  ;;  %v3636_v13 = vld [vmem:[#allocation9 + $0x1610] sm:$0xff]  ;;  %v3437_v19 = vld [vmem:[#allocation9 + $0xfd8] sm:$0xff] }
 0x431   : > { %4417 = vmatpush.msra.mxu2 %v3924_v33  ;;  %4434 = vmatpush.msra.mxu3 %v3053_v6  ;;  %v3892_v53 = vld [vmem:[#allocation9 + $0x1e10] sm:$0xff]  ;;  %v3173_v30 = vld [vmem:[#allocation9 + $0x798] sm:$0xff] }
 0x432   : > { %4378 = vmatpush.msrb.mxu0 %v3660_v2  ;;  %4488 = vmatpush.msra.mxu1 %v3197_v47  ;;  %v3628_v48 = vld [vmem:[#allocation9 + $0x15d0] sm:$0xff]  ;;  %v3733_v28 = vld [vmem:[#allocation9 + $0x1918] sm:$0xff] }
 0x433   : > { %4418 = vmatpush.msra.mxu2 %v3916_v0  ;;  %4435 = vmatpush.msra.mxu3 %v3045_v35  ;;  %v3884_v38 = vld [vmem:[#allocation9 + $0x1dd0] sm:$0xff]  ;;  %v2941_v33 = vld [vmem:[#allocation9 + $0x58] sm:$0xff] }
 0x434   : > { %4379 = vmatpush.msrb.mxu0 %v3652_v52  ;;  %4489 = vmatpush.msra.mxu1 %v3189_v62  ;;  %v3620_v42 = vld [vmem:[#allocation9 + $0x1590] sm:$0xff]  ;;  %v3429_v6 = vld [vmem:[#allocation9 + $0xf98] sm:$0xff] }
 0x435   : > { %4419 = vmatpush.msra.mxu2 %v3908_v25  ;;  %4436 = vmatpush.msra.mxu3 %v3037_v45  ;;  %v3876_v36 = vld [vmem:[#allocation9 + $0x1d90] sm:$0xff]  ;;  %v3165_v2 = vld [vmem:[#allocation9 + $0x758] sm:$0xff] }
 0x436   : > { %4490 = vmatmul.f32.vlgmr.msra.gmra.mxu1 %v9210_v8  ;;  %4380 = vmatpush.msrb.mxu0 %v3644_v1  ;;  %v3612_v55 = vld [vmem:[#allocation9 + $0x1550] sm:$0xff]  ;;  %v3725_v47 = vld [vmem:[#allocation9 + $0x18d8] sm:$0xff] }
 0x437   : > { %4554 = vmatpush.msrb.mxu1 %v3821_v26  ;;  %4420 = vmatpush.msra.mxu2 %v3900_v40  ;;  %v3868_v56 = vld [vmem:[#allocation9 + $0x1d50] sm:$0xff]  ;;  %v2933_v0 = vld [vmem:[#allocation9 + $0x18] sm:$0xff] }
 0x438   : > { %4437 = vmatpush.msra.mxu3 %v3029_v16  ;;  %4381 = vmatpush.msrb.mxu0 %v3636_v13  ;;  %v3604_v54 = vld [vmem:[#allocation9 + $0x1510] sm:$0xff]  ;;  %v3421_v35 = vld [vmem:[#allocation9 + $0xf58] sm:$0xff]  ;;  %v3971_v13 = vpop.f32.mrf.mxu2 }
 0x439   : > { %4555 = vmatpush.msrb.mxu1 %v3813_v7  ;;  %4421 = vmatpush.msra.mxu2 %v3892_v53  ;;  %v3860_v18 = vld [vmem:[#allocation9 + $0x1d10] sm:$0xff]  ;;  %v3157_v52 = vld [vmem:[#allocation9 + $0x718] sm:$0xff] }
 0x43a   : > { %4438 = vmatpush.msra.mxu3 %v3021_v63  ;;  %4382 = vmatpush.msrb.mxu0 %v3628_v48  ;;  %v3596_v60 = vld [vmem:[#allocation9 + $0x14d0] sm:$0xff]  ;;  %v3717_v62 = vld [vmem:[#allocation9 + $0x1898] sm:$0xff] }
 0x43b   : > { %4556 = vmatpush.msrb.mxu1 %v3805_v20  ;;  %4422 = vmatpush.msra.mxu2 %v3884_v38  ;;  %v3852_v37 = vld [vmem:[#allocation9 + $0x1cd0] sm:$0xff]  ;;  %v3413_v25 = vld [vmem:[#allocation9 + $0xf18] sm:$0xff]  ;;  %v3991_v20 = vpop.f32.mrf.mxu3 }
 0x43c   : > { %4439 = vmatpush.msra.mxu3 %v3013_v11  ;;  %4383 = vmatpush.msrb.mxu0 %v3620_v42  ;;  %v3588_v29 = vld [vmem:[#allocation9 + $0x1490] sm:$0xff]  ;;  %v3565_v45 = vld [vmem:[#allocation9 + $0x13d8] sm:$0xff]  ;;  %v3310_v11 = vld [vmem:[#allocation9 + $0xbe0] sm:$0xff] }
 0x43d   : > { %4557 = vmatpush.msrb.mxu1 %v3797_v41  ;;  %4423 = vmatpush.msra.mxu2 %v3876_v36  ;;  %v3844_v39 = vld [vmem:[#allocation9 + $0x1c90] sm:$0xff]  ;;  %v3149_v1 = vld [vmem:[#allocation9 + $0x6d8] sm:$0xff] }
 0x43e   : > { %4440 = vmatpush.msra.mxu3 %v3005_v9  ;;  %4384 = vmatpush.msrb.mxu0 %v3612_v55  ;;  %v3580_v46 = vld [vmem:[#allocation9 + $0x1450] sm:$0xff]  ;;  %v3709_v26 = vld [vmem:[#allocation9 + $0x1858] sm:$0xff]  ;;  %v3992_v9 = vadd.f32 %v3991_v20, %v3971_v13  ;;  %v3302_v55 = vld [vmem:[#allocation9 + $0xba0] sm:$0xff] }
 0x43f   : > { %4558 = vmatpush.msrb.mxu1 %v3789_v21  ;;  %4424 = vmatpush.msra.mxu2 %v3868_v56  ;;  %v3836_v51 = vld [vmem:[#allocation9 + $0x1c50] sm:$0xff]  ;;  %v3405_v40 = vld [vmem:[#allocation9 + $0xed8] sm:$0xff]  ;;  %v4011_v56 = vpop.f32.mrf.mxu0 }
 0x440   : > { %4441 = vmatpush.msra.mxu3 %v2997_v50  ;;  %4385 = vmatpush.msrb.mxu0 %v3604_v54  ;;  %v3572_v49 = vld [vmem:[#allocation9 + $0x1410] sm:$0xff]  ;;  %v3557_v16 = vld [vmem:[#allocation9 + $0x1398] sm:$0xff] }
 0x441   : > { %4559 = vmatpush.msrb.mxu1 %v3781_v44  ;;  %4425 = vmatpush.msra.mxu2 %v3860_v18  ;;  %v3828_v24 = vld [vmem:[#allocation9 + $0x1c10] sm:$0xff]  ;;  %v3141_v7 = vld [vmem:[#allocation9 + $0x698] sm:$0xff]  ;;  %v3294_v44 = vld [vmem:[#allocation9 + $0xb60] sm:$0xff] }
 0x442   : > { %4442 = vmatpush.msra.mxu3 %v2989_v12  ;;  %4386 = vmatpush.msrb.mxu0 %v3596_v60  ;;  %v3701_v53 = vld [vmem:[#allocation9 + $0x1818] sm:$0xff] }
 0x443   : > { %4560 = vmatpush.msrb.mxu1 %v3773_v5  ;;  %4426 = vmatpush.msra.mxu2 %v3852_v37  ;;  %v3397_v63 = vld [vmem:[#allocation9 + $0xe98] sm:$0xff]  ;;  %v4012_v5 = vadd.f32 %v4011_v56, %v3992_v9  ;;  %v3286_v37 = vld [vmem:[#allocation9 + $0xb20] sm:$0xff] }
 0x444   : > { %4443 = vmatpush.msra.mxu3 %v2981_v4  ;;  %4387 = vmatpush.msrb.mxu0 %v3588_v29  ;;  %v3549_v48 = vld [vmem:[#allocation9 + $0x1358] sm:$0xff]  ;;  %v4031_v29 = vpop.f32.mrf.mxu2 }
 0x445   : > { %4561 = vmatpush.msrb.mxu1 %v3765_v31  ;;  %4427 = vmatpush.msra.mxu2 %v3844_v39  ;;  %v3133_v38 = vld [vmem:[#allocation9 + $0x658] sm:$0xff] }
 0x446   : > { %4444 = vmatpush.msra.mxu3 %v2973_v15  ;;  %4388 = vmatpush.msrb.mxu0 %v3580_v46  ;;  %v3389_v42 = vld [vmem:[#allocation9 + $0xe58] sm:$0xff]  ;;  %v3278_v15 = vld [vmem:[#allocation9 + $0xae0] sm:$0xff] }
 0x447   : > { %4562 = vmatpush.msrb.mxu1 %v3757_v14  ;;  %4428 = vmatpush.msra.mxu2 %v3836_v51  ;;  %v3541_v41 = vld [vmem:[#allocation9 + $0x1318] sm:$0xff] }
 0x448   : > { %4445 = vmatpush.msra.mxu3 %v2965_v58  ;;  %4389 = vmatpush.msrb.mxu0 %v3572_v49  ;;  %v3125_v36 = vld [vmem:[#allocation9 + $0x618] sm:$0xff]  ;;  %v4032_v49 = vadd.f32 %v4031_v29, %v4012_v5  ;;  %v3190_v29 = vld [vmem:[#allocation9 + $0x820] sm:$0xff] }
 0x449   : > { %4563 = vmatpush.msrb.mxu1 %v3749_v10  ;;  %4390 = vmatmul.f32.vlgmr.msrb.gmra.mxu0 %v9225_v59  ;;  %v3381_v21 = vld [vmem:[#allocation9 + $0xe18] sm:$0xff]  ;;  %v3270_v10 = vld [vmem:[#allocation9 + $0xaa0] sm:$0xff] }
 0x44a   : > { %4429 = vmatpush.msra.mxu2 %v3828_v24  ;;  %4446 = vmatpush.msra.mxu3 %v2957_v43  ;;  %v3533_v50 = vld [vmem:[#allocation9 + $0x12d8] sm:$0xff] }
 0x44b   : > { %4454 = vmatpush.msra.mxu0 %v3181_v57  ;;  %4564 = vmatpush.msrb.mxu1 %v3741_v22  ;;  %v3117_v54 = vld [vmem:[#allocation9 + $0x5d8] sm:$0xff] }
 0x44c   : > { %4430 = vmatmul.f32.vlgmr.msra.gmra.mxu2 %v9227_v17  ;;  %4447 = vmatpush.msra.mxu3 %v2949_v27  ;;  %v3373_v18 = vld [vmem:[#allocation9 + $0xdd8] sm:$0xff]  ;;  %v3262_v27 = vld [vmem:[#allocation9 + $0xa60] sm:$0xff] }
 0x44d   : > { %4494 = vmatpush.msrb.mxu2 %v3437_v19  ;;  %4455 = vmatpush.msra.mxu0 %v3173_v30  ;;  %v3525_v12 = vld [vmem:[#allocation9 + $0x1298] sm:$0xff]  ;;  %v4051_v14 = vpop.f32.mrf.mxu3 }
 0x44e   : > { %4565 = vmatpush.msrb.mxu1 %v3733_v28  ;;  %4448 = vmatpush.msra.mxu3 %v2941_v33  ;;  %v3109_v60 = vld [vmem:[#allocation9 + $0x598] sm:$0xff]  ;;  %v4052_v22 = vadd.f32 %v4051_v14, %v4032_v49  ;;  %v3822_v14 = vld [vmem:[#allocation9 + $0x1be0] sm:$0xff] }
 0x44f   : > { %4495 = vmatpush.msrb.mxu2 %v3429_v6  ;;  %4456 = vmatpush.msra.mxu0 %v3165_v2  ;;  %v3365_v4 = vld [vmem:[#allocation9 + $0xd98] sm:$0xff]  ;;  %v3254_v6 = vld [vmem:[#allocation9 + $0xa20] sm:$0xff] }
 0x450   : > { %4566 = vmatpush.msrb.mxu1 %v3725_v47  ;;  %4449 = vmatpush.msra.mxu3 %v2933_v0  ;;  %v3517_v31 = vld [vmem:[#allocation9 + $0x1258] sm:$0xff]  ;;  %v3030_v49 = vld [vmem:[#allocation9 + $0x320] sm:$0xff] }
 0x451   : > { %4496 = vmatpush.msrb.mxu2 %v3421_v35  ;;  %4457 = vmatpush.msra.mxu0 %v3157_v52  ;;  %v3101_v39 = vld [vmem:[#allocation9 + $0x558] sm:$0xff]  ;;  %v3246_v52 = vld [vmem:[#allocation9 + $0x9e0] sm:$0xff] }
 0x452   : > { %4567 = vmatpush.msrb.mxu1 %v3717_v62  ;;  %4450 = vmatmul.f32.vlgmr.msra.gmra.mxu3 %v9202_v3  ;;  %v3357_v46 = vld [vmem:[#allocation9 + $0xd58] sm:$0xff] }
 0x453   : > { %4497 = vmatpush.msrb.mxu2 %v3413_v25  ;;  %4514 = vmatpush.msrb.mxu3 %v3565_v45  ;;  %v3509_v51 = vld [vmem:[#allocation9 + $0x1218] sm:$0xff]  ;;  %v4091_v25 = vpop.f32.mrf.mxu1 }
 0x454   : > { %4458 = vmatpush.msra.mxu0 %v3149_v1  ;;  %4568 = vmatpush.msrb.mxu1 %v3709_v26  ;;  %v3093_v58 = vld [vmem:[#allocation9 + $0x518] sm:$0xff]  ;;  %v3238_v26 = vld [vmem:[#allocation9 + $0x9a0] sm:$0xff] }
 0x455   : > { %4498 = vmatpush.msrb.mxu2 %v3405_v40  ;;  %4515 = vmatpush.msrb.mxu3 %v3557_v16  ;;  %v3349_v24 = vld [vmem:[#allocation9 + $0xd18] sm:$0xff] }
 0x456   : > { %4459 = vmatpush.msra.mxu0 %v3141_v7  ;;  %4569 = vmatpush.msrb.mxu1 %v3701_v53  ;;  %v3501_v43 = vld [vmem:[#allocation9 + $0x11d8] sm:$0xff] }
 0x457   : > { %4499 = vmatpush.msrb.mxu2 %v3397_v63  ;;  %4516 = vmatpush.msrb.mxu3 %v3549_v48  ;;  %v3085_v57 = vld [vmem:[#allocation9 + $0x4d8] sm:$0xff]  ;;  %v3230_v63 = vld [vmem:[#allocation9 + $0x960] sm:$0xff] }
 0x458   : > { %4570 = vmatmul.f32.vlgmr.msrb.gmra.mxu1 %v9216_v23  ;;  %4460 = vmatpush.msra.mxu0 %v3133_v38  ;;  %v3341_v19 = vld [vmem:[#allocation9 + $0xcd8] sm:$0xff] }
 0x459   : > { %4634 = vmatpush.msra.mxu1 %v3310_v11  ;;  %4500 = vmatpush.msrb.mxu2 %v3389_v42  ;;  %v3493_v30 = vld [vmem:[#allocation9 + $0x1198] sm:$0xff]  ;;  %v3222_v42 = vld [vmem:[#allocation9 + $0x920] sm:$0xff] }
 0x45a   : > { %4517 = vmatpush.msrb.mxu3 %v3541_v41  ;;  %4461 = vmatpush.msra.mxu0 %v3125_v36  ;;  %v3077_v28 = vld [vmem:[#allocation9 + $0x498] sm:$0xff] }
 0x45b   : > { %4635 = vmatpush.msra.mxu1 %v3302_v55  ;;  %4501 = vmatpush.msrb.mxu2 %v3381_v21  ;;  %v3333_v2 = vld [vmem:[#allocation9 + $0xc98] sm:$0xff]  ;;  %v3214_v55 = vld [vmem:[#allocation9 + $0x8e0] sm:$0xff] }
 0x45c   : > { %4518 = vmatpush.msrb.mxu3 %v3533_v50  ;;  %4462 = vmatpush.msra.mxu0 %v3117_v54  ;;  %v3485_v0 = vld [vmem:[#allocation9 + $0x1158] sm:$0xff]  ;;  %v3206_v54 = vld [vmem:[#allocation9 + $0x8a0] sm:$0xff] }
 0x45d   : > { %4636 = vmatpush.msra.mxu1 %v3294_v44  ;;  %4502 = vmatpush.msrb.mxu2 %v3373_v18  ;;  %v3069_v35 = vld [vmem:[#allocation9 + $0x458] sm:$0xff]  ;;  %v3054_v18 = vld [vmem:[#allocation9 + $0x3e0] sm:$0xff] }
 0x45e   : > { %4519 = vmatpush.msrb.mxu3 %v3525_v12  ;;  %4463 = vmatpush.msra.mxu0 %v3109_v60  ;;  %v3325_v62 = vld [vmem:[#allocation9 + $0xc58] sm:$0xff]  ;;  %v3198_v60 = vld [vmem:[#allocation9 + $0x860] sm:$0xff] }
 0x45f   : > { %4637 = vmatpush.msra.mxu1 %v3286_v37  ;;  %4503 = vmatpush.msrb.mxu2 %v3365_v4  ;;  %v3477_v45 = vld [vmem:[#allocation9 + $0x1118] sm:$0xff]  ;;  %v3046_v37 = vld [vmem:[#allocation9 + $0x3a0] sm:$0xff] }
 0x460   : > { %4520 = vmatpush.msrb.mxu3 %v3517_v31  ;;  %4464 = vmatpush.msra.mxu0 %v3101_v39  ;;  %v3061_v1 = vld [vmem:[#allocation9 + $0x418] sm:$0xff]  ;;  %v3038_v39 = vld [vmem:[#allocation9 + $0x360] sm:$0xff] }
 0x461   : > { %4638 = vmatpush.msra.mxu1 %v3278_v15  ;;  %4504 = vmatpush.msrb.mxu2 %v3357_v46  ;;  %v3317_v16 = vld [vmem:[#allocation9 + $0xc18] sm:$0xff] }
 0x462   : > { %4521 = vmatpush.msrb.mxu3 %v3509_v51  ;;  %4465 = vmatpush.msra.mxu0 %v3093_v58  ;;  %v3469_v13 = vld [vmem:[#allocation9 + $0x10d8] sm:$0xff]  ;;  %v4131_v58 = vpop.f32.mrf.mxu3 }
 0x463   : > { %4639 = vmatpush.msra.mxu1 %v3270_v10  ;;  %4505 = vmatpush.msrb.mxu2 %v3349_v24  ;;  %v3693_v53 = vld [vmem:[#allocation9 + $0x17d8] sm:$0xff] }
 0x464   : > { %v4071_v33 = vpop.f32.mrf.mxu0  ;;  %4522 = vmatpush.msrb.mxu3 %v3501_v43  ;;  %4466 = vmatpush.msra.mxu0 %v3085_v57  ;;  %v3461_v20 = vld [vmem:[#allocation9 + $0x1098] sm:$0xff]  ;;  %v3814_v43 = vld [vmem:[#allocation9 + $0x1ba0] sm:$0xff] }
 0x465   : > { %v4072_v47 = vadd.f32 %v4071_v33, %v4052_v22  ;;  %4640 = vmatpush.msra.mxu1 %v3262_v27  ;;  %4506 = vmatpush.msrb.mxu2 %v3341_v19  ;;  %v3949_v38 = vld [vmem:[#allocation9 + $0x1fd8] sm:$0xff]  ;;  %v3022_v22 = vld [vmem:[#allocation9 + $0x2e0] sm:$0xff] }
 0x466   : > { %4523 = vmatpush.msrb.mxu3 %v3493_v30  ;;  %4467 = vmatpush.msra.mxu0 %v3077_v28  ;;  %v3685_v11 = vld [vmem:[#allocation9 + $0x1798] sm:$0xff]  ;;  %v3806_v19 = vld [vmem:[#allocation9 + $0x1b60] sm:$0xff]  ;;  %v4171_v28 = vpop.f32.mrf.mxu1 }
 0x467   : > { %4641 = vmatpush.msra.mxu1 %v3254_v6  ;;  %4507 = vmatpush.msrb.mxu2 %v3333_v2  ;;  %v4092_v40 = vadd.f32 %v4091_v25, %v4072_v47  ;;  %v3453_v41 = vld [vmem:[#allocation9 + $0x1058] sm:$0xff]  ;;  %v3014_v6 = vld [vmem:[#allocation9 + $0x2a0] sm:$0xff] }
 0x468   : > { %4524 = vmatpush.msrb.mxu3 %v3485_v0  ;;  %4468 = vmatpush.msra.mxu0 %v3069_v35  ;;  %v3941_v36 = vld [vmem:[#allocation9 + $0x1f98] sm:$0xff]  ;;  %v3798_v0 = vld [vmem:[#allocation9 + $0x1b20] sm:$0xff] }
 0x469   : > { %4642 = vmatpush.msra.mxu1 %v3246_v52  ;;  %4508 = vmatpush.msrb.mxu2 %v3325_v62  ;;  %v3677_v9 = vld [vmem:[#allocation9 + $0x1758] sm:$0xff]  ;;  %v3006_v52 = vld [vmem:[#allocation9 + $0x260] sm:$0xff] }
 0x46a   : > { %v4111_v7 = vpop.f32.mrf.mxu2  ;;  %4525 = vmatpush.msrb.mxu3 %v3477_v45  ;;  %4469 = vmatpush.msra.mxu0 %v3061_v1  ;;  %v3445_v21 = vld [vmem:[#allocation9 + $0x1018] sm:$0xff]  ;;  %v3790_v45 = vld [vmem:[#allocation9 + $0x1ae0] sm:$0xff] }
 0x46b   : > { %v4112_v48 = vadd.f32 %v4111_v7, %v4092_v40  ;;  %4643 = vmatpush.msra.mxu1 %v3238_v26  ;;  %4470 = vmatmul.f32.vlgmr.msra.gmra.mxu0 %v9207_v61  ;;  %v3933_v56 = vld [vmem:[#allocation9 + $0x1f58] sm:$0xff]  ;;  %v2998_v26 = vld [vmem:[#allocation9 + $0x220] sm:$0xff] }
 0x46c   : > { %4509 = vmatpush.msrb.mxu2 %v3317_v16  ;;  %4526 = vmatpush.msrb.mxu3 %v3469_v13  ;;  %v3669_v50 = vld [vmem:[#allocation9 + $0x1718] sm:$0xff]  ;;  %v4151_v15 = vpop.f32.mrf.mxu0  ;;  %v3782_v16 = vld [vmem:[#allocation9 + $0x1aa0] sm:$0xff] }
 0x46d   : > { %5234 = vst [vmem:[%s9265_s21] sm:$0x7f] %v4112_v48  ;;  %4534 = vmatpush.msrb.mxu0 %v3693_v53  ;;  %4644 = vmatpush.msra.mxu1 %v3230_v63  ;;  %v3925_v44 = vld [vmem:[#allocation9 + $0x1f18] sm:$0xff]  ;;  %v4152_v24 = vadd.f32 %v4151_v15, %v4131_v58  ;;  %v2990_v53 = vld [vmem:[#allocation9 + $0x1e0] sm:$0xff] }
 0x46e   : > { %4510 = vmatmul.f32.vlgmr.msrb.gmra.mxu2 %v9212_v32  ;;  %4527 = vmatpush.msrb.mxu3 %v3461_v20  ;;  %v3661_v12 = vld [vmem:[#allocation9 + $0x16d8] sm:$0xff]  ;;  %v3774_v48 = vld [vmem:[#allocation9 + $0x1a60] sm:$0xff] }
 0x46f   : > { %4574 = vmatpush.msra.mxu2 %v3949_v38  ;;  %4535 = vmatpush.msrb.mxu0 %v3685_v11  ;;  %v3917_v5 = vld [vmem:[#allocation9 + $0x1ed8] sm:$0xff]  ;;  %v4172_v47 = vadd.f32 %v4171_v28, %v4152_v24  ;;  %v3734_v58 = vld [vmem:[#allocation9 + $0x1920] sm:$0xff] }
 0x470   : > { %4645 = vmatpush.msra.mxu1 %v3222_v42  ;;  %4528 = vmatpush.msrb.mxu3 %v3453_v41  ;;  %v3653_v4 = vld [vmem:[#allocation9 + $0x1698] sm:$0xff]  ;;  %v4211_v7 = vpop.f32.mrf.mxu3  ;;  %v2982_v42 = vld [vmem:[#allocation9 + $0x1a0] sm:$0xff] }
 0x471   : > { %4575 = vmatpush.msra.mxu2 %v3941_v36  ;;  %4536 = vmatpush.msrb.mxu0 %v3677_v9  ;;  %v3909_v31 = vld [vmem:[#allocation9 + $0x1e98] sm:$0xff]  ;;  %v3766_v36 = vld [vmem:[#allocation9 + $0x1a20] sm:$0xff] }
 0x472   : > { %4646 = vmatpush.msra.mxu1 %v3214_v55  ;;  %4529 = vmatpush.msrb.mxu3 %v3445_v21  ;;  %v3645_v46 = vld [vmem:[#allocation9 + $0x1658] sm:$0xff]  ;;  %v2974_v21 = vld [vmem:[#allocation9 + $0x160] sm:$0xff] }
 0x473   : > { %4576 = vmatpush.msra.mxu2 %v3933_v56  ;;  %4537 = vmatpush.msrb.mxu0 %v3669_v50  ;;  %v3901_v51 = vld [vmem:[#allocation9 + $0x1e58] sm:$0xff]  ;;  %v4191_v33 = vpop.f32.mrf.mxu2  ;;  %v3758_v50 = vld [vmem:[#allocation9 + $0x19e0] sm:$0xff] }
 0x474   : > { %4647 = vmatpush.msra.mxu1 %v3206_v54  ;;  %4530 = vmatmul.f32.vlgmr.msrb.gmra.mxu3 %v9221_v34  ;;  %v3637_v10 = vld [vmem:[#allocation9 + $0x1618] sm:$0xff]  ;;  %v4192_v25 = vadd.f32 %v4191_v33, %v4172_v47  ;;  %v3166_v24 = vld [vmem:[#allocation9 + $0x760] sm:$0xff] }
 0x475   : > { %4577 = vmatpush.msra.mxu2 %v3925_v44  ;;  %4594 = vmatpush.msra.mxu3 %v3054_v18  ;;  %v3893_v57 = vld [vmem:[#allocation9 + $0x1e18] sm:$0xff]  ;;  %v4251_v44 = vpop.f32.mrf.mxu1  ;;  %v2966_v18 = vld [vmem:[#allocation9 + $0x120] sm:$0xff] }
 0x476   : > { %4538 = vmatpush.msrb.mxu0 %v3661_v12  ;;  %4648 = vmatpush.msra.mxu1 %v3198_v60  ;;  %v3629_v27 = vld [vmem:[#allocation9 + $0x15d8] sm:$0xff]  ;;  %v4212_v38 = vadd.f32 %v4211_v7, %v4192_v25  ;;  %v3750_v60 = vld [vmem:[#allocation9 + $0x19a0] sm:$0xff] }
 0x477   : > { %4578 = vmatpush.msra.mxu2 %v3917_v5  ;;  %4595 = vmatpush.msra.mxu3 %v3046_v37  ;;  %v3885_v30 = vld [vmem:[#allocation9 + $0x1dd8] sm:$0xff]  ;;  %v3566_v28 = vld [vmem:[#allocation9 + $0x13e0] sm:$0xff] }
 0x478   : > { %4539 = vmatpush.msrb.mxu0 %v3653_v4  ;;  %4649 = vmatpush.msra.mxu1 %v3190_v29  ;;  %v3621_v2 = vld [vmem:[#allocation9 + $0x1598] sm:$0xff]  ;;  %v2958_v4 = vld [vmem:[#allocation9 + $0xe0] sm:$0xff] }
 0x479   : > { %4579 = vmatpush.msra.mxu2 %v3909_v31  ;;  %4596 = vmatpush.msra.mxu3 %v3038_v39  ;;  %v3877_v35 = vld [vmem:[#allocation9 + $0x1d98] sm:$0xff]  ;;  %v3182_v31 = vld [vmem:[#allocation9 + $0x7e0] sm:$0xff] }
 0x47a   : > { %4650 = vmatmul.f32.vlgmr.msra.gmra.mxu1 %v9210_v8  ;;  %4540 = vmatpush.msrb.mxu0 %v3645_v46  ;;  %v3613_v62 = vld [vmem:[#allocation9 + $0x1558] sm:$0xff]  ;;  %v3742_v39 = vld [vmem:[#allocation9 + $0x1960] sm:$0xff] }
 0x47b   : > { %4714 = vmatpush.msrb.mxu1 %v3822_v14  ;;  %4580 = vmatpush.msra.mxu2 %v3901_v51  ;;  %v3869_v1 = vld [vmem:[#allocation9 + $0x1d58] sm:$0xff]  ;;  %v2950_v46 = vld [vmem:[#allocation9 + $0xa0] sm:$0xff] }
 0x47c   : > { %4597 = vmatpush.msra.mxu3 %v3030_v49  ;;  %4541 = vmatpush.msrb.mxu0 %v3637_v10  ;;  %v3605_v40 = vld [vmem:[#allocation9 + $0x1518] sm:$0xff]  ;;  %v3438_v14 = vld [vmem:[#allocation9 + $0xfe0] sm:$0xff] }
 0x47d   : > { %4715 = vmatpush.msrb.mxu1 %v3814_v43  ;;  %4581 = vmatpush.msra.mxu2 %v3893_v57  ;;  %v3861_v13 = vld [vmem:[#allocation9 + $0x1d18] sm:$0xff]  ;;  %v3174_v51 = vld [vmem:[#allocation9 + $0x7a0] sm:$0xff] }
 0x47e   : > { %4598 = vmatpush.msra.mxu3 %v3022_v22  ;;  %4542 = vmatpush.msrb.mxu0 %v3629_v27  ;;  %v3597_v63 = vld [vmem:[#allocation9 + $0x14d8] sm:$0xff]  ;;  %v2942_v49 = vld [vmem:[#allocation9 + $0x60] sm:$0xff] }
 0x47f   : > { %4716 = vmatpush.msrb.mxu1 %v3806_v19  ;;  %4582 = vmatpush.msra.mxu2 %v3885_v30  ;;  %v3853_v20 = vld [vmem:[#allocation9 + $0x1cd8] sm:$0xff]  ;;  %v3430_v10 = vld [vmem:[#allocation9 + $0xfa0] sm:$0xff] }
 0x480   : > { %4599 = vmatpush.msra.mxu3 %v3014_v6  ;;  %4543 = vmatpush.msrb.mxu0 %v3621_v2  ;;  %v3589_v41 = vld [vmem:[#allocation9 + $0x1498] sm:$0xff]  ;;  %v3726_v43 = vld [vmem:[#allocation9 + $0x18e0] sm:$0xff] }
 0x481   : > { %4717 = vmatpush.msrb.mxu1 %v3798_v0  ;;  %4583 = vmatpush.msra.mxu2 %v3877_v35  ;;  %v3845_v9 = vld [vmem:[#allocation9 + $0x1c98] sm:$0xff]  ;;  %v2934_v57 = vld [vmem:[#allocation9 + $0x20] sm:$0xff] }
 0x482   : > { %4600 = vmatpush.msra.mxu3 %v3006_v52  ;;  %4544 = vmatpush.msrb.mxu0 %v3613_v62  ;;  %v3581_v56 = vld [vmem:[#allocation9 + $0x1458] sm:$0xff]  ;;  %v3422_v22 = vld [vmem:[#allocation9 + $0xf60] sm:$0xff] }
 0x483   : > { %4718 = vmatpush.msrb.mxu1 %v3790_v45  ;;  %4584 = vmatpush.msra.mxu2 %v3869_v1  ;;  %v3837_v54 = vld [vmem:[#allocation9 + $0x1c58] sm:$0xff]  ;;  %v3158_v27 = vld [vmem:[#allocation9 + $0x720] sm:$0xff]  ;;  %v3311_v45 = vld [vmem:[#allocation9 + $0xbe8] sm:$0xff] }
 0x484   : > { %4601 = vmatpush.msra.mxu3 %v2998_v26  ;;  %4545 = vmatpush.msrb.mxu0 %v3605_v40  ;;  %v4231_v11 = vpop.f32.mrf.mxu0  ;;  %v3573_v12 = vld [vmem:[#allocation9 + $0x1418] sm:$0xff]  ;;  %v3718_v19 = vld [vmem:[#allocation9 + $0x18a0] sm:$0xff] }
 0x485   : > { %4719 = vmatpush.msrb.mxu1 %v3782_v16  ;;  %4585 = vmatpush.msra.mxu2 %v3861_v13  ;;  %v4232_v55 = vadd.f32 %v4231_v11, %v4212_v38  ;;  %v3829_v37 = vld [vmem:[#allocation9 + $0x1c18] sm:$0xff]  ;;  %v3414_v30 = vld [vmem:[#allocation9 + $0xf20] sm:$0xff]  ;;  %v3303_v16 = vld [vmem:[#allocation9 + $0xba8] sm:$0xff] }
 0x486   : > { %4602 = vmatpush.msra.mxu3 %v2990_v53  ;;  %4546 = vmatpush.msrb.mxu0 %v3597_v63  ;;  %v3150_v33 = vld [vmem:[#allocation9 + $0x6e0] sm:$0xff]  ;;  %v3295_v63 = vld [vmem:[#allocation9 + $0xb68] sm:$0xff] }
 0x487   : > { %4720 = vmatpush.msrb.mxu1 %v3774_v48  ;;  %4586 = vmatpush.msra.mxu2 %v3853_v20  ;;  %v4252_v5 = vadd.f32 %v4251_v44, %v4232_v55  ;;  %v3710_v6 = vld [vmem:[#allocation9 + $0x1860] sm:$0xff]  ;;  %v3287_v11 = vld [vmem:[#allocation9 + $0xb28] sm:$0xff] }
 0x488   : > { %4603 = vmatpush.msra.mxu3 %v2982_v42  ;;  %4547 = vmatpush.msrb.mxu0 %v3589_v41  ;;  %v3406_v2 = vld [vmem:[#allocation9 + $0xee0] sm:$0xff] }
 0x489   : > { %4721 = vmatpush.msrb.mxu1 %v3766_v36  ;;  %4587 = vmatpush.msra.mxu2 %v3845_v9  ;;  %v3558_v47 = vld [vmem:[#allocation9 + $0x13a0] sm:$0xff]  ;;  %v3279_v9 = vld [vmem:[#allocation9 + $0xae8] sm:$0xff] }
 0x48a   : > { %4604 = vmatpush.msra.mxu3 %v2974_v21  ;;  %4548 = vmatpush.msrb.mxu0 %v3581_v56  ;;  %v3142_v0 = vld [vmem:[#allocation9 + $0x6a0] sm:$0xff] }
 0x48b   : > { %4722 = vmatpush.msrb.mxu1 %v3758_v50  ;;  %4588 = vmatpush.msra.mxu2 %v3837_v54  ;;  %v3702_v35 = vld [vmem:[#allocation9 + $0x1820] sm:$0xff]  ;;  %v3271_v50 = vld [vmem:[#allocation9 + $0xaa8] sm:$0xff] }
 0x48c   : > { %v4271_v29 = vpop.f32.mrf.mxu2  ;;  %4605 = vmatpush.msra.mxu3 %v2966_v18  ;;  %4549 = vmatpush.msrb.mxu0 %v3573_v12  ;;  %v3398_v52 = vld [vmem:[#allocation9 + $0xea0] sm:$0xff]  ;;  %v3263_v12 = vld [vmem:[#allocation9 + $0xa68] sm:$0xff] }
 0x48d   : > { %v4272_v15 = vadd.f32 %v4271_v29, %v4252_v5  ;;  %4723 = vmatpush.msrb.mxu1 %v3750_v60  ;;  %4550 = vmatmul.f32.vlgmr.msrb.gmra.mxu0 %v9225_v59  ;;  %v3550_v62 = vld [vmem:[#allocation9 + $0x1360] sm:$0xff] }
 0x48e   : > { %4589 = vmatpush.msra.mxu2 %v3829_v37  ;;  %4606 = vmatpush.msra.mxu3 %v2958_v4  ;;  %v3134_v25 = vld [vmem:[#allocation9 + $0x660] sm:$0xff]  ;;  %v3255_v4 = vld [vmem:[#allocation9 + $0xa28] sm:$0xff] }
 0x48f   : > { %5235 = vst [vmem:[%s9265_s21 + $0x8] sm:$0x7f] %v4272_v15  ;;  %4614 = vmatpush.msra.mxu0 %v3182_v31  ;;  %4724 = vmatpush.msrb.mxu1 %v3742_v39  ;;  %v3390_v1 = vld [vmem:[#allocation9 + $0xe60] sm:$0xff]  ;;  %v3247_v15 = vld [vmem:[#allocation9 + $0x9e8] sm:$0xff] }
 0x490   : > { %4590 = vmatmul.f32.vlgmr.msra.gmra.mxu2 %v9227_v17  ;;  %4607 = vmatpush.msra.mxu3 %v2950_v46  ;;  %v3542_v26 = vld [vmem:[#allocation9 + $0x1320] sm:$0xff] }
 0x491   : > { %4654 = vmatpush.msrb.mxu2 %v3438_v14  ;;  %4615 = vmatpush.msra.mxu0 %v3174_v51  ;;  %v3126_v40 = vld [vmem:[#allocation9 + $0x620] sm:$0xff] }
 0x492   : > { %4725 = vmatpush.msrb.mxu1 %v3734_v58  ;;  %4608 = vmatpush.msra.mxu3 %v2942_v49  ;;  %v3382_v13 = vld [vmem:[#allocation9 + $0xe20] sm:$0xff]  ;;  %v3239_v58 = vld [vmem:[#allocation9 + $0x9a8] sm:$0xff] }
 0x493   : > { %4655 = vmatpush.msrb.mxu2 %v3430_v10  ;;  %4616 = vmatpush.msra.mxu0 %v3166_v24  ;;  %v3534_v7 = vld [vmem:[#allocation9 + $0x12e0] sm:$0xff] }
 0x494   : > { %4726 = vmatpush.msrb.mxu1 %v3726_v43  ;;  %4609 = vmatpush.msra.mxu3 %v2934_v57  ;;  %v3118_v53 = vld [vmem:[#allocation9 + $0x5e0] sm:$0xff]  ;;  %v3231_v43 = vld [vmem:[#allocation9 + $0x968] sm:$0xff] }
 0x495   : > { %4656 = vmatpush.msrb.mxu2 %v3422_v22  ;;  %4617 = vmatpush.msra.mxu0 %v3158_v27  ;;  %v3374_v48 = vld [vmem:[#allocation9 + $0xde0] sm:$0xff] }
 0x496   : > { %4727 = vmatpush.msrb.mxu1 %v3718_v19  ;;  %4610 = vmatmul.f32.vlgmr.msra.gmra.mxu3 %v9202_v3  ;;  %v3526_v20 = vld [vmem:[#allocation9 + $0x12a0] sm:$0xff]  ;;  %v3223_v19 = vld [vmem:[#allocation9 + $0x928] sm:$0xff] }
 0x497   : > { %4657 = vmatpush.msrb.mxu2 %v3414_v30  ;;  %4674 = vmatpush.msrb.mxu3 %v3566_v28  ;;  %v3110_v38 = vld [vmem:[#allocation9 + $0x5a0] sm:$0xff] }
 0x498   : > { %4618 = vmatpush.msra.mxu0 %v3150_v33  ;;  %4728 = vmatpush.msrb.mxu1 %v3710_v6  ;;  %v3366_v42 = vld [vmem:[#allocation9 + $0xda0] sm:$0xff]  ;;  %v3215_v6 = vld [vmem:[#allocation9 + $0x8e8] sm:$0xff] }
 0x499   : > { %4658 = vmatpush.msrb.mxu2 %v3406_v2  ;;  %4675 = vmatpush.msrb.mxu3 %v3558_v47  ;;  %v3518_v41 = vld [vmem:[#allocation9 + $0x1260] sm:$0xff] }
 0x49a   : > { %4619 = vmatpush.msra.mxu0 %v3142_v0  ;;  %4729 = vmatpush.msrb.mxu1 %v3702_v35  ;;  %v3102_v36 = vld [vmem:[#allocation9 + $0x560] sm:$0xff]  ;;  %v3207_v35 = vld [vmem:[#allocation9 + $0x8a8] sm:$0xff] }
 0x49b   : > { %4659 = vmatpush.msrb.mxu2 %v3398_v52  ;;  %4676 = vmatpush.msrb.mxu3 %v3550_v62  ;;  %v3358_v55 = vld [vmem:[#allocation9 + $0xd60] sm:$0xff]  ;;  %v3055_v62 = vld [vmem:[#allocation9 + $0x3e8] sm:$0xff] }
 0x49c   : > { %4730 = vmatmul.f32.vlgmr.msrb.gmra.mxu1 %v9216_v23  ;;  %4620 = vmatpush.msra.mxu0 %v3134_v25  ;;  %v3510_v21 = vld [vmem:[#allocation9 + $0x1220] sm:$0xff] }
 0x49d   : > { %4794 = vmatpush.msra.mxu1 %v3311_v45  ;;  %4660 = vmatpush.msrb.mxu2 %v3390_v1  ;;  %v3094_v56 = vld [vmem:[#allocation9 + $0x520] sm:$0xff]  ;;  %v3199_v45 = vld [vmem:[#allocation9 + $0x868] sm:$0xff] }
 0x49e   : > { %4677 = vmatpush.msrb.mxu3 %v3542_v26  ;;  %4621 = vmatpush.msra.mxu0 %v3126_v40  ;;  %v3350_v54 = vld [vmem:[#allocation9 + $0xd20] sm:$0xff]  ;;  %v3047_v26 = vld [vmem:[#allocation9 + $0x3a8] sm:$0xff] }
 0x49f   : > { %4795 = vmatpush.msra.mxu1 %v3303_v16  ;;  %4661 = vmatpush.msrb.mxu2 %v3382_v13  ;;  %v3502_v44 = vld [vmem:[#allocation9 + $0x11e0] sm:$0xff]  ;;  %v3191_v16 = vld [vmem:[#allocation9 + $0x828] sm:$0xff] }
 0x4a0   : > { %4678 = vmatpush.msrb.mxu3 %v3534_v7  ;;  %4622 = vmatpush.msra.mxu0 %v3118_v53  ;;  %v3086_v18 = vld [vmem:[#allocation9 + $0x4e0] sm:$0xff]  ;;  %v3039_v7 = vld [vmem:[#allocation9 + $0x368] sm:$0xff] }
 0x4a1   : > { %4796 = vmatpush.msra.mxu1 %v3295_v63  ;;  %4662 = vmatpush.msrb.mxu2 %v3374_v48  ;;  %v3342_v60 = vld [vmem:[#allocation9 + $0xce0] sm:$0xff]  ;;  %v3823_v63 = vld [vmem:[#allocation9 + $0x1be8] sm:$0xff] }
 0x4a2   : > { %4679 = vmatpush.msrb.mxu3 %v3526_v20  ;;  %4623 = vmatpush.msra.mxu0 %v3110_v38  ;;  %v3494_v5 = vld [vmem:[#allocation9 + $0x11a0] sm:$0xff]  ;;  %v4291_v20 = vpop.f32.mrf.mxu3 }
 0x4a3   : > { %4797 = vmatpush.msra.mxu1 %v3287_v11  ;;  %4663 = vmatpush.msrb.mxu2 %v3366_v42  ;;  %v3078_v37 = vld [vmem:[#allocation9 + $0x4a0] sm:$0xff]  ;;  %v3031_v11 = vld [vmem:[#allocation9 + $0x328] sm:$0xff] }
 0x4a4   : > { %4680 = vmatpush.msrb.mxu3 %v3518_v41  ;;  %4624 = vmatpush.msra.mxu0 %v3102_v36  ;;  %v3334_v29 = vld [vmem:[#allocation9 + $0xca0] sm:$0xff]  ;;  %v3815_v41 = vld [vmem:[#allocation9 + $0x1ba8] sm:$0xff] }
 0x4a5   : > { %4798 = vmatpush.msra.mxu1 %v3279_v9  ;;  %4664 = vmatpush.msrb.mxu2 %v3358_v55  ;;  %v3486_v31 = vld [vmem:[#allocation9 + $0x1160] sm:$0xff]  ;;  %v4311_v38 = vpop.f32.mrf.mxu0  ;;  %v3023_v9 = vld [vmem:[#allocation9 + $0x2e8] sm:$0xff] }
 0x4a6   : > { %4681 = vmatpush.msrb.mxu3 %v3510_v21  ;;  %4625 = vmatpush.msra.mxu0 %v3094_v56  ;;  %v3070_v39 = vld [vmem:[#allocation9 + $0x460] sm:$0xff]  ;;  %v4312_v21 = vadd.f32 %v4311_v38, %v4291_v20  ;;  %v3807_v56 = vld [vmem:[#allocation9 + $0x1b68] sm:$0xff] }
 0x4a7   : > { %4799 = vmatpush.msra.mxu1 %v3271_v50  ;;  %4665 = vmatpush.msrb.mxu2 %v3350_v54  ;;  %v3326_v46 = vld [vmem:[#allocation9 + $0xc60] sm:$0xff]  ;;  %v3015_v54 = vld [vmem:[#allocation9 + $0x2a8] sm:$0xff] }
 0x4a8   : > { %4682 = vmatpush.msrb.mxu3 %v3502_v44  ;;  %4626 = vmatpush.msra.mxu0 %v3086_v18  ;;  %v3478_v14 = vld [vmem:[#allocation9 + $0x1120] sm:$0xff]  ;;  %v3799_v18 = vld [vmem:[#allocation9 + $0x1b28] sm:$0xff] }
 0x4a9   : > { %4800 = vmatpush.msra.mxu1 %v3263_v12  ;;  %4666 = vmatpush.msrb.mxu2 %v3342_v60  ;;  %v3062_v51 = vld [vmem:[#allocation9 + $0x420] sm:$0xff]  ;;  %v4331_v60 = vpop.f32.mrf.mxu1  ;;  %v3175_v20 = vld [vmem:[#allocation9 + $0x7a8] sm:$0xff] }
 0x4aa   : > { %4683 = vmatpush.msrb.mxu3 %v3494_v5  ;;  %4627 = vmatpush.msra.mxu0 %v3078_v37  ;;  %v3318_v49 = vld [vmem:[#allocation9 + $0xc20] sm:$0xff]  ;;  %v3007_v37 = vld [vmem:[#allocation9 + $0x268] sm:$0xff] }
 0x4ab   : > { %4801 = vmatpush.msra.mxu1 %v3255_v4  ;;  %4667 = vmatpush.msrb.mxu2 %v3334_v29  ;;  %v3470_v10 = vld [vmem:[#allocation9 + $0x10e0] sm:$0xff]  ;;  %v4332_v29 = vadd.f32 %v4331_v60, %v4312_v21  ;;  %v3735_v38 = vld [vmem:[#allocation9 + $0x1928] sm:$0xff] }
 0x4ac   : > { %4684 = vmatpush.msrb.mxu3 %v3486_v31  ;;  %4628 = vmatpush.msra.mxu0 %v3070_v39  ;;  %v3694_v24 = vld [vmem:[#allocation9 + $0x17e0] sm:$0xff]  ;;  %v3791_v31 = vld [vmem:[#allocation9 + $0x1ae8] sm:$0xff] }
 0x4ad   : > { %4802 = vmatpush.msra.mxu1 %v3247_v15  ;;  %4668 = vmatpush.msrb.mxu2 %v3326_v46  ;;  %v3462_v57 = vld [vmem:[#allocation9 + $0x10a0] sm:$0xff]  ;;  %v4351_v5 = vpop.f32.mrf.mxu2  ;;  %v2999_v46 = vld [vmem:[#allocation9 + $0x228] sm:$0xff] }
 0x4ae   : > { %4685 = vmatpush.msrb.mxu3 %v3478_v14  ;;  %4629 = vmatpush.msra.mxu0 %v3062_v51  ;;  %v3950_v22 = vld [vmem:[#allocation9 + $0x1fe0] sm:$0xff]  ;;  %v4352_v51 = vadd.f32 %v4351_v5, %v4332_v29  ;;  %v3159_v21 = vld [vmem:[#allocation9 + $0x728] sm:$0xff] }
 0x4af   : > { %4803 = vmatpush.msra.mxu1 %v3239_v58  ;;  %4630 = vmatmul.f32.vlgmr.msra.gmra.mxu0 %v9207_v61  ;;  %v3686_v27 = vld [vmem:[#allocation9 + $0x17a0] sm:$0xff]  ;;  %v3783_v58 = vld [vmem:[#allocation9 + $0x1aa8] sm:$0xff] }
 0x4b0   : > { %4669 = vmatpush.msrb.mxu2 %v3318_v49  ;;  %4686 = vmatpush.msrb.mxu3 %v3470_v10  ;;  %v3454_v30 = vld [vmem:[#allocation9 + $0x1060] sm:$0xff]  ;;  %v2991_v10 = vld [vmem:[#allocation9 + $0x1e8] sm:$0xff] }
 0x4b1   : > { %4694 = vmatpush.msrb.mxu0 %v3694_v24  ;;  %4804 = vmatpush.msra.mxu1 %v3231_v43  ;;  %v3942_v28 = vld [vmem:[#allocation9 + $0x1fa0] sm:$0xff]  ;;  %v3559_v60 = vld [vmem:[#allocation9 + $0x13a8] sm:$0xff] }
 0x4b2   : > { %4670 = vmatmul.f32.vlgmr.msrb.gmra.mxu2 %v9212_v32  ;;  %4687 = vmatpush.msrb.mxu3 %v3462_v57  ;;  %v3678_v33 = vld [vmem:[#allocation9 + $0x1760] sm:$0xff]  ;;  %v3143_v5 = vld [vmem:[#allocation9 + $0x6a8] sm:$0xff] }
 0x4b3   : > { %4734 = vmatpush.msra.mxu2 %v3950_v22  ;;  %4695 = vmatpush.msrb.mxu0 %v3686_v27  ;;  %v3446_v2 = vld [vmem:[#allocation9 + $0x1020] sm:$0xff]  ;;  %v4371_v15 = vpop.f32.mrf.mxu3  ;;  %v3775_v22 = vld [vmem:[#allocation9 + $0x1a68] sm:$0xff] }
 0x4b4   : > { %4805 = vmatpush.msra.mxu1 %v3223_v19  ;;  %4688 = vmatpush.msrb.mxu3 %v3454_v30  ;;  %v3934_v47 = vld [vmem:[#allocation9 + $0x1f60] sm:$0xff]  ;;  %v4372_v57 = vadd.f32 %v4371_v15, %v4352_v51  ;;  %v2983_v19 = vld [vmem:[#allocation9 + $0x1a8] sm:$0xff]  ;;  %v3304_v51 = vld [vmem:[#allocation9 + $0xbb0] sm:$0xff] }
 0x4b5   : > { %v3670_v0 = vld [vmem:[#allocation9 + $0x1720] sm:$0xff]  ;;  %4735 = vmatpush.msra.mxu2 %v3942_v28  ;;  %4696 = vmatpush.msrb.mxu0 %v3678_v33  ;;  %v3767_v28 = vld [vmem:[#allocation9 + $0x1a28] sm:$0xff] }
 0x4b6   : > { %4806 = vmatpush.msra.mxu1 %v3215_v6  ;;  %4689 = vmatpush.msrb.mxu3 %v3446_v2  ;;  %v3926_v52 = vld [vmem:[#allocation9 + $0x1f20] sm:$0xff]  ;;  %v2975_v2 = vld [vmem:[#allocation9 + $0x168] sm:$0xff] }
 0x4b7   : > { %4736 = vmatpush.msra.mxu2 %v3934_v47  ;;  %4697 = vmatpush.msrb.mxu0 %v3670_v0  ;;  %v3662_v25 = vld [vmem:[#allocation9 + $0x16e0] sm:$0xff]  ;;  %v3759_v0 = vld [vmem:[#allocation9 + $0x19e8] sm:$0xff] }
 0x4b8   : > { %4807 = vmatpush.msra.mxu1 %v3207_v35  ;;  %4690 = vmatmul.f32.vlgmr.msrb.gmra.mxu3 %v9221_v34  ;;  %v3918_v1 = vld [vmem:[#allocation9 + $0x1ee0] sm:$0xff]  ;;  %v3551_v29 = vld [vmem:[#allocation9 + $0x1368] sm:$0xff] }
 0x4b9   : > { %4737 = vmatpush.msra.mxu2 %v3926_v52  ;;  %4754 = vmatpush.msra.mxu3 %v3055_v62  ;;  %v3654_v40 = vld [vmem:[#allocation9 + $0x16a0] sm:$0xff]  ;;  %v4411_v52 = vpop.f32.mrf.mxu1  ;;  %v2967_v62 = vld [vmem:[#allocation9 + $0x128] sm:$0xff] }
 0x4ba   : > { %4698 = vmatpush.msrb.mxu0 %v3662_v25  ;;  %4808 = vmatpush.msra.mxu1 %v3199_v45  ;;  %v3910_v13 = vld [vmem:[#allocation9 + $0x1ea0] sm:$0xff]  ;;  %v3751_v45 = vld [vmem:[#allocation9 + $0x19a8] sm:$0xff] }
 0x4bb   : > { %4738 = vmatpush.msra.mxu2 %v3918_v1  ;;  %4755 = vmatpush.msra.mxu3 %v3047_v26  ;;  %v3646_v53 = vld [vmem:[#allocation9 + $0x1660] sm:$0xff]  ;;  %v3391_v15 = vld [vmem:[#allocation9 + $0xe68] sm:$0xff] }
 0x4bc   : > { %4699 = vmatpush.msrb.mxu0 %v3654_v40  ;;  %4809 = vmatpush.msra.mxu1 %v3191_v16  ;;  %v3902_v48 = vld [vmem:[#allocation9 + $0x1e60] sm:$0xff]  ;;  %v2959_v40 = vld [vmem:[#allocation9 + $0xe8] sm:$0xff] }
 0x4bd   : > { %4739 = vmatpush.msra.mxu2 %v3910_v13  ;;  %4756 = vmatpush.msra.mxu3 %v3039_v7  ;;  %v3638_v42 = vld [vmem:[#allocation9 + $0x1620] sm:$0xff]  ;;  %v3183_v13 = vld [vmem:[#allocation9 + $0x7e8] sm:$0xff] }
 0x4be   : > { %4810 = vmatmul.f32.vlgmr.msra.gmra.mxu1 %v9210_v8  ;;  %4700 = vmatpush.msrb.mxu0 %v3646_v53  ;;  %v3894_v36 = vld [vmem:[#allocation9 + $0x1e20] sm:$0xff]  ;;  %v3743_v7 = vld [vmem:[#allocation9 + $0x1968] sm:$0xff] }
 0x4bf   : > { %4874 = vmatpush.msrb.mxu1 %v3823_v63  ;;  %4740 = vmatpush.msra.mxu2 %v3902_v48  ;;  %v3630_v55 = vld [vmem:[#allocation9 + $0x15e0] sm:$0xff]  ;;  %v2951_v63 = vld [vmem:[#allocation9 + $0xa8] sm:$0xff] }
 0x4c0   : > { %4757 = vmatpush.msra.mxu3 %v3031_v11  ;;  %4701 = vmatpush.msrb.mxu0 %v3638_v42  ;;  %v3886_v50 = vld [vmem:[#allocation9 + $0x1de0] sm:$0xff]  ;;  %v3439_v48 = vld [vmem:[#allocation9 + $0xfe8] sm:$0xff] }
 0x4c1   : > { %4875 = vmatpush.msrb.mxu1 %v3815_v41  ;;  %4741 = vmatpush.msra.mxu2 %v3894_v36  ;;  %v3622_v44 = vld [vmem:[#allocation9 + $0x15a0] sm:$0xff]  ;;  %v2943_v11 = vld [vmem:[#allocation9 + $0x68] sm:$0xff] }
 0x4c2   : > { %4758 = vmatpush.msra.mxu3 %v3023_v9  ;;  %4702 = vmatpush.msrb.mxu0 %v3630_v55  ;;  %v3878_v12 = vld [vmem:[#allocation9 + $0x1da0] sm:$0xff]  ;;  %v3431_v42 = vld [vmem:[#allocation9 + $0xfa8] sm:$0xff] }
 0x4c3   : > { %4876 = vmatpush.msrb.mxu1 %v3807_v56  ;;  %4742 = vmatpush.msra.mxu2 %v3886_v50  ;;  %v3614_v4 = vld [vmem:[#allocation9 + $0x1560] sm:$0xff]  ;;  %v3167_v41 = vld [vmem:[#allocation9 + $0x768] sm:$0xff] }
 0x4c4   : > { %4759 = vmatpush.msra.mxu3 %v3015_v54  ;;  %4703 = vmatpush.msrb.mxu0 %v3622_v44  ;;  %v3870_v39 = vld [vmem:[#allocation9 + $0x1d60] sm:$0xff]  ;;  %v3727_v36 = vld [vmem:[#allocation9 + $0x18e8] sm:$0xff] }
 0x4c5   : > { %4877 = vmatpush.msrb.mxu1 %v3799_v18  ;;  %4743 = vmatpush.msra.mxu2 %v3878_v12  ;;  %v3606_v14 = vld [vmem:[#allocation9 + $0x1520] sm:$0xff]  ;;  %v2935_v9 = vld [vmem:[#allocation9 + $0x28] sm:$0xff] }
 0x4c6   : > { %4760 = vmatpush.msra.mxu3 %v3007_v37  ;;  %4704 = vmatpush.msrb.mxu0 %v3614_v4  ;;  %v3862_v49 = vld [vmem:[#allocation9 + $0x1d20] sm:$0xff]  ;;  %v4391_v43 = vpop.f32.mrf.mxu0  ;;  %v3423_v55 = vld [vmem:[#allocation9 + $0xf68] sm:$0xff] }
 0x4c7   : > { %4878 = vmatpush.msrb.mxu1 %v3791_v31  ;;  %4744 = vmatpush.msra.mxu2 %v3870_v39  ;;  %v3598_v24 = vld [vmem:[#allocation9 + $0x14e0] sm:$0xff]  ;;  %v4392_v6 = vadd.f32 %v4391_v43, %v4372_v57  ;;  %v3719_v56 = vld [vmem:[#allocation9 + $0x18a8] sm:$0xff]  ;;  %v3312_v39 = vld [vmem:[#allocation9 + $0xbf0] sm:$0xff] }
 0x4c8   : > { %4761 = vmatpush.msra.mxu3 %v2999_v46  ;;  %4705 = vmatpush.msrb.mxu0 %v3606_v14  ;;  %v3854_v27 = vld [vmem:[#allocation9 + $0x1ce0] sm:$0xff]  ;;  %v3415_v50 = vld [vmem:[#allocation9 + $0xf28] sm:$0xff] }
 0x4c9   : > { %4879 = vmatpush.msrb.mxu1 %v3783_v58  ;;  %4745 = vmatpush.msra.mxu2 %v3862_v49  ;;  %v3590_v30 = vld [vmem:[#allocation9 + $0x14a0] sm:$0xff]  ;;  %v4412_v1 = vadd.f32 %v4411_v52, %v4392_v6  ;;  %v3567_v54 = vld [vmem:[#allocation9 + $0x13e8] sm:$0xff] }
 0x4ca   : > { %4762 = vmatpush.msra.mxu3 %v2991_v10  ;;  %4706 = vmatpush.msrb.mxu0 %v3598_v24  ;;  %v3846_v33 = vld [vmem:[#allocation9 + $0x1ca0] sm:$0xff]  ;;  %v3151_v44 = vld [vmem:[#allocation9 + $0x6e8] sm:$0xff]  ;;  %v3296_v24 = vld [vmem:[#allocation9 + $0xb70] sm:$0xff] }
 0x4cb   : > { %4880 = vmatpush.msrb.mxu1 %v3775_v22  ;;  %4746 = vmatpush.msra.mxu2 %v3854_v27  ;;  %v3582_v47 = vld [vmem:[#allocation9 + $0x1460] sm:$0xff]  ;;  %v3711_v18 = vld [vmem:[#allocation9 + $0x1868] sm:$0xff]  ;;  %v3288_v27 = vld [vmem:[#allocation9 + $0xb30] sm:$0xff] }
 0x4cc   : > { %4763 = vmatpush.msra.mxu3 %v2983_v19  ;;  %4707 = vmatpush.msrb.mxu0 %v3590_v30  ;;  %v3838_v35 = vld [vmem:[#allocation9 + $0x1c60] sm:$0xff]  ;;  %v3407_v12 = vld [vmem:[#allocation9 + $0xee8] sm:$0xff] }
 0x4cd   : > { %4881 = vmatpush.msrb.mxu1 %v3767_v28  ;;  %4747 = vmatpush.msra.mxu2 %v3846_v33  ;;  %v3574_v25 = vld [vmem:[#allocation9 + $0x1420] sm:$0xff]  ;;  %v3703_v37 = vld [vmem:[#allocation9 + $0x1828] sm:$0xff]  ;;  %v3280_v33 = vld [vmem:[#allocation9 + $0xaf0] sm:$0xff] }
 0x4ce   : > { %4764 = vmatpush.msra.mxu3 %v2975_v2  ;;  %4708 = vmatpush.msrb.mxu0 %v3582_v47  ;;  %v3830_v26 = vld [vmem:[#allocation9 + $0x1c20] sm:$0xff]  ;;  %v3399_v4 = vld [vmem:[#allocation9 + $0xea8] sm:$0xff] }
 0x4cf   : > { %4882 = vmatpush.msrb.mxu1 %v3759_v0  ;;  %4748 = vmatpush.msra.mxu2 %v3838_v35  ;;  %v4431_v16 = vpop.f32.mrf.mxu2  ;;  %v3135_v31 = vld [vmem:[#allocation9 + $0x668] sm:$0xff]  ;;  %v3272_v0 = vld [vmem:[#allocation9 + $0xab0] sm:$0xff] }
 0x4d0   : > { %4765 = vmatpush.msra.mxu3 %v2967_v62  ;;  %4709 = vmatpush.msrb.mxu0 %v3574_v25  ;;  %v4432_v53 = vadd.f32 %v4431_v16, %v4412_v1  ;;  %v3543_v46 = vld [vmem:[#allocation9 + $0x1328] sm:$0xff]  ;;  %v3264_v25 = vld [vmem:[#allocation9 + $0xa70] sm:$0xff] }
 0x4d1   : > { %4883 = vmatpush.msrb.mxu1 %v3751_v45  ;;  %4710 = vmatmul.f32.vlgmr.msrb.gmra.mxu0 %v9225_v59  ;;  %v3127_v14 = vld [vmem:[#allocation9 + $0x628] sm:$0xff] }
 0x4d2   : > { %4749 = vmatpush.msra.mxu2 %v3830_v26  ;;  %4766 = vmatpush.msra.mxu3 %v2959_v40  ;;  %5236 = vst [vmem:[%s9265_s21 + $0x10] sm:$0x7f] %v4432_v53  ;;  %v3383_v58 = vld [vmem:[#allocation9 + $0xe28] sm:$0xff]  ;;  %v3256_v40 = vld [vmem:[#allocation9 + $0xa30] sm:$0xff] }
 0x4d3   : > { %4774 = vmatpush.msra.mxu0 %v3183_v13  ;;  %4884 = vmatpush.msrb.mxu1 %v3743_v7  ;;  %v3535_v49 = vld [vmem:[#allocation9 + $0x12e8] sm:$0xff]  ;;  %v3248_v53 = vld [vmem:[#allocation9 + $0x9f0] sm:$0xff] }
 0x4d4   : > { %4750 = vmatmul.f32.vlgmr.msra.gmra.mxu2 %v9227_v17  ;;  %4767 = vmatpush.msra.mxu3 %v2951_v63  ;;  %v3119_v10 = vld [vmem:[#allocation9 + $0x5e8] sm:$0xff] }
 0x4d5   : > { %4814 = vmatpush.msrb.mxu2 %v3439_v48  ;;  %4775 = vmatpush.msra.mxu0 %v3175_v20  ;;  %v3375_v43 = vld [vmem:[#allocation9 + $0xde8] sm:$0xff] }
 0x4d6   : > { %4885 = vmatpush.msrb.mxu1 %v3735_v38  ;;  %4768 = vmatpush.msra.mxu3 %v2943_v11  ;;  %v3527_v57 = vld [vmem:[#allocation9 + $0x12a8] sm:$0xff]  ;;  %v3240_v38 = vld [vmem:[#allocation9 + $0x9b0] sm:$0xff] }
 0x4d7   : > { %4815 = vmatpush.msrb.mxu2 %v3431_v42  ;;  %4776 = vmatpush.msra.mxu0 %v3167_v41  ;;  %v3111_v22 = vld [vmem:[#allocation9 + $0x5a8] sm:$0xff] }
 0x4d8   : > { %4886 = vmatpush.msrb.mxu1 %v3727_v36  ;;  %4769 = vmatpush.msra.mxu3 %v2935_v9  ;;  %v3367_v19 = vld [vmem:[#allocation9 + $0xda8] sm:$0xff]  ;;  %v3232_v36 = vld [vmem:[#allocation9 + $0x970] sm:$0xff] }
 0x4d9   : > { %4816 = vmatpush.msrb.mxu2 %v3423_v55  ;;  %4777 = vmatpush.msra.mxu0 %v3159_v21  ;;  %v3519_v30 = vld [vmem:[#allocation9 + $0x1268] sm:$0xff] }
 0x4da   : > { %4887 = vmatpush.msrb.mxu1 %v3719_v56  ;;  %4770 = vmatmul.f32.vlgmr.msra.gmra.mxu3 %v9202_v3  ;;  %v3103_v28 = vld [vmem:[#allocation9 + $0x568] sm:$0xff]  ;;  %v3224_v56 = vld [vmem:[#allocation9 + $0x930] sm:$0xff] }
 0x4db   : > { %4817 = vmatpush.msrb.mxu2 %v3415_v50  ;;  %4834 = vmatpush.msrb.mxu3 %v3567_v54  ;;  %v3359_v6 = vld [vmem:[#allocation9 + $0xd68] sm:$0xff] }
 0x4dc   : > { %4778 = vmatpush.msra.mxu0 %v3151_v44  ;;  %4888 = vmatpush.msrb.mxu1 %v3711_v18  ;;  %v3511_v2 = vld [vmem:[#allocation9 + $0x1228] sm:$0xff]  ;;  %v3216_v18 = vld [vmem:[#allocation9 + $0x8f0] sm:$0xff] }
 0x4dd   : > { %4818 = vmatpush.msrb.mxu2 %v3407_v12  ;;  %4835 = vmatpush.msrb.mxu3 %v3559_v60  ;;  %v3095_v47 = vld [vmem:[#allocation9 + $0x528] sm:$0xff] }
 0x4de   : > { %4779 = vmatpush.msra.mxu0 %v3143_v5  ;;  %4889 = vmatpush.msrb.mxu1 %v3703_v37  ;;  %v3351_v35 = vld [vmem:[#allocation9 + $0xd28] sm:$0xff]  ;;  %v3208_v37 = vld [vmem:[#allocation9 + $0x8b0] sm:$0xff] }
 0x4df   : > { %4819 = vmatpush.msrb.mxu2 %v3399_v4  ;;  %4836 = vmatpush.msrb.mxu3 %v3551_v29  ;;  %v3503_v52 = vld [vmem:[#allocation9 + $0x11e8] sm:$0xff]  ;;  %v3056_v29 = vld [vmem:[#allocation9 + $0x3f0] sm:$0xff] }
 0x4e0   : > { %4890 = vmatmul.f32.vlgmr.msrb.gmra.mxu1 %v9216_v23  ;;  %4780 = vmatpush.msra.mxu0 %v3135_v31  ;;  %v3087_v62 = vld [vmem:[#allocation9 + $0x4e8] sm:$0xff] }
 0x4e1   : > { %4954 = vmatpush.msra.mxu1 %v3312_v39  ;;  %4820 = vmatpush.msrb.mxu2 %v3391_v15  ;;  %v3343_v45 = vld [vmem:[#allocation9 + $0xce8] sm:$0xff]  ;;  %v3200_v39 = vld [vmem:[#allocation9 + $0x870] sm:$0xff] }
 0x4e2   : > { %4837 = vmatpush.msrb.mxu3 %v3543_v46  ;;  %4781 = vmatpush.msra.mxu0 %v3127_v14  ;;  %v3495_v1 = vld [vmem:[#allocation9 + $0x11a8] sm:$0xff]  ;;  %v3048_v46 = vld [vmem:[#allocation9 + $0x3b0] sm:$0xff] }
 0x4e3   : > { %4955 = vmatpush.msra.mxu1 %v3304_v51  ;;  %4821 = vmatpush.msrb.mxu2 %v3383_v58  ;;  %v3079_v26 = vld [vmem:[#allocation9 + $0x4a8] sm:$0xff]  ;;  %v3192_v51 = vld [vmem:[#allocation9 + $0x830] sm:$0xff] }
 0x4e4   : > { %4838 = vmatpush.msrb.mxu3 %v3535_v49  ;;  %4782 = vmatpush.msra.mxu0 %v3119_v10  ;;  %v3335_v16 = vld [vmem:[#allocation9 + $0xca8] sm:$0xff]  ;;  %v3040_v49 = vld [vmem:[#allocation9 + $0x370] sm:$0xff] }
 0x4e5   : > { %4956 = vmatpush.msra.mxu1 %v3296_v24  ;;  %4822 = vmatpush.msrb.mxu2 %v3375_v43  ;;  %v3487_v13 = vld [vmem:[#allocation9 + $0x1168] sm:$0xff]  ;;  %v3824_v24 = vld [vmem:[#allocation9 + $0x1bf0] sm:$0xff] }
 0x4e6   : > { %4839 = vmatpush.msrb.mxu3 %v3527_v57  ;;  %4783 = vmatpush.msra.mxu0 %v3111_v22  ;;  %v3071_v7 = vld [vmem:[#allocation9 + $0x468] sm:$0xff]  ;;  %v4451_v57 = vpop.f32.mrf.mxu3 }
 0x4e7   : > { %4957 = vmatpush.msra.mxu1 %v3288_v27  ;;  %4823 = vmatpush.msrb.mxu2 %v3367_v19  ;;  %v3327_v63 = vld [vmem:[#allocation9 + $0xc68] sm:$0xff]  ;;  %v3032_v27 = vld [vmem:[#allocation9 + $0x330] sm:$0xff] }
 0x4e8   : > { %4840 = vmatpush.msrb.mxu3 %v3519_v30  ;;  %4784 = vmatpush.msra.mxu0 %v3103_v28  ;;  %v3479_v48 = vld [vmem:[#allocation9 + $0x1128] sm:$0xff]  ;;  %v4471_v22 = vpop.f32.mrf.mxu0  ;;  %v3816_v30 = vld [vmem:[#allocation9 + $0x1bb0] sm:$0xff] }
 0x4e9   : > { %4958 = vmatpush.msra.mxu1 %v3280_v33  ;;  %4824 = vmatpush.msrb.mxu2 %v3359_v6  ;;  %v3063_v20 = vld [vmem:[#allocation9 + $0x428] sm:$0xff]  ;;  %v3024_v33 = vld [vmem:[#allocation9 + $0x2f0] sm:$0xff] }
 0x4ea   : > { %4841 = vmatpush.msrb.mxu3 %v3511_v2  ;;  %4785 = vmatpush.msra.mxu0 %v3095_v47  ;;  %v3319_v11 = vld [vmem:[#allocation9 + $0xc28] sm:$0xff]  ;;  %v4472_v2 = vadd.f32 %v4471_v22, %v4451_v57  ;;  %v3808_v47 = vld [vmem:[#allocation9 + $0x1b70] sm:$0xff] }
 0x4eb   : > { %4959 = vmatpush.msra.mxu1 %v3272_v0  ;;  %4825 = vmatpush.msrb.mxu2 %v3351_v35  ;;  %v3471_v42 = vld [vmem:[#allocation9 + $0x10e8] sm:$0xff]  ;;  %v3016_v35 = vld [vmem:[#allocation9 + $0x2b0] sm:$0xff] }
 0x4ec   : > { %4842 = vmatpush.msrb.mxu3 %v3503_v52  ;;  %4786 = vmatpush.msra.mxu0 %v3087_v62  ;;  %v3695_v41 = vld [vmem:[#allocation9 + $0x17e8] sm:$0xff]  ;;  %v3800_v62 = vld [vmem:[#allocation9 + $0x1b30] sm:$0xff] }
 0x4ed   : > { %4960 = vmatpush.msra.mxu1 %v3264_v25  ;;  %4826 = vmatpush.msrb.mxu2 %v3343_v45  ;;  %v3463_v9 = vld [vmem:[#allocation9 + $0x10a8] sm:$0xff]  ;;  %v4491_v45 = vpop.f32.mrf.mxu1  ;;  %v3176_v57 = vld [vmem:[#allocation9 + $0x7b0] sm:$0xff] }
 0x4ee   : > { %4843 = vmatpush.msrb.mxu3 %v3495_v1  ;;  %4787 = vmatpush.msra.mxu0 %v3079_v26  ;;  %v3951_v55 = vld [vmem:[#allocation9 + $0x1fe8] sm:$0xff]  ;;  %v3008_v26 = vld [vmem:[#allocation9 + $0x270] sm:$0xff] }
 0x4ef   : > { %4961 = vmatpush.msra.mxu1 %v3256_v40  ;;  %4827 = vmatpush.msrb.mxu2 %v3335_v16  ;;  %v3687_v21 = vld [vmem:[#allocation9 + $0x17a8] sm:$0xff]  ;;  %v4492_v16 = vadd.f32 %v4491_v45, %v4472_v2  ;;  %v3736_v22 = vld [vmem:[#allocation9 + $0x1930] sm:$0xff] }
 0x4f0   : > { %4844 = vmatpush.msrb.mxu3 %v3487_v13  ;;  %4788 = vmatpush.msra.mxu0 %v3071_v7  ;;  %v3455_v50 = vld [vmem:[#allocation9 + $0x1068] sm:$0xff]  ;;  %v3792_v13 = vld [vmem:[#allocation9 + $0x1af0] sm:$0xff] }
 0x4f1   : > { %4962 = vmatpush.msra.mxu1 %v3248_v53  ;;  %4828 = vmatpush.msrb.mxu2 %v3327_v63  ;;  %v3943_v54 = vld [vmem:[#allocation9 + $0x1fa8] sm:$0xff]  ;;  %v4511_v1 = vpop.f32.mrf.mxu2  ;;  %v3000_v63 = vld [vmem:[#allocation9 + $0x230] sm:$0xff] }
 0x4f2   : > { %4845 = vmatpush.msrb.mxu3 %v3479_v48  ;;  %4789 = vmatpush.msra.mxu0 %v3063_v20  ;;  %v3679_v44 = vld [vmem:[#allocation9 + $0x1768] sm:$0xff]  ;;  %v4512_v20 = vadd.f32 %v4511_v1, %v4492_v16  ;;  %v3160_v2 = vld [vmem:[#allocation9 + $0x730] sm:$0xff] }
 0x4f3   : > { %4963 = vmatpush.msra.mxu1 %v3240_v38  ;;  %4790 = vmatmul.f32.vlgmr.msra.gmra.mxu0 %v9207_v61  ;;  %v3447_v12 = vld [vmem:[#allocation9 + $0x1028] sm:$0xff]  ;;  %v3784_v38 = vld [vmem:[#allocation9 + $0x1ab0] sm:$0xff] }
 0x4f4   : > { %4829 = vmatpush.msrb.mxu2 %v3319_v11  ;;  %4846 = vmatpush.msrb.mxu3 %v3471_v42  ;;  %v3935_v60 = vld [vmem:[#allocation9 + $0x1f68] sm:$0xff]  ;;  %v2992_v42 = vld [vmem:[#allocation9 + $0x1f0] sm:$0xff] }
 0x4f5   : > { %4854 = vmatpush.msrb.mxu0 %v3695_v41  ;;  %4964 = vmatpush.msra.mxu1 %v3232_v36  ;;  %v3671_v5 = vld [vmem:[#allocation9 + $0x1728] sm:$0xff]  ;;  %v3560_v45 = vld [vmem:[#allocation9 + $0x13b0] sm:$0xff] }
 0x4f6   : > { %4830 = vmatmul.f32.vlgmr.msrb.gmra.mxu2 %v9212_v32  ;;  %4847 = vmatpush.msrb.mxu3 %v3463_v9  ;;  %v3927_v4 = vld [vmem:[#allocation9 + $0x1f28] sm:$0xff]  ;;  %v3144_v1 = vld [vmem:[#allocation9 + $0x6b0] sm:$0xff] }
 0x4f7   : > { %4894 = vmatpush.msra.mxu2 %v3951_v55  ;;  %4855 = vmatpush.msrb.mxu0 %v3687_v21  ;;  %v3663_v31 = vld [vmem:[#allocation9 + $0x16e8] sm:$0xff]  ;;  %v4531_v53 = vpop.f32.mrf.mxu3  ;;  %v3776_v55 = vld [vmem:[#allocation9 + $0x1a70] sm:$0xff] }
 0x4f8   : > { %4965 = vmatpush.msra.mxu1 %v3224_v56  ;;  %4848 = vmatpush.msrb.mxu3 %v3455_v50  ;;  %v3919_v15 = vld [vmem:[#allocation9 + $0x1ee8] sm:$0xff]  ;;  %v4532_v9 = vadd.f32 %v4531_v53, %v4512_v20  ;;  %v2984_v56 = vld [vmem:[#allocation9 + $0x1b0] sm:$0xff]  ;;  %v3305_v20 = vld [vmem:[#allocation9 + $0xbb8] sm:$0xff] }
 0x4f9   : > { %4895 = vmatpush.msra.mxu2 %v3943_v54  ;;  %4856 = vmatpush.msrb.mxu0 %v3679_v44  ;;  %v3655_v14 = vld [vmem:[#allocation9 + $0x16a8] sm:$0xff]  ;;  %v3768_v54 = vld [vmem:[#allocation9 + $0x1a30] sm:$0xff] }
 0x4fa   : > { %4966 = vmatpush.msra.mxu1 %v3216_v18  ;;  %4849 = vmatpush.msrb.mxu3 %v3447_v12  ;;  %v3911_v58 = vld [vmem:[#allocation9 + $0x1ea8] sm:$0xff]  ;;  %v2976_v12 = vld [vmem:[#allocation9 + $0x170] sm:$0xff] }
 0x4fb   : > { %4896 = vmatpush.msra.mxu2 %v3935_v60  ;;  %4857 = vmatpush.msrb.mxu0 %v3671_v5  ;;  %v3647_v10 = vld [vmem:[#allocation9 + $0x1668] sm:$0xff]  ;;  %v3760_v5 = vld [vmem:[#allocation9 + $0x19f0] sm:$0xff] }
 0x4fc   : > { %4967 = vmatpush.msra.mxu1 %v3208_v37  ;;  %4850 = vmatmul.f32.vlgmr.msrb.gmra.mxu3 %v9221_v34  ;;  %v3903_v43 = vld [vmem:[#allocation9 + $0x1e68] sm:$0xff]  ;;  %v3552_v16 = vld [vmem:[#allocation9 + $0x1370] sm:$0xff] }
 0x4fd   : > { %4897 = vmatpush.msra.mxu2 %v3927_v4  ;;  %4914 = vmatpush.msra.mxu3 %v3056_v29  ;;  %v3639_v19 = vld [vmem:[#allocation9 + $0x1628] sm:$0xff]  ;;  %v4571_v4 = vpop.f32.mrf.mxu1  ;;  %v2968_v29 = vld [vmem:[#allocation9 + $0x130] sm:$0xff] }
 0x4fe   : > { %4858 = vmatpush.msrb.mxu0 %v3663_v31  ;;  %4968 = vmatpush.msra.mxu1 %v3200_v39  ;;  %v3895_v28 = vld [vmem:[#allocation9 + $0x1e28] sm:$0xff]  ;;  %v3752_v39 = vld [vmem:[#allocation9 + $0x19b0] sm:$0xff] }
 0x4ff   : > { %4898 = vmatpush.msra.mxu2 %v3919_v15  ;;  %4915 = vmatpush.msra.mxu3 %v3048_v46  ;;  %v3631_v6 = vld [vmem:[#allocation9 + $0x15e8] sm:$0xff]  ;;  %v3392_v53 = vld [vmem:[#allocation9 + $0xe70] sm:$0xff] }
 0x500   : > { %4859 = vmatpush.msrb.mxu0 %v3655_v14  ;;  %4969 = vmatpush.msra.mxu1 %v3192_v51  ;;  %v3887_v0 = vld [vmem:[#allocation9 + $0x1de8] sm:$0xff]  ;;  %v2960_v14 = vld [vmem:[#allocation9 + $0xf0] sm:$0xff] }
 0x501   : > { %4899 = vmatpush.msra.mxu2 %v3911_v58  ;;  %4916 = vmatpush.msra.mxu3 %v3040_v49  ;;  %v3623_v52 = vld [vmem:[#allocation9 + $0x15a8] sm:$0xff]  ;;  %v3184_v58 = vld [vmem:[#allocation9 + $0x7f0] sm:$0xff] }
 0x502   : > { %4970 = vmatmul.f32.vlgmr.msra.gmra.mxu1 %v9210_v8  ;;  %4860 = vmatpush.msrb.mxu0 %v3647_v10  ;;  %v3879_v25 = vld [vmem:[#allocation9 + $0x1da8] sm:$0xff]  ;;  %v3744_v49 = vld [vmem:[#allocation9 + $0x1970] sm:$0xff] }
 0x503   : > { %5034 = vmatpush.msrb.mxu1 %v3824_v24  ;;  %4900 = vmatpush.msra.mxu2 %v3903_v43  ;;  %v3615_v40 = vld [vmem:[#allocation9 + $0x1568] sm:$0xff]  ;;  %v2952_v24 = vld [vmem:[#allocation9 + $0xb0] sm:$0xff] }
 0x504   : > { %4917 = vmatpush.msra.mxu3 %v3032_v27  ;;  %4861 = vmatpush.msrb.mxu0 %v3639_v19  ;;  %v3871_v7 = vld [vmem:[#allocation9 + $0x1d68] sm:$0xff]  ;;  %v3440_v43 = vld [vmem:[#allocation9 + $0xff0] sm:$0xff] }
 0x505   : > { %5035 = vmatpush.msrb.mxu1 %v3816_v30  ;;  %4901 = vmatpush.msra.mxu2 %v3895_v28  ;;  %v3607_v48 = vld [vmem:[#allocation9 + $0x1528] sm:$0xff]  ;;  %v2944_v27 = vld [vmem:[#allocation9 + $0x70] sm:$0xff] }
 0x506   : > { %4918 = vmatpush.msra.mxu3 %v3024_v33  ;;  %4862 = vmatpush.msrb.mxu0 %v3631_v6  ;;  %v3863_v11 = vld [vmem:[#allocation9 + $0x1d28] sm:$0xff]  ;;  %v3432_v19 = vld [vmem:[#allocation9 + $0xfb0] sm:$0xff] }
 0x507   : > { %5036 = vmatpush.msrb.mxu1 %v3808_v47  ;;  %4902 = vmatpush.msra.mxu2 %v3887_v0  ;;  %v3599_v41 = vld [vmem:[#allocation9 + $0x14e8] sm:$0xff]  ;;  %v3168_v30 = vld [vmem:[#allocation9 + $0x770] sm:$0xff] }
 0x508   : > { %4919 = vmatpush.msra.mxu3 %v3016_v35  ;;  %4863 = vmatpush.msrb.mxu0 %v3623_v52  ;;  %v3855_v21 = vld [vmem:[#allocation9 + $0x1ce8] sm:$0xff]  ;;  %v3728_v28 = vld [vmem:[#allocation9 + $0x18f0] sm:$0xff] }
 0x509   : > { %5037 = vmatpush.msrb.mxu1 %v3800_v62  ;;  %4903 = vmatpush.msra.mxu2 %v3879_v25  ;;  %v3591_v50 = vld [vmem:[#allocation9 + $0x14a8] sm:$0xff]  ;;  %v2936_v33 = vld [vmem:[#allocation9 + $0x30] sm:$0xff] }
 0x50a   : > { %4920 = vmatpush.msra.mxu3 %v3008_v26  ;;  %4864 = vmatpush.msrb.mxu0 %v3615_v40  ;;  %v4551_v36 = vpop.f32.mrf.mxu0  ;;  %v3847_v44 = vld [vmem:[#allocation9 + $0x1ca8] sm:$0xff]  ;;  %v3424_v6 = vld [vmem:[#allocation9 + $0xf70] sm:$0xff] }
 0x50b   : > { %5038 = vmatpush.msrb.mxu1 %v3792_v13  ;;  %4904 = vmatpush.msra.mxu2 %v3871_v7  ;;  %v4552_v18 = vadd.f32 %v4551_v36, %v4532_v9  ;;  %v3583_v60 = vld [vmem:[#allocation9 + $0x1468] sm:$0xff]  ;;  %v3720_v47 = vld [vmem:[#allocation9 + $0x18b0] sm:$0xff]  ;;  %v3313_v7 = vld [vmem:[#allocation9 + $0xbf8] sm:$0xff] }
 0x50c   : > { %4921 = vmatpush.msra.mxu3 %v3000_v63  ;;  %4865 = vmatpush.msrb.mxu0 %v3607_v48  ;;  %v3839_v37 = vld [vmem:[#allocation9 + $0x1c68] sm:$0xff]  ;;  %v3416_v0 = vld [vmem:[#allocation9 + $0xf30] sm:$0xff] }
 0x50d   : > { %5039 = vmatpush.msrb.mxu1 %v3784_v38  ;;  %4905 = vmatpush.msra.mxu2 %v3863_v11  ;;  %v3575_v31 = vld [vmem:[#allocation9 + $0x1428] sm:$0xff]  ;;  %v4572_v15 = vadd.f32 %v4571_v4, %v4552_v18  ;;  %v3568_v35 = vld [vmem:[#allocation9 + $0x13f0] sm:$0xff] }
 0x50e   : > { %4922 = vmatpush.msra.mxu3 %v2992_v42  ;;  %4866 = vmatpush.msrb.mxu0 %v3599_v41  ;;  %v3831_v46 = vld [vmem:[#allocation9 + $0x1c28] sm:$0xff]  ;;  %v3152_v52 = vld [vmem:[#allocation9 + $0x6f0] sm:$0xff]  ;;  %v3297_v41 = vld [vmem:[#allocation9 + $0xb78] sm:$0xff] }
 0x50f   : > { %5040 = vmatpush.msrb.mxu1 %v3776_v55  ;;  %4906 = vmatpush.msra.mxu2 %v3855_v21  ;;  %v3712_v62 = vld [vmem:[#allocation9 + $0x1870] sm:$0xff]  ;;  %v3289_v21 = vld [vmem:[#allocation9 + $0xb38] sm:$0xff] }
 0x510   : > { %4923 = vmatpush.msra.mxu3 %v2984_v56  ;;  %4867 = vmatpush.msrb.mxu0 %v3591_v50  ;;  %v3408_v25 = vld [vmem:[#allocation9 + $0xef0] sm:$0xff] }
 0x511   : > { %5041 = vmatpush.msrb.mxu1 %v3768_v54  ;;  %4907 = vmatpush.msra.mxu2 %v3847_v44  ;;  %v3704_v26 = vld [vmem:[#allocation9 + $0x1830] sm:$0xff]  ;;  %v3281_v44 = vld [vmem:[#allocation9 + $0xaf8] sm:$0xff] }
 0x512   : > { %4924 = vmatpush.msra.mxu3 %v2976_v12  ;;  %4868 = vmatpush.msrb.mxu0 %v3583_v60  ;;  %v3400_v40 = vld [vmem:[#allocation9 + $0xeb0] sm:$0xff] }
 0x513   : > { %5042 = vmatpush.msrb.mxu1 %v3760_v5  ;;  %4908 = vmatpush.msra.mxu2 %v3839_v37  ;;  %v4591_v51 = vpop.f32.mrf.mxu2  ;;  %v3136_v13 = vld [vmem:[#allocation9 + $0x670] sm:$0xff]  ;;  %v3273_v5 = vld [vmem:[#allocation9 + $0xab8] sm:$0xff] }
 0x514   : > { %4925 = vmatpush.msra.mxu3 %v2968_v29  ;;  %4869 = vmatpush.msrb.mxu0 %v3575_v31  ;;  %v4592_v10 = vadd.f32 %v4591_v51, %v4572_v15  ;;  %v3544_v63 = vld [vmem:[#allocation9 + $0x1330] sm:$0xff]  ;;  %v3265_v31 = vld [vmem:[#allocation9 + $0xa78] sm:$0xff] }
 0x515   : > { %5043 = vmatpush.msrb.mxu1 %v3752_v39  ;;  %4870 = vmatmul.f32.vlgmr.msrb.gmra.mxu0 %v9225_v59  ;;  %v3128_v48 = vld [vmem:[#allocation9 + $0x630] sm:$0xff] }
 0x516   : > { %4909 = vmatpush.msra.mxu2 %v3831_v46  ;;  %4926 = vmatpush.msra.mxu3 %v2960_v14  ;;  %5237 = vst [vmem:[%s9265_s21 + $0x18] sm:$0x7f] %v4592_v10  ;;  %v3384_v38 = vld [vmem:[#allocation9 + $0xe30] sm:$0xff]  ;;  %v3257_v14 = vld [vmem:[#allocation9 + $0xa38] sm:$0xff] }
 0x517   : > { %4934 = vmatpush.msra.mxu0 %v3184_v58  ;;  %5044 = vmatpush.msrb.mxu1 %v3744_v49  ;;  %v3536_v11 = vld [vmem:[#allocation9 + $0x12f0] sm:$0xff]  ;;  %v3249_v10 = vld [vmem:[#allocation9 + $0x9f8] sm:$0xff] }
 0x518   : > { %4910 = vmatmul.f32.vlgmr.msra.gmra.mxu2 %v9227_v17  ;;  %4927 = vmatpush.msra.mxu3 %v2952_v24  ;;  %v3120_v42 = vld [vmem:[#allocation9 + $0x5f0] sm:$0xff] }
 0x519   : > { %4974 = vmatpush.msrb.mxu2 %v3440_v43  ;;  %4935 = vmatpush.msra.mxu0 %v3176_v57  ;;  %v3376_v36 = vld [vmem:[#allocation9 + $0xdf0] sm:$0xff] }
 0x51a   : > { %5045 = vmatpush.msrb.mxu1 %v3736_v22  ;;  %4928 = vmatpush.msra.mxu3 %v2944_v27  ;;  %v3528_v9 = vld [vmem:[#allocation9 + $0x12b0] sm:$0xff]  ;;  %v3241_v22 = vld [vmem:[#allocation9 + $0x9b8] sm:$0xff] }
 0x51b   : > { %4975 = vmatpush.msrb.mxu2 %v3432_v19  ;;  %4936 = vmatpush.msra.mxu0 %v3168_v30  ;;  %v3112_v55 = vld [vmem:[#allocation9 + $0x5b0] sm:$0xff] }
 0x51c   : > { %5046 = vmatpush.msrb.mxu1 %v3728_v28  ;;  %4929 = vmatpush.msra.mxu3 %v2936_v33  ;;  %v3368_v56 = vld [vmem:[#allocation9 + $0xdb0] sm:$0xff]  ;;  %v3233_v28 = vld [vmem:[#allocation9 + $0x978] sm:$0xff] }
 0x51d   : > { %4976 = vmatpush.msrb.mxu2 %v3424_v6  ;;  %4937 = vmatpush.msra.mxu0 %v3160_v2  ;;  %v3520_v50 = vld [vmem:[#allocation9 + $0x1270] sm:$0xff] }
 0x51e   : > { %5047 = vmatpush.msrb.mxu1 %v3720_v47  ;;  %4930 = vmatmul.f32.vlgmr.msra.gmra.mxu3 %v9202_v3  ;;  %v3104_v54 = vld [vmem:[#allocation9 + $0x570] sm:$0xff]  ;;  %v3225_v47 = vld [vmem:[#allocation9 + $0x938] sm:$0xff] }
 0x51f   : > { %4977 = vmatpush.msrb.mxu2 %v3416_v0  ;;  %4994 = vmatpush.msrb.mxu3 %v3568_v35  ;;  %v3360_v18 = vld [vmem:[#allocation9 + $0xd70] sm:$0xff] }
 0x520   : > { %4938 = vmatpush.msra.mxu0 %v3152_v52  ;;  %5048 = vmatpush.msrb.mxu1 %v3712_v62  ;;  %v3512_v12 = vld [vmem:[#allocation9 + $0x1230] sm:$0xff]  ;;  %v3217_v62 = vld [vmem:[#allocation9 + $0x8f8] sm:$0xff] }
 0x521   : > { %4978 = vmatpush.msrb.mxu2 %v3408_v25  ;;  %4995 = vmatpush.msrb.mxu3 %v3560_v45  ;;  %v3096_v60 = vld [vmem:[#allocation9 + $0x530] sm:$0xff] }
 0x522   : > { %4939 = vmatpush.msra.mxu0 %v3144_v1  ;;  %5049 = vmatpush.msrb.mxu1 %v3704_v26  ;;  %v3352_v37 = vld [vmem:[#allocation9 + $0xd30] sm:$0xff]  ;;  %v3209_v26 = vld [vmem:[#allocation9 + $0x8b8] sm:$0xff] }
 0x523   : > { %4979 = vmatpush.msrb.mxu2 %v3400_v40  ;;  %4996 = vmatpush.msrb.mxu3 %v3552_v16  ;;  %v3504_v4 = vld [vmem:[#allocation9 + $0x11f0] sm:$0xff]  ;;  %v3057_v16 = vld [vmem:[#allocation9 + $0x3f8] sm:$0xff] }
 0x524   : > { %5050 = vmatmul.f32.vlgmr.msrb.gmra.mxu1 %v9216_v23  ;;  %4940 = vmatpush.msra.mxu0 %v3136_v13  ;;  %v3088_v29 = vld [vmem:[#allocation9 + $0x4f0] sm:$0xff] }
 0x525   : > { %5114 = vmatpush.msra.mxu1 %v3313_v7  ;;  %4980 = vmatpush.msrb.mxu2 %v3392_v53  ;;  %v3344_v39 = vld [vmem:[#allocation9 + $0xcf0] sm:$0xff]  ;;  %v3201_v7 = vld [vmem:[#allocation9 + $0x878] sm:$0xff] }
 0x526   : > { %4997 = vmatpush.msrb.mxu3 %v3544_v63  ;;  %4941 = vmatpush.msra.mxu0 %v3128_v48  ;;  %v3496_v15 = vld [vmem:[#allocation9 + $0x11b0] sm:$0xff]  ;;  %v3049_v63 = vld [vmem:[#allocation9 + $0x3b8] sm:$0xff] }
 0x527   : > { %5115 = vmatpush.msra.mxu1 %v3305_v20  ;;  %4981 = vmatpush.msrb.mxu2 %v3384_v38  ;;  %v3080_v46 = vld [vmem:[#allocation9 + $0x4b0] sm:$0xff]  ;;  %v3193_v20 = vld [vmem:[#allocation9 + $0x838] sm:$0xff] }
 0x528   : > { %4998 = vmatpush.msrb.mxu3 %v3536_v11  ;;  %4942 = vmatpush.msra.mxu0 %v3120_v42  ;;  %v3336_v51 = vld [vmem:[#allocation9 + $0xcb0] sm:$0xff]  ;;  %v3041_v11 = vld [vmem:[#allocation9 + $0x378] sm:$0xff] }
 0x529   : > { %5116 = vmatpush.msra.mxu1 %v3297_v41  ;;  %4982 = vmatpush.msrb.mxu2 %v3376_v36  ;;  %v3488_v58 = vld [vmem:[#allocation9 + $0x1170] sm:$0xff]  ;;  %v3825_v41 = vld [vmem:[#allocation9 + $0x1bf8] sm:$0xff] }
 0x52a   : > { %4999 = vmatpush.msrb.mxu3 %v3528_v9  ;;  %4943 = vmatpush.msra.mxu0 %v3112_v55  ;;  %v3072_v49 = vld [vmem:[#allocation9 + $0x470] sm:$0xff]  ;;  %v4611_v9 = vpop.f32.mrf.mxu3 }
 0x52b   : > { %5117 = vmatpush.msra.mxu1 %v3289_v21  ;;  %4983 = vmatpush.msrb.mxu2 %v3368_v56  ;;  %v3328_v24 = vld [vmem:[#allocation9 + $0xc70] sm:$0xff]  ;;  %v3033_v21 = vld [vmem:[#allocation9 + $0x338] sm:$0xff] }
 0x52c   : > { %5000 = vmatpush.msrb.mxu3 %v3520_v50  ;;  %4944 = vmatpush.msra.mxu0 %v3104_v54  ;;  %v3480_v43 = vld [vmem:[#allocation9 + $0x1130] sm:$0xff]  ;;  %v4631_v55 = vpop.f32.mrf.mxu0  ;;  %v3817_v50 = vld [vmem:[#allocation9 + $0x1bb8] sm:$0xff] }
 0x52d   : > { %5118 = vmatpush.msra.mxu1 %v3281_v44  ;;  %4984 = vmatpush.msrb.mxu2 %v3360_v18  ;;  %v3064_v57 = vld [vmem:[#allocation9 + $0x430] sm:$0xff]  ;;  %v3025_v44 = vld [vmem:[#allocation9 + $0x2f8] sm:$0xff] }
 0x52e   : > { %5001 = vmatpush.msrb.mxu3 %v3512_v12  ;;  %4945 = vmatpush.msra.mxu0 %v3096_v60  ;;  %v3320_v27 = vld [vmem:[#allocation9 + $0xc30] sm:$0xff]  ;;  %v4632_v12 = vadd.f32 %v4631_v55, %v4611_v9  ;;  %v3809_v60 = vld [vmem:[#allocation9 + $0x1b78] sm:$0xff] }
 0x52f   : > { %5119 = vmatpush.msra.mxu1 %v3273_v5  ;;  %4985 = vmatpush.msrb.mxu2 %v3352_v37  ;;  %v3472_v19 = vld [vmem:[#allocation9 + $0x10f0] sm:$0xff]  ;;  %v3017_v37 = vld [vmem:[#allocation9 + $0x2b8] sm:$0xff] }
 0x530   : > { %5002 = vmatpush.msrb.mxu3 %v3504_v4  ;;  %4946 = vmatpush.msra.mxu0 %v3088_v29  ;;  %v3696_v30 = vld [vmem:[#allocation9 + $0x17f0] sm:$0xff]  ;;  %v3801_v29 = vld [vmem:[#allocation9 + $0x1b38] sm:$0xff] }
 0x531   : > { %5120 = vmatpush.msra.mxu1 %v3265_v31  ;;  %4986 = vmatpush.msrb.mxu2 %v3344_v39  ;;  %v3464_v33 = vld [vmem:[#allocation9 + $0x10b0] sm:$0xff]  ;;  %v4651_v31 = vpop.f32.mrf.mxu1  ;;  %v3737_v9 = vld [vmem:[#allocation9 + $0x1938] sm:$0xff] }
 0x532   : > { %5003 = vmatpush.msrb.mxu3 %v3496_v15  ;;  %4947 = vmatpush.msra.mxu0 %v3080_v46  ;;  %v3952_v6 = vld [vmem:[#allocation9 + $0x1ff0] sm:$0xff]  ;;  %v3009_v15 = vld [vmem:[#allocation9 + $0x278] sm:$0xff] }
 0x533   : > { %5121 = vmatpush.msra.mxu1 %v3257_v14  ;;  %4987 = vmatpush.msrb.mxu2 %v3336_v51  ;;  %v3688_v2 = vld [vmem:[#allocation9 + $0x17b0] sm:$0xff]  ;;  %v4652_v14 = vadd.f32 %v4651_v31, %v4632_v12  ;;  %v3793_v51 = vld [vmem:[#allocation9 + $0x1af8] sm:$0xff] }
 0x534   : > { %5004 = vmatpush.msrb.mxu3 %v3488_v58  ;;  %4948 = vmatpush.msra.mxu0 %v3072_v49  ;;  %v3456_v0 = vld [vmem:[#allocation9 + $0x1070] sm:$0xff]  ;;  %v2945_v55 = vld [vmem:[#allocation9 + $0x78] sm:$0xff] }
 0x535   : > { %5122 = vmatpush.msra.mxu1 %v3249_v10  ;;  %4988 = vmatpush.msrb.mxu2 %v3328_v24  ;;  %v3944_v35 = vld [vmem:[#allocation9 + $0x1fb0] sm:$0xff]  ;;  %v4671_v39 = vpop.f32.mrf.mxu2  ;;  %v3001_v10 = vld [vmem:[#allocation9 + $0x238] sm:$0xff] }
 0x536   : > { %5005 = vmatpush.msrb.mxu3 %v3480_v43  ;;  %4949 = vmatpush.msra.mxu0 %v3064_v57  ;;  %v3680_v52 = vld [vmem:[#allocation9 + $0x1770] sm:$0xff]  ;;  %v4672_v43 = vadd.f32 %v4671_v39, %v4652_v14  ;;  %v3785_v57 = vld [vmem:[#allocation9 + $0x1ab8] sm:$0xff] }
 0x537   : > { %5123 = vmatpush.msra.mxu1 %v3241_v22  ;;  %4950 = vmatmul.f32.vlgmr.msra.gmra.mxu0 %v9207_v61  ;;  %v3448_v25 = vld [vmem:[#allocation9 + $0x1030] sm:$0xff]  ;;  %v3721_v12 = vld [vmem:[#allocation9 + $0x18b8] sm:$0xff] }
 0x538   : > { %4989 = vmatpush.msrb.mxu2 %v3320_v27  ;;  %5006 = vmatpush.msrb.mxu3 %v3472_v19  ;;  %v3936_v45 = vld [vmem:[#allocation9 + $0x1f70] sm:$0xff]  ;;  %v2993_v27 = vld [vmem:[#allocation9 + $0x1f8] sm:$0xff] }
 0x539   : > { %5014 = vmatpush.msrb.mxu0 %v3696_v30  ;;  %5124 = vmatpush.msra.mxu1 %v3233_v28  ;;  %v3672_v1 = vld [vmem:[#allocation9 + $0x1730] sm:$0xff]  ;;  %v3145_v31 = vld [vmem:[#allocation9 + $0x6b8] sm:$0xff] }
 0x53a   : > { %4990 = vmatmul.f32.vlgmr.msrb.gmra.mxu2 %v9212_v32  ;;  %5007 = vmatpush.msrb.mxu3 %v3464_v33  ;;  %v3928_v40 = vld [vmem:[#allocation9 + $0x1f30] sm:$0xff]  ;;  %v3777_v33 = vld [vmem:[#allocation9 + $0x1a78] sm:$0xff] }
 0x53b   : > { %5054 = vmatpush.msra.mxu2 %v3952_v6  ;;  %5015 = vmatpush.msrb.mxu0 %v3688_v2  ;;  %v3664_v13 = vld [vmem:[#allocation9 + $0x16f0] sm:$0xff]  ;;  %v4691_v49 = vpop.f32.mrf.mxu3  ;;  %v2985_v2 = vld [vmem:[#allocation9 + $0x1b8] sm:$0xff] }
 0x53c   : > { %5125 = vmatpush.msra.mxu1 %v3225_v47  ;;  %5008 = vmatpush.msrb.mxu3 %v3456_v0  ;;  %v3920_v53 = vld [vmem:[#allocation9 + $0x1ef0] sm:$0xff]  ;;  %v4692_v28 = vadd.f32 %v4691_v49, %v4672_v43  ;;  %v3769_v0 = vld [vmem:[#allocation9 + $0x1a38] sm:$0xff] }
 0x53d   : > { %5055 = vmatpush.msra.mxu2 %v3944_v35  ;;  %5016 = vmatpush.msrb.mxu0 %v3680_v52  ;;  %v3656_v48 = vld [vmem:[#allocation9 + $0x16b0] sm:$0xff]  ;;  %v3705_v39 = vld [vmem:[#allocation9 + $0x1838] sm:$0xff] }
 0x53e   : > { %5126 = vmatpush.msra.mxu1 %v3217_v62  ;;  %5009 = vmatpush.msrb.mxu3 %v3448_v25  ;;  %v3912_v38 = vld [vmem:[#allocation9 + $0x1eb0] sm:$0xff]  ;;  %v2977_v62 = vld [vmem:[#allocation9 + $0x178] sm:$0xff] }
 0x53f   : > { %5056 = vmatpush.msra.mxu2 %v3936_v45  ;;  %5017 = vmatpush.msrb.mxu0 %v3672_v1  ;;  %v3648_v42 = vld [vmem:[#allocation9 + $0x1670] sm:$0xff]  ;;  %v3761_v45 = vld [vmem:[#allocation9 + $0x19f8] sm:$0xff] }
 0x540   : > { %5127 = vmatpush.msra.mxu1 %v3209_v26  ;;  %5010 = vmatmul.f32.vlgmr.msrb.gmra.mxu3 %v9221_v34  ;;  %v3904_v36 = vld [vmem:[#allocation9 + $0x1e70] sm:$0xff]  ;;  %v4731_v26 = vpop.f32.mrf.mxu1  ;;  %v3137_v14 = vld [vmem:[#allocation9 + $0x678] sm:$0xff] }
 0x541   : > { %5057 = vmatpush.msra.mxu2 %v3928_v40  ;;  %5074 = vmatpush.msra.mxu3 %v3057_v16  ;;  %v3640_v56 = vld [vmem:[#allocation9 + $0x1630] sm:$0xff]  ;;  %v2969_v40 = vld [vmem:[#allocation9 + $0x138] sm:$0xff] }
 0x542   : > { %5018 = vmatpush.msrb.mxu0 %v3664_v13  ;;  %5128 = vmatpush.msra.mxu1 %v3201_v7  ;;  %v3896_v54 = vld [vmem:[#allocation9 + $0x1e30] sm:$0xff]  ;;  %v3753_v13 = vld [vmem:[#allocation9 + $0x19b8] sm:$0xff] }
 0x543   : > { %5058 = vmatpush.msra.mxu2 %v3920_v53  ;;  %5075 = vmatpush.msra.mxu3 %v3049_v63  ;;  %v3632_v18 = vld [vmem:[#allocation9 + $0x15f0] sm:$0xff]  ;;  %v2961_v63 = vld [vmem:[#allocation9 + $0xf8] sm:$0xff] }
 0x544   : > { %5019 = vmatpush.msrb.mxu0 %v3656_v48  ;;  %5129 = vmatpush.msra.mxu1 %v3193_v20  ;;  %v3888_v5 = vld [vmem:[#allocation9 + $0x1df0] sm:$0xff]  ;;  %v3185_v20 = vld [vmem:[#allocation9 + $0x7f8] sm:$0xff] }
 0x545   : > { %5059 = vmatpush.msra.mxu2 %v3912_v38  ;;  %5076 = vmatpush.msra.mxu3 %v3041_v11  ;;  %v3624_v4 = vld [vmem:[#allocation9 + $0x15b0] sm:$0xff]  ;;  %v3745_v38 = vld [vmem:[#allocation9 + $0x1978] sm:$0xff] }
 0x546   : > { %5130 = vmatmul.f32.vlgmr.msra.gmra.mxu1 %v9210_v8  ;;  %5020 = vmatpush.msrb.mxu0 %v3648_v42  ;;  %v3880_v8 = vld [vmem:[#allocation9 + $0x1db0] sm:$0xff]  ;;  %v2953_v42 = vld [vmem:[#allocation9 + $0xb8] sm:$0xff] }
 0x547   : > { %5194 = vmatpush.msrb.mxu1 %v3825_v41  ;;  %5060 = vmatpush.msra.mxu2 %v3904_v36  ;;  %v3616_v46 = vld [vmem:[#allocation9 + $0x1570] sm:$0xff]  ;;  %v3441_v41 = vld [vmem:[#allocation9 + $0xff8] sm:$0xff] }
 0x548   : > { %5077 = vmatpush.msra.mxu3 %v3033_v21  ;;  %5021 = vmatpush.msrb.mxu0 %v3640_v56  ;;  %v3872_v58 = vld [vmem:[#allocation9 + $0x1d70] sm:$0xff]  ;;  %v3177_v36 = vld [vmem:[#allocation9 + $0x7b8] sm:$0xff] }
 0x549   : > { %5195 = vmatpush.msrb.mxu1 %v3817_v50  ;;  %5061 = vmatpush.msra.mxu2 %v3896_v54  ;;  %v3608_v24 = vld [vmem:[#allocation9 + $0x1530] sm:$0xff]  ;;  %v3433_v21 = vld [vmem:[#allocation9 + $0xfb8] sm:$0xff] }
 0x54a   : > { %5078 = vmatpush.msra.mxu3 %v3025_v44  ;;  %5022 = vmatpush.msrb.mxu0 %v3632_v18  ;;  %v3864_v22 = vld [vmem:[#allocation9 + $0x1d30] sm:$0xff]  ;;  %v3169_v56 = vld [vmem:[#allocation9 + $0x778] sm:$0xff] }
 0x54b   : > { %5196 = vmatpush.msrb.mxu1 %v3809_v60  ;;  %5062 = vmatpush.msra.mxu2 %v3888_v5  ;;  %v3600_v19 = vld [vmem:[#allocation9 + $0x14f0] sm:$0xff]  ;;  %v3729_v50 = vld [vmem:[#allocation9 + $0x18f8] sm:$0xff] }
 0x54c   : > { %5079 = vmatpush.msra.mxu3 %v3017_v37  ;;  %5023 = vmatpush.msrb.mxu0 %v3624_v4  ;;  %v3856_v6 = vld [vmem:[#allocation9 + $0x1cf0] sm:$0xff]  ;;  %v2937_v54 = vld [vmem:[#allocation9 + $0x38] sm:$0xff] }
 0x54d   : > { %5197 = vmatpush.msrb.mxu1 %v3801_v29  ;;  %5063 = vmatpush.msra.mxu2 %v3880_v8  ;;  %v3592_v47 = vld [vmem:[#allocation9 + $0x14b0] sm:$0xff]  ;;  %v3425_v44 = vld [vmem:[#allocation9 + $0xf78] sm:$0xff] }
 0x54e   : > { %5080 = vmatpush.msra.mxu3 %v3009_v15  ;;  %5024 = vmatpush.msrb.mxu0 %v3616_v46  ;;  %v4711_v30 = vpop.f32.mrf.mxu0  ;;  %v3848_v35 = vld [vmem:[#allocation9 + $0x1cb0] sm:$0xff]  ;;  %v3161_v18 = vld [vmem:[#allocation9 + $0x738] sm:$0xff] }
 0x54f   : > { %5198 = vmatpush.msrb.mxu1 %v3793_v51  ;;  %5064 = vmatpush.msra.mxu2 %v3872_v58  ;;  %v4712_v52 = vadd.f32 %v4711_v30, %v4692_v28  ;;  %v3584_v25 = vld [vmem:[#allocation9 + $0x1470] sm:$0xff]  ;;  %v3417_v60 = vld [vmem:[#allocation9 + $0xf38] sm:$0xff] }
 0x550   : > { %5081 = vmatpush.msra.mxu3 %v3001_v10  ;;  %5025 = vmatpush.msrb.mxu0 %v3608_v24  ;;  %v3840_v1 = vld [vmem:[#allocation9 + $0x1c70] sm:$0xff]  ;;  %v3569_v5 = vld [vmem:[#allocation9 + $0x13f8] sm:$0xff] }
 0x551   : > { %5199 = vmatpush.msrb.mxu1 %v3785_v57  ;;  %5065 = vmatpush.msra.mxu2 %v3864_v22  ;;  %v3576_v16 = vld [vmem:[#allocation9 + $0x1430] sm:$0xff]  ;;  %v4732_v7 = vadd.f32 %v4731_v26, %v4712_v52  ;;  %v3153_v37 = vld [vmem:[#allocation9 + $0x6f8] sm:$0xff] }
 0x552   : > { %5082 = vmatpush.msra.mxu3 %v2993_v27  ;;  %5026 = vmatpush.msrb.mxu0 %v3600_v19  ;;  %v3832_v53 = vld [vmem:[#allocation9 + $0x1c30] sm:$0xff]  ;;  %v3713_v4 = vld [vmem:[#allocation9 + $0x1878] sm:$0xff] }
 0x553   : > { %5200 = vmatpush.msrb.mxu1 %v3777_v33  ;;  %5066 = vmatpush.msra.mxu2 %v3856_v6  ;;  %v3409_v29 = vld [vmem:[#allocation9 + $0xef8] sm:$0xff] }
 0x554   : > { %5083 = vmatpush.msra.mxu3 %v2985_v2  ;;  %5027 = vmatpush.msrb.mxu0 %v3592_v47  ;;  %v3561_v8 = vld [vmem:[#allocation9 + $0x13b8] sm:$0xff] }
 0x555   : > { %5201 = vmatpush.msrb.mxu1 %v3769_v0  ;;  %5067 = vmatpush.msra.mxu2 %v3848_v35  ;;  %v3401_v15 = vld [vmem:[#allocation9 + $0xeb8] sm:$0xff] }
 0x556   : > { %5084 = vmatpush.msra.mxu3 %v2977_v62  ;;  %5028 = vmatpush.msrb.mxu0 %v3584_v25  ;;  %v3553_v46 = vld [vmem:[#allocation9 + $0x1378] sm:$0xff] }
 0x557   : > { %5202 = vmatpush.msrb.mxu1 %v3761_v45  ;;  %5068 = vmatpush.msra.mxu2 %v3840_v1  ;;  %v4751_v48 = vpop.f32.mrf.mxu2  ;;  %v3393_v51 = vld [vmem:[#allocation9 + $0xe78] sm:$0xff] }
 0x558   : > { %5085 = vmatpush.msra.mxu3 %v2969_v40  ;;  %5029 = vmatpush.msrb.mxu0 %v3576_v16  ;;  %v4752_v11 = vadd.f32 %v4751_v48, %v4732_v7  ;;  %v3545_v58 = vld [vmem:[#allocation9 + $0x1338] sm:$0xff] }
 0x559   : > { %5203 = vmatpush.msrb.mxu1 %v3753_v13  ;;  %5030 = vmatmul.f32.vlgmr.msrb.gmra.mxu0 %v9225_v59  ;;  %v3385_v49 = vld [vmem:[#allocation9 + $0xe38] sm:$0xff] }
 0x55a   : > { %5069 = vmatpush.msra.mxu2 %v3832_v53  ;;  %5086 = vmatpush.msra.mxu3 %v2961_v63  ;;  %5238 = vst [vmem:[%s9265_s21 + $0x20] sm:$0x7f] %v4752_v11  ;;  %v3537_v10 = vld [vmem:[#allocation9 + $0x12f8] sm:$0xff] }
 0x55b   : > { %5094 = vmatpush.msra.mxu0 %v3185_v20  ;;  %5204 = vmatpush.msrb.mxu1 %v3745_v38  ;;  %v3121_v24 = vld [vmem:[#allocation9 + $0x5f8] sm:$0xff] }
 0x55c   : > { %5070 = vmatmul.f32.vlgmr.msra.gmra.mxu2 %v9227_v17  ;;  %5087 = vmatpush.msra.mxu3 %v2953_v42  ;;  %v3377_v43 = vld [vmem:[#allocation9 + $0xdf8] sm:$0xff] }
 0x55d   : > { %5134 = vmatpush.msrb.mxu2 %v3441_v41  ;;  %5095 = vmatpush.msra.mxu0 %v3177_v36  ;;  %v3529_v57 = vld [vmem:[#allocation9 + $0x12b8] sm:$0xff] }
 0x55e   : > { %5205 = vmatpush.msrb.mxu1 %v3737_v9  ;;  %5088 = vmatpush.msra.mxu3 %v2945_v55  ;;  %v3113_v22 = vld [vmem:[#allocation9 + $0x5b8] sm:$0xff] }
 0x55f   : > { %5135 = vmatpush.msrb.mxu2 %v3433_v21  ;;  %5096 = vmatpush.msra.mxu0 %v3169_v56  ;;  %v3369_v27 = vld [vmem:[#allocation9 + $0xdb8] sm:$0xff] }
 0x560   : > { %5206 = vmatpush.msrb.mxu1 %v3729_v50  ;;  %5089 = vmatpush.msra.mxu3 %v2937_v54  ;;  %v3521_v19 = vld [vmem:[#allocation9 + $0x1278] sm:$0xff] }
 0x561   : > { %5136 = vmatpush.msrb.mxu2 %v3425_v44  ;;  %5097 = vmatpush.msra.mxu0 %v3161_v18  ;;  %v3105_v30 = vld [vmem:[#allocation9 + $0x578] sm:$0xff]  ;;  %v4771_v44 = vpop.f32.mrf.mxu3 }
 0x562   : > { %5207 = vmatpush.msrb.mxu1 %v3721_v12  ;;  %5090 = vmatmul.f32.vlgmr.msra.gmra.mxu3 %v9202_v3  ;;  %v3129_v3 = vld [vmem:[#allocation9 + $0x638] sm:$0xff] }
 0x563   : > { %5137 = vmatpush.msrb.mxu2 %v3417_v60  ;;  %5154 = vmatpush.msrb.mxu3 %v3569_v5  ;;  %v3513_v28 = vld [vmem:[#allocation9 + $0x1238] sm:$0xff] }
 0x564   : > { %5098 = vmatpush.msra.mxu0 %v3153_v37  ;;  %5208 = vmatpush.msrb.mxu1 %v3713_v4  ;;  %v3097_v33 = vld [vmem:[#allocation9 + $0x538] sm:$0xff] }
 0x565   : > { %5138 = vmatpush.msrb.mxu2 %v3409_v29  ;;  %5155 = vmatpush.msrb.mxu3 %v3561_v8  ;;  %v3353_v6 = vld [vmem:[#allocation9 + $0xd38] sm:$0xff]  ;;  %v4811_v8 = vpop.f32.mrf.mxu1 }
 0x566   : > { %5099 = vmatpush.msra.mxu0 %v3145_v31  ;;  %5209 = vmatpush.msrb.mxu1 %v3705_v39  ;;  %v3505_v2 = vld [vmem:[#allocation9 + $0x11f8] sm:$0xff] }
 0x567   : > { %5139 = vmatpush.msrb.mxu2 %v3401_v15  ;;  %5156 = vmatpush.msrb.mxu3 %v3553_v46  ;;  %v3089_v47 = vld [vmem:[#allocation9 + $0x4f8] sm:$0xff] }
 0x568   : > { %5210 = vmatmul.f32.vlgmr.msrb.gmra.mxu1 %v9216_v23  ;;  %5100 = vmatpush.msra.mxu0 %v3137_v14  ;;  %v3361_v23 = vld [vmem:[#allocation9 + $0xd78] sm:$0xff] }
 0x569   : > { %5140 = vmatpush.msrb.mxu2 %v3393_v51  ;;  %5157 = vmatpush.msrb.mxu3 %v3545_v58  ;;  %v3345_v0 = vld [vmem:[#allocation9 + $0xcf8] sm:$0xff] }
 0x56a   : > { %5101 = vmatpush.msra.mxu0 %v3129_v3  ;;  %v3497_v35 = vld [vmem:[#allocation9 + $0x11b8] sm:$0xff] }
 0x56b   : > { %5141 = vmatpush.msrb.mxu2 %v3385_v49  ;;  %5158 = vmatpush.msrb.mxu3 %v3537_v10  ;;  %v3081_v52 = vld [vmem:[#allocation9 + $0x4b8] sm:$0xff] }
 0x56c   : > { %5102 = vmatpush.msra.mxu0 %v3121_v24  ;;  %v3337_v62 = vld [vmem:[#allocation9 + $0xcb8] sm:$0xff] }
 0x56d   : > { %5142 = vmatpush.msrb.mxu2 %v3377_v43  ;;  %5159 = vmatpush.msrb.mxu3 %v3529_v57  ;;  %v3489_v25 = vld [vmem:[#allocation9 + $0x1178] sm:$0xff] }
 0x56e   : > { %5103 = vmatpush.msra.mxu0 %v3113_v22  ;;  %v3073_v45 = vld [vmem:[#allocation9 + $0x478] sm:$0xff] }
 0x56f   : > { %5143 = vmatpush.msrb.mxu2 %v3369_v27  ;;  %5160 = vmatpush.msrb.mxu3 %v3521_v19  ;;  %v3329_v1 = vld [vmem:[#allocation9 + $0xc78] sm:$0xff] }
 0x570   : > { %5104 = vmatpush.msra.mxu0 %v3105_v30  ;;  %v3481_v26 = vld [vmem:[#allocation9 + $0x1138] sm:$0xff]  ;;  %v4791_v18 = vpop.f32.mrf.mxu0 }
 0x571   : > { %5144 = vmatpush.msrb.mxu2 %v3361_v23  ;;  %5161 = vmatpush.msrb.mxu3 %v3513_v28  ;;  %v3065_v40 = vld [vmem:[#allocation9 + $0x438] sm:$0xff]  ;;  %v4891_v23 = vpop.f32.mrf.mxu1 }
 0x572   : > { %5105 = vmatpush.msra.mxu0 %v3097_v33  ;;  %v3321_v16 = vld [vmem:[#allocation9 + $0xc38] sm:$0xff] }
 0x573   : > { %5145 = vmatpush.msrb.mxu2 %v3353_v6  ;;  %5162 = vmatpush.msrb.mxu3 %v3505_v2  ;;  %v3473_v13 = vld [vmem:[#allocation9 + $0x10f8] sm:$0xff] }
 0x574   : > { %5106 = vmatpush.msra.mxu0 %v3089_v47  ;;  %v3697_v7 = vld [vmem:[#allocation9 + $0x17f8] sm:$0xff] }
 0x575   : > { %5146 = vmatpush.msrb.mxu2 %v3345_v0  ;;  %5163 = vmatpush.msrb.mxu3 %v3497_v35  ;;  %v3953_v53 = vld [vmem:[#allocation9 + $0x1ff8] sm:$0xff] }
 0x576   : > { %5107 = vmatpush.msra.mxu0 %v3081_v52  ;;  %v3465_v63 = vld [vmem:[#allocation9 + $0x10b8] sm:$0xff] }
 0x577   : > { %5147 = vmatpush.msrb.mxu2 %v3337_v62  ;;  %5164 = vmatpush.msrb.mxu3 %v3489_v25  ;;  %v3689_v48 = vld [vmem:[#allocation9 + $0x17b8] sm:$0xff] }
 0x578   : > { %5108 = vmatpush.msra.mxu0 %v3073_v45  ;;  %v3945_v20 = vld [vmem:[#allocation9 + $0x1fb8] sm:$0xff] }
 0x579   : > { %5148 = vmatpush.msrb.mxu2 %v3329_v1  ;;  %5165 = vmatpush.msrb.mxu3 %v3481_v26  ;;  %v3457_v38 = vld [vmem:[#allocation9 + $0x1078] sm:$0xff]  ;;  %v4831_v31 = vpop.f32.mrf.mxu2 }
 0x57a   : > { %5109 = vmatpush.msra.mxu0 %v3065_v40  ;;  %v3681_v11 = vld [vmem:[#allocation9 + $0x1778] sm:$0xff] }
 0x57b   : > { %5110 = vmatmul.f32.vlgmr.msra.gmra.mxu0 %v9207_v61  ;;  %5149 = vmatpush.msrb.mxu2 %v3321_v16  ;;  %v3937_v42 = vld [vmem:[#allocation9 + $0x1f78] sm:$0xff] }
 0x57c   : > { %5166 = vmatpush.msrb.mxu3 %v3473_v13  ;;  %5174 = vmatpush.msrb.mxu0 %v3697_v7  ;;  %v3449_v41 = vld [vmem:[#allocation9 + $0x1038] sm:$0xff] }
 0x57d   : > { %5150 = vmatmul.f32.vlgmr.msrb.gmra.mxu2 %v9212_v32  ;;  %v3673_v36 = vld [vmem:[#allocation9 + $0x1738] sm:$0xff] }
 0x57e   : > { %5214 = vmatpush.msra.mxu2 %v3953_v53  ;;  %5167 = vmatpush.msrb.mxu3 %v3465_v63  ;;  %v3929_v61 = vld [vmem:[#allocation9 + $0x1f38] sm:$0xff] }
 0x57f   : > { %5175 = vmatpush.msrb.mxu0 %v3689_v48  ;;  %v3665_v9 = vld [vmem:[#allocation9 + $0x16f8] sm:$0xff]  ;;  %v4851_v14 = vpop.f32.mrf.mxu3  ;;  %v4971_v52 = vpop.f32.mrf.mxu1 }
 0x580   : > { %5215 = vmatpush.msra.mxu2 %v3945_v20  ;;  %5168 = vmatpush.msrb.mxu3 %v3457_v38  ;;  %v3921_v32 = vld [vmem:[#allocation9 + $0x1ef8] sm:$0xff] }
 0x581   : > { %5176 = vmatpush.msrb.mxu0 %v3681_v11  ;;  %v3657_v55 = vld [vmem:[#allocation9 + $0x16b8] sm:$0xff] }
 0x582   : > { %5216 = vmatpush.msra.mxu2 %v3937_v42  ;;  %5169 = vmatpush.msrb.mxu3 %v3449_v41  ;;  %v3913_v21 = vld [vmem:[#allocation9 + $0x1eb8] sm:$0xff] }
 0x583   : > { %5177 = vmatpush.msrb.mxu0 %v3673_v36  ;;  %5170 = vmatmul.f32.vlgmr.msrb.gmra.mxu3 %v9221_v34  ;;  %v3649_v56 = vld [vmem:[#allocation9 + $0x1678] sm:$0xff]  ;;  %v4792_v34 = vadd.f32 %v4791_v18, %v4771_v44 }
 0x584   : > { %5217 = vmatpush.msra.mxu2 %v3929_v61  ;;  %v3905_v50 = vld [vmem:[#allocation9 + $0x1e78] sm:$0xff] }
 0x585   : > { %5178 = vmatpush.msrb.mxu0 %v3665_v9  ;;  %v3641_v54 = vld [vmem:[#allocation9 + $0x1638] sm:$0xff]  ;;  %v4812_v15 = vadd.f32 %v4811_v8, %v4792_v34 }
 0x586   : > { %5218 = vmatpush.msra.mxu2 %v3921_v32  ;;  %v3897_v12 = vld [vmem:[#allocation9 + $0x1e38] sm:$0xff] }
 0x587   : > { %5179 = vmatpush.msrb.mxu0 %v3657_v55  ;;  %v3633_v60 = vld [vmem:[#allocation9 + $0x15f8] sm:$0xff]  ;;  %v4832_v58 = vadd.f32 %v4831_v31, %v4812_v15 }
 0x588   : > { %5219 = vmatpush.msra.mxu2 %v3913_v21  ;;  %v3889_v5 = vld [vmem:[#allocation9 + $0x1df8] sm:$0xff] }
 0x589   : > { %5180 = vmatpush.msrb.mxu0 %v3649_v56  ;;  %v3625_v37 = vld [vmem:[#allocation9 + $0x15b8] sm:$0xff]  ;;  %v4852_v24 = vadd.f32 %v4851_v14, %v4832_v58 }
 0x58a   : > { %5220 = vmatpush.msra.mxu2 %v3905_v50  ;;  %v3881_v4 = vld [vmem:[#allocation9 + $0x1db8] sm:$0xff] }
 0x58b   : > { %5181 = vmatpush.msrb.mxu0 %v3641_v54  ;;  %v3617_v29 = vld [vmem:[#allocation9 + $0x1578] sm:$0xff] }
 0x58c   : > { %5221 = vmatpush.msra.mxu2 %v3897_v12  ;;  %v3873_v39 = vld [vmem:[#allocation9 + $0x1d78] sm:$0xff] }
 0x58d   : > { %5182 = vmatpush.msrb.mxu0 %v3633_v60  ;;  %v3609_v46 = vld [vmem:[#allocation9 + $0x1538] sm:$0xff] }
 0x58e   : > { %5222 = vmatpush.msra.mxu2 %v3889_v5  ;;  %v3865_v51 = vld [vmem:[#allocation9 + $0x1d38] sm:$0xff] }
 0x58f   : > { %5183 = vmatpush.msrb.mxu0 %v3625_v37  ;;  %v3601_v3 = vld [vmem:[#allocation9 + $0x14f8] sm:$0xff] }
 0x590   : > { %5223 = vmatpush.msra.mxu2 %v3881_v4  ;;  %v3857_v49 = vld [vmem:[#allocation9 + $0x1cf8] sm:$0xff] }
 0x591   : > { %5184 = vmatpush.msrb.mxu0 %v3617_v29  ;;  %v3593_v43 = vld [vmem:[#allocation9 + $0x14b8] sm:$0xff] }
 0x592   : > { %5224 = vmatpush.msra.mxu2 %v3873_v39  ;;  %v4871_v10 = vpop.f32.mrf.mxu0  ;;  %v3849_v57 = vld [vmem:[#allocation9 + $0x1cb8] sm:$0xff] }
 0x593   : > { %5185 = vmatpush.msrb.mxu0 %v3609_v46  ;;  %v3585_v22 = vld [vmem:[#allocation9 + $0x1478] sm:$0xff]  ;;  %v4872_v27 = vadd.f32 %v4871_v10, %v4852_v24 }
 0x594   : > { %5225 = vmatpush.msra.mxu2 %v3865_v51  ;;  %v3841_v19 = vld [vmem:[#allocation9 + $0x1c78] sm:$0xff] }
 0x595   : > { %5186 = vmatpush.msrb.mxu0 %v3601_v3  ;;  %v3577_v30 = vld [vmem:[#allocation9 + $0x1438] sm:$0xff]  ;;  %v4892_v33 = vadd.f32 %v4891_v23, %v4872_v27 }
 0x596   : > { %5226 = vmatpush.msra.mxu2 %v3857_v49  ;;  %v3833_v28 = vld [vmem:[#allocation9 + $0x1c38] sm:$0xff] }
 0x597   : > { %5187 = vmatpush.msrb.mxu0 %v3593_v43 }
 0x598   : > { %5227 = vmatpush.msra.mxu2 %v3849_v57 }
 0x599   : > { %5188 = vmatpush.msrb.mxu0 %v3585_v22 }
 0x59a   : > { %5228 = vmatpush.msra.mxu2 %v3841_v19 }
 0x59b   : > { %5189 = vmatpush.msrb.mxu0 %v3577_v30  ;;  %v4911_v6 = vpop.f32.mrf.mxu2 }
 0x59c   : > { %5190 = vmatmul.f32.vlgmr.msrb.gmra.mxu0 %v9225_v59  ;;  %5229 = vmatpush.msra.mxu2 %v3833_v28  ;;  %v4912_v2 = vadd.f32 %v4911_v6, %v4892_v33 }
 0x59d   : > { %5230 = vmatmul.f32.vlgmr.msra.gmra.mxu2 %v9227_v17 }
 0x59e   : > { %5239 = vst [vmem:[%s9265_s21 + $0x28] sm:$0x7f] %v4912_v2 }
 0x5a1   : > { %v4931_v47 = vpop.f32.mrf.mxu3  ;;  %v5051_v13 = vpop.f32.mrf.mxu1 }
 0x5b4   : > { %v4951_v0 = vpop.f32.mrf.mxu0 }
 0x5b5   : > { %v4952_v35 = vadd.f32 %v4951_v0, %v4931_v47 }
 0x5b7   : > { %v4972_v25 = vadd.f32 %v4971_v52, %v4952_v35 }
 0x5bd   : > { %v4991_v62 = vpop.f32.mrf.mxu2 }
 0x5be   : > { %v4992_v1 = vadd.f32 %v4991_v62, %v4972_v25 }
 0x5c3   : > { %v5011_v45 = vpop.f32.mrf.mxu3  ;;  %v5131_v20 = vpop.f32.mrf.mxu1 }
 0x5c4   : > { %v5012_v40 = vadd.f32 %v5011_v45, %v4992_v1 }
 0x5d6   : > { %v5031_v26 = vpop.f32.mrf.mxu0 }
 0x5d7   : > { %v5032_v16 = vadd.f32 %v5031_v26, %v5012_v40 }
 0x5d9   : > { %v5052_v7 = vadd.f32 %v5051_v13, %v5032_v16 }
 0x5df   : > { %v5071_v59 = vpop.f32.mrf.mxu2 }
 0x5e0   : > { %v5072_v53 = vadd.f32 %v5071_v59, %v5052_v7 }
 0x5e2   : > { %5240 = vst [vmem:[%s9265_s21 + $0x30] sm:$0x7f] %v5072_v53 }
 0x5e5   : > { %v5091_v17 = vpop.f32.mrf.mxu3  ;;  %v5211_v32 = vpop.f32.mrf.mxu1 }
 0x5f8   : > { %v5111_v63 = vpop.f32.mrf.mxu0 }
 0x5f9   : > { %v5112_v48 = vadd.f32 %v5111_v63, %v5091_v17 }
 0x5fb   : > { %v5132_v11 = vadd.f32 %v5131_v20, %v5112_v48 }
 0x600   : > { %v5151_v38 = vpop.f32.mrf.mxu2 }
 0x601   : > { %v5152_v41 = vadd.f32 %v5151_v38, %v5132_v11 }
 0x606   : > { %v5171_v42 = vpop.f32.mrf.mxu3 }
 0x607   : > { %v5172_v36 = vadd.f32 %v5171_v42, %v5152_v41 }
 0x619   : > { %v5191_v61 = vpop.f32.mrf.mxu0 }
 0x61a   : > { %v5192_v9 = vadd.f32 %v5191_v61, %v5172_v36 }
 0x61c   : > { %v5212_v55 = vadd.f32 %v5211_v32, %v5192_v9 }
 0x620   : > { %v5231_v21 = vpop.f32.mrf.mxu2 }
 0x621   : > { %v5232_v56 = vadd.f32 %v5231_v21, %v5212_v55 }
 0x623   : > { %5241 = vst [vmem:[%s9265_s21 + $0x38] sm:$0x7f] %v5232_v56 }
 0x624 PF: > { %s20_s28 = sadd.s32 1, %s6318_s28   ;;  %s10391_s21 = smov %s6294_s22 }
 0x625   : > { %p17_p6 = scmp.ge.s32.totalorder %s20_s28, 6   ;;  %s10392_s22 = smov %s6298_s23 }
 0x626   : > { %s10393_s23 = smov %s6456_s17  ;;  %s10394_s24 = smov %s6310_s26 }
 0x627   : > { %s10395_s25 = smov %s6314_s27  ;;  %s10396_s26 = smov %s10399_s29 }
 0x628   : > { %s10397_s27 = smov %s10403_s7  ;;  %19 = sbr.rel (!%p17_p6) target bundleno = 9 (0x9), region = 101 }
 0x62d   :  { %5272 = vsyncpa [#allocation6], 1 }
 0x62e   :  { %5274 = vsyncpa [#allocation6 + $0x1], 1 }
 0x62f   :  { %5275 = vsyncpa [#allocation8], 1 }

</bundles_post_ra>
